<compile_context>
chip_gen: v7x
topology: tpu7x:2x2x1
jax: 0.10.0
libtpu: 0.0.40
codegen_flags: <defaults>
</compile_context>

<pallas_src>
import functools

import jax
import jax.numpy as jnp
from jax.experimental import pallas as pl
from jax.experimental.pallas import tpu as pltpu


# ------------------------- packed weight-slab layout ----------------------- #

def _slab_layout(c):
  """Row offsets of each weight/bias block in the packed (rows, 9c) slab."""
  sizes = (('skip', 3 * c), ('f1', 2 * c), ('f3', 9 * c), ('p1', c),
           ('p2', 3 * c), ('kc1', 3 * c), ('fk', 9 * c), ('bias', 8),
           ('kc2', 81 * c))
  off, r = {}, 0
  for name, n in sizes:
    off[name] = r
    r += n
  return off, r


# ------------------------------ Pallas kernel ------------------------------ #

def _dydecoder_kernel(xmf_ref, ws_ref, o_ref, tpad_ref, ypad_ref,
                      *, H, W, c, out_pad):
  """One grid step = one image.  Rows layout: (H*W, channels)."""
  HW = H * W
  p0 = W + 1                       # row offset of the image inside the padded buffers
  c3, c9 = 3 * c, 9 * c
  f32 = jnp.float32
  off, _ = _slab_layout(c)
  bo = off['bias']

  # ---- unpack the packed weight/bias slab (static slices, no extra DMAs) --- #
  w_skip = ws_ref[off['skip']:off['skip'] + c3, 0:c]        # (3c, c)
  w_f1   = ws_ref[off['f1']:off['f1'] + 2 * c, 0:c]         # (2c, c)  rows: [x | skip]
  w_f3   = ws_ref[off['f3']:off['f3'] + c9, 0:c]            # (9c, c)  im2col form
  w_p1   = ws_ref[off['p1']:off['p1'] + c, 0:c3]            # (c, 3c)
  w_p2   = ws_ref[off['p2']:off['p2'] + c3, 0:c3]           # (3c, 3c) block-diag
  w_kc1  = ws_ref[off['kc1']:off['kc1'] + c3, 0:c9]         # (3c, 9c) block-diag
  w_fk   = ws_ref[off['fk']:off['fk'] + c9, 0:c9]           # (9c, 9c)
  w_kc2  = ws_ref[off['kc2']:off['kc2'] + 9 * c9, 0:c9]     # (81c, 9c) dense grouped conv
  b_skip = ws_ref[bo + 0:bo + 1, 0:c]
  b_f1   = ws_ref[bo + 1:bo + 2, 0:c]
  b_f3   = ws_ref[bo + 2:bo + 3, 0:c]
  b_p1   = ws_ref[bo + 3:bo + 4, 0:c3]
  b_p2   = ws_ref[bo + 4:bo + 5, 0:c3]
  b_kc1  = ws_ref[bo + 5:bo + 6, 0:c9]
  b_kc2  = ws_ref[bo + 6:bo + 7, 0:c9]
  b_fk   = ws_ref[bo + 7:bo + 8, 0:c9]

  xmf = xmf_ref[...]               # (HW, 4c) = [x | rgb | hsv | lab]
  x = xmf[:, 0:c]
  mf = xmf[:, c:4 * c]

  # ---- in-kernel column-edge masks (no colmask input) ---------------------- #
  col9 = jax.lax.broadcasted_iota(jnp.int32, (HW, c9), 0) % W
  m_l9 = col9 >= 1                 # output col >= 1   (left edge otherwise)
  m_r9 = col9 <= W - 2             # output col <= W-2 (right edge otherwise)
  m_lc = m_l9[:, 0:c]
  m_rc = m_r9[:, 0:c]

  # ---- skip_conv 1x1 + ReLU, then fuse_conv 1x1 on [x | skip] -------------- #
  skip = jnp.maximum(jnp.dot(mf, w_skip, preferred_element_type=f32) + b_skip, 0.0)
  t = jnp.dot(jnp.concatenate([x, skip], axis=-1), w_f1,
              preferred_element_type=f32) + b_f1                       # (HW, c)

  # ---- fuse_conv 3x3 (reflect pad 1) as ONE im2col matmul ------------------ #
  tpad_ref[p0:p0 + HW, :] = t
  tpad_ref[1:1 + W, :] = t[W:2 * W, :]                                 # row -1 -> row 1
  tpad_ref[p0 + HW:p0 + HW + W, :] = t[(H - 2) * W:(H - 1) * W, :]     # row H  -> row H-2
  tpad_ref[0:1, :] = jnp.zeros((1, c), f32)                            # corner rows are
  tpad_ref[p0 + HW + W:p0 + HW + W + 1, :] = jnp.zeros((1, c), f32)    # never selected

  f_taps = []
  for kh in range(3):
    r0 = p0 + (kh - 1) * W
    s_m = tpad_ref[r0 - 1:r0 - 1 + HW, :]
    s_0 = tpad_ref[r0:r0 + HW, :]
    s_p = tpad_ref[r0 + 1:r0 + 1 + HW, :]
    f_taps.append(jnp.where(m_lc, s_m, s_p))    # reflect: col -1 -> col 1
    f_taps.append(s_0)
    f_taps.append(jnp.where(m_rc, s_p, s_m))    # reflect: col W  -> col W-2
  of = jnp.dot(jnp.concatenate(f_taps, axis=-1), w_f3,
               preferred_element_type=f32) + b_f3
  out_feature = jnp.maximum(of, 0.0)                                   # (HW, c)

  # ---- three DyBlocks fused: modulation, kc1 1x1, grouped 3x3 (one dot) ---- #
  p1 = jnp.dot(out_feature, w_p1, preferred_element_type=f32) + b_p1   # (HW, 3c)
  p2 = jnp.dot(mf, w_p2, preferred_element_type=f32) + b_p2            # (HW, 3c)
  y = jnp.dot(p1 * p2, w_kc1, preferred_element_type=f32) + b_kc1      # (HW, 9c)

  ypad_ref[0:p0, :] = jnp.zeros((p0, c9), f32)                         # halo-only zero
  ypad_ref[p0 + HW:p0 + HW + W + 1, :] = jnp.zeros((W + 1, c9), f32)
  ypad_ref[p0:p0 + HW, :] = y

  k_taps = []
  for kh in range(3):
    r0 = p0 + (kh - 1) * W
    s_m = ypad_ref[r0 - 1:r0 - 1 + HW, :]
    s_0 = ypad_ref[r0:r0 + HW, :]
    s_p = ypad_ref[r0 + 1:r0 + 1 + HW, :]
    k_taps.append(jnp.where(m_l9, s_m, 0.0))    # zero pad at col 0
    k_taps.append(s_0)
    k_taps.append(jnp.where(m_r9, s_p, 0.0))    # zero pad at col W-1
  kcat = jnp.dot(jnp.concatenate(k_taps, axis=-1), w_kc2,
                 preferred_element_type=f32) + b_kc2                   # (HW, 9c)

  # ---- fuse_kernel 1x1 ------------------------------------------------------ #
  kern = jnp.dot(kcat, w_fk, preferred_element_type=f32) + b_fk        # (HW, 9c)

  # ---- single lane-dense output store: [out_feature | kernel | zero pad] ---- #
  pieces = [out_feature, kern]
  pad = out_pad - 10 * c
  if pad > 0:
    pieces.append(jnp.zeros((HW, pad), f32))
  o_ref[...] = jnp.concatenate(pieces, axis=-1).astype(o_ref.dtype)


# ------------------------------ JAX wrapper -------------------------------- #

def _rows(x_nchw):
  n, ch, h, w = x_nchw.shape
  return jnp.transpose(x_nchw, (0, 2, 3, 1)).reshape(n, h * w, ch)


def _unrows(rows, h, w):
  n, hw, ch = rows.shape
  return jnp.transpose(rows.reshape(n, h, w, ch), (0, 3, 1, 2))


def _pack_weights(params, c):
  """PyTorch-convention params -> one packed (111c+8, 9c) f32 slab."""
  c9 = 9 * c
  blocks = [params['rgb'], params['hsv'], params['lab']]
  f32 = jnp.float32

  def padw(m):
    m = m.astype(f32)
    return jnp.pad(m, ((0, 0), (0, c9 - m.shape[1])))

  def padb(v):
    v = v.reshape(1, -1).astype(f32)
    return jnp.pad(v, ((0, 0), (0, c9 - v.shape[1])))

  w_skip = params['skip_w'].T                                          # (3c, c)
  w_f1 = params['fuse1_w'].T                                           # (2c, c)
  w_f3 = jnp.transpose(params['fuse3_w'], (2, 3, 1, 0)).reshape(9 * c, c)   # (9c, c)
  w_p1 = jnp.concatenate([b['p1_w'].T for b in blocks], axis=1)        # (c, 3c)
  w_p2 = jax.scipy.linalg.block_diag(*[b['p2_w'].T for b in blocks])   # (3c, 3c)
  w_kc1 = jax.scipy.linalg.block_diag(*[b['kc1_w'].T for b in blocks]) # (3c, 9c)
  w_fk = params['fusek_w'].T                                           # (9c, 9c)

  # Grouped 3x3 conv (groups=c per DyBlock -> 3c groups over the fused 9c channels)
  # densified into a (81c, 9c) im2col weight: row = tap*9c + input channel.
  w_kc2_cat = jnp.concatenate([b['kc2_w'] for b in blocks], axis=0)    # (9c, 3, 3, 3)
  o_idx = jnp.arange(c9)
  wd = jnp.zeros((9 * c9, c9), f32)
  for kh in range(3):
    for kw in range(3):
      tap = kh * 3 + kw
      for j in range(3):
        rows = tap * c9 + 3 * (o_idx // 3) + j
        wd = wd.at[rows, o_idx].set(w_kc2_cat[:, j, kh, kw])

  bias = jnp.concatenate([
      padb(params['skip_b']), padb(params['fuse1_b']), padb(params['fuse3_b']),
      padb(jnp.concatenate([b['p1_b'] for b in blocks])),
      padb(jnp.concatenate([b['p2_b'] for b in blocks])),
      padb(jnp.concatenate([b['kc1_b'] for b in blocks])),
      padb(jnp.concatenate([b['kc2_b'] for b in blocks])),
      padb(params['fusek_b']),
  ], axis=0)                                                           # (8, 9c)

  _, total = _slab_layout(c)
  slab = jnp.concatenate(
      [padw(w_skip), padw(w_f1), padw(w_f3), padw(w_p1), padw(w_p2),
       padw(w_kc1), padw(w_fk), bias, wd], axis=0)
  assert slab.shape == (total, c9)
  return slab


def dydecoder_forward(params, x, x_rgb, x_hsv, x_lab):
  n, c, h, w = x.shape
  hw = h * w
  c9 = 9 * c
  out_ch = 10 * c                                # [out_feature (c) | kernel (9c)]
  out_pad = -(-out_ch // 128) * 128              # lane-dense output width

  # one NCHW -> rows transpose per input, fused into a single (N, HW, 4c) slab
  xmf = jnp.concatenate([_rows(x), _rows(x_rgb), _rows(x_hsv), _rows(x_lab)], axis=-1)
  wslab = _pack_weights(params, c)
  slab_rows = wslab.shape[0]

  out = pl.pallas_call(
      functools.partial(_dydecoder_kernel, H=h, W=w, c=c, out_pad=out_pad),
      out_shape=jax.ShapeDtypeStruct((n, hw, out_pad), jnp.float32),
      grid=(n,),
      in_specs=[pl.BlockSpec((None, hw, 4 * c), lambda i: (i, 0, 0)),
                pl.BlockSpec((slab_rows, c9), lambda i: (0, 0))],
      out_specs=pl.BlockSpec((None, hw, out_pad), lambda i: (i, 0, 0)),
      scratch_shapes=[pltpu.VMEM((hw + 2 * w + 2, c), jnp.float32),    # reflect halo buf
                      pltpu.VMEM((hw + 2 * w + 2, c9), jnp.float32)],  # zero-pad halo buf
      compiler_params=pltpu.CompilerParams(
          dimension_semantics=("parallel",),
          vmem_limit_bytes=32 * 1024 * 1024),
  )(xmf, wslab)

  out_feature = _unrows(out[:, :, :c], h, w)
  kernel = _unrows(out[:, :, c:out_ch], h, w)
  return out_feature, kernel


# ------------------------- deterministic params ---------------------------- #

def init_params(key, c):
  ks = jax.random.split(key, 32)
  it = iter(range(32))

  def w(shape, scale=0.2):
    return jax.random.normal(ks[next(it)], shape, jnp.float32) * scale

  params = {
      'skip_w': w((c, 3 * c)), 'skip_b': w((c,), 0.1),
      'fuse1_w': w((c, 2 * c)), 'fuse1_b': w((c,), 0.1),
      'fuse3_w': w((c, c, 3, 3)), 'fuse3_b': w((c,), 0.1),
      'fusek_w': w((9 * c, 9 * c)), 'fusek_b': w((9 * c,), 0.1),
  }
  for name in ('rgb', 'hsv', 'lab'):
    params[name] = {
        'p1_w': w((c, c)), 'p1_b': w((c,), 0.1),
        'p2_w': w((c, c)), 'p2_b': w((c,), 0.1),
        'kc1_w': w((3 * c, c)), 'kc1_b': w((3 * c,), 0.1),
        'kc2_w': w((3 * c, 3, 3, 3)), 'kc2_b': w((3 * c,), 0.1),
    }
  return params


# --------------------------- pure-JAX reference ----------------------------- #

def ref_conv2d(x, w, b, padding=0, pad_mode="zeros", groups=1):
  if padding > 0:
    mode = "reflect" if pad_mode == "reflect" else "constant"
    x = jnp.pad(x, ((0, 0), (0, 0), (padding, padding), (padding, padding)), mode=mode)
  out = jax.lax.conv_general_dilated(
      x, w, window_strides=(1, 1), padding="VALID",
      dimension_numbers=("NCHW", "OIHW", "NCHW"),
      feature_group_count=groups,
      precision=jax.lax.Precision.HIGHEST)
  return out + b.reshape(1, -1, 1, 1)


def ref_forward(p, x, x_rgb, x_hsv, x_lab, c):
  def c1(xx, wo, b, relu=False):
    out = ref_conv2d(xx, wo[:, :, None, None], b)
    return jnp.maximum(out, 0.0) if relu else out

  skip = c1(jnp.concatenate([x_rgb, x_hsv, x_lab], 1), p['skip_w'], p['skip_b'], relu=True)
  t = c1(jnp.concatenate([x, skip], 1), p['fuse1_w'], p['fuse1_b'])
  out_feature = jnp.maximum(
      ref_conv2d(t, p['fuse3_w'], p['fuse3_b'], padding=1, pad_mode="reflect"), 0.0)

  def dyb(pp, xx, xmf):
    m = c1(xx, pp['p1_w'], pp['p1_b']) * c1(xmf, pp['p2_w'], pp['p2_b'])
    k = c1(m, pp['kc1_w'], pp['kc1_b'])
    k = ref_conv2d(k, pp['kc2_w'], pp['kc2_b'], padding=1, pad_mode="zeros", groups=c)
    return k

  rk = dyb(p['rgb'], out_feature, x_rgb)
  hk = dyb(p['hsv'], out_feature, x_hsv)
  lk = dyb(p['lab'], out_feature, x_lab)
  kern = c1(jnp.concatenate([rk, hk, lk], 1), p['fusek_w'], p['fusek_b'])
  return out_feature, kern


# --------------------------------- main ------------------------------------ #

if __name__ == "__main__":
  key = jax.random.PRNGKey(0)
  c, n, h, w = 4, 2, 16, 16
  kx, kr, khsv, kl, kp = jax.random.split(key, 5)
  x = jax.random.normal(kx, (n, c, h, w), jnp.float32) * 0.5
  x_rgb = jax.random.normal(kr, (n, c, h, w), jnp.float32) * 0.5
  x_hsv = jax.random.normal(khsv, (n, c, h, w), jnp.float32) * 0.5
  x_lab = jax.random.normal(kl, (n, c, h, w), jnp.float32) * 0.5
  params = init_params(kp, c)

  out_feature, kernel = jax.jit(dydecoder_forward)(params, x, x_rgb, x_hsv, x_lab)
  jax.block_until_ready((out_feature, kernel))

  assert out_feature.shape == (n, c, h, w)
  assert kernel.shape == (n, 9 * c, h, w)

  # Correctness vs. a Precision.HIGHEST lax.conv reference.  The kernel's dots use the
  # MXU's default precision (bf16 passes, f32 accumulation); that drift is accepted
  # explicitly and covered by the 2e-2 tolerance.
  ref_of, ref_k = ref_forward(params, x, x_rgb, x_hsv, x_lab, c)
  assert jnp.allclose(out_feature, ref_of, atol=2e-2, rtol=2e-2), "out_feature mismatch"
  assert jnp.allclose(kernel, ref_k, atol=2e-2, rtol=2e-2), "kernel mismatch"

  print("KERNEL_OK")
</pallas_src>

<mosaic_0001>
module attributes {stable_mosaic.version = 11 : i64} {
  func.func @_dydecoder_kernel(%arg0: i32, %arg1: memref<1x256x16xf32, #tpu.memory_space<vmem>>, %arg2: memref<452x36xf32, #tpu.memory_space<vmem>>, %arg3: memref<1x256x128xf32, #tpu.memory_space<vmem>>, %arg4: memref<290x4xf32, #tpu.memory_space<vmem>>, %arg5: memref<290x36xf32, #tpu.memory_space<vmem>>) attributes {dimension_semantics = [#tpu.dimension_semantics<parallel>], iteration_bounds = array<i64: 2>, scalar_prefetch = 0 : i64, scratch_operands = 2 : i64, tpu.core_type = #tpu.core_type<tc>, window_params = [{transform_indices = @transform_0, window_bounds = array<i64: 1, 256, 16>}, {pipeline_mode = #tpu.pipeline_mode<synchronous>, transform_indices = @transform_1, window_bounds = array<i64: 452, 36>}, {transform_indices = @transform_2, window_bounds = array<i64: 1, 256, 128>}]} {
    %c0 = arith.constant 0 : index
    %c0_0 = arith.constant 0 : index
    %0 = vector.load %arg2[%c0, %c0_0] : memref<452x36xf32, #tpu.memory_space<vmem>>, vector<12x4xf32>
    %c12 = arith.constant 12 : index
    %c0_1 = arith.constant 0 : index
    %1 = vector.load %arg2[%c12, %c0_1] : memref<452x36xf32, #tpu.memory_space<vmem>>, vector<8x4xf32>
    %c20 = arith.constant 20 : index
    %c0_2 = arith.constant 0 : index
    %2 = vector.load %arg2[%c20, %c0_2] : memref<452x36xf32, #tpu.memory_space<vmem>>, vector<36x4xf32>
    %c56 = arith.constant 56 : index
    %c0_3 = arith.constant 0 : index
    %3 = vector.load %arg2[%c56, %c0_3] : memref<452x36xf32, #tpu.memory_space<vmem>>, vector<4x12xf32>
    %c60 = arith.constant 60 : index
    %c0_4 = arith.constant 0 : index
    %4 = vector.load %arg2[%c60, %c0_4] : memref<452x36xf32, #tpu.memory_space<vmem>>, vector<12x12xf32>
    %c72 = arith.constant 72 : index
    %c0_5 = arith.constant 0 : index
    %5 = vector.load %arg2[%c72, %c0_5] : memref<452x36xf32, #tpu.memory_space<vmem>>, vector<12x36xf32>
    %c84 = arith.constant 84 : index
    %c0_6 = arith.constant 0 : index
    %6 = vector.load %arg2[%c84, %c0_6] : memref<452x36xf32, #tpu.memory_space<vmem>>, vector<36x36xf32>
    %c128 = arith.constant 128 : index
    %c0_7 = arith.constant 0 : index
    %7 = vector.load %arg2[%c128, %c0_7] : memref<452x36xf32, #tpu.memory_space<vmem>>, vector<324x36xf32>
    %c120 = arith.constant 120 : index
    %c0_8 = arith.constant 0 : index
    %8 = vector.load %arg2[%c120, %c0_8] : memref<452x36xf32, #tpu.memory_space<vmem>>, vector<1x4xf32>
    %c121 = arith.constant 121 : index
    %c0_9 = arith.constant 0 : index
    %9 = vector.load %arg2[%c121, %c0_9] : memref<452x36xf32, #tpu.memory_space<vmem>>, vector<1x4xf32>
    %c122 = arith.constant 122 : index
    %c0_10 = arith.constant 0 : index
    %10 = vector.load %arg2[%c122, %c0_10] : memref<452x36xf32, #tpu.memory_space<vmem>>, vector<1x4xf32>
    %c123 = arith.constant 123 : index
    %c0_11 = arith.constant 0 : index
    %11 = vector.load %arg2[%c123, %c0_11] : memref<452x36xf32, #tpu.memory_space<vmem>>, vector<1x12xf32>
    %c124 = arith.constant 124 : index
    %c0_12 = arith.constant 0 : index
    %12 = vector.load %arg2[%c124, %c0_12] : memref<452x36xf32, #tpu.memory_space<vmem>>, vector<1x12xf32>
    %c125 = arith.constant 125 : index
    %c0_13 = arith.constant 0 : index
    %13 = vector.load %arg2[%c125, %c0_13] : memref<452x36xf32, #tpu.memory_space<vmem>>, vector<1x36xf32>
    %c126 = arith.constant 126 : index
    %c0_14 = arith.constant 0 : index
    %14 = vector.load %arg2[%c126, %c0_14] : memref<452x36xf32, #tpu.memory_space<vmem>>, vector<1x36xf32>
    %c127 = arith.constant 127 : index
    %c0_15 = arith.constant 0 : index
    %15 = vector.load %arg2[%c127, %c0_15] : memref<452x36xf32, #tpu.memory_space<vmem>>, vector<1x36xf32>
    %c0_16 = arith.constant 0 : index
    %c0_17 = arith.constant 0 : index
    %c0_18 = arith.constant 0 : index
    %16 = vector.load %arg1[%c0_16, %c0_17, %c0_18] : memref<1x256x16xf32, #tpu.memory_space<vmem>>, vector<1x256x16xf32>
    %17 = vector.shape_cast %16 : vector<1x256x16xf32> to vector<256x16xf32>
    %18 = vector.extract_strided_slice %17 {offsets = [0, 0], sizes = [256, 4], strides = [1, 1]} : vector<256x16xf32> to vector<256x4xf32>
    %19 = vector.extract_strided_slice %17 {offsets = [0, 4], sizes = [256, 12], strides = [1, 1]} : vector<256x16xf32> to vector<256x12xf32>
    %20 = tpu.iota {dimensions = array<i32: 0>} : vector<256x36xi32>
    %c16_i32 = arith.constant 16 : i32
    %c0_i32 = arith.constant 0 : i32
    %21 = arith.cmpi eq, %c16_i32, %c0_i32 : i32
    %c1_i32 = arith.constant 1 : i32
    %22 = arith.select %21, %c1_i32, %c16_i32 : i32
    %23 = vector.broadcast %22 : i32 to vector<256x36xi32>
    %24 = arith.remsi %20, %23 : vector<256x36xi32>
    %c0_i32_19 = arith.constant 0 : i32
    %25 = vector.broadcast %c0_i32_19 : i32 to vector<256x36xi32>
    %26 = arith.cmpi ne, %24, %25 : vector<256x36xi32>
    %c0_i32_20 = arith.constant 0 : i32
    %27 = vector.broadcast %c0_i32_20 : i32 to vector<256x36xi32>
    %28 = arith.cmpi slt, %24, %27 : vector<256x36xi32>
    %c0_i32_21 = arith.constant 0 : i32
    %29 = arith.cmpi slt, %22, %c0_i32_21 : i32
    %30 = vector.broadcast %29 : i1 to vector<256x36xi1>
    %31 = vector.broadcast %30 : vector<256x36xi1> to vector<256x36xi1>
    %32 = arith.xori %28, %31 : vector<256x36xi1>
    %33 = arith.andi %32, %26 : vector<256x36xi1>
    %34 = vector.broadcast %22 : i32 to vector<256x36xi32>
    %35 = arith.addi %24, %34 : vector<256x36xi32>
    %36 = arith.select %33, %35, %24 : vector<256x36xi1>, vector<256x36xi32>
    %c1_i32_22 = arith.constant 1 : i32
    %37 = vector.broadcast %c1_i32_22 : i32 to vector<256x36xi32>
    %38 = arith.cmpi sge, %36, %37 : vector<256x36xi32>
    %c14_i32 = arith.constant 14 : i32
    %39 = vector.broadcast %c14_i32 : i32 to vector<256x36xi32>
    %40 = arith.cmpi sle, %36, %39 : vector<256x36xi32>
    %41 = vector.extract_strided_slice %38 {offsets = [0, 0], sizes = [256, 4], strides = [1, 1]} : vector<256x36xi1> to vector<256x4xi1>
    %42 = vector.extract_strided_slice %40 {offsets = [0, 0], sizes = [256, 4], strides = [1, 1]} : vector<256x36xi1> to vector<256x4xi1>
    %cst = arith.constant dense<0.000000e+00> : vector<256x4xf32>
    %43 = tpu.matmul %19, %0, %cst {dimension_numbers = #tpu.dot_dimension_numbers<[1], [0], [0], [1], [0, 0, 1, 1], [], []>} : vector<256x12xf32>, vector<12x4xf32>, vector<256x4xf32> -> vector<256x4xf32>
    %44 = vector.broadcast %8 : vector<1x4xf32> to vector<256x4xf32>
    %45 = arith.addf %43, %44 : vector<256x4xf32>
    %cst_23 = arith.constant 0.000000e+00 : f32
    %46 = vector.broadcast %cst_23 : f32 to vector<256x4xf32>
    %47 = arith.maximumf %45, %46 : vector<256x4xf32>
    %48 = tpu.concatenate %18, %47 in 1 : vector<256x4xf32>, vector<256x4xf32> -> vector<256x8xf32>
    %cst_24 = arith.constant dense<0.000000e+00> : vector<256x4xf32>
    %49 = tpu.matmul %48, %1, %cst_24 {dimension_numbers = #tpu.dot_dimension_numbers<[1], [0], [0], [1], [0, 0, 1, 1], [], []>} : vector<256x8xf32>, vector<8x4xf32>, vector<256x4xf32> -> vector<256x4xf32>
    %50 = vector.broadcast %9 : vector<1x4xf32> to vector<256x4xf32>
    %51 = arith.addf %49, %50 : vector<256x4xf32>
    %c17 = arith.constant 17 : index
    %c0_25 = arith.constant 0 : index
    %52 = vector.load %arg4[%c17, %c0_25] : memref<290x4xf32, #tpu.memory_space<vmem>>, vector<256x4xf32>
    tpu.vector_store %arg4[%c17, %c0_25], %51 {strides = array<i32>} : memref<290x4xf32, #tpu.memory_space<vmem>>, vector<256x4xf32>,
    %53 = vector.extract_strided_slice %51 {offsets = [16, 0], sizes = [16, 4], strides = [1, 1]} : vector<256x4xf32> to vector<16x4xf32>
    %c1 = arith.constant 1 : index
    %c0_26 = arith.constant 0 : index
    %54 = vector.load %arg4[%c1, %c0_26] : memref<290x4xf32, #tpu.memory_space<vmem>>, vector<16x4xf32>
    tpu.vector_store %arg4[%c1, %c0_26], %53 {strides = array<i32>} : memref<290x4xf32, #tpu.memory_space<vmem>>, vector<16x4xf32>,
    %55 = vector.extract_strided_slice %51 {offsets = [224, 0], sizes = [16, 4], strides = [1, 1]} : vector<256x4xf32> to vector<16x4xf32>
    %c273 = arith.constant 273 : index
    %c0_27 = arith.constant 0 : index
    %56 = vector.load %arg4[%c273, %c0_27] : memref<290x4xf32, #tpu.memory_space<vmem>>, vector<16x4xf32>
    tpu.vector_store %arg4[%c273, %c0_27], %55 {strides = array<i32>} : memref<290x4xf32, #tpu.memory_space<vmem>>, vector<16x4xf32>,
    %cst_28 = arith.constant 0.000000e+00 : f32
    %57 = vector.broadcast %cst_28 : f32 to vector<1x4xf32>
    %c0_29 = arith.constant 0 : index
    %c0_30 = arith.constant 0 : index
    %58 = vector.load %arg4[%c0_29, %c0_30] : memref<290x4xf32, #tpu.memory_space<vmem>>, vector<1x4xf32>
    tpu.vector_store %arg4[%c0_29, %c0_30], %57 {strides = array<i32>} : memref<290x4xf32, #tpu.memory_space<vmem>>, vector<1x4xf32>,
    %cst_31 = arith.constant 0.000000e+00 : f32
    %59 = vector.broadcast %cst_31 : f32 to vector<1x4xf32>
    %c289 = arith.constant 289 : index
    %c0_32 = arith.constant 0 : index
    %60 = vector.load %arg4[%c289, %c0_32] : memref<290x4xf32, #tpu.memory_space<vmem>>, vector<1x4xf32>
    tpu.vector_store %arg4[%c289, %c0_32], %59 {strides = array<i32>} : memref<290x4xf32, #tpu.memory_space<vmem>>, vector<1x4xf32>,
    %c0_33 = arith.constant 0 : index
    %c0_34 = arith.constant 0 : index
    %61 = vector.load %arg4[%c0_33, %c0_34] : memref<290x4xf32, #tpu.memory_space<vmem>>, vector<256x4xf32>
    %c1_35 = arith.constant 1 : index
    %c0_36 = arith.constant 0 : index
    %62 = vector.load %arg4[%c1_35, %c0_36] : memref<290x4xf32, #tpu.memory_space<vmem>>, vector<256x4xf32>
    %c2 = arith.constant 2 : index
    %c0_37 = arith.constant 0 : index
    %63 = vector.load %arg4[%c2, %c0_37] : memref<290x4xf32, #tpu.memory_space<vmem>>, vector<256x4xf32>
    %64 = arith.select %41, %61, %63 : vector<256x4xi1>, vector<256x4xf32>
    %65 = arith.select %42, %63, %61 : vector<256x4xi1>, vector<256x4xf32>
    %c16 = arith.constant 16 : index
    %c0_38 = arith.constant 0 : index
    %66 = vector.load %arg4[%c16, %c0_38] : memref<290x4xf32, #tpu.memory_space<vmem>>, vector<256x4xf32>
    %c17_39 = arith.constant 17 : index
    %c0_40 = arith.constant 0 : index
    %67 = vector.load %arg4[%c17_39, %c0_40] : memref<290x4xf32, #tpu.memory_space<vmem>>, vector<256x4xf32>
    %c18 = arith.constant 18 : index
    %c0_41 = arith.constant 0 : index
    %68 = vector.load %arg4[%c18, %c0_41] : memref<290x4xf32, #tpu.memory_space<vmem>>, vector<256x4xf32>
    %69 = arith.select %41, %66, %68 : vector<256x4xi1>, vector<256x4xf32>
    %70 = arith.select %42, %68, %66 : vector<256x4xi1>, vector<256x4xf32>
    %c32 = arith.constant 32 : index
    %c0_42 = arith.constant 0 : index
    %71 = vector.load %arg4[%c32, %c0_42] : memref<290x4xf32, #tpu.memory_space<vmem>>, vector<256x4xf32>
    %c33 = arith.constant 33 : index
    %c0_43 = arith.constant 0 : index
    %72 = vector.load %arg4[%c33, %c0_43] : memref<290x4xf32, #tpu.memory_space<vmem>>, vector<256x4xf32>
    %c34 = arith.constant 34 : index
    %c0_44 = arith.constant 0 : index
    %73 = vector.load %arg4[%c34, %c0_44] : memref<290x4xf32, #tpu.memory_space<vmem>>, vector<256x4xf32>
    %74 = arith.select %41, %71, %73 : vector<256x4xi1>, vector<256x4xf32>
    %75 = arith.select %42, %73, %71 : vector<256x4xi1>, vector<256x4xf32>
    %76 = tpu.concatenate %64, %62, %65, %69, %67, %70, %74, %72, %75 in 1 : vector<256x4xf32>, vector<256x4xf32>, vector<256x4xf32>, vector<256x4xf32>, vector<256x4xf32>, vector<256x4xf32>, vector<256x4xf32>, vector<256x4xf32>, vector<256x4xf32> -> vector<256x36xf32>
    %cst_45 = arith.constant dense<0.000000e+00> : vector<256x4xf32>
    %77 = tpu.matmul %76, %2, %cst_45 {dimension_numbers = #tpu.dot_dimension_numbers<[1], [0], [0], [1], [0, 0, 1, 1], [], []>} : vector<256x36xf32>, vector<36x4xf32>, vector<256x4xf32> -> vector<256x4xf32>
    %78 = vector.broadcast %10 : vector<1x4xf32> to vector<256x4xf32>
    %79 = arith.addf %77, %78 : vector<256x4xf32>
    %cst_46 = arith.constant 0.000000e+00 : f32
    %80 = vector.broadcast %cst_46 : f32 to vector<256x4xf32>
    %81 = arith.maximumf %79, %80 : vector<256x4xf32>
    %cst_47 = arith.constant dense<0.000000e+00> : vector<256x12xf32>
    %82 = tpu.matmul %81, %3, %cst_47 {dimension_numbers = #tpu.dot_dimension_numbers<[1], [0], [0], [1], [0, 0, 1, 1], [], []>} : vector<256x4xf32>, vector<4x12xf32>, vector<256x12xf32> -> vector<256x12xf32>
    %83 = vector.broadcast %11 : vector<1x12xf32> to vector<256x12xf32>
    %84 = arith.addf %82, %83 : vector<256x12xf32>
    %cst_48 = arith.constant dense<0.000000e+00> : vector<256x12xf32>
    %85 = tpu.matmul %19, %4, %cst_48 {dimension_numbers = #tpu.dot_dimension_numbers<[1], [0], [0], [1], [0, 0, 1, 1], [], []>} : vector<256x12xf32>, vector<12x12xf32>, vector<256x12xf32> -> vector<256x12xf32>
    %86 = vector.broadcast %12 : vector<1x12xf32> to vector<256x12xf32>
    %87 = arith.addf %85, %86 : vector<256x12xf32>
    %88 = arith.mulf %84, %87 : vector<256x12xf32>
    %cst_49 = arith.constant dense<0.000000e+00> : vector<256x36xf32>
    %89 = tpu.matmul %88, %5, %cst_49 {dimension_numbers = #tpu.dot_dimension_numbers<[1], [0], [0], [1], [0, 0, 1, 1], [], []>} : vector<256x12xf32>, vector<12x36xf32>, vector<256x36xf32> -> vector<256x36xf32>
    %90 = vector.broadcast %13 : vector<1x36xf32> to vector<256x36xf32>
    %91 = arith.addf %89, %90 : vector<256x36xf32>
    %cst_50 = arith.constant 0.000000e+00 : f32
    %92 = vector.broadcast %cst_50 : f32 to vector<17x36xf32>
    %c0_51 = arith.constant 0 : index
    %c0_52 = arith.constant 0 : index
    %93 = vector.load %arg5[%c0_51, %c0_52] : memref<290x36xf32, #tpu.memory_space<vmem>>, vector<17x36xf32>
    tpu.vector_store %arg5[%c0_51, %c0_52], %92 {strides = array<i32>} : memref<290x36xf32, #tpu.memory_space<vmem>>, vector<17x36xf32>,
    %cst_53 = arith.constant 0.000000e+00 : f32
    %94 = vector.broadcast %cst_53 : f32 to vector<17x36xf32>
    %c273_54 = arith.constant 273 : index
    %c0_55 = arith.constant 0 : index
    %95 = vector.load %arg5[%c273_54, %c0_55] : memref<290x36xf32, #tpu.memory_space<vmem>>, vector<17x36xf32>
    tpu.vector_store %arg5[%c273_54, %c0_55], %94 {strides = array<i32>} : memref<290x36xf32, #tpu.memory_space<vmem>>, vector<17x36xf32>,
    %c17_56 = arith.constant 17 : index
    %c0_57 = arith.constant 0 : index
    %96 = vector.load %arg5[%c17_56, %c0_57] : memref<290x36xf32, #tpu.memory_space<vmem>>, vector<256x36xf32>
    tpu.vector_store %arg5[%c17_56, %c0_57], %91 {strides = array<i32>} : memref<290x36xf32, #tpu.memory_space<vmem>>, vector<256x36xf32>,
    %c0_58 = arith.constant 0 : index
    %c0_59 = arith.constant 0 : index
    %97 = vector.load %arg5[%c0_58, %c0_59] : memref<290x36xf32, #tpu.memory_space<vmem>>, vector<256x36xf32>
    %c1_60 = arith.constant 1 : index
    %c0_61 = arith.constant 0 : index
    %98 = vector.load %arg5[%c1_60, %c0_61] : memref<290x36xf32, #tpu.memory_space<vmem>>, vector<256x36xf32>
    %c2_62 = arith.constant 2 : index
    %c0_63 = arith.constant 0 : index
    %99 = vector.load %arg5[%c2_62, %c0_63] : memref<290x36xf32, #tpu.memory_space<vmem>>, vector<256x36xf32>
    %cst_64 = arith.constant 0.000000e+00 : f32
    %100 = vector.broadcast %cst_64 : f32 to vector<256x36xf32>
    %101 = arith.select %38, %97, %100 : vector<256x36xi1>, vector<256x36xf32>
    %cst_65 = arith.constant 0.000000e+00 : f32
    %102 = vector.broadcast %cst_65 : f32 to vector<256x36xf32>
    %103 = arith.select %40, %99, %102 : vector<256x36xi1>, vector<256x36xf32>
    %c16_66 = arith.constant 16 : index
    %c0_67 = arith.constant 0 : index
    %104 = vector.load %arg5[%c16_66, %c0_67] : memref<290x36xf32, #tpu.memory_space<vmem>>, vector<256x36xf32>
    %c17_68 = arith.constant 17 : index
    %c0_69 = arith.constant 0 : index
    %105 = vector.load %arg5[%c17_68, %c0_69] : memref<290x36xf32, #tpu.memory_space<vmem>>, vector<256x36xf32>
    %c18_70 = arith.constant 18 : index
    %c0_71 = arith.constant 0 : index
    %106 = vector.load %arg5[%c18_70, %c0_71] : memref<290x36xf32, #tpu.memory_space<vmem>>, vector<256x36xf32>
    %cst_72 = arith.constant 0.000000e+00 : f32
    %107 = vector.broadcast %cst_72 : f32 to vector<256x36xf32>
    %108 = arith.select %38, %104, %107 : vector<256x36xi1>, vector<256x36xf32>
    %cst_73 = arith.constant 0.000000e+00 : f32
    %109 = vector.broadcast %cst_73 : f32 to vector<256x36xf32>
    %110 = arith.select %40, %106, %109 : vector<256x36xi1>, vector<256x36xf32>
    %c32_74 = arith.constant 32 : index
    %c0_75 = arith.constant 0 : index
    %111 = vector.load %arg5[%c32_74, %c0_75] : memref<290x36xf32, #tpu.memory_space<vmem>>, vector<256x36xf32>
    %c33_76 = arith.constant 33 : index
    %c0_77 = arith.constant 0 : index
    %112 = vector.load %arg5[%c33_76, %c0_77] : memref<290x36xf32, #tpu.memory_space<vmem>>, vector<256x36xf32>
    %c34_78 = arith.constant 34 : index
    %c0_79 = arith.constant 0 : index
    %113 = vector.load %arg5[%c34_78, %c0_79] : memref<290x36xf32, #tpu.memory_space<vmem>>, vector<256x36xf32>
    %cst_80 = arith.constant 0.000000e+00 : f32
    %114 = vector.broadcast %cst_80 : f32 to vector<256x36xf32>
    %115 = arith.select %38, %111, %114 : vector<256x36xi1>, vector<256x36xf32>
    %cst_81 = arith.constant 0.000000e+00 : f32
    %116 = vector.broadcast %cst_81 : f32 to vector<256x36xf32>
    %117 = arith.select %40, %113, %116 : vector<256x36xi1>, vector<256x36xf32>
    %118 = tpu.concatenate %101, %98, %103, %108, %105, %110, %115, %112, %117 in 1 : vector<256x36xf32>, vector<256x36xf32>, vector<256x36xf32>, vector<256x36xf32>, vector<256x36xf32>, vector<256x36xf32>, vector<256x36xf32>, vector<256x36xf32>, vector<256x36xf32> -> vector<256x324xf32>
    %cst_82 = arith.constant dense<0.000000e+00> : vector<256x36xf32>
    %119 = tpu.matmul %118, %7, %cst_82 {dimension_numbers = #tpu.dot_dimension_numbers<[1], [0], [0], [1], [0, 0, 1, 1], [], []>} : vector<256x324xf32>, vector<324x36xf32>, vector<256x36xf32> -> vector<256x36xf32>
    %120 = vector.broadcast %14 : vector<1x36xf32> to vector<256x36xf32>
    %121 = arith.addf %119, %120 : vector<256x36xf32>
    %cst_83 = arith.constant dense<0.000000e+00> : vector<256x36xf32>
    %122 = tpu.matmul %121, %6, %cst_83 {dimension_numbers = #tpu.dot_dimension_numbers<[1], [0], [0], [1], [0, 0, 1, 1], [], []>} : vector<256x36xf32>, vector<36x36xf32>, vector<256x36xf32> -> vector<256x36xf32>
    %123 = vector.broadcast %15 : vector<1x36xf32> to vector<256x36xf32>
    %124 = arith.addf %122, %123 : vector<256x36xf32>
    %cst_84 = arith.constant 0.000000e+00 : f32
    %125 = vector.broadcast %cst_84 : f32 to vector<256x88xf32>
    %126 = tpu.concatenate %81, %124, %125 in 1 : vector<256x4xf32>, vector<256x36xf32>, vector<256x88xf32> -> vector<256x128xf32>
    %c0_85 = arith.constant 0 : index
    %c0_86 = arith.constant 0 : index
    %c0_87 = arith.constant 0 : index
    %127 = vector.load %arg3[%c0_85, %c0_86, %c0_87] : memref<1x256x128xf32, #tpu.memory_space<vmem>>, vector<1x256x128xf32>
    %128 = vector.shape_cast %127 : vector<1x256x128xf32> to vector<256x128xf32>
    %129 = vector.shape_cast %126 : vector<256x128xf32> to vector<1x256x128xf32>
    tpu.vector_store %arg3[%c0_85, %c0_86, %c0_87], %129 {strides = array<i32>} : memref<1x256x128xf32, #tpu.memory_space<vmem>>, vector<1x256x128xf32>,
    return
  }
  func.func @transform_0(%arg0: i32) -> (i32, i32, i32) {
    %c0_i32 = arith.constant 0 : i32
    %c0_i32_0 = arith.constant 0 : i32
    %c0_i32_1 = arith.constant 0 : i32
    return %arg0, %c0_i32, %c0_i32_0 : i32, i32, i32
  }
  func.func @transform_1(%arg0: i32) -> (i32, i32) {
    %c0_i32 = arith.constant 0 : i32
    %c0_i32_0 = arith.constant 0 : i32
    %c0_i32_1 = arith.constant 0 : i32
    return %c0_i32, %c0_i32_0 : i32, i32
  }
  func.func @transform_2(%arg0: i32) -> (i32, i32, i32) {
    %c0_i32 = arith.constant 0 : i32
    %c0_i32_0 = arith.constant 0 : i32
    %c0_i32_1 = arith.constant 0 : i32
    return %arg0, %c0_i32, %c0_i32_0 : i32, i32, i32
  }
}

</mosaic_0001>

<bundles_post_ra>
// kernel: dydecoder_forward.1
= control target key start
LH: loop header
LB: loop body
LE: loop exit
PB: predicated region body
PF: predicated region fallthrough
CT: control target
= control target key end

     0   :  { %s8873_s9 = smov 0   ;;  %s13378_s0 = inlined_call_operand.vmem [shape: f32[2,256,16], index: 0, kind: input, shape index: {}]   ;;  %s13379_s1 = inlined_call_operand.vmem [shape: f32[452,36], index: 1, kind: input, shape index: {}]   ;;  %s13380_s2 = inlined_call_operand.vmem [shape: f32[2,256,128], index: 2, kind: output, shape index: {}]  }
   0x1 LB: > { %s7208_s10 = sadd.s32 4294967295, %s8839_s9   ;;  %p7212_p0 = scmp.ge.s32.totalorder %s8839_s9, 1  ;;  %s8839_s9 = sphi %s8873_s9, %s12_s9  }
   0x2   : > { %p112_p1 = scmp.lt.s32.totalorder %s8839_s9, 3 }
   0x4   : > { %p113_p2 = pnand %p7212_p0, %p112_p1 }
   0x6   : > { %116 = sbr.rel (%p113_p2) target bundleno = 2751 (0xabf), region = 28 }
   0xd   : > { %p134_p3 = scmp.lt.s32.totalorder %s7208_s10, 1  ;;  %v144_v0 = vld [vmem:[%s13379_s1] sm:$0xff]  ;;  %v145_v1 = vld [vmem:[%s13379_s1 + $0x8] sm:$0xf]  ;;  %vm13413_vm0 = vcmask 1043456   ;;  %vm8841_vm1 = vmmov 1  }
   0xe   : > { %v8213_v2 = vpack.c.bf16 %v145_v1, %v144_v0  ;;  %vm8890_vm2 = vmpackc.low %vm13413_vm0, %vm8841_vm1  ;;  %v13598_v3 = vmov 0  ;;  %s8842_s19 = smov 124   ;;  %vm13421_vm3 = vcmask 97280   ;;  %s8843_s24 = smov 4   ;;  %vm13418_vm4 = vcmask 31744  }
   0xf   : > { %s14586_s10 = smov (!%p134_p3, %s7208_s10), 1  ;;  %v13599_v3 = vsel %vm8890_vm2, 4294967295, %v13598_v3  ;;  %vm13419_vm5 = vcmask 64512   ;;  %vm1673_vm6 = vcmask 24576   ;;  %s8845_s27 = smov 16   ;;  %vm13420_vm12 = vcmask 293888  }
  0x10   : > { %13600 = vst [vmem:[#allocation4_spill] sm:$0xff] %v13599_v3  ;;  %8215 = vmatprep.subr.msk.bf16.mxu0 %vm8890_vm2, %v8213_v2  ;;  %s7490_s15 = sshll.u32 %s14586_s10, 8  ;;  %s8846_s28 = smov 12  }
  0x11   : > { %8218 = vmatpush3.bf16.msk.msra.mxu0 %vm8890_vm2, %v8213_v2  ;;  %s8904_s18 = scalar_lea.vmem %s13378_s0, %s7490_s15  ;;  %s8847_s29 = smov 20  }
  0x12   : > { %v8907_v4 = vld [vmem:[%s8904_s18] sm:$0xff]  ;;  %v8910_v5 = vld [vmem:[%s8904_s18 + $0x10] sm:$0xff]  ;;  %v8917_v6 = vld [vmem:[%s8904_s18 + $0x8] sm:$0xff]  ;;  %s8848_s30 = smov 28   ;;  %s8849_s3 = smov 8  }
  0x13   : > { %760 = vrot.lane.b32.xlu0 %v8907_v4, %s8842_s19  ;;  %764 = vrot.lane.b32.xlu1 %v8910_v5, %s8842_s19  ;;  %v8920_v7 = vld [vmem:[%s8904_s18 + $0x18] sm:$0xff]  ;;  %v8927_v8 = vld [vmem:[%s8904_s18 + $0x20] sm:$0xff]  ;;  %s8850_s4 = smov 24   ;;  %s8851_s5 = smov 32  }
  0x14   : > { %v8930_v9 = vld [vmem:[%s8904_s18 + $0x28] sm:$0xff]  ;;  %v8937_v10 = vld [vmem:[%s8904_s18 + $0x30] sm:$0xff]  ;;  %v8940_v11 = vld [vmem:[%s8904_s18 + $0x38] sm:$0xff]  ;;  %s8852_s16 = smov 36   ;;  %s8854_s20 = smov 108  }
  0x15   : > { %v8947_v12 = vld [vmem:[%s8904_s18 + $0x40] sm:$0xff]  ;;  %v8950_v13 = vld [vmem:[%s8904_s18 + $0x48] sm:$0xff]  ;;  %v8957_v14 = vld [vmem:[%s8904_s18 + $0x50] sm:$0xff]  ;;  %s8855_s26 = smov 72   ;;  %s8856_s6 = smov 52  }
  0x16   : > { %v8960_v15 = vld [vmem:[%s8904_s18 + $0x58] sm:$0xff]  ;;  %v8967_v16 = vld [vmem:[%s8904_s18 + $0x60] sm:$0xff]  ;;  %v8970_v17 = vld [vmem:[%s8904_s18 + $0x68] sm:$0xff]  ;;  %s13185_s21 = scalar_lea.vmem %s13380_s2, %s7490_s15 }
  0x17   : > { %762 = vrot.lane.b32.xlu0 %v8917_v6, %s8842_s19  ;;  %766 = vrot.lane.b32.xlu1 %v8920_v7, %s8842_s19  ;;  %v8977_v18 = vld [vmem:[%s8904_s18 + $0x70] sm:$0xff]  ;;  %v8980_v19 = vld [vmem:[%s8904_s18 + $0x78] sm:$0xff] }
  0x18   : > { %v8987_v20 = vld [vmem:[%s8904_s18 + $0x80] sm:$0xff]  ;;  %v8990_v21 = vld [vmem:[%s8904_s18 + $0x88] sm:$0xff]  ;;  %v8997_v22 = vld [vmem:[%s8904_s18 + $0x90] sm:$0xff] }
  0x19   : > { %v9000_v23 = vld [vmem:[%s8904_s18 + $0x98] sm:$0xff]  ;;  %v9007_v24 = vld [vmem:[%s8904_s18 + $0xa0] sm:$0xff]  ;;  %v9010_v25 = vld [vmem:[%s8904_s18 + $0xa8] sm:$0xff] }
  0x1a   : > { %v9017_v26 = vld [vmem:[%s8904_s18 + $0xb0] sm:$0xff]  ;;  %v9020_v27 = vld [vmem:[%s8904_s18 + $0xb8] sm:$0xff]  ;;  %v9027_v28 = vld [vmem:[%s8904_s18 + $0xc0] sm:$0xff] }
  0x1b   : > { %768 = vrot.lane.b32.xlu0 %v8927_v8, %s8842_s19  ;;  %770 = vrot.lane.b32.xlu1 %v8930_v9, %s8842_s19  ;;  %v9030_v29 = vld [vmem:[%s8904_s18 + $0xc8] sm:$0xff]  ;;  %v9037_v30 = vld [vmem:[%s8904_s18 + $0xd0] sm:$0xff] }
  0x1c   : > { %v9040_v31 = vld [vmem:[%s8904_s18 + $0xd8] sm:$0xff]  ;;  %v9047_v32 = vld [vmem:[%s8904_s18 + $0xe0] sm:$0xff]  ;;  %v9050_v33 = vld [vmem:[%s8904_s18 + $0xe8] sm:$0xff] }
  0x1d   : > { %v9057_v34 = vld [vmem:[%s8904_s18 + $0xf0] sm:$0xff]  ;;  %v9060_v35 = vld [vmem:[%s8904_s18 + $0xf8] sm:$0xff] }
  0x1f   : > { %772 = vrot.lane.b32.xlu0 %v8937_v10, %s8842_s19  ;;  %774 = vrot.lane.b32.xlu1 %v8940_v11, %s8842_s19 }
  0x23   : > { %776 = vrot.lane.b32.xlu0 %v8947_v12, %s8842_s19  ;;  %778 = vrot.lane.b32.xlu1 %v8950_v13, %s8842_s19 }
  0x27   : > { %780 = vrot.lane.b32.xlu0 %v8957_v14, %s8842_s19  ;;  %782 = vrot.lane.b32.xlu1 %v8960_v15, %s8842_s19 }
  0x2b   : > { %784 = vrot.lane.b32.xlu0 %v8967_v16, %s8842_s19  ;;  %786 = vrot.lane.b32.xlu1 %v8970_v17, %s8842_s19 }
  0x2f   : > { %788 = vrot.lane.b32.xlu0 %v8977_v18, %s8842_s19  ;;  %790 = vrot.lane.b32.xlu1 %v8980_v19, %s8842_s19 }
  0x33   : > { %792 = vrot.lane.b32.xlu0 %v8987_v20, %s8842_s19  ;;  %794 = vrot.lane.b32.xlu1 %v8990_v21, %s8842_s19 }
  0x37   : > { %796 = vrot.lane.b32.xlu0 %v8997_v22, %s8842_s19  ;;  %798 = vrot.lane.b32.xlu1 %v9000_v23, %s8842_s19 }
  0x3b   : > { %800 = vrot.lane.b32.xlu0 %v9007_v24, %s8842_s19  ;;  %802 = vrot.lane.b32.xlu1 %v9010_v25, %s8842_s19 }
  0x3f   : > { %804 = vrot.lane.b32.xlu0 %v9017_v26, %s8842_s19  ;;  %806 = vrot.lane.b32.xlu1 %v9020_v27, %s8842_s19 }
  0x43   : > { %808 = vrot.lane.b32.xlu0 %v9027_v28, %s8842_s19  ;;  %810 = vrot.lane.b32.xlu1 %v9030_v29, %s8842_s19 }
  0x47   : > { %812 = vrot.lane.b32.xlu0 %v9037_v30, %s8842_s19  ;;  %814 = vrot.lane.b32.xlu1 %v9040_v31, %s8842_s19 }
  0x4b   : > { %816 = vrot.lane.b32.xlu0 %v9047_v32, %s8842_s19  ;;  %818 = vrot.lane.b32.xlu1 %v9050_v33, %s8842_s19 }
  0x4f   : > { %820 = vrot.lane.b32.xlu0 %v9057_v34, %s8842_s19  ;;  %822 = vrot.lane.b32.xlu1 %v9060_v35, %s8842_s19 }
  0x85   : > { %v9066_v36 = vpop.permute.xlu0 %760  ;;  %v9068_v37 = vpop.permute.xlu1 %764 }
  0x86   : > { %13601 = vst [vmem:[#allocation5_spill] sm:$0xff] %v9068_v37  ;;  %7779 = vmatprep.mubr.msk.f32.mxu0 %vm13421_vm3, %v9066_v36 }
  0x89   : > { %v9072_v38 = vpop.permute.xlu0 %762  ;;  %v9074_v39 = vpop.permute.xlu1 %766 }
  0x8a   : > { %13602 = vst [vmem:[#allocation6_spill] sm:$0xff] %v9074_v39  ;;  %7780 = vmatmul.mubr.msk.f32.vlgmr.msra.gmra.mrb[0].mxu0 %vm13421_vm3, %v9072_v38 }
  0x8b   : > { %7782 = vmatprep.mubr.msk.f32.mxu0 %vm13421_vm3, %v9068_v37 }
  0x8d   : > { %v9080_v40 = vpop.permute.xlu0 %768  ;;  %v9084_v41 = vpop.permute.xlu1 %770 }
  0x8e   : > { %13603 = vst [vmem:[#allocation7_spill] sm:$0xff] %v9080_v40  ;;  %7783 = vmatmul.mubr.msk.f32.gmra.mrb[2].mxu0 %vm13421_vm3, %v9074_v39  ;;  %13604 = vst [vmem:[#allocation8_spill] sm:$0xff] %v9084_v41 }
  0x8f   : > { %7785 = vmatprep.mubr.msk.f32.mxu0 %vm13421_vm3, %v9080_v40 }
  0x91   : > { %v9088_v42 = vpop.permute.xlu0 %772  ;;  %v9092_v43 = vpop.permute.xlu1 %774 }
  0x92   : > { %13605 = vst [vmem:[#allocation9_spill] sm:$0xff] %v9088_v42  ;;  %7786 = vmatmul.mubr.msk.f32.gmra.mrb[4].mxu0 %vm13421_vm3, %v9084_v41  ;;  %13606 = vst [vmem:[#allocation10_spill] sm:$0xff] %v9092_v43 }
  0x93   : > { %7788 = vmatprep.mubr.msk.f32.mxu0 %vm13421_vm3, %v9088_v42 }
  0x95   : > { %v9096_v44 = vpop.permute.xlu0 %776  ;;  %v9100_v45 = vpop.permute.xlu1 %778 }
  0x96   : > { %13607 = vst [vmem:[#allocation11_spill] sm:$0xff] %v9096_v44  ;;  %7789 = vmatmul.mubr.msk.f32.gmra.mrb[6].mxu0 %vm13421_vm3, %v9092_v43  ;;  %13608 = vst [vmem:[#allocation12_spill] sm:$0xff] %v9100_v45 }
  0x97   : > { %7791 = vmatprep.mubr.msk.f32.mxu0 %vm13421_vm3, %v9096_v44 }
  0x99   : > { %v9104_v46 = vpop.permute.xlu0 %780  ;;  %v9108_v47 = vpop.permute.xlu1 %782 }
  0x9a   : > { %13609 = vst [vmem:[#allocation13_spill] sm:$0xff] %v9104_v46  ;;  %7792 = vmatmul.mubr.msk.f32.gmra.mrb[8].mxu0 %vm13421_vm3, %v9100_v45  ;;  %13610 = vst [vmem:[#allocation14_spill] sm:$0xff] %v9108_v47 }
  0x9b   : > { %7794 = vmatprep.mubr.msk.f32.mxu0 %vm13421_vm3, %v9104_v46 }
  0x9d   : > { %v9112_v48 = vpop.permute.xlu0 %784  ;;  %v9116_v49 = vpop.permute.xlu1 %786 }
  0x9e   : > { %13611 = vst [vmem:[#allocation15_spill] sm:$0xff] %v9112_v48  ;;  %7795 = vmatmul.mubr.msk.f32.gmra.mrb[10].mxu0 %vm13421_vm3, %v9108_v47  ;;  %13612 = vst [vmem:[#allocation16_spill] sm:$0xff] %v9116_v49 }
  0x9f   : > { %7797 = vmatprep.mubr.msk.f32.mxu0 %vm13421_vm3, %v9112_v48 }
  0xa1   : > { %v9120_v50 = vpop.permute.xlu0 %788  ;;  %v9124_v51 = vpop.permute.xlu1 %790 }
  0xa2   : > { %13613 = vst [vmem:[#allocation17_spill] sm:$0xff] %v9120_v50  ;;  %7798 = vmatmul.mubr.msk.f32.gmra.mrb[12].mxu0 %vm13421_vm3, %v9116_v49  ;;  %13614 = vst [vmem:[#allocation18_spill] sm:$0xff] %v9124_v51 }
  0xa3   : > { %7800 = vmatprep.mubr.msk.f32.mxu0 %vm13421_vm3, %v9120_v50 }
  0xa5   : > { %v9128_v52 = vpop.permute.xlu0 %792  ;;  %v9132_v53 = vpop.permute.xlu1 %794 }
  0xa6   : > { %13615 = vst [vmem:[#allocation19_spill] sm:$0xff] %v9128_v52  ;;  %7801 = vmatmul.mubr.msk.f32.gmra.mrb[14].mxu0 %vm13421_vm3, %v9124_v51  ;;  %13616 = vst [vmem:[#allocation20_spill] sm:$0xff] %v9132_v53 }
  0xa7   : > { %7803 = vmatprep.mubr.msk.f32.mxu0 %vm13421_vm3, %v9128_v52 }
  0xa9   : > { %v9138_v54 = vpop.permute.xlu0 %796  ;;  %v9140_v55 = vpop.permute.xlu1 %798 }
  0xaa   : > { %7804 = vmatmul.mubr.msk.f32.gmra.mrb[16].mxu0 %vm13421_vm3, %v9132_v53  ;;  %13617 = vst [vmem:[#allocation21_spill] sm:$0xff] %v9138_v54  ;;  %13618 = vst [vmem:[#allocation22_spill] sm:$0xff] %v9140_v55 }
  0xab   : > { %7806 = vmatprep.mubr.msk.f32.mxu0 %vm13421_vm3, %v9138_v54 }
  0xad   : > { %v9146_v56 = vpop.permute.xlu0 %800  ;;  %v9148_v57 = vpop.permute.xlu1 %802 }
  0xae   : > { %7807 = vmatmul.mubr.msk.f32.gmra.mrb[18].mxu0 %vm13421_vm3, %v9140_v55  ;;  %13619 = vst [vmem:[#allocation23_spill] sm:$0xff] %v9146_v56  ;;  %13620 = vst [vmem:[#allocation24_spill] sm:$0xff] %v9148_v57 }
  0xaf   : > { %7809 = vmatprep.mubr.msk.f32.mxu0 %vm13421_vm3, %v9146_v56 }
  0xb1   : > { %v9154_v58 = vpop.permute.xlu0 %804  ;;  %v9156_v59 = vpop.permute.xlu1 %806 }
  0xb2   : > { %7810 = vmatmul.mubr.msk.f32.gmra.mrb[20].mxu0 %vm13421_vm3, %v9148_v57  ;;  %13621 = vst [vmem:[#allocation25_spill] sm:$0xff] %v9154_v58  ;;  %13622 = vst [vmem:[#allocation26_spill] sm:$0xff] %v9156_v59 }
  0xb3   : > { %7812 = vmatprep.mubr.msk.f32.mxu0 %vm13421_vm3, %v9154_v58 }
  0xb5   : > { %v9162_v60 = vpop.permute.xlu0 %808  ;;  %v9164_v61 = vpop.permute.xlu1 %810 }
  0xb6   : > { %7813 = vmatmul.mubr.msk.f32.gmra.mrb[22].mxu0 %vm13421_vm3, %v9156_v59  ;;  %13623 = vst [vmem:[#allocation27_spill] sm:$0xff] %v9162_v60  ;;  %13624 = vst [vmem:[#allocation28_spill] sm:$0xff] %v9164_v61 }
  0xb7   : > { %7815 = vmatprep.mubr.msk.f32.mxu0 %vm13421_vm3, %v9162_v60 }
  0xb9   : > { %v9170_v62 = vpop.permute.xlu0 %812  ;;  %v9172_v63 = vpop.permute.xlu1 %814 }
  0xba   : > { %7816 = vmatmul.mubr.msk.f32.gmra.mrb[24].mxu0 %vm13421_vm3, %v9164_v61  ;;  %13625 = vst [vmem:[#allocation29_spill] sm:$0xff] %v9170_v62  ;;  %13626 = vst [vmem:[#allocation30_spill] sm:$0xff] %v9172_v63 }
  0xbb   : > { %7818 = vmatprep.mubr.msk.f32.mxu0 %vm13421_vm3, %v9170_v62 }
  0xbd   : > { %v9178_v0 = vpop.permute.xlu0 %816  ;;  %v9180_v1 = vpop.permute.xlu1 %818 }
  0xbe   : > { %7819 = vmatmul.mubr.msk.f32.gmra.mrb[26].mxu0 %vm13421_vm3, %v9172_v63  ;;  %13627 = vst [vmem:[#allocation31_spill] sm:$0xff] %v9178_v0  ;;  %13628 = vst [vmem:[#allocation32_spill] sm:$0xff] %v9180_v1  ;;  %v146_v63 = vld [vmem:[%s13379_s1 + $0xc] sm:$0xff] }
  0xbf   : > { %7821 = vmatprep.mubr.msk.f32.mxu0 %vm13421_vm3, %v9178_v0  ;;  %7827 = vmatprep.subr.mxu1 %v146_v63 }
  0xc0   : > { %7828 = vmatpush3.msra.mxu1 %v146_v63 }
  0xc1   : > { %v9186_v2 = vpop.permute.xlu0 %820  ;;  %v9188_v61 = vpop.permute.xlu1 %822 }
  0xc2   : > { %7822 = vmatmul.mubr.msk.f32.gmra.mrb[28].mxu0 %vm13421_vm3, %v9180_v1  ;;  %13629 = vst [vmem:[#allocation33_spill] sm:$0xff] %v9186_v2  ;;  %13630 = vst [vmem:[#allocation34_spill] sm:$0xff] %v9188_v61  ;;  %v9200_v1 = vld [vmem:[%s13379_s1 + $0x78] ss:$0 sm:$0xff] }
  0xc3   : > { %7824 = vmatprep.mubr.msk.f32.mxu0 %vm13421_vm3, %v9186_v2 }
  0xc6   : > { %7825 = vmatmul.mubr.msk.f32.gmra.mrb[30].mxu0 %vm13421_vm3, %v9188_v61 }
 0x15d   : > { %v7781_v0 = vpop.f32.mrb[0].mxu0 }
 0x15e   : > { %v965_v62 = vadd.f32 %v7781_v0, %v9200_v1  ;;  %v959_v60 = vpop.f32.mrb[1].mxu0 }
 0x15f   : > { %v960_v2 = vadd.f32 %v9200_v1, %v959_v60 }
 0x160   : > { %v1119_v59 = vmax.f32 %v965_v62, 0.0 }
 0x161   : > { %v1118_v58 = vmax.f32 %v960_v2, 0.0  ;;  %v7784_v61 = vpop.f32.mrb[2].mxu0 }
 0x162   : > { %v975_v57 = vadd.f32 %v7784_v61, %v9200_v1  ;;  %1184 = vrot.lane.b32.xlu1 %v1119_v59, %s8843_s24  ;;  %v969_v63 = vpop.f32.mrb[3].mxu0 }
 0x163   : > { %v970_v56 = vadd.f32 %v9200_v1, %v969_v63  ;;  %1182 = vrot.lane.b32.xlu0 %v1118_v58, %s8843_s24 }
 0x164   : > { %v1121_v55 = vmax.f32 %v975_v57, 0.0 }
 0x165   : > { %v1120_v54 = vmax.f32 %v970_v56, 0.0  ;;  %v7787_v53 = vpop.f32.mrb[4].mxu0 }
 0x166   : > { %v985_v0 = vadd.f32 %v7787_v53, %v9200_v1  ;;  %v979_v52 = vpop.f32.mrb[5].mxu0  ;;  %1188 = vrot.lane.b32.xlu1 %v1121_v55, %s8843_s24 }
 0x167   : > { %1186 = vrot.lane.b32.xlu0 %v1120_v54, %s8843_s24  ;;  %v980_v60 = vadd.f32 %v9200_v1, %v979_v52 }
 0x168   : > { %v1123_v61 = vmax.f32 %v985_v0, 0.0 }
 0x169   : > { %v1122_v62 = vmax.f32 %v980_v60, 0.0  ;;  %v7790_v59 = vpop.f32.mrb[6].mxu0 }
 0x16a   : > { %1192 = vrot.lane.b32.xlu1 %v1123_v61, %s8843_s24  ;;  %v995_v2 = vadd.f32 %v7790_v59, %v9200_v1  ;;  %v989_v58 = vpop.f32.mrb[7].mxu0 }
 0x16b   : > { %1190 = vrot.lane.b32.xlu0 %v1122_v62, %s8843_s24  ;;  %v990_v56 = vadd.f32 %v9200_v1, %v989_v58 }
 0x16c   : > { %v1125_v53 = vmax.f32 %v995_v2, 0.0 }
 0x16d   : > { %v1124_v57 = vmax.f32 %v990_v56, 0.0  ;;  %v7793_v63 = vpop.f32.mrb[8].mxu0 }
 0x16e   : > { %1196 = vrot.lane.b32.xlu1 %v1125_v53, %s8843_s24  ;;  %v1005_v54 = vadd.f32 %v7793_v63, %v9200_v1  ;;  %v999_v52 = vpop.f32.mrb[9].mxu0 }
 0x16f   : > { %1194 = vrot.lane.b32.xlu0 %v1124_v57, %s8843_s24  ;;  %v1000_v55 = vadd.f32 %v9200_v1, %v999_v52 }
 0x170   : > { %v1127_v0 = vmax.f32 %v1005_v54, 0.0 }
 0x171   : > { %v1126_v60 = vmax.f32 %v1000_v55, 0.0  ;;  %v7796_v61 = vpop.f32.mrb[10].mxu0 }
 0x172   : > { %1200 = vrot.lane.b32.xlu1 %v1127_v0, %s8843_s24  ;;  %v1015_v62 = vadd.f32 %v7796_v61, %v9200_v1  ;;  %v1009_v59 = vpop.f32.mrb[11].mxu0 }
 0x173   : > { %1198 = vrot.lane.b32.xlu0 %v1126_v60, %s8843_s24  ;;  %v1010_v2 = vadd.f32 %v9200_v1, %v1009_v59 }
 0x174   : > { %v1129_v58 = vmax.f32 %v1015_v62, 0.0 }
 0x175   : > { %v1128_v56 = vmax.f32 %v1010_v2, 0.0  ;;  %v7799_v53 = vpop.f32.mrb[12].mxu0 }
 0x176   : > { %1204 = vrot.lane.b32.xlu1 %v1129_v58, %s8843_s24  ;;  %v1025_v57 = vadd.f32 %v7799_v53, %v9200_v1  ;;  %v1019_v63 = vpop.f32.mrb[13].mxu0 }
 0x177   : > { %1202 = vrot.lane.b32.xlu0 %v1128_v56, %s8843_s24  ;;  %v1020_v54 = vadd.f32 %v9200_v1, %v1019_v63 }
 0x178   : > { %v1131_v52 = vmax.f32 %v1025_v57, 0.0 }
 0x179   : > { %v1130_v55 = vmax.f32 %v1020_v54, 0.0  ;;  %v7802_v0 = vpop.f32.mrb[14].mxu0 }
 0x17a   : > { %1208 = vrot.lane.b32.xlu1 %v1131_v52, %s8843_s24  ;;  %v1035_v60 = vadd.f32 %v7802_v0, %v9200_v1  ;;  %v1029_v61 = vpop.f32.mrb[15].mxu0 }
 0x17b   : > { %1206 = vrot.lane.b32.xlu0 %v1130_v55, %s8843_s24  ;;  %v1030_v62 = vadd.f32 %v9200_v1, %v1029_v61 }
 0x17c   : > { %v1133_v59 = vmax.f32 %v1035_v60, 0.0 }
 0x17d   : > { %v1132_v2 = vmax.f32 %v1030_v62, 0.0  ;;  %v7805_v58 = vpop.f32.mrb[16].mxu0 }
 0x17e   : > { %1212 = vrot.lane.b32.xlu1 %v1133_v59, %s8843_s24  ;;  %v1045_v56 = vadd.f32 %v7805_v58, %v9200_v1  ;;  %v1039_v53 = vpop.f32.mrb[17].mxu0 }
 0x17f   : > { %1210 = vrot.lane.b32.xlu0 %v1132_v2, %s8843_s24  ;;  %v1040_v57 = vadd.f32 %v9200_v1, %v1039_v53 }
 0x180   : > { %v1135_v63 = vmax.f32 %v1045_v56, 0.0 }
 0x181   : > { %v1134_v54 = vmax.f32 %v1040_v57, 0.0  ;;  %v7808_v52 = vpop.f32.mrb[18].mxu0 }
 0x182   : > { %1216 = vrot.lane.b32.xlu1 %v1135_v63, %s8843_s24  ;;  %v1055_v55 = vadd.f32 %v7808_v52, %v9200_v1  ;;  %v1049_v0 = vpop.f32.mrb[19].mxu0 }
 0x183   : > { %1214 = vrot.lane.b32.xlu0 %v1134_v54, %s8843_s24  ;;  %v1050_v60 = vadd.f32 %v9200_v1, %v1049_v0 }
 0x184   : > { %v1137_v61 = vmax.f32 %v1055_v55, 0.0 }
 0x185   : > { %v1136_v62 = vmax.f32 %v1050_v60, 0.0  ;;  %v7811_v59 = vpop.f32.mrb[20].mxu0 }
 0x186   : > { %1220 = vrot.lane.b32.xlu1 %v1137_v61, %s8843_s24  ;;  %v1065_v2 = vadd.f32 %v7811_v59, %v9200_v1  ;;  %v1059_v58 = vpop.f32.mrb[21].mxu0 }
 0x187   : > { %1218 = vrot.lane.b32.xlu0 %v1136_v62, %s8843_s24  ;;  %v1060_v56 = vadd.f32 %v9200_v1, %v1059_v58 }
 0x188   : > { %v1139_v53 = vmax.f32 %v1065_v2, 0.0 }
 0x189   : > { %v1138_v57 = vmax.f32 %v1060_v56, 0.0  ;;  %v7814_v63 = vpop.f32.mrb[22].mxu0 }
 0x18a   : > { %1224 = vrot.lane.b32.xlu1 %v1139_v53, %s8843_s24  ;;  %v1075_v54 = vadd.f32 %v7814_v63, %v9200_v1  ;;  %v1069_v52 = vpop.f32.mrb[23].mxu0 }
 0x18b   : > { %1222 = vrot.lane.b32.xlu0 %v1138_v57, %s8843_s24  ;;  %v1070_v55 = vadd.f32 %v9200_v1, %v1069_v52 }
 0x18c   : > { %v1141_v0 = vmax.f32 %v1075_v54, 0.0 }
 0x18d   : > { %v1140_v60 = vmax.f32 %v1070_v55, 0.0  ;;  %v7817_v61 = vpop.f32.mrb[24].mxu0 }
 0x18e   : > { %v1085_v59 = vadd.f32 %v7817_v61, %v9200_v1  ;;  %1228 = vrot.lane.b32.xlu1 %v1141_v0, %s8843_s24  ;;  %v1079_v62 = vpop.f32.mrb[25].mxu0 }
 0x18f   : > { %1226 = vrot.lane.b32.xlu0 %v1140_v60, %s8843_s24  ;;  %v1080_v2 = vadd.f32 %v9200_v1, %v1079_v62 }
 0x190   : > { %v1143_v58 = vmax.f32 %v1085_v59, 0.0 }
 0x191   : > { %v1142_v56 = vmax.f32 %v1080_v2, 0.0  ;;  %v7820_v53 = vpop.f32.mrb[26].mxu0 }
 0x192   : > { %v1095_v63 = vadd.f32 %v7820_v53, %v9200_v1  ;;  %v1089_v57 = vpop.f32.mrb[27].mxu0  ;;  %1232 = vrot.lane.b32.xlu1 %v1143_v58, %s8843_s24 }
 0x193   : > { %v1090_v54 = vadd.f32 %v9200_v1, %v1089_v57  ;;  %1230 = vrot.lane.b32.xlu0 %v1142_v56, %s8843_s24 }
 0x194   : > { %v1145_v52 = vmax.f32 %v1095_v63, 0.0 }
 0x195   : > { %v1144_v0 = vmax.f32 %v1090_v54, 0.0  ;;  %v7823_v60 = vpop.f32.mrb[28].mxu0 }
 0x196   : > { %v1105_v59 = vadd.f32 %v7823_v60, %v9200_v1  ;;  %v1099_v62 = vpop.f32.mrb[29].mxu0  ;;  %1236 = vrot.lane.b32.xlu1 %v1145_v52, %s8843_s24 }
 0x197   : > { %v1100_v58 = vadd.f32 %v9200_v1, %v1099_v62  ;;  %1234 = vrot.lane.b32.xlu0 %v1144_v0, %s8843_s24 }
 0x198   : > { %v1147_v53 = vmax.f32 %v1105_v59, 0.0 }
 0x199   : > { %v1146_v57 = vmax.f32 %v1100_v58, 0.0  ;;  %v7826_v54 = vpop.f32.mrb[30].mxu0 }
 0x19a   : > { %1240 = vrot.lane.b32.xlu1 %v1147_v53, %s8843_s24 }
 0x19b   : > { %1238 = vrot.lane.b32.xlu0 %v1146_v57, %s8843_s24 }
 0x1d4   : > { %v1185_v55 = vpop.permute.xlu1 %1184 }
 0x1d5   : > { %v1183_v61 = vpop.permute.xlu0 %1182  ;;  %v1280_v56 = vsel %vm13418_vm4, %v8917_v6, %v1185_v55 }
 0x1d6   : > { %v1279_v2 = vsel %vm13418_vm4, %v8907_v4, %v1183_v61  ;;  %v1115_v4 = vadd.f32 %v7826_v54, %v9200_v1  ;;  %v1109_v61 = vpop.f32.mrb[31].mxu0 }
 0x1d7   : > { %7829 = vmatprep.mubr.msk.f32.mxu1 %vm13419_vm5, %v1279_v2  ;;  %v1110_v55 = vadd.f32 %v9200_v1, %v1109_v61 }
 0x1d8   : > { %7830 = vmatmul.mubr.msk.f32.vlgmr.msra.gmra.mrb[0].mxu1 %vm13419_vm5, %v1280_v56  ;;  %v1189_v63 = vpop.permute.xlu1 %1188  ;;  %v1149_v0 = vmax.f32 %v1115_v4, 0.0 }
 0x1d9   : > { %v1187_v60 = vpop.permute.xlu0 %1186  ;;  %v1282_v52 = vsel %vm13418_vm4, %v8920_v7, %v1189_v63  ;;  %v1148_v62 = vmax.f32 %v1110_v55, 0.0 }
 0x1da   : > { %v1281_v6 = vsel %vm13418_vm4, %v8910_v5, %v1187_v60  ;;  %1244 = vrot.lane.b32.xlu1 %v1149_v0, %s8843_s24 }
 0x1db   : > { %7832 = vmatprep.mubr.msk.f32.mxu1 %vm13419_vm5, %v1281_v6  ;;  %1242 = vrot.lane.b32.xlu0 %v1148_v62, %s8843_s24 }
 0x1dc   : > { %7833 = vmatmul.mubr.msk.f32.gmra.mrb[2].mxu1 %vm13419_vm5, %v1282_v52  ;;  %v1193_v59 = vpop.permute.xlu1 %1192 }
 0x1dd   : > { %v1191_v7 = vpop.permute.xlu0 %1190  ;;  %v1284_v2 = vsel %vm13418_vm4, %v8930_v9, %v1193_v59 }
 0x1de   : > { %v1283_v5 = vsel %vm13418_vm4, %v8927_v8, %v1191_v7 }
 0x1df   : > { %7835 = vmatprep.mubr.msk.f32.mxu1 %vm13419_vm5, %v1283_v5 }
 0x1e0   : > { %7836 = vmatmul.mubr.msk.f32.gmra.mrb[4].mxu1 %vm13419_vm5, %v1284_v2  ;;  %v1197_v1 = vpop.permute.xlu1 %1196 }
 0x1e1   : > { %v1195_v58 = vpop.permute.xlu0 %1194  ;;  %v1286_v56 = vsel %vm13418_vm4, %v8940_v11, %v1197_v1 }
 0x1e2   : > { %v1285_v53 = vsel %vm13418_vm4, %v8937_v10, %v1195_v58 }
 0x1e3   : > { %7838 = vmatprep.mubr.msk.f32.mxu1 %vm13419_vm5, %v1285_v53 }
 0x1e4   : > { %7839 = vmatmul.mubr.msk.f32.gmra.mrb[6].mxu1 %vm13419_vm5, %v1286_v56  ;;  %v1201_v9 = vpop.permute.xlu1 %1200 }
 0x1e5   : > { %v1199_v8 = vpop.permute.xlu0 %1198  ;;  %v1288_v63 = vsel %vm13418_vm4, %v8950_v13, %v1201_v9 }
 0x1e6   : > { %v1287_v57 = vsel %vm13418_vm4, %v8947_v12, %v1199_v8 }
 0x1e7   : > { %7841 = vmatprep.mubr.msk.f32.mxu1 %vm13419_vm5, %v1287_v57 }
 0x1e8   : > { %7842 = vmatmul.mubr.msk.f32.gmra.mrb[8].mxu1 %vm13419_vm5, %v1288_v63  ;;  %v1205_v11 = vpop.permute.xlu1 %1204 }
 0x1e9   : > { %v1203_v54 = vpop.permute.xlu0 %1202  ;;  %v1290_v10 = vsel %vm13418_vm4, %v8960_v15, %v1205_v11 }
 0x1ea   : > { %v1289_v60 = vsel %vm13418_vm4, %v8957_v14, %v1203_v54 }
 0x1eb   : > { %7844 = vmatprep.mubr.msk.f32.mxu1 %vm13419_vm5, %v1289_v60 }
 0x1ec   : > { %7845 = vmatmul.mubr.msk.f32.gmra.mrb[10].mxu1 %vm13419_vm5, %v1290_v10  ;;  %v1209_v13 = vpop.permute.xlu1 %1208 }
 0x1ed   : > { %v1207_v52 = vpop.permute.xlu0 %1206  ;;  %v1292_v12 = vsel %vm13418_vm4, %v8970_v17, %v1209_v13 }
 0x1ee   : > { %v1291_v4 = vsel %vm13418_vm4, %v8967_v16, %v1207_v52 }
 0x1ef   : > { %7847 = vmatprep.mubr.msk.f32.mxu1 %vm13419_vm5, %v1291_v4 }
 0x1f0   : > { %7848 = vmatmul.mubr.msk.f32.gmra.mrb[12].mxu1 %vm13419_vm5, %v1292_v12  ;;  %v1213_v15 = vpop.permute.xlu1 %1212 }
 0x1f1   : > { %v1211_v61 = vpop.permute.xlu0 %1210  ;;  %v1294_v14 = vsel %vm13418_vm4, %v8980_v19, %v1213_v15  ;;  %v13397_v19 = vmov 0.0  }
 0x1f2   : > { %v1293_v6 = vsel %vm13418_vm4, %v8977_v18, %v1211_v61  ;;  %1674 = vst.msk [vmem:[#allocation2] sm:$0x1] %vm1673_vm6, %v13397_v19  ;;  %1675 = vst.msk [vmem:[#allocation2 + $0x121] sm:$0x1] %vm1673_vm6, %v13397_v19 }
 0x1f3   : > { %7850 = vmatprep.mubr.msk.f32.mxu1 %vm13419_vm5, %v1293_v6  ;;  %4482 = vst.msk [vmem:[#allocation3] sm:$0xff] %vm13420_vm12, %v13397_v19  ;;  %4483 = vst.msk [vmem:[#allocation3 + $0x8] sm:$0xff] %vm13420_vm12, %v13397_v19 }
 0x1f4   : > { %7851 = vmatmul.mubr.msk.f32.gmra.mrb[14].mxu1 %vm13419_vm5, %v1294_v14  ;;  %v1217_v17 = vpop.permute.xlu1 %1216  ;;  %4486 = vst.msk [vmem:[#allocation3 + $0x111] sm:$0xff] %vm13420_vm12, %v13397_v19  ;;  %4487 = vst.msk [vmem:[#allocation3 + $0x119] sm:$0xff] %vm13420_vm12, %v13397_v19  ;;  %vm13424_vm12 = vcmask 228352  }
 0x1f5   : > { %v1215_v55 = vpop.permute.xlu0 %1214  ;;  %v1296_v16 = vsel %vm13418_vm4, %v8990_v21, %v1217_v17 }
 0x1f6   : > { %v1295_v0 = vsel %vm13418_vm4, %v8987_v20, %v1215_v55 }
 0x1f7   : > { %7853 = vmatprep.mubr.msk.f32.mxu1 %vm13419_vm5, %v1295_v0 }
 0x1f8   : > { %7854 = vmatmul.mubr.msk.f32.gmra.mrb[16].mxu1 %vm13419_vm5, %v1296_v16  ;;  %v1221_v59 = vpop.permute.xlu1 %1220 }
 0x1f9   : > { %v1219_v18 = vpop.permute.xlu0 %1218  ;;  %v1298_v21 = vsel %vm13418_vm4, %v9000_v23, %v1221_v59 }
 0x1fa   : > { %v1297_v62 = vsel %vm13418_vm4, %v8997_v22, %v1219_v18 }
 0x1fb   : > { %7856 = vmatprep.mubr.msk.f32.mxu1 %vm13419_vm5, %v1297_v62 }
 0x1fc   : > { %7857 = vmatmul.mubr.msk.f32.gmra.mrb[18].mxu1 %vm13419_vm5, %v1298_v21  ;;  %v1225_v7 = vpop.permute.xlu1 %1224 }
 0x1fd   : > { %v1223_v20 = vpop.permute.xlu0 %1222  ;;  %v1300_v5 = vsel %vm13418_vm4, %v9010_v25, %v1225_v7 }
 0x1fe   : > { %v1299_v2 = vsel %vm13418_vm4, %v9007_v24, %v1223_v20  ;;  %v13631_v20 = vmov 0 }
 0x1ff   : > { %7859 = vmatprep.mubr.msk.f32.mxu1 %vm13419_vm5, %v1299_v2 }
 0x200   : > { %7860 = vmatmul.mubr.msk.f32.gmra.mrb[20].mxu1 %vm13419_vm5, %v1300_v5  ;;  %v1229_v1 = vpop.permute.xlu1 %1228 }
 0x201   : > { %v1227_v22 = vpop.permute.xlu0 %1226  ;;  %v1302_v58 = vsel %vm13418_vm4, %v9020_v27, %v1229_v1 }
 0x202   : > { %v1301_v23 = vsel %vm13418_vm4, %v9017_v26, %v1227_v22 }
 0x203   : > { %7862 = vmatprep.mubr.msk.f32.mxu1 %vm13419_vm5, %v1301_v23 }
 0x204   : > { %7863 = vmatmul.mubr.msk.f32.gmra.mrb[22].mxu1 %vm13419_vm5, %v1302_v58  ;;  %v1233_v56 = vpop.permute.xlu1 %1232 }
 0x205   : > { %v1231_v24 = vpop.permute.xlu0 %1230  ;;  %v1304_v53 = vsel %vm13418_vm4, %v9030_v29, %v1233_v56 }
 0x206   : > { %v1303_v25 = vsel %vm13418_vm4, %v9027_v28, %v1231_v24 }
 0x207   : > { %7865 = vmatprep.mubr.msk.f32.mxu1 %vm13419_vm5, %v1303_v25 }
 0x208   : > { %7866 = vmatmul.mubr.msk.f32.gmra.mrb[24].mxu1 %vm13419_vm5, %v1304_v53  ;;  %v1237_v9 = vpop.permute.xlu1 %1236 }
 0x209   : > { %v1235_v26 = vpop.permute.xlu0 %1234  ;;  %v1306_v8 = vsel %vm13418_vm4, %v9040_v31, %v1237_v9 }
 0x20a   : > { %v1305_v27 = vsel %vm13418_vm4, %v9037_v30, %v1235_v26  ;;  %v13634_v26 = vmov 0 }
 0x20b   : > { %7868 = vmatprep.mubr.msk.f32.mxu1 %vm13419_vm5, %v1305_v27 }
 0x20c   : > { %7869 = vmatmul.mubr.msk.f32.gmra.mrb[26].mxu1 %vm13419_vm5, %v1306_v8  ;;  %v1241_v63 = vpop.permute.xlu1 %1240 }
 0x20d   : > { %v1239_v28 = vpop.permute.xlu0 %1238  ;;  %v1308_v57 = vsel %vm13418_vm4, %v9050_v33, %v1241_v63  ;;  %v9367_v33 = vld [vmem:[%s13379_s1 + $0x79] ss:$0 sm:$0xff] }
 0x20e   : > { %v1307_v29 = vsel %vm13418_vm4, %v9047_v32, %v1239_v28  ;;  %v243_v32 = vlaneseq }
 0x20f   : > { %7871 = vmatprep.mubr.msk.f32.mxu1 %vm13419_vm5, %v1307_v29  ;;  %v13637_v29 = vmov 0 }
 0x210   : > { %7872 = vmatmul.mubr.msk.f32.gmra.mrb[28].mxu1 %vm13419_vm5, %v1308_v57  ;;  %v9369_v60 = vshrl.u32 %v243_v32, 7 }
 0x212   : > { %v246_v12 = vadd.s32 16, %v9369_v60  ;;  %v248_v17 = vadd.s32 32, %v9369_v60  ;;  %v250_v62 = vadd.s32 48, %v9369_v60 }
 0x214   : > { %v294_v6 = vand.u32 15, %v246_v12  ;;  %v308_v7 = vand.u32 15, %v248_v17  ;;  %v322_v24 = vand.u32 15, %v250_v62  ;;  %v13640_v17 = vmov 0 }
 0x215   : > { %v247_v62 = vadd.s32 24, %v9369_v60 }
 0x216   : > { %vm9393_vm7 = vcmp.ge.s32.totalorder %v294_v6, 1  ;;  %vm9413_vm8 = vcmp.ge.s32.totalorder %v308_v7, 1  ;;  %vm9425_vm9 = vcmp.ge.s32.totalorder %v322_v24, 1 }
 0x217   : > { %v13632_v20 = vsel %vm9393_vm7, 4294967295, %v13631_v20  ;;  %v13635_v26 = vsel %vm9413_vm8, 4294967295, %v13634_v26  ;;  %v13638_v29 = vsel %vm9425_vm9, 4294967295, %v13637_v29  ;;  %v301_v24 = vand.u32 15, %v247_v62 }
 0x218   : > { %13633 = vst [vmem:[#allocation35_spill] sm:$0xff] %v13632_v20  ;;  %13636 = vst [vmem:[#allocation36_spill] sm:$0xff] %v13635_v26  ;;  %v13836_v26 = vmov 0 }
 0x219   : > { %13639 = vst [vmem:[#allocation37_spill] sm:$0xff] %v13638_v29  ;;  %vm9513_vm13 = vcmp.le.s32.totalorder %v301_v24, 14 }
 0x24c   : > { %v1245_v11 = vpop.permute.xlu1 %1244 }
 0x24d   : > { %v1243_v30 = vpop.permute.xlu0 %1242  ;;  %v1310_v54 = vsel %vm13418_vm4, %v9060_v35, %v1245_v11 }
 0x24e   : > { %v1309_v31 = vsel %vm13418_vm4, %v9057_v34, %v1243_v30 }
 0x24f   : > { %7874 = vmatprep.mubr.msk.f32.mxu1 %vm13419_vm5, %v1309_v31 }
 0x250   : > { %7875 = vmatmul.mubr.msk.f32.gmra.mrb[30].mxu1 %vm13419_vm5, %v1310_v54 }
 0x2ab   : > { %v7831_v10 = vpop.f32.mrb[0].mxu1 }
 0x2ac   : > { %v1484_v13 = vadd.f32 %v7831_v10, %v9367_v33  ;;  %v1478_v52 = vpop.f32.mrb[1].mxu1 }
 0x2ad   : > { %v1479_v34 = vadd.f32 %v9367_v33, %v1478_v52 }
 0x2ae   : > { %1638 = vst.msk [vmem:[#allocation2 + $0x19] sm:$0xff] %vm13418_vm4, %v1484_v13 }
 0x2af   : > { %1637 = vst.msk [vmem:[#allocation2 + $0x11] sm:$0xff] %vm13418_vm4, %v1479_v34  ;;  %v7834_v35 = vpop.f32.mrb[2].mxu1 }
 0x2b0   : > { %v1494_v4 = vadd.f32 %v7834_v35, %v9367_v33  ;;  %v1488_v15 = vpop.f32.mrb[3].mxu1 }
 0x2b1   : > { %v1489_v61 = vadd.f32 %v9367_v33, %v1488_v15 }
 0x2b2   : > { %1640 = vst.msk [vmem:[#allocation2 + $0x29] sm:$0xff] %vm13418_vm4, %v1494_v4  ;;  %1670 = vst.msk [vmem:[#allocation2 + $0x9] sm:$0xff] %vm13418_vm4, %v1494_v4 }
 0x2b3   : > { %1639 = vst.msk [vmem:[#allocation2 + $0x21] sm:$0xff] %vm13418_vm4, %v1489_v61  ;;  %1669 = vst.msk [vmem:[#allocation2 + $0x1] sm:$0xff] %vm13418_vm4, %v1489_v61  ;;  %v7837_v14 = vpop.f32.mrb[4].mxu1  ;;  %v280_v61 = vand.u32 15, %v9369_v60 }
 0x2b4   : > { %v1504_v55 = vadd.f32 %v7837_v14, %v9367_v33  ;;  %v1498_v16 = vpop.f32.mrb[5].mxu1 }
 0x2b5   : > { %v1499_v0 = vadd.f32 %v9367_v33, %v1498_v16  ;;  %v1711_v18 = vld [vmem:[#allocation2 + $0x19] sm:$0xff]  ;;  %vm9462_vm10 = vcmp.ge.s32.totalorder %v280_v61, 1 }
 0x2b6   : > { %1642 = vst.msk [vmem:[#allocation2 + $0x39] sm:$0xff] %vm13418_vm4, %v1504_v55  ;;  %2364 = vrot.lane.b32.xlu0 %v1711_v18, %s8845_s27  ;;  %v9387_v59 = vld [vmem:[#allocation2 + $0x18] sm:$0xff]  ;;  %v13641_v17 = vsel %vm9462_vm10, 4294967295, %v13640_v17 }
 0x2b7   : > { %1641 = vst.msk [vmem:[#allocation2 + $0x31] sm:$0xff] %vm13418_vm4, %v1499_v0  ;;  %2266 = vrot.lane.b32.xlu1 %v9387_v59, %s8846_s28  ;;  %v7840_v21 = vpop.f32.mrb[6].mxu1  ;;  %v9398_v22 = vld [vmem:[#allocation2 + $0x12] sm:$0xff]  ;;  %13642 = vst [vmem:[#allocation38_spill] sm:$0xff] %v13641_v17  ;;  %v245_v0 = vadd.s32 8, %v9369_v60 }
 0x2b8   : > { %v1514_v2 = vadd.f32 %v7840_v21, %v9367_v33  ;;  %v1508_v5 = vpop.f32.mrb[7].mxu1  ;;  %v1710_v58 = vld [vmem:[#allocation2 + $0x11] sm:$0xff] }
 0x2b9   : > { %v9400_v1 = vld [vmem:[#allocation2 + $0x10] sm:$0xff]  ;;  %v1509_v23 = vadd.f32 %v9367_v33, %v1508_v5 }
 0x2ba   : > { %2014 = vrot.lane.b32.xlu0 %v1711_v18, %s8843_s24  ;;  %1644 = vst.msk [vmem:[#allocation2 + $0x49] sm:$0xff] %vm13418_vm4, %v1514_v2  ;;  %v9410_v25 = vld [vmem:[#allocation2 + $0x22] sm:$0xff]  ;;  %v1842_v55 = vsel %vm9462_vm10, %v9400_v1, %v9398_v22  ;;  %v287_v18 = vand.u32 15, %v245_v0 }
 0x2bb   : > { %2012 = vrot.lane.b32.xlu1 %v1710_v58, %s8843_s24  ;;  %1643 = vst.msk [vmem:[#allocation2 + $0x41] sm:$0xff] %vm13418_vm4, %v1509_v23  ;;  %v7843_v53 = vpop.f32.mrb[8].mxu1  ;;  %v9417_v9 = vld [vmem:[#allocation2 + $0x20] sm:$0xff]  ;;  %v1713_v54 = vld [vmem:[#allocation2 + $0x29] sm:$0xff]  ;;  %v13643_v23 = vmov 0 }
 0x2bc   : > { %v1524_v27 = vadd.f32 %v7843_v53, %v9367_v33  ;;  %v1518_v8 = vpop.f32.mrb[9].mxu1  ;;  %v1709_v4 = vld [vmem:[#allocation2 + $0x9] sm:$0xff]  ;;  %v1708_v15 = vld [vmem:[#allocation2 + $0x1] sm:$0xff]  ;;  %vm9489_vm11 = vcmp.le.s32.totalorder %v287_v18, 14 }
 0x2bd   : > { %v1519_v28 = vadd.f32 %v9367_v33, %v1518_v8  ;;  %v9458_v14 = vld [vmem:[#allocation2 + $0x2] sm:$0xff]  ;;  %v13644_v23 = vsel %vm9489_vm11, 4294967295, %v13643_v23  ;;  %v1715_v61 = vld [vmem:[#allocation2 + $0x39] sm:$0xff] }
 0x2be   : > { %2362 = vrot.lane.b32.xlu0 %v1710_v58, %s8845_s27  ;;  %v9422_v63 = vld [vmem:[#allocation2 + $0x32] sm:$0xff]  ;;  %1646 = vst.msk [vmem:[#allocation2 + $0x59] sm:$0xff] %vm13418_vm4, %v1524_v27  ;;  %v1712_v6 = vld [vmem:[#allocation2 + $0x21] sm:$0xff]  ;;  %13645 = vst [vmem:[#allocation39_spill] sm:$0xff] %v13644_v23 }
 0x2bf   : > { %2490 = vrot.lane.b32.xlu1 %v9398_v22, %s8847_s29  ;;  %1645 = vst.msk [vmem:[#allocation2 + $0x51] sm:$0xff] %vm13418_vm4, %v1519_v28  ;;  %v9436_v30 = vld [vmem:[#allocation2 + $0x30] sm:$0xff]  ;;  %v7846_v11 = vpop.f32.mrb[10].mxu1  ;;  %v9473_v16 = vld [vmem:[#allocation2 + $0x28] sm:$0xff]  ;;  %v1743_v58 = vld [vmem:[#allocation2 + $0x1a] sm:$0xff] }
 0x2c0   : > { %v1528_v31 = vpop.f32.mrb[11].mxu1  ;;  %v1534_v32 = vadd.f32 %v7846_v11, %v9367_v33  ;;  %v9495_v53 = vld [vmem:[#allocation2 + $0x8] sm:$0xff]  ;;  %v1875_v8 = vsel %vm9489_vm11, %v1743_v58, %v9387_v59  ;;  %v13646_v11 = vmov 0 }
 0x2c1   : > { %v1529_v10 = vadd.f32 %v9367_v33, %v1528_v31  ;;  %v1741_v27 = vld [vmem:[#allocation2 + $0xa] sm:$0xff]  ;;  %v13647_v11 = vsel %vm9513_vm13, 4294967295, %v13646_v11  ;;  %v1807_v31 = vsel %vm9513_vm13, %v1743_v58, %v9387_v59  ;;  %v1914_v58 = vsel %vm9393_vm7, %v9436_v30, %v9422_v63 }
 0x2c2   : > { %2718 = vrot.lane.b32.xlu0 %v1713_v54, %s8848_s30  ;;  %1648 = vst.msk [vmem:[#allocation2 + $0x69] sm:$0xff] %vm13418_vm4, %v1534_v32  ;;  %v1805_v28 = vsel %vm9489_vm11, %v1741_v27, %v9495_v53  ;;  %13648 = vst [vmem:[#allocation40_spill] sm:$0xff] %v13647_v11  ;;  %v147_v32 = vld [vmem:[%s13379_s1 + $0x14] sm:$0xff]  ;;  %v1745_v0 = vld [vmem:[#allocation2 + $0x2a] sm:$0xff]  ;;  %v1846_v27 = vsel %vm9413_vm8, %v9436_v30, %v9422_v63 }
 0x2c3   : > { %2140 = vrot.lane.b32.xlu1 %v9398_v22, %s8849_s3  ;;  %1647 = vst.msk [vmem:[#allocation2 + $0x61] sm:$0xff] %vm13418_vm4, %v1529_v10  ;;  %v7849_v52 = vpop.f32.mrb[12].mxu1  ;;  %v148_v10 = vld [vmem:[%s13379_s1 + $0x1c] sm:$0xff] }
 0x2c4   : > { %v1538_v34 = vpop.f32.mrb[13].mxu1  ;;  %v1544_v35 = vadd.f32 %v7849_v52, %v9367_v33  ;;  %v8219_v52 = vpack.c.bf16 %v148_v10, %v147_v32  ;;  %v9599_v32 = vld [vmem:[#allocation2 + $0x42] sm:$0xff] }
 0x2c5   : > { %v1539_v12 = vadd.f32 %v9367_v33, %v1538_v34  ;;  %v1714_v34 = vld [vmem:[#allocation2 + $0x31] sm:$0xff]  ;;  %v1717_v10 = vld [vmem:[#allocation2 + $0x49] sm:$0xff] }
 0x2c6   : > { %2368 = vrot.lane.b32.xlu0 %v1713_v54, %s8845_s27  ;;  %1650 = vst.msk [vmem:[#allocation2 + $0x79] sm:$0xff] %vm13418_vm4, %v1544_v35  ;;  %v1844_v35 = vsel %vm9393_vm7, %v9417_v9, %v9410_v25  ;;  %8220 = vmatprep.subr.bf16.mxu1 %v8219_v52  ;;  %v9697_v56 = vld [vmem:[#allocation2 + $0x50] sm:$0xff] }
 0x2c7   : > { %2010 = vrot.lane.b32.xlu1 %v1709_v4, %s8843_s24  ;;  %1649 = vst.msk [vmem:[#allocation2 + $0x71] sm:$0xff] %vm13418_vm4, %v1539_v12  ;;  %v7852_v21 = vpop.f32.mrb[14].mxu1  ;;  %8222 = vmatpush3.bf16.msra.mxu1 %v8219_v52  ;;  %v149_v12 = vld [vmem:[%s13379_s1 + $0x24] sm:$0xff]  ;;  %v150_v4 = vld [vmem:[%s13379_s1 + $0x2c] sm:$0xff] }
 0x2c8   : > { %v1554_v7 = vadd.f32 %v7852_v21, %v9367_v33  ;;  %v1548_v2 = vpop.f32.mrb[15].mxu1  ;;  %v9611_v52 = vld [vmem:[#allocation2 + $0x48] sm:$0xff] }
 0x2c9   : > { %v1549_v5 = vadd.f32 %v9367_v33, %v1548_v2  ;;  %v1721_v47 = vld [vmem:[#allocation2 + $0x69] sm:$0xff] }
 0x2ca   : > { %2008 = vrot.lane.b32.xlu0 %v1708_v15, %s8843_s24  ;;  %1652 = vst.msk [vmem:[#allocation2 + $0x89] sm:$0xff] %vm13418_vm4, %v1554_v7  ;;  %v8223_v15 = vpack.c.bf16 %v150_v4, %v149_v12  ;;  %v1945_v7 = vsel %vm9489_vm11, %v1745_v0, %v9473_v16  ;;  %v9743_v48 = vld [vmem:[#allocation2 + $0x62] sm:$0xff] }
 0x2cb   : > { %2018 = vrot.lane.b32.xlu1 %v1713_v54, %s8843_s24  ;;  %1651 = vst.msk [vmem:[#allocation2 + $0x81] sm:$0xff] %vm13418_vm4, %v1549_v5  ;;  %v1912_v54 = vsel %vm9462_vm10, %v9417_v9, %v9410_v25  ;;  %v7855_v18 = vpop.f32.mrb[16].mxu1  ;;  %v249_v5 = vadd.s32 40, %v9369_v60  ;;  %v9791_v41 = vld [vmem:[#allocation2 + $0x60] sm:$0xff] }
 0x2cc   : > { %8224 = vmatprep.subr.bf16.mxu1 %v8223_v15  ;;  %v1564_v62 = vadd.f32 %v7855_v18, %v9367_v33  ;;  %v1558_v21 = vpop.f32.mrb[17].mxu1 }
 0x2cd   : > { %8226 = vmatpush3.bf16.msra.mxu1 %v8223_v15  ;;  %v1559_v2 = vadd.f32 %v9367_v33, %v1558_v21  ;;  %v315_v24 = vand.u32 15, %v249_v5 }
 0x2ce   : > { %2136 = vrot.lane.b32.xlu0 %v9458_v14, %s8849_s3  ;;  %1654 = vst.msk [vmem:[#allocation2 + $0x99] sm:$0xff] %vm13418_vm4, %v1564_v62  ;;  %v9849_v39 = vld [vmem:[#allocation2 + $0x71] sm:$0xff] }
 0x2cf   : > { %2716 = vrot.lane.b32.xlu1 %v1712_v6, %s8848_s30  ;;  %1653 = vst.msk [vmem:[#allocation2 + $0x91] sm:$0xff] %vm13418_vm4, %v1559_v2  ;;  %vm9590_vm14 = vcmp.le.s32.totalorder %v315_v24, 14  ;;  %v13652_v2 = vmov 0  ;;  %v1718_v24 = vld [vmem:[#allocation2 + $0x51] sm:$0xff] }
 0x2d2   : > { %2264 = vrot.lane.b32.xlu0 %v1842_v55, %s8846_s28  ;;  %v9560_v55 = vld [vmem:[#allocation2 + $0x38] sm:$0xff] }
 0x2d3   : > { %2366 = vrot.lane.b32.xlu1 %v1712_v6, %s8845_s27 }
 0x2d6   : > { %2620 = vrot.lane.b32.xlu0 %v9473_v16, %s8850_s4 }
 0x2d7   : > { %2844 = vrot.lane.b32.xlu1 %v9410_v25, %s8851_s5 }
 0x2da   : > { %2270 = vrot.lane.b32.xlu0 %v9473_v16, %s8846_s28 }
 0x2db   : > { %2494 = vrot.lane.b32.xlu1 %v9410_v25, %s8847_s29 }
 0x2de   : > { %2144 = vrot.lane.b32.xlu0 %v9410_v25, %s8849_s3 }
 0x2df   : > { %2016 = vrot.lane.b32.xlu1 %v1712_v6, %s8843_s24  ;;  %v151_v6 = vld [vmem:[%s13379_s1 + $0x34] sm:$0xf] }
 0x2e0   : > { %7885 = vmatprep.subr.msk.mxu1 %vm13413_vm0, %v151_v6 }
 0x2e1   : > { %7886 = vmatpush3.msk.msra.mxu1 %vm13413_vm0, %v151_v6  ;;  %v9621_v6 = vld [vmem:[#allocation2 + $0x40] sm:$0xff]  ;;  %vm13431_vm0 = vcmask 130048  }
 0x2e2   : > { %2492 = vrot.lane.b32.xlu0 %v1875_v8, %s8847_s29  ;;  %v1877_v8 = vsel %vm9513_vm13, %v1745_v0, %v9473_v16  ;;  %v1916_v18 = vsel %vm9413_vm8, %v9621_v6, %v9599_v32  ;;  %v1848_v21 = vsel %vm9425_vm9, %v9621_v6, %v9599_v32 }
 0x2e3   : > { %2138 = vrot.lane.b32.xlu1 %v1805_v28, %s8849_s3  ;;  %v13649_v28 = vmov 0 }
 0x2e4   : > { %v13650_v28 = vsel %vm9590_vm14, 4294967295, %v13649_v28 }
 0x2e5   : > { %13651 = vst [vmem:[#allocation41_spill] sm:$0xff] %v13650_v28  ;;  %v13655_v28 = vmov 0 }
 0x2e6   : > { %2142 = vrot.lane.b32.xlu0 %v1807_v31, %s8849_s3  ;;  %v1716_v31 = vld [vmem:[#allocation2 + $0x41] sm:$0xff] }
 0x2e7   : > { %2618 = vrot.lane.b32.xlu1 %v1912_v54, %s8850_s4  ;;  %v1809_v54 = vsel %vm9590_vm14, %v1745_v0, %v9473_v16  ;;  %v251_v0 = vadd.s32 56, %v9369_v60 }
 0x2e9   : > { %v329_v62 = vand.u32 15, %v251_v0  ;;  %v9684_v0 = vld [vmem:[#allocation2 + $0x58] sm:$0xff] }
 0x2ea   : > { %2720 = vrot.lane.b32.xlu0 %v1714_v34, %s8848_s30 }
 0x2eb   : > { %2268 = vrot.lane.b32.xlu1 %v1844_v35, %s8846_s28  ;;  %v7858_v35 = vpop.f32.mrb[18].mxu1  ;;  %vm9643_vm15 = vcmp.le.s32.totalorder %v329_v62, 14 }
 0x2ec   : > { %v1574_v12 = vadd.f32 %v7858_v35, %v9367_v33  ;;  %v1568_v4 = vpop.f32.mrb[19].mxu1  ;;  %v13653_v2 = vsel %vm9643_vm15, 4294967295, %v13652_v2 }
 0x2ed   : > { %13654 = vst [vmem:[#allocation42_spill] sm:$0xff] %v13653_v2  ;;  %v7861_v62 = vpop.f32.mrb[20].mxu1 }
 0x2ee   : > { %2848 = vrot.lane.b32.xlu0 %v9422_v63, %s8851_s5  ;;  %1656 = vst.msk [vmem:[#allocation2 + $0xa9] sm:$0xff] %vm13418_vm4, %v1574_v12 }
 0x2ef   : > { %2722 = vrot.lane.b32.xlu1 %v1715_v61, %s8848_s30 }
 0x2f2   : > { %2370 = vrot.lane.b32.xlu0 %v1714_v34, %s8845_s27 }
 0x2f3   : > { %2372 = vrot.lane.b32.xlu1 %v1715_v61, %s8845_s27 }
 0x2f6   : > { %2498 = vrot.lane.b32.xlu0 %v9422_v63, %s8847_s29 }
 0x2f7   : > { %2022 = vrot.lane.b32.xlu1 %v1715_v61, %s8843_s24  ;;  %v1569_v61 = vadd.f32 %v9367_v33, %v1568_v4 }
 0x2f9   : > { %1655 = vst.msk [vmem:[#allocation2 + $0xa1] sm:$0xff] %vm13418_vm4, %v1569_v61 }
 0x2fa   : > { %2148 = vrot.lane.b32.xlu0 %v9422_v63, %s8849_s3 }
 0x2fb   : > { %2624 = vrot.lane.b32.xlu1 %v9560_v55, %s8850_s4 }
 0x2fe   : > { %2846 = vrot.lane.b32.xlu0 %v1945_v7, %s8851_s5 }
 0x2ff   : > { %2274 = vrot.lane.b32.xlu1 %v9560_v55, %s8846_s28 }
 0x302   : > { %2622 = vrot.lane.b32.xlu0 %v1914_v58, %s8850_s4 }
 0x303   : > { %2020 = vrot.lane.b32.xlu1 %v1714_v34, %s8843_s24  ;;  %v1747_v34 = vld [vmem:[#allocation2 + $0x3a] sm:$0xff] }
 0x304   : > { %v1947_v15 = vsel %vm9513_vm13, %v1747_v34, %v9560_v55  ;;  %v1879_v7 = vsel %vm9590_vm14, %v1747_v34, %v9560_v55 }
 0x306   : > { %2272 = vrot.lane.b32.xlu0 %v1846_v27, %s8846_s28  ;;  %v1811_v27 = vsel %vm9643_vm15, %v1747_v34, %v9560_v55 }
 0x307   : > { %2496 = vrot.lane.b32.xlu1 %v1877_v8, %s8847_s29 }
 0x30a   : > { %2724 = vrot.lane.b32.xlu0 %v1716_v31, %s8848_s30 }
 0x30b   : > { %2146 = vrot.lane.b32.xlu1 %v1809_v54, %s8849_s3  ;;  %v9660_v54 = vld [vmem:[#allocation2 + $0x52] sm:$0xff] }
 0x30e   : > { %2852 = vrot.lane.b32.xlu0 %v9599_v32, %s8851_s5 }
 0x30f   : > { %2726 = vrot.lane.b32.xlu1 %v1717_v10, %s8848_s30 }
 0x312   : > { %2374 = vrot.lane.b32.xlu0 %v1716_v31, %s8845_s27 }
 0x313   : > { %2376 = vrot.lane.b32.xlu1 %v1717_v10, %s8845_s27 }
 0x316   : > { %2502 = vrot.lane.b32.xlu0 %v9599_v32, %s8847_s29 }
 0x317   : > { %2026 = vrot.lane.b32.xlu1 %v1717_v10, %s8843_s24  ;;  %v1719_v10 = vld [vmem:[#allocation2 + $0x59] sm:$0xff] }
 0x31a   : > { %2152 = vrot.lane.b32.xlu0 %v9599_v32, %s8849_s3 }
 0x31b   : > { %2628 = vrot.lane.b32.xlu1 %v9611_v52, %s8850_s4 }
 0x31e   : > { %2850 = vrot.lane.b32.xlu0 %v1947_v15, %s8851_s5 }
 0x31f   : > { %2278 = vrot.lane.b32.xlu1 %v9611_v52, %s8846_s28 }
 0x322   : > { %2626 = vrot.lane.b32.xlu0 %v1916_v18, %s8850_s4  ;;  %v1749_v18 = vld [vmem:[#allocation2 + $0x4a] sm:$0xff] }
 0x323   : > { %2024 = vrot.lane.b32.xlu1 %v1716_v31, %s8843_s24  ;;  %v1949_v13 = vsel %vm9590_vm14, %v1749_v18, %v9611_v52 }
 0x326   : > { %2276 = vrot.lane.b32.xlu0 %v1848_v21, %s8846_s28 }
 0x327   : > { %2500 = vrot.lane.b32.xlu1 %v1879_v7, %s8847_s29  ;;  %v252_v7 = vadd.s32 64, %v9369_v60 }
 0x328   : > { %v9647_v5 = vpop.permute.xlu0 %2364 }
 0x329   : > { %v9649_v58 = vpop.permute.xlu1 %2266  ;;  %v336_v23 = vand.u32 15, %v252_v7  ;;  %v1881_v7 = vsel %vm9643_vm15, %v1749_v18, %v9611_v52 }
 0x32a   : > { %2728 = vrot.lane.b32.xlu0 %v1718_v24, %s8848_s30 }
 0x32b   : > { %2150 = vrot.lane.b32.xlu1 %v1811_v27, %s8849_s3  ;;  %v1584_v27 = vadd.f32 %v7861_v62, %v9367_v33  ;;  %v253_v62 = vadd.s32 72, %v9369_v60  ;;  %vm9710_vm1 = vcmp.ge.s32.totalorder %v336_v23, 1  ;;  %v13658_v23 = vmov 0 }
 0x32c   : > { %v9656_v8 = vpop.permute.xlu0 %2014  ;;  %v13656_v28 = vsel %vm9710_vm1, 4294967295, %v13655_v28 }
 0x32d   : > { %v9658_v31 = vpop.permute.xlu1 %2012  ;;  %1658 = vst.msk [vmem:[#allocation2 + $0xb9] sm:$0xff] %vm13418_vm4, %v1584_v27  ;;  %13657 = vst [vmem:[#allocation43_spill] sm:$0xff] %v13656_v28 }
 0x32e   : > { %2856 = vrot.lane.b32.xlu0 %v9660_v54, %s8851_s5 }
 0x32f   : > { %2730 = vrot.lane.b32.xlu1 %v1719_v10, %s8848_s30 }
 0x330   : > { %v9665_v35 = vpop.permute.xlu0 %2362 }
 0x331   : > { %v9667_v12 = vpop.permute.xlu1 %2490 }
 0x332   : > { %2378 = vrot.lane.b32.xlu0 %v1718_v24, %s8845_s27 }
 0x333   : > { %2380 = vrot.lane.b32.xlu1 %v1719_v10, %s8845_s27 }
 0x334   : > { %v9671_v34 = vpop.permute.xlu0 %2718 }
 0x335   : > { %v9673_v4 = vpop.permute.xlu1 %2140 }
 0x336   : > { %2506 = vrot.lane.b32.xlu0 %v9660_v54, %s8847_s29 }
 0x337   : > { %2030 = vrot.lane.b32.xlu1 %v1719_v10, %s8843_s24  ;;  %v1578_v10 = vpop.f32.mrb[21].mxu1 }
 0x338   : > { %v9678_v15 = vpop.permute.xlu0 %2368  ;;  %v1579_v57 = vadd.f32 %v9367_v33, %v1578_v10  ;;  %v1918_v10 = vsel %vm9425_vm9, %v9697_v56, %v9660_v54 }
 0x339   : > { %v9680_v61 = vpop.permute.xlu1 %2010 }
 0x33a   : > { %2156 = vrot.lane.b32.xlu0 %v9660_v54, %s8849_s3  ;;  %1657 = vst.msk [vmem:[#allocation2 + $0xb1] sm:$0xff] %vm13418_vm4, %v1579_v57  ;;  %v1850_v57 = vsel %vm9710_vm1, %v9697_v56, %v9660_v54 }
 0x33b   : > { %2632 = vrot.lane.b32.xlu1 %v9684_v0, %s8850_s4 }
 0x33c   : > { %v2009_v21 = vpop.permute.xlu0 %2008 }
 0x33d   : > { %v9690_v19 = vpop.permute.xlu1 %2018 }
 0x33e   : > { %2854 = vrot.lane.b32.xlu0 %v1949_v13, %s8851_s5  ;;  %v343_v13 = vand.u32 15, %v253_v62 }
 0x33f   : > { %2282 = vrot.lane.b32.xlu1 %v9684_v0, %s8846_s28 }
 0x340   : > { %v2137_v11 = vpop.permute.xlu0 %2136  ;;  %vm9725_vm6 = vcmp.le.s32.totalorder %v343_v13, 14  ;;  %v1676_v13 = vld [vmem:[#allocation2] sm:$0xff] }
 0x341   : > { %v2717_v51 = vpop.permute.xlu1 %2716  ;;  %v13659_v23 = vsel %vm9725_vm6, 4294967295, %v13658_v23  ;;  %v1772_v46 = vsel %vm9462_vm10, %v1676_v13, %v9458_v14 }
 0x342   : > { %2630 = vrot.lane.b32.xlu0 %v1918_v10, %s8850_s4  ;;  %13660 = vst [vmem:[#allocation44_spill] sm:$0xff] %v13659_v23  ;;  %v9731_v10 = vld [vmem:[#allocation2 + $0x61] sm:$0xff] }
 0x343   : > { %2028 = vrot.lane.b32.xlu1 %v1718_v24, %s8843_s24 }
 0x344   : > { %v2265_v27 = vpop.permute.xlu0 %2264 }
 0x345   : > { %v9714_v50 = vpop.permute.xlu1 %2366 }
 0x346   : > { %2280 = vrot.lane.b32.xlu0 %v1850_v57, %s8846_s28  ;;  %v1813_v57 = vsel %vm9725_vm6, %v1749_v18, %v9611_v52 }
 0x347   : > { %2504 = vrot.lane.b32.xlu1 %v1881_v7, %s8847_s29 }
 0x348   : > { %v9729_v24 = vpop.permute.xlu0 %2620 }
 0x349   : > { %v2845_v62 = vpop.permute.xlu1 %2844 }
 0x34a   : > { %2732 = vrot.lane.b32.xlu0 %v9731_v10, %s8848_s30 }
 0x34b   : > { %2154 = vrot.lane.b32.xlu1 %v1813_v57, %s8849_s3  ;;  %v2940_v57 = vsel %vm13418_vm4, %v1772_v46, %v2009_v21  ;;  %vm13426_vm4 = vcmask 162816  }
 0x34c   : > { %v9739_v49 = vpop.permute.xlu0 %2270  ;;  %v2972_v44 = vsel %vm13419_vm5, %v2940_v57, %v2137_v11  ;;  %vm13422_vm5 = vcmask 195584  }
 0x34d   : > { %v9741_v7 = vpop.permute.xlu1 %2494  ;;  %v3004_v43 = vsel %vm13421_vm3, %v2972_v44, %v2265_v27  ;;  %vm13425_vm3 = vcmask 261120  }
 0x34e   : > { %2860 = vrot.lane.b32.xlu0 %v9743_v48, %s8851_s5  ;;  %v3037_v14 = vsel %vm13431_vm0, %v3004_v43, %v9665_v35  ;;  %v9775_v43 = vld [vmem:[#allocation2 + $0x68] sm:$0xff]  ;;  %v1751_v35 = vld [vmem:[#allocation2 + $0x5a] sm:$0xff] }
 0x34f   : > { %2734 = vrot.lane.b32.xlu1 %v1721_v47, %s8848_s30  ;;  %v3070_v44 = vsel %vm13426_vm4, %v3037_v14, %v9667_v12  ;;  %v254_v12 = vadd.s32 80, %v9369_v60  ;;  %vm13665_vm4 = vcmask 64512  }
 0x350   : > { %v9751_v18 = vpop.permute.xlu0 %2144 }
 0x351   : > { %v9754_v45 = vpop.permute.xlu1 %2016 }
 0x352   : > { %2382 = vrot.lane.b32.xlu0 %v9731_v10, %s8845_s27 }
 0x353   : > { %2384 = vrot.lane.b32.xlu1 %v1721_v47, %s8845_s27 }
 0x354   : > { %v9761_v42 = vpop.permute.xlu0 %2492 }
 0x355   : > { %v2139_v17 = vpop.permute.xlu1 %2138 }
 0x356   : > { %2510 = vrot.lane.b32.xlu0 %v9743_v48, %s8847_s29 }
 0x357   : > { %2034 = vrot.lane.b32.xlu1 %v1721_v47, %s8843_s24  ;;  %v7864_v47 = vpop.f32.mrb[22].mxu1 }
 0x358   : > { %v9768_v46 = vpop.permute.xlu0 %2142  ;;  %v1594_v14 = vadd.f32 %v7864_v47, %v9367_v33 }
 0x359   : > { %v2619_v11 = vpop.permute.xlu1 %2618 }
 0x35a   : > { %v3103_v21 = vsel %vm13422_vm5, %v3070_v44, %v2619_v11  ;;  %2160 = vrot.lane.b32.xlu0 %v9743_v48, %s8849_s3  ;;  %v1588_v11 = vpop.f32.mrb[23].mxu1  ;;  %vm13661_vm5 = vcmask 293888  }
 0x35b   : > { %v3136_v27 = vsel %vm13424_vm12, %v3103_v21, %v2717_v51  ;;  %2636 = vrot.lane.b32.xlu1 %v9775_v43, %s8850_s4  ;;  %v1951_v51 = vsel %vm9643_vm15, %v1751_v35, %v9684_v0  ;;  %v1589_v21 = vadd.f32 %v9367_v33, %v1588_v11  ;;  %vm13662_vm12 = vcmask 31744   ;;  %v7867_v2 = vpop.f32.mrb[24].mxu1 }
 0x35c   : > { %v9780_v13 = vpop.permute.xlu0 %2720  ;;  %v3169_v57 = vsel %vm13425_vm3, %v3136_v27, %v2845_v62  ;;  %1660 = vst.msk [vmem:[#allocation2 + $0xc9] sm:$0xff] %vm13662_vm12, %v1594_v14  ;;  %v255_v62 = vadd.s32 88, %v9369_v60  ;;  %vm13663_vm3 = vmmov %vm13662_vm12  ;;  %v1920_v14 = vsel %vm9710_vm1, %v9791_v41, %v9743_v48  ;;  %v1598_v40 = vpop.f32.mrb[25].mxu1 }
 0x35d   : > { %v2269_v44 = vpop.permute.xlu1 %2268  ;;  %7887 = vmatprep.mubr.msk.f32.mxu1 %vm13661_vm5, %v3169_v57  ;;  %1659 = vst.msk [vmem:[#allocation2 + $0xc1] sm:$0xff] %vm13663_vm3, %v1589_v21  ;;  %vm13664_vm5 = vmmov %vm13663_vm3  ;;  %v350_v57 = vand.u32 15, %v254_v12  ;;  %v1604_v21 = vadd.f32 %v7867_v2, %v9367_v33  ;;  %vm13666_vm3 = vcmask 97280  }
 0x35e   : > { %2858 = vrot.lane.b32.xlu0 %v1951_v51, %s8851_s5  ;;  %v2941_v27 = vsel %vm13664_vm5, %v9495_v53, %v9680_v61  ;;  %v357_v53 = vand.u32 15, %v255_v62  ;;  %v1599_v61 = vadd.f32 %v9367_v33, %v1598_v40  ;;  %vm13670_vm12 = vmmov %vm13664_vm5  ;;  %v7870_v40 = vpop.f32.mrb[26].mxu1 }
 0x35f   : > { %2286 = vrot.lane.b32.xlu1 %v9775_v43, %s8846_s28  ;;  %v2973_v11 = vsel %vm13665_vm4, %v2941_v27, %v2139_v17  ;;  %vm9819_vm4 = vcmp.ge.s32.totalorder %v350_v57, 1  ;;  %v13667_v27 = vmov 0  ;;  %1662 = vst.msk [vmem:[#allocation2 + $0xd9] sm:$0xff] %vm13670_vm12, %v1604_v21  ;;  %v1608_v62 = vpop.f32.mrb[27].mxu1  ;;  %vm13674_vm12 = vmmov %vm13664_vm5 }
 0x360   : > { %v9801_v47 = vpop.permute.xlu0 %2848  ;;  %v3005_v17 = vsel %vm13666_vm3, %v2973_v11, %v9649_v58  ;;  %v13668_v27 = vsel %vm9819_vm4, 4294967295, %v13667_v27  ;;  %v1852_v2 = vsel %vm9819_vm4, %v9791_v41, %v9743_v48  ;;  %1661 = vst.msk [vmem:[#allocation2 + $0xd1] sm:$0xff] %vm13664_vm5, %v1599_v61  ;;  %v1883_v58 = vsel %vm9725_vm6, %v1751_v35, %v9684_v0 }
 0x361   : > { %v9804_v51 = vpop.permute.xlu1 %2722  ;;  %13669 = vst [vmem:[#allocation45_spill] sm:$0xff] %v13668_v27  ;;  %v3038_v57 = vsel %vm13431_vm0, %v3005_v17, %v9647_v5  ;;  %vm9839_vm3 = vcmp.le.s32.totalorder %v357_v53, 14  ;;  %v13671_v11 = vmov 0  ;;  %v1609_v21 = vadd.f32 %v9367_v33, %v1608_v62  ;;  %v7873_v17 = vpop.f32.mrb[28].mxu1 }
 0x362   : > { %2634 = vrot.lane.b32.xlu0 %v1920_v14, %s8850_s4  ;;  %v13672_v11 = vsel %vm9839_vm3, 4294967295, %v13671_v11  ;;  %v1815_v5 = vsel %vm9839_vm3, %v1751_v35, %v9684_v0  ;;  %vm13675_vm0 = vcmask 162816  }
 0x363   : > { %2032 = vrot.lane.b32.xlu1 %v9731_v10, %s8843_s24  ;;  %v1614_v10 = vadd.f32 %v7870_v40, %v9367_v33  ;;  %13673 = vst [vmem:[#allocation46_spill] sm:$0xff] %v13672_v11  ;;  %1663 = vst.msk [vmem:[#allocation2 + $0xe1] sm:$0xff] %vm13664_vm5, %v1609_v21  ;;  %v3071_v53 = vsel %vm13675_vm0, %v3038_v57, %v9761_v42  ;;  %v1624_v40 = vadd.f32 %v7873_v17, %v9367_v33  ;;  %vm13678_vm0 = vcmask 64512  }
 0x364   : > { %v9817_v12 = vpop.permute.xlu0 %2370  ;;  %v13720_v11 = vmov 0 }
 0x365   : > { %v9824_v14 = vpop.permute.xlu1 %2372  ;;  %1664 = vst.msk [vmem:[#allocation2 + $0xe9] sm:$0xff] %vm13674_vm12, %v1614_v10  ;;  %v13676_v10 = vsel %vm9393_vm7, %v9400_v1, %v9398_v22  ;;  %vm13677_vm12 = vmmov %vm13664_vm5  ;;  %vm13679_vm5 = vcmask 195584  }
 0x366   : > { %2284 = vrot.lane.b32.xlu0 %v1852_v2, %s8846_s28  ;;  %v2942_v62 = vsel %vm13677_vm12, %v13676_v10, %v9658_v31  ;;  %v3104_v17 = vsel %vm13679_vm5, %v3071_v53, %v9729_v24  ;;  %vm13680_vm15 = vmmov %vm13677_vm12  ;;  %v1723_v31 = vld [vmem:[#allocation2 + $0x79] sm:$0xff]  ;;  %vm13687_vm5 = vcmask 130048  }
 0x367   : > { %2508 = vrot.lane.b32.xlu1 %v1883_v58, %s8847_s29  ;;  %v1618_v58 = vpop.f32.mrb[29].mxu1  ;;  %v2974_v42 = vsel %vm13678_vm0, %v2942_v62, %v9673_v4  ;;  %1666 = vst.msk [vmem:[#allocation2 + $0xf9] sm:$0xff] %vm13680_vm15, %v1624_v40  ;;  %vm13681_vm14 = vmmov %vm13677_vm12  ;;  %vm13682_vm12 = vcmask 97280  }
 0x368   : > { %v9844_v61 = vpop.permute.xlu0 %2498  ;;  %v1619_v35 = vadd.f32 %v9367_v33, %v1618_v58  ;;  %1672 = vst.msk [vmem:[#allocation2 + $0x119] sm:$0xff] %vm13681_vm14, %v1624_v40  ;;  %v7876_v22 = vpop.f32.mrb[30].mxu1  ;;  %v3006_v1 = vsel %vm13682_vm12, %v2974_v42, %v2269_v44  ;;  %vm13683_vm13 = vmmov %vm13681_vm14  ;;  %vm13685_vm14 = vcmask 228352   ;;  %vm13688_vm12 = vcmask 261120  }
 0x369   : > { %v9847_v2 = vpop.permute.xlu1 %2022  ;;  %vm13684_vm0 = vmmov %vm13683_vm13  ;;  %v1634_v4 = vadd.f32 %v7876_v22, %v9367_v33  ;;  %v1628_v58 = vpop.f32.mrb[31].mxu1  ;;  %v3137_v53 = vsel %vm13685_vm14, %v3104_v17, %v9671_v34  ;;  %v3039_v44 = vsel %vm13687_vm5, %v3006_v1, %v9714_v50  ;;  %vm13691_vm14 = vcmask 162816   ;;  %v9917_v1 = vld [vmem:[#allocation2 + $0x78] sm:$0xff] }
 0x36a   : > { %2736 = vrot.lane.b32.xlu0 %v9849_v39, %s8848_s30  ;;  %1665 = vst.msk [vmem:[#allocation2 + $0xf1] sm:$0xff] %vm13683_vm13, %v1619_v35  ;;  %v1629_v24 = vadd.f32 %v9367_v33, %v1628_v58  ;;  %vm13686_vm15 = vmmov %vm13684_vm0  ;;  %v3072_v33 = vsel %vm13691_vm14, %v3039_v44, %v9741_v7  ;;  %vm13693_vm5 = vcmask 228352   ;;  %v256_v58 = vadd.s32 96, %v9369_v60  ;;  %v1736_v20 = vld [vmem:[#allocation2 + $0xe1] sm:$0xff] }
 0x36b   : > { %2158 = vrot.lane.b32.xlu1 %v1815_v5, %s8849_s3  ;;  %v9875_v5 = vld [vmem:[#allocation2 + $0x72] sm:$0xff]  ;;  %1671 = vst.msk [vmem:[#allocation2 + $0x111] sm:$0xff] %vm13684_vm0, %v1619_v35  ;;  %vm13689_vm13 = vmmov %vm13684_vm0  ;;  %vm13690_vm0 = vcmask 293888   ;;  %vm13696_vm14 = vcmask 64512  }
 0x36c   : > { %v9868_v21 = vpop.permute.xlu0 %2148  ;;  %1668 = vst.msk [vmem:[#allocation2 + $0x109] sm:$0xff] %vm13686_vm15, %v1634_v4  ;;  %vm13692_vm15 = vcmask 195584   ;;  %v1753_v4 = vld [vmem:[#allocation2 + $0x6a] sm:$0xff]  ;;  %v364_v44 = vand.u32 15, %v256_v58  ;;  %v13697_v58 = vmov 0 }
 0x36d   : > { %v9873_v57 = vpop.permute.xlu1 %2624  ;;  %1667 = vst.msk [vmem:[#allocation2 + $0x101] sm:$0xff] %vm13689_vm13, %v1629_v24  ;;  %vm13694_vm13 = vmmov %vm13690_vm0  ;;  %v9928_v24 = vld [vmem:[#allocation2 + $0x70] sm:$0xff] }
 0x36e   : > { %2864 = vrot.lane.b32.xlu0 %v9875_v5, %s8851_s5 }
 0x36f   : > { %2738 = vrot.lane.b32.xlu1 %v1723_v31, %s8848_s30 }
 0x370   : > { %v2847_v40 = vpop.permute.xlu0 %2846 }
 0x371   : > { %v3170_v10 = vsel %vm13688_vm12, %v3137_v53, %v2847_v40  ;;  %v9895_v62 = vpop.permute.xlu1 %2274  ;;  %v257_v53 = vadd.s32 104, %v9369_v60 }
 0x372   : > { %2386 = vrot.lane.b32.xlu0 %v9849_v39, %s8845_s27  ;;  %7888 = vmatmul.mubr.msk.f32.vlgmr.msra.gmra.mrb[32].mxu1 %vm13690_vm0, %v3170_v10  ;;  %vm13695_vm0 = vcmask 31744  }
 0x373   : > { %2388 = vrot.lane.b32.xlu1 %v1723_v31, %s8845_s27 }
 0x374   : > { %v2623_v34 = vpop.permute.xlu0 %2622 }
 0x375   : > { %v3105_v35 = vsel %vm13692_vm15, %v3072_v33, %v2623_v34  ;;  %v9905_v50 = vpop.permute.xlu1 %2020  ;;  %v1922_v33 = vsel %vm9819_vm4, %v9928_v24, %v9875_v5  ;;  %v2943_v34 = vsel %vm13695_vm0, %v9387_v59, %v9656_v8  ;;  %vm9949_vm15 = vcmp.ge.s32.totalorder %v364_v44, 1 }
 0x376   : > { %v3138_v42 = vsel %vm13693_vm5, %v3105_v35, %v9780_v13  ;;  %2514 = vrot.lane.b32.xlu0 %v9875_v5, %s8847_s29  ;;  %v2975_v35 = vsel %vm13696_vm14, %v2943_v34, %v9768_v46  ;;  %v13698_v58 = vsel %vm9949_vm15, 4294967295, %v13697_v58  ;;  %v1854_v59 = vsel %vm9949_vm15, %v9928_v24, %v9875_v5 }
 0x377   : > { %2038 = vrot.lane.b32.xlu1 %v1723_v31, %s8843_s24  ;;  %v3171_v17 = vsel %vm13688_vm12, %v3138_v42, %v9801_v47  ;;  %v1953_v47 = vsel %vm9725_vm6, %v1753_v4, %v9775_v43  ;;  %v371_v42 = vand.u32 15, %v257_v53  ;;  %13699 = vst [vmem:[#allocation47_spill] sm:$0xff] %v13698_v58  ;;  %vm13700_vm5 = vcmask 97280  }
 0x378   : > { %7890 = vmatprep.mubr.msk.f32.mxu1 %vm13694_vm13, %v3171_v17  ;;  %v2273_v22 = vpop.permute.xlu0 %2272  ;;  %v3007_v8 = vsel %vm13700_vm5, %v2975_v35, %v9739_v49  ;;  %v13701_v46 = vmov 0  ;;  %vm13704_vm13 = vcmask 130048   ;;  %v1724_v49 = vld [vmem:[#allocation2 + $0x81] sm:$0xff]  ;;  %v13705_v34 = vsel %vm9413_vm8, %v9417_v9, %v9410_v25 }
 0x379   : > { %v2497_v7 = vpop.permute.xlu1 %2496  ;;  %vm9966_vm12 = vcmp.le.s32.totalorder %v371_v42, 14  ;;  %v3040_v44 = vsel %vm13704_vm13, %v3007_v8, %v9678_v15  ;;  %v2944_v35 = vsel %vm13695_vm0, %v13705_v34, %v9754_v45  ;;  %vm13706_vm14 = vcmask 162816   ;;  %v9997_v45 = vld [vmem:[#allocation2 + $0x82] sm:$0xff] }
 0x37a   : > { %2164 = vrot.lane.b32.xlu0 %v9875_v5, %s8849_s3  ;;  %v13702_v46 = vsel %vm9966_vm12, 4294967295, %v13701_v46  ;;  %v3073_v42 = vsel %vm13706_vm14, %v3040_v44, %v2497_v7  ;;  %vm13707_vm5 = vcmask 64512   ;;  %vm13708_vm13 = vcmask 195584  }
 0x37b   : > { %2640 = vrot.lane.b32.xlu1 %v9917_v1, %s8850_s4  ;;  %13703 = vst [vmem:[#allocation48_spill] sm:$0xff] %v13702_v46  ;;  %v2976_v8 = vsel %vm13707_vm5, %v2944_v35, %v9751_v18  ;;  %v3106_v25 = vsel %vm13708_vm13, %v3073_v42, %v9873_v57  ;;  %vm13709_vm0 = vcmask 97280   ;;  %vm13710_vm14 = vcmask 228352  }
 0x37c   : > { %v2725_v13 = vpop.permute.xlu0 %2724  ;;  %v3008_v7 = vsel %vm13709_vm0, %v2976_v8, %v2273_v22  ;;  %vm13711_vm5 = vcmask 130048   ;;  %vm13712_vm13 = vcmask 261120   ;;  %vm13713_vm0 = vcmask 293888  }
 0x37d   : > { %v9922_v31 = vpop.permute.xlu1 %2146  ;;  %v3041_v18 = vsel %vm13711_vm5, %v3008_v7, %v9817_v12  ;;  %vm13714_vm6 = vcmask 162816   ;;  %vm13715_vm8 = vcmask 195584   ;;  %vm13716_vm5 = vmmov %vm13712_vm13  ;;  %v1755_v7 = vld [vmem:[#allocation2 + $0x7a] sm:$0xff]  ;;  %v13743_v46 = vmov 0 }
 0x37e   : > { %2862 = vrot.lane.b32.xlu0 %v1953_v47, %s8851_s5  ;;  %v3074_v22 = vsel %vm13714_vm6, %v3041_v18, %v9844_v61  ;;  %v10026_v61 = vld [vmem:[#allocation2 + $0x88] sm:$0xff]  ;;  %v259_v18 = vadd.s32 120, %v9369_v60  ;;  %vm13719_vm6 = vcmask 64512  }
 0x37f   : > { %2290 = vrot.lane.b32.xlu1 %v9917_v1, %s8846_s28 }
 0x380   : > { %v2853_v40 = vpop.permute.xlu0 %2852 }
 0x381   : > { %v9933_v10 = vpop.permute.xlu1 %2726 }
 0x382   : > { %2638 = vrot.lane.b32.xlu0 %v1922_v33, %s8850_s4 }
 0x383   : > { %2036 = vrot.lane.b32.xlu1 %v9849_v39, %s8843_s24  ;;  %v1885_v39 = vsel %vm9839_vm3, %v1753_v4, %v9775_v43 }
 0x384   : > { %v9947_v17 = vpop.permute.xlu0 %2374 }
 0x385   : > { %v9953_v47 = vpop.permute.xlu1 %2376 }
 0x386   : > { %2288 = vrot.lane.b32.xlu0 %v1854_v59, %s8846_s28  ;;  %v1817_v59 = vsel %vm9966_vm12, %v1753_v4, %v9775_v43  ;;  %v1725_v4 = vld [vmem:[#allocation2 + $0x89] sm:$0xff] }
 0x387   : > { %2512 = vrot.lane.b32.xlu1 %v1885_v39, %s8847_s29  ;;  %v3139_v39 = vsel %vm13710_vm14, %v3106_v25, %v9804_v51 }
 0x388   : > { %v9970_v53 = vpop.permute.xlu0 %2502 }
 0x389   : > { %v9974_v33 = vpop.permute.xlu1 %2026 }
 0x38a   : > { %2740 = vrot.lane.b32.xlu0 %v1724_v49, %s8848_s30 }
 0x38b   : > { %2162 = vrot.lane.b32.xlu1 %v1817_v59, %s8849_s3 }
 0x38c   : > { %v9989_v15 = vpop.permute.xlu0 %2152 }
 0x38d   : > { %v9995_v9 = vpop.permute.xlu1 %2628 }
 0x38e   : > { %2868 = vrot.lane.b32.xlu0 %v9997_v45, %s8851_s5 }
 0x38f   : > { %2742 = vrot.lane.b32.xlu1 %v1725_v4, %s8848_s30 }
 0x390   : > { %v2851_v44 = vpop.permute.xlu0 %2850 }
 0x391   : > { %v3172_v57 = vsel %vm13712_vm13, %v3139_v39, %v2851_v44  ;;  %v10008_v34 = vpop.permute.xlu1 %2278  ;;  %vm13717_vm13 = vmmov %vm13713_vm0  ;;  %v258_v39 = vadd.s32 112, %v9369_v60 }
 0x392   : > { %2390 = vrot.lane.b32.xlu0 %v1724_v49, %s8845_s27  ;;  %7891 = vmatmul.mubr.msk.f32.gmra.mrb[34].mxu1 %vm13713_vm0, %v3172_v57 }
 0x393   : > { %2392 = vrot.lane.b32.xlu1 %v1725_v4, %s8845_s27 }
 0x394   : > { %v2627_v35 = vpop.permute.xlu0 %2626 }
 0x395   : > { %v3107_v51 = vsel %vm13715_vm8, %v3074_v22, %v2627_v35  ;;  %v10016_v42 = vpop.permute.xlu1 %2024  ;;  %v378_v22 = vand.u32 15, %v258_v39  ;;  %vm13718_vm8 = vcmask 31744  }
 0x396   : > { %v3140_v12 = vsel %vm13710_vm14, %v3107_v51, %v2725_v13  ;;  %2518 = vrot.lane.b32.xlu0 %v9997_v45, %s8847_s29  ;;  %vm13723_vm14 = vcmask 97280  }
 0x397   : > { %2042 = vrot.lane.b32.xlu1 %v1725_v4, %s8843_s24  ;;  %v3173_v59 = vsel %vm13716_vm5, %v3140_v12, %v2853_v40  ;;  %v1955_v40 = vsel %vm9839_vm3, %v1755_v7, %v9917_v1  ;;  %v10037_v4 = vld [vmem:[#allocation2 + $0x80] sm:$0xff]  ;;  %v2945_v12 = vsel %vm13718_vm8, %v9473_v16, %v9690_v19  ;;  %vm10057_vm0 = vcmp.ge.s32.totalorder %v378_v22, 1 }
 0x398   : > { %7893 = vmatprep.mubr.msk.f32.mxu1 %vm13717_vm13, %v3173_v59  ;;  %v2277_v8 = vpop.permute.xlu0 %2276  ;;  %v1924_v51 = vsel %vm9949_vm15, %v10037_v4, %v9997_v45  ;;  %v2977_v59 = vsel %vm13719_vm6, %v2945_v12, %v9922_v31  ;;  %v13721_v11 = vsel %vm10057_vm0, 4294967295, %v13720_v11  ;;  %v1856_v19 = vsel %vm10057_vm0, %v10037_v4, %v9997_v45 }
 0x399   : > { %v2501_v25 = vpop.permute.xlu1 %2500  ;;  %13722 = vst [vmem:[#allocation49_spill] sm:$0xff] %v13721_v11  ;;  %v3009_v16 = vsel %vm13723_vm14, %v2977_v59, %v9895_v62  ;;  %v1887_v31 = vsel %vm9966_vm12, %v1755_v7, %v9917_v1  ;;  %vm13727_vm13 = vcmask 130048   ;;  %v1726_v62 = vld [vmem:[#allocation2 + $0x91] sm:$0xff]  ;;  %v13728_v12 = vsel %vm9425_vm9, %v9436_v30, %v9422_v63 }
 0x39a   : > { %2168 = vrot.lane.b32.xlu0 %v9997_v45, %s8849_s3  ;;  %v3042_v22 = vsel %vm13727_vm13, %v3009_v16, %v9824_v14  ;;  %v2946_v59 = vsel %vm13718_vm8, %v13728_v12, %v9905_v50  ;;  %vm13729_vm6 = vcmask 162816   ;;  %vm13730_vm14 = vcmask 64512   ;;  %v10105_v50 = vld [vmem:[#allocation2 + $0x92] sm:$0xff] }
 0x39b   : > { %2644 = vrot.lane.b32.xlu1 %v10026_v61, %s8850_s4  ;;  %v2978_v16 = vsel %vm13730_vm14, %v2946_v59, %v9868_v21  ;;  %vm13731_vm13 = vcmask 195584   ;;  %vm13732_vm8 = vcmask 97280   ;;  %vm13734_vm14 = vcmask 130048  }
 0x39c   : > { %v2729_v13 = vpop.permute.xlu0 %2728  ;;  %vm13737_vm3 = vcmask 162816   ;;  %vm13738_vm9 = vcmask 195584   ;;  %v13831_v11 = vmov 0 }
 0x39d   : > { %v10031_v44 = vpop.permute.xlu1 %2150 }
 0x39e   : > { %2866 = vrot.lane.b32.xlu0 %v1955_v40, %s8851_s5  ;;  %v385_v40 = vand.u32 15, %v259_v18 }
 0x39f   : > { %2294 = vrot.lane.b32.xlu1 %v10026_v61, %s8846_s28 }
 0x3a0   : > { %v2857_v57 = vpop.permute.xlu0 %2856  ;;  %vm10074_vm5 = vcmp.le.s32.totalorder %v385_v40, 14  ;;  %v3075_v40 = vsel %vm13729_vm6, %v3042_v22, %v2501_v25  ;;  %v3010_v25 = vsel %vm13732_vm8, %v2978_v16, %v2277_v8  ;;  %vm13733_vm6 = vcmask 228352  }
 0x3a1   : > { %v10042_v35 = vpop.permute.xlu1 %2730  ;;  %v3108_v63 = vsel %vm13731_vm13, %v3075_v40, %v9995_v9  ;;  %v3043_v21 = vsel %vm13734_vm14, %v3010_v25, %v9947_v17  ;;  %vm13735_vm13 = vcmask 261120   ;;  %vm13736_vm8 = vcmask 293888   ;;  %v1757_v25 = vld [vmem:[#allocation2 + $0x8a] sm:$0xff] }
 0x3a2   : > { %2642 = vrot.lane.b32.xlu0 %v1924_v51, %s8850_s4  ;;  %v3076_v8 = vsel %vm13737_vm3, %v3043_v21, %v9970_v53  ;;  %vm13739_vm14 = vmmov %vm13735_vm13  ;;  %v10134_v53 = vld [vmem:[#allocation2 + $0x98] sm:$0xff]  ;;  %v261_v21 = vadd.s32 136, %v9369_v60  ;;  %vm13742_vm3 = vcmask 64512  }
 0x3a3   : > { %2040 = vrot.lane.b32.xlu1 %v1724_v49, %s8843_s24  ;;  %v13724_v49 = vmov 0 }
 0x3a4   : > { %v10055_v39 = vpop.permute.xlu0 %2378  ;;  %v13725_v49 = vsel %vm10074_vm5, 4294967295, %v13724_v49 }
 0x3a5   : > { %v10061_v23 = vpop.permute.xlu1 %2380  ;;  %13726 = vst [vmem:[#allocation50_spill] sm:$0xff] %v13725_v49  ;;  %v13767_v49 = vmov 0 }
 0x3a6   : > { %2292 = vrot.lane.b32.xlu0 %v1856_v19, %s8846_s28  ;;  %v1819_v19 = vsel %vm10074_vm5, %v1755_v7, %v9917_v1  ;;  %v1727_v7 = vld [vmem:[#allocation2 + $0x99] sm:$0xff] }
 0x3a7   : > { %2516 = vrot.lane.b32.xlu1 %v1887_v31, %s8847_s29  ;;  %v3141_v31 = vsel %vm13733_vm6, %v3108_v63, %v9933_v10 }
 0x3a8   : > { %v10078_v18 = vpop.permute.xlu0 %2506 }
 0x3a9   : > { %v10082_v51 = vpop.permute.xlu1 %2030 }
 0x3aa   : > { %2744 = vrot.lane.b32.xlu0 %v1726_v62, %s8848_s30 }
 0x3ab   : > { %2166 = vrot.lane.b32.xlu1 %v1819_v19, %s8849_s3 }
 0x3ac   : > { %v10097_v14 = vpop.permute.xlu0 %2156 }
 0x3ad   : > { %v10103_v30 = vpop.permute.xlu1 %2632 }
 0x3ae   : > { %2872 = vrot.lane.b32.xlu0 %v10105_v50, %s8851_s5 }
 0x3af   : > { %2746 = vrot.lane.b32.xlu1 %v1727_v7, %s8848_s30 }
 0x3b0   : > { %v2855_v22 = vpop.permute.xlu0 %2854 }
 0x3b1   : > { %v3174_v9 = vsel %vm13735_vm13, %v3141_v31, %v2855_v22  ;;  %v10116_v12 = vpop.permute.xlu1 %2282  ;;  %vm13740_vm13 = vmmov %vm13736_vm8  ;;  %v260_v31 = vadd.s32 128, %v9369_v60 }
 0x3b2   : > { %2394 = vrot.lane.b32.xlu0 %v1726_v62, %s8845_s27  ;;  %7894 = vmatmul.mubr.msk.f32.gmra.mrb[36].mxu1 %vm13736_vm8, %v3174_v9 }
 0x3b3   : > { %2396 = vrot.lane.b32.xlu1 %v1727_v7, %s8845_s27 }
 0x3b4   : > { %v2631_v59 = vpop.permute.xlu0 %2630 }
 0x3b5   : > { %v3109_v10 = vsel %vm13738_vm9, %v3076_v8, %v2631_v59  ;;  %v10124_v40 = vpop.permute.xlu1 %2028  ;;  %v392_v8 = vand.u32 15, %v260_v31  ;;  %vm13741_vm9 = vcmask 31744  }
 0x3b6   : > { %v3142_v17 = vsel %vm13733_vm6, %v3109_v10, %v2729_v13  ;;  %2522 = vrot.lane.b32.xlu0 %v10105_v50, %s8847_s29  ;;  %vm13746_vm6 = vcmask 97280  }
 0x3b7   : > { %2046 = vrot.lane.b32.xlu1 %v1727_v7, %s8843_s24  ;;  %v3175_v19 = vsel %vm13739_vm14, %v3142_v17, %v2857_v57  ;;  %v1957_v57 = vsel %vm9966_vm12, %v1757_v25, %v10026_v61  ;;  %v10145_v7 = vld [vmem:[#allocation2 + $0x90] sm:$0xff]  ;;  %v2947_v17 = vsel %vm13741_vm9, %v9560_v55, %v9847_v2  ;;  %vm10165_vm8 = vcmp.ge.s32.totalorder %v392_v8, 1 }
 0x3b8   : > { %7896 = vmatprep.mubr.msk.f32.mxu1 %vm13740_vm13, %v3175_v19  ;;  %v2281_v16 = vpop.permute.xlu0 %2280  ;;  %v1926_v10 = vsel %vm10057_vm0, %v10145_v7, %v10105_v50  ;;  %v2979_v19 = vsel %vm13742_vm3, %v2947_v17, %v10031_v44  ;;  %v13744_v46 = vsel %vm10165_vm8, 4294967295, %v13743_v46  ;;  %v1858_v55 = vsel %vm10165_vm8, %v10145_v7, %v10105_v50  ;;  %v1728_v17 = vld [vmem:[#allocation2 + $0xa1] sm:$0xff] }
 0x3b9   : > { %v2505_v63 = vpop.permute.xlu1 %2504  ;;  %13745 = vst [vmem:[#allocation51_spill] sm:$0xff] %v13744_v46  ;;  %v3011_v2 = vsel %vm13746_vm6, %v2979_v19, %v10008_v34  ;;  %v1889_v44 = vsel %vm10074_vm5, %v1757_v25, %v10026_v61  ;;  %v1780_v8 = vsel %vm9710_vm1, %v9621_v6, %v9599_v32  ;;  %vm13750_vm13 = vcmask 130048   ;;  %v152_v32 = vld [vmem:[%s13379_s1 + $0x38] sm:$0xf] }
 0x3ba   : > { %2172 = vrot.lane.b32.xlu0 %v10105_v50, %s8849_s3  ;;  %v3044_v34 = vsel %vm13750_vm13, %v3011_v2, %v9953_v47  ;;  %v2948_v19 = vsel %vm13741_vm9, %v1780_v8, %v10016_v42  ;;  %vm13751_vm3 = vcmask 162816   ;;  %vm13752_vm6 = vcmask 1043456  }
 0x3bb   : > { %2648 = vrot.lane.b32.xlu1 %v10134_v53, %s8850_s4  ;;  %7935 = vmatprep.subr.msk.mxu0 %vm13752_vm6, %v152_v32  ;;  %vm13753_vm13 = vmmov %vm13752_vm6  ;;  %vm13754_vm9 = vcmask 64512   ;;  %vm13756_vm12 = vcmask 97280   ;;  %vm13757_vm6 = vcmask 228352   ;;  %vm13762_vm1 = vcmask 195584  }
 0x3bc   : > { %v2733_v13 = vpop.permute.xlu0 %2732  ;;  %7936 = vmatpush3.msk.msra.mxu0 %vm13753_vm13, %v152_v32  ;;  %v2980_v47 = vsel %vm13754_vm9, %v2948_v19, %v9989_v15  ;;  %vm13758_vm13 = vcmask 130048   ;;  %vm13759_vm9 = vcmask 261120  }
 0x3bd   : > { %v10139_v22 = vpop.permute.xlu1 %2154  ;;  %v3012_v2 = vsel %vm13756_vm12, %v2980_v47, %v2281_v16  ;;  %vm13760_vm12 = vcmask 293888  }
 0x3be   : > { %2870 = vrot.lane.b32.xlu0 %v1957_v57, %s8851_s5  ;;  %v399_v57 = vand.u32 15, %v261_v21  ;;  %v3045_v15 = vsel %vm13758_vm13, %v3012_v2, %v10055_v39  ;;  %vm13763_vm13 = vmmov %vm13759_vm9  ;;  %v1759_v2 = vld [vmem:[#allocation2 + $0x9a] sm:$0xff] }
 0x3bf   : > { %2298 = vrot.lane.b32.xlu1 %v10134_v53, %s8846_s28 }
 0x3c0   : > { %v2861_v9 = vpop.permute.xlu0 %2860  ;;  %vm10182_vm14 = vcmp.le.s32.totalorder %v399_v57, 14  ;;  %v3077_v57 = vsel %vm13751_vm3, %v3044_v34, %v2505_v63  ;;  %vm13755_vm3 = vcmask 195584  }
 0x3c1   : > { %v10150_v59 = vpop.permute.xlu1 %2734  ;;  %v3110_v42 = vsel %vm13755_vm3, %v3077_v57, %v10103_v30  ;;  %vm13761_vm3 = vcmask 162816  }
 0x3c2   : > { %2646 = vrot.lane.b32.xlu0 %v1926_v10, %s8850_s4  ;;  %v3143_v8 = vsel %vm13757_vm6, %v3110_v42, %v10042_v35  ;;  %v3078_v16 = vsel %vm13761_vm3, %v3045_v15, %v10078_v18  ;;  %v10246_v18 = vld [vmem:[#allocation2 + $0xa8] sm:$0xff]  ;;  %v263_v15 = vadd.s32 152, %v9369_v60 }
 0x3c3   : > { %2044 = vrot.lane.b32.xlu1 %v1726_v62, %s8843_s24  ;;  %v13747_v62 = vmov 0 }
 0x3c4   : > { %v10163_v31 = vpop.permute.xlu0 %2382  ;;  %v13748_v62 = vsel %vm10182_vm14, 4294967295, %v13747_v62 }
 0x3c5   : > { %v10169_v29 = vpop.permute.xlu1 %2384  ;;  %13749 = vst [vmem:[#allocation52_spill] sm:$0xff] %v13748_v62 }
 0x3c6   : > { %2296 = vrot.lane.b32.xlu0 %v1858_v55, %s8846_s28  ;;  %v1821_v55 = vsel %vm10182_vm14, %v1757_v25, %v10026_v61  ;;  %v10217_v25 = vld [vmem:[#allocation2 + $0xa2] sm:$0xff] }
 0x3c7   : > { %2520 = vrot.lane.b32.xlu1 %v1889_v44, %s8847_s29  ;;  %v1729_v44 = vld [vmem:[#allocation2 + $0xa9] sm:$0xff] }
 0x3c8   : > { %v10186_v21 = vpop.permute.xlu0 %2510 }
 0x3c9   : > { %v10194_v10 = vpop.permute.xlu1 %2034 }
 0x3ca   : > { %2748 = vrot.lane.b32.xlu0 %v1728_v17, %s8848_s30 }
 0x3cb   : > { %2170 = vrot.lane.b32.xlu1 %v1821_v55, %s8849_s3 }
 0x3cc   : > { %v10208_v6 = vpop.permute.xlu0 %2160 }
 0x3cd   : > { %v10215_v63 = vpop.permute.xlu1 %2636 }
 0x3ce   : > { %2876 = vrot.lane.b32.xlu0 %v10217_v25, %s8851_s5 }
 0x3cf   : > { %2750 = vrot.lane.b32.xlu1 %v1729_v44, %s8848_s30 }
 0x3d0   : > { %v2859_v34 = vpop.permute.xlu0 %2858 }
 0x3d1   : > { %v3176_v30 = vsel %vm13759_vm9, %v3143_v8, %v2859_v34  ;;  %v10228_v19 = vpop.permute.xlu1 %2286  ;;  %vm13764_vm9 = vmmov %vm13760_vm12  ;;  %v262_v8 = vadd.s32 144, %v9369_v60 }
 0x3d2   : > { %2398 = vrot.lane.b32.xlu0 %v1728_v17, %s8845_s27  ;;  %7897 = vmatmul.mubr.msk.f32.gmra.mrb[38].mxu1 %vm13760_vm12, %v3176_v30  ;;  %vm13766_vm12 = vcmask 64512  }
 0x3d3   : > { %2400 = vrot.lane.b32.xlu1 %v1729_v44, %s8845_s27 }
 0x3d4   : > { %v2635_v57 = vpop.permute.xlu0 %2634 }
 0x3d5   : > { %v3111_v35 = vsel %vm13762_vm1, %v3078_v16, %v2635_v57  ;;  %v10236_v55 = vpop.permute.xlu1 %2032  ;;  %v406_v16 = vand.u32 15, %v262_v8  ;;  %vm13765_vm1 = vcmask 31744  }
 0x3d6   : > { %v3144_v39 = vsel %vm13757_vm6, %v3111_v35, %v2733_v13  ;;  %2526 = vrot.lane.b32.xlu0 %v10217_v25, %s8847_s29  ;;  %vm13770_vm6 = vcmask 97280  }
 0x3d7   : > { %2050 = vrot.lane.b32.xlu1 %v1729_v44, %s8843_s24  ;;  %v3177_v32 = vsel %vm13763_vm13, %v3144_v39, %v2861_v9  ;;  %v1959_v9 = vsel %vm10074_vm5, %v1759_v2, %v10134_v53  ;;  %v10257_v44 = vld [vmem:[#allocation2 + $0xa0] sm:$0xff]  ;;  %v2949_v39 = vsel %vm13765_vm1, %v9611_v52, %v9974_v33  ;;  %vm10277_vm3 = vcmp.ge.s32.totalorder %v406_v16, 1 }
 0x3d8   : > { %7899 = vmatprep.mubr.msk.f32.mxu1 %vm13764_vm9, %v3177_v32  ;;  %v2285_v47 = vpop.permute.xlu0 %2284  ;;  %v1928_v35 = vsel %vm10165_vm8, %v10257_v44, %v10217_v25  ;;  %v2981_v32 = vsel %vm13766_vm12, %v2949_v39, %v10139_v22  ;;  %v13768_v49 = vsel %vm10277_vm3, 4294967295, %v13767_v49  ;;  %v1860_v52 = vsel %vm10277_vm3, %v10257_v44, %v10217_v25  ;;  %v1730_v39 = vld [vmem:[#allocation2 + $0xb1] sm:$0xff] }
 0x3d9   : > { %v2509_v42 = vpop.permute.xlu1 %2508  ;;  %13769 = vst [vmem:[#allocation53_spill] sm:$0xff] %v13768_v49  ;;  %v3013_v33 = vsel %vm13770_vm6, %v2981_v32, %v10116_v12  ;;  %v1891_v22 = vsel %vm10182_vm14, %v1759_v2, %v10134_v53  ;;  %v1782_v16 = vsel %vm9819_vm4, %v9697_v56, %v9660_v54  ;;  %vm13774_vm9 = vcmask 130048  }
 0x3da   : > { %2176 = vrot.lane.b32.xlu0 %v10217_v25, %s8849_s3  ;;  %v3046_v12 = vsel %vm13774_vm9, %v3013_v33, %v10061_v23  ;;  %v2950_v32 = vsel %vm13765_vm1, %v1782_v16, %v10124_v40  ;;  %vm13775_vm12 = vcmask 162816   ;;  %vm13776_vm6 = vcmask 64512   ;;  %v10324_v40 = vld [vmem:[#allocation2 + $0xb2] sm:$0xff] }
 0x3db   : > { %2652 = vrot.lane.b32.xlu1 %v10246_v18, %s8850_s4  ;;  %v2982_v54 = vsel %vm13776_vm6, %v2950_v32, %v10097_v14  ;;  %vm13777_vm9 = vcmask 195584   ;;  %vm13778_vm1 = vcmask 97280   ;;  %vm13780_vm6 = vcmask 130048  }
 0x3dc   : > { %v2737_v13 = vpop.permute.xlu0 %2736  ;;  %vm13783_vm5 = vcmask 162816   ;;  %vm13784_vm4 = vcmask 195584  }
 0x3dd   : > { %v10251_v34 = vpop.permute.xlu1 %2158 }
 0x3de   : > { %2874 = vrot.lane.b32.xlu0 %v1959_v9, %s8851_s5  ;;  %v413_v9 = vand.u32 15, %v263_v15 }
 0x3df   : > { %2302 = vrot.lane.b32.xlu1 %v10246_v18, %s8846_s28 }
 0x3e0   : > { %v2865_v30 = vpop.permute.xlu0 %2864  ;;  %vm10294_vm13 = vcmp.le.s32.totalorder %v413_v9, 14  ;;  %v3079_v9 = vsel %vm13775_vm12, %v3046_v12, %v2509_v42  ;;  %v3014_v42 = vsel %vm13778_vm1, %v2982_v54, %v2285_v47  ;;  %vm13779_vm12 = vcmask 228352  }
 0x3e1   : > { %v10262_v57 = vpop.permute.xlu1 %2738  ;;  %v3112_v23 = vsel %vm13777_vm9, %v3079_v9, %v10215_v63  ;;  %v3047_v14 = vsel %vm13780_vm6, %v3014_v42, %v10163_v31  ;;  %vm13781_vm9 = vcmask 261120   ;;  %vm13782_vm1 = vcmask 293888   ;;  %v1761_v42 = vld [vmem:[#allocation2 + $0xaa] sm:$0xff] }
 0x3e2   : > { %2650 = vrot.lane.b32.xlu0 %v1928_v35, %s8850_s4  ;;  %v3080_v47 = vsel %vm13783_vm5, %v3047_v14, %v10186_v21  ;;  %vm13785_vm6 = vmmov %vm13781_vm9  ;;  %v10353_v21 = vld [vmem:[#allocation2 + $0xb8] sm:$0xff]  ;;  %v265_v14 = vadd.s32 168, %v9369_v60  ;;  %vm13788_vm5 = vcmask 64512  }
 0x3e3   : > { %2048 = vrot.lane.b32.xlu1 %v1728_v17, %s8843_s24  ;;  %v13771_v17 = vmov 0 }
 0x3e4   : > { %v10275_v8 = vpop.permute.xlu0 %2386  ;;  %v13772_v17 = vsel %vm10294_vm13, 4294967295, %v13771_v17 }
 0x3e5   : > { %v10281_v28 = vpop.permute.xlu1 %2388  ;;  %13773 = vst [vmem:[#allocation54_spill] sm:$0xff] %v13772_v17  ;;  %v13810_v17 = vmov 0 }
 0x3e6   : > { %2300 = vrot.lane.b32.xlu0 %v1860_v52, %s8846_s28  ;;  %v1823_v52 = vsel %vm10294_vm13, %v1759_v2, %v10134_v53  ;;  %v1731_v2 = vld [vmem:[#allocation2 + $0xb9] sm:$0xff] }
 0x3e7   : > { %2524 = vrot.lane.b32.xlu1 %v1891_v22, %s8847_s29  ;;  %v3145_v22 = vsel %vm13779_vm12, %v3112_v23, %v10150_v59 }
 0x3e8   : > { %v10298_v15 = vpop.permute.xlu0 %2514 }
 0x3e9   : > { %v10306_v35 = vpop.permute.xlu1 %2038 }
 0x3ea   : > { %2752 = vrot.lane.b32.xlu0 %v1730_v39, %s8848_s30 }
 0x3eb   : > { %2174 = vrot.lane.b32.xlu1 %v1823_v52, %s8849_s3 }
 0x3ec   : > { %v10316_v56 = vpop.permute.xlu0 %2164 }
 0x3ed   : > { %v10322_v33 = vpop.permute.xlu1 %2640 }
 0x3ee   : > { %2880 = vrot.lane.b32.xlu0 %v10324_v40, %s8851_s5 }
 0x3ef   : > { %2754 = vrot.lane.b32.xlu1 %v1731_v2, %s8848_s30 }
 0x3f0   : > { %v2863_v16 = vpop.permute.xlu0 %2862 }
 0x3f1   : > { %v3178_v63 = vsel %vm13781_vm9, %v3145_v22, %v2863_v16  ;;  %v10335_v12 = vpop.permute.xlu1 %2290  ;;  %vm13786_vm9 = vmmov %vm13782_vm1  ;;  %v264_v22 = vadd.s32 160, %v9369_v60 }
 0x3f2   : > { %2402 = vrot.lane.b32.xlu0 %v1730_v39, %s8845_s27  ;;  %7900 = vmatmul.mubr.msk.f32.gmra.mrb[40].mxu1 %vm13782_vm1, %v3178_v63 }
 0x3f3   : > { %2404 = vrot.lane.b32.xlu1 %v1731_v2, %s8845_s27 }
 0x3f4   : > { %v2639_v32 = vpop.permute.xlu0 %2638 }
 0x3f5   : > { %v3113_v59 = vsel %vm13784_vm4, %v3080_v47, %v2639_v32  ;;  %v10343_v9 = vpop.permute.xlu1 %2036  ;;  %v420_v47 = vand.u32 15, %v264_v22  ;;  %vm13787_vm4 = vcmask 31744  }
 0x3f6   : > { %v3146_v31 = vsel %vm13779_vm12, %v3113_v59, %v2737_v13  ;;  %2530 = vrot.lane.b32.xlu0 %v10324_v40, %s8847_s29  ;;  %vm13791_vm12 = vcmask 97280  }
 0x3f7   : > { %2054 = vrot.lane.b32.xlu1 %v1731_v2, %s8843_s24  ;;  %v3179_v52 = vsel %vm13785_vm6, %v3146_v31, %v2865_v30  ;;  %v1961_v30 = vsel %vm10182_vm14, %v1761_v42, %v10246_v18  ;;  %v10364_v2 = vld [vmem:[#allocation2 + $0xb0] sm:$0xff]  ;;  %v2951_v31 = vsel %vm13787_vm4, %v9684_v0, %v10082_v51  ;;  %vm10384_vm1 = vcmp.ge.s32.totalorder %v420_v47, 1 }
 0x3f8   : > { %7902 = vmatprep.mubr.msk.f32.mxu1 %vm13786_vm9, %v3179_v52  ;;  %v2289_v54 = vpop.permute.xlu0 %2288  ;;  %v1930_v59 = vsel %vm10277_vm3, %v10364_v2, %v10324_v40  ;;  %v2983_v52 = vsel %vm13788_vm5, %v2951_v31, %v10251_v34  ;;  %v1862_v0 = vsel %vm10384_vm1, %v10364_v2, %v10324_v40  ;;  %v1893_v34 = vsel %vm10294_vm13, %v1761_v42, %v10246_v18  ;;  %v1732_v31 = vld [vmem:[#allocation2 + $0xc1] sm:$0xff] }
 0x3f9   : > { %v2513_v23 = vpop.permute.xlu1 %2512  ;;  %v3015_v51 = vsel %vm13791_vm12, %v2983_v52, %v10228_v19  ;;  %v1784_v47 = vsel %vm9949_vm15, %v9791_v41, %v9743_v48  ;;  %vm13795_vm9 = vcmask 130048   ;;  %vm13796_vm5 = vcmask 162816  }
 0x3fa   : > { %2180 = vrot.lane.b32.xlu0 %v10324_v40, %s8849_s3  ;;  %v3048_v19 = vsel %vm13795_vm9, %v3015_v51, %v10169_v29  ;;  %v2952_v52 = vsel %vm13787_vm4, %v1784_v47, %v10236_v55  ;;  %vm13797_vm12 = vcmask 64512   ;;  %vm13798_vm9 = vcmask 195584   ;;  %v10431_v55 = vld [vmem:[#allocation2 + $0xc2] sm:$0xff] }
 0x3fb   : > { %2656 = vrot.lane.b32.xlu1 %v10353_v21, %s8850_s4  ;;  %v2984_v48 = vsel %vm13797_vm12, %v2952_v52, %v10208_v6  ;;  %vm13799_vm4 = vcmask 97280   ;;  %vm13801_vm12 = vcmask 130048   ;;  %vm13804_vm14 = vcmask 162816  }
 0x3fc   : > { %v2741_v13 = vpop.permute.xlu0 %2740  ;;  %vm13805_vm15 = vcmask 195584  }
 0x3fd   : > { %v10358_v16 = vpop.permute.xlu1 %2162 }
 0x3fe   : > { %2878 = vrot.lane.b32.xlu0 %v1961_v30, %s8851_s5  ;;  %v427_v30 = vand.u32 15, %v265_v14 }
 0x3ff   : > { %2306 = vrot.lane.b32.xlu1 %v10353_v21, %s8846_s28 }
 0x400   : > { %v2869_v63 = vpop.permute.xlu0 %2868  ;;  %vm10401_vm6 = vcmp.le.s32.totalorder %v427_v30, 14  ;;  %v3081_v30 = vsel %vm13796_vm5, %v3048_v19, %v2513_v23  ;;  %v3016_v23 = vsel %vm13799_vm4, %v2984_v48, %v2289_v54  ;;  %vm13800_vm5 = vcmask 228352  }
 0x401   : > { %v10369_v32 = vpop.permute.xlu1 %2742  ;;  %v3114_v29 = vsel %vm13798_vm9, %v3081_v30, %v10322_v33  ;;  %v3049_v6 = vsel %vm13801_vm12, %v3016_v23, %v10275_v8  ;;  %vm13802_vm9 = vcmask 261120   ;;  %vm13803_vm4 = vcmask 293888   ;;  %v1763_v23 = vld [vmem:[#allocation2 + $0xba] sm:$0xff] }
 0x402   : > { %2654 = vrot.lane.b32.xlu0 %v1930_v59, %s8850_s4  ;;  %v3082_v54 = vsel %vm13804_vm14, %v3049_v6, %v10298_v15  ;;  %vm13806_vm12 = vmmov %vm13802_vm9  ;;  %v10460_v15 = vld [vmem:[#allocation2 + $0xc8] sm:$0xff]  ;;  %v267_v6 = vadd.s32 184, %v9369_v60  ;;  %vm13809_vm14 = vcmask 64512  }
 0x403   : > { %2052 = vrot.lane.b32.xlu1 %v1730_v39, %s8843_s24  ;;  %v13792_v39 = vmov 0 }
 0x404   : > { %v10382_v22 = vpop.permute.xlu0 %2390  ;;  %v13793_v39 = vsel %vm10401_vm6, 4294967295, %v13792_v39 }
 0x405   : > { %v10388_v27 = vpop.permute.xlu1 %2392  ;;  %13794 = vst [vmem:[#allocation55_spill] sm:$0xff] %v13793_v39 }
 0x406   : > { %2304 = vrot.lane.b32.xlu0 %v1862_v0, %s8846_s28  ;;  %v1825_v0 = vsel %vm10401_vm6, %v1761_v42, %v10246_v18  ;;  %v1733_v42 = vld [vmem:[#allocation2 + $0xc9] sm:$0xff] }
 0x407   : > { %2528 = vrot.lane.b32.xlu1 %v1893_v34, %s8847_s29  ;;  %v3147_v34 = vsel %vm13800_vm5, %v3114_v29, %v10262_v57 }
 0x408   : > { %v10405_v14 = vpop.permute.xlu0 %2518 }
 0x409   : > { %v10413_v59 = vpop.permute.xlu1 %2042 }
 0x40a   : > { %2756 = vrot.lane.b32.xlu0 %v1732_v31, %s8848_s30 }
 0x40b   : > { %2178 = vrot.lane.b32.xlu1 %v1825_v0, %s8849_s3 }
 0x40c   : > { %v10423_v41 = vpop.permute.xlu0 %2168 }
 0x40d   : > { %v10429_v51 = vpop.permute.xlu1 %2644 }
 0x40e   : > { %2884 = vrot.lane.b32.xlu0 %v10431_v55, %s8851_s5 }
 0x40f   : > { %2758 = vrot.lane.b32.xlu1 %v1733_v42, %s8848_s30 }
 0x410   : > { %v2867_v47 = vpop.permute.xlu0 %2866 }
 0x411   : > { %v3180_v33 = vsel %vm13802_vm9, %v3147_v34, %v2867_v47  ;;  %v10442_v19 = vpop.permute.xlu1 %2294  ;;  %vm13807_vm9 = vmmov %vm13803_vm4  ;;  %v266_v34 = vadd.s32 176, %v9369_v60 }
 0x412   : > { %2406 = vrot.lane.b32.xlu0 %v1732_v31, %s8845_s27  ;;  %7903 = vmatmul.mubr.msk.f32.gmra.mrb[42].mxu1 %vm13803_vm4, %v3180_v33 }
 0x413   : > { %2408 = vrot.lane.b32.xlu1 %v1733_v42, %s8845_s27 }
 0x414   : > { %v2643_v52 = vpop.permute.xlu0 %2642 }
 0x415   : > { %v3115_v57 = vsel %vm13805_vm15, %v3082_v54, %v2643_v52  ;;  %v10450_v30 = vpop.permute.xlu1 %2040  ;;  %v434_v54 = vand.u32 15, %v266_v34  ;;  %vm13808_vm15 = vcmask 31744  }
 0x416   : > { %v3148_v8 = vsel %vm13800_vm5, %v3115_v57, %v2741_v13  ;;  %2534 = vrot.lane.b32.xlu0 %v10431_v55, %s8847_s29  ;;  %vm13812_vm5 = vcmask 97280  }
 0x417   : > { %2058 = vrot.lane.b32.xlu1 %v1733_v42, %s8843_s24  ;;  %v3181_v0 = vsel %vm13806_vm12, %v3148_v8, %v2869_v63  ;;  %v1963_v63 = vsel %vm10294_vm13, %v1763_v23, %v10353_v21  ;;  %v10471_v42 = vld [vmem:[#allocation2 + $0xc0] sm:$0xff]  ;;  %v2953_v8 = vsel %vm13808_vm15, %v9775_v43, %v10194_v10  ;;  %vm10491_vm4 = vcmp.ge.s32.totalorder %v434_v54, 1 }
 0x418   : > { %7905 = vmatprep.mubr.msk.f32.mxu1 %vm13807_vm9, %v3181_v0  ;;  %v2293_v48 = vpop.permute.xlu0 %2292  ;;  %v1932_v57 = vsel %vm10384_vm1, %v10471_v42, %v10431_v55  ;;  %v2985_v0 = vsel %vm13809_vm14, %v2953_v8, %v10358_v16  ;;  %v13811_v17 = vsel %vm10491_vm4, 4294967295, %v13810_v17  ;;  %v1864_v43 = vsel %vm10491_vm4, %v10471_v42, %v10431_v55  ;;  %v1734_v8 = vld [vmem:[#allocation2 + $0xd1] sm:$0xff] }
 0x419   : > { %v2517_v29 = vpop.permute.xlu1 %2516  ;;  %v3017_v10 = vsel %vm13812_vm5, %v2985_v0, %v10335_v12  ;;  %v1895_v16 = vsel %vm10401_vm6, %v1763_v23, %v10353_v21  ;;  %v1786_v54 = vsel %vm10057_vm0, %v9928_v24, %v9875_v5  ;;  %vm13816_vm9 = vcmask 130048  }
 0x41a   : > { %2184 = vrot.lane.b32.xlu0 %v10431_v55, %s8849_s3  ;;  %v3050_v12 = vsel %vm13816_vm9, %v3017_v10, %v10281_v28  ;;  %v2954_v0 = vsel %vm13808_vm15, %v1786_v54, %v10343_v9  ;;  %vm13817_vm14 = vcmask 162816   ;;  %vm13818_vm5 = vcmask 64512   ;;  %v10538_v9 = vld [vmem:[#allocation2 + $0xd2] sm:$0xff] }
 0x41b   : > { %2660 = vrot.lane.b32.xlu1 %v10460_v15, %s8850_s4  ;;  %v2986_v28 = vsel %vm13818_vm5, %v2954_v0, %v10316_v56  ;;  %vm13819_vm9 = vcmask 195584   ;;  %vm13820_vm15 = vcmask 97280   ;;  %vm13822_vm5 = vcmask 130048  }
 0x41c   : > { %v2745_v13 = vpop.permute.xlu0 %2744  ;;  %vm13825_vm13 = vcmask 162816   ;;  %vm13826_vm0 = vcmask 195584  }
 0x41d   : > { %v10465_v47 = vpop.permute.xlu1 %2166 }
 0x41e   : > { %2882 = vrot.lane.b32.xlu0 %v1963_v63, %s8851_s5  ;;  %v441_v63 = vand.u32 15, %v267_v6 }
 0x41f   : > { %2310 = vrot.lane.b32.xlu1 %v10460_v15, %s8846_s28 }
 0x420   : > { %v2873_v33 = vpop.permute.xlu0 %2872  ;;  %vm10508_vm12 = vcmp.le.s32.totalorder %v441_v63, 14  ;;  %v3083_v63 = vsel %vm13817_vm14, %v3050_v12, %v2517_v29  ;;  %v3018_v29 = vsel %vm13820_vm15, %v2986_v28, %v2293_v48  ;;  %vm13821_vm14 = vcmask 228352  }
 0x421   : > { %v10476_v52 = vpop.permute.xlu1 %2746  ;;  %v3116_v24 = vsel %vm13819_vm9, %v3083_v63, %v10429_v51  ;;  %v3051_v56 = vsel %vm13822_vm5, %v3018_v29, %v10382_v22  ;;  %vm13823_vm9 = vcmask 261120   ;;  %vm13824_vm15 = vcmask 293888   ;;  %v1765_v29 = vld [vmem:[#allocation2 + $0xca] sm:$0xff] }
 0x422   : > { %2658 = vrot.lane.b32.xlu0 %v1932_v57, %s8850_s4  ;;  %v3084_v48 = vsel %vm13825_vm13, %v3051_v56, %v10405_v14  ;;  %vm13827_vm5 = vmmov %vm13823_vm9  ;;  %v10567_v14 = vld [vmem:[#allocation2 + $0xd8] sm:$0xff]  ;;  %v269_v56 = vadd.s32 200, %v9369_v60  ;;  %vm13830_vm13 = vcmask 64512  }
 0x423   : > { %2056 = vrot.lane.b32.xlu1 %v1732_v31, %s8843_s24  ;;  %v13813_v31 = vmov 0 }
 0x424   : > { %v10489_v34 = vpop.permute.xlu0 %2394  ;;  %v13814_v31 = vsel %vm10508_vm12, 4294967295, %v13813_v31 }
 0x425   : > { %v10495_v58 = vpop.permute.xlu1 %2396  ;;  %13815 = vst [vmem:[#allocation56_spill] sm:$0xff] %v13814_v31 }
 0x426   : > { %2308 = vrot.lane.b32.xlu0 %v1864_v43, %s8846_s28  ;;  %v1827_v43 = vsel %vm10508_vm12, %v1763_v23, %v10353_v21  ;;  %v1735_v23 = vld [vmem:[#allocation2 + $0xd9] sm:$0xff] }
 0x427   : > { %2532 = vrot.lane.b32.xlu1 %v1895_v16, %s8847_s29  ;;  %v3149_v16 = vsel %vm13821_vm14, %v3116_v24, %v10369_v32 }
 0x428   : > { %v10512_v6 = vpop.permute.xlu0 %2522 }
 0x429   : > { %v10520_v57 = vpop.permute.xlu1 %2046 }
 0x42a   : > { %2760 = vrot.lane.b32.xlu0 %v1734_v8, %s8848_s30 }
 0x42b   : > { %2182 = vrot.lane.b32.xlu1 %v1827_v43, %s8849_s3 }
 0x42c   : > { %v10530_v5 = vpop.permute.xlu0 %2172 }
 0x42d   : > { %v10536_v10 = vpop.permute.xlu1 %2648 }
 0x42e   : > { %2888 = vrot.lane.b32.xlu0 %v10538_v9, %s8851_s5 }
 0x42f   : > { %2762 = vrot.lane.b32.xlu1 %v1735_v23, %s8848_s30 }
 0x430   : > { %v2871_v54 = vpop.permute.xlu0 %2870 }
 0x431   : > { %v3182_v51 = vsel %vm13823_vm9, %v3149_v16, %v2871_v54  ;;  %v10549_v12 = vpop.permute.xlu1 %2298  ;;  %vm13828_vm9 = vmmov %vm13824_vm15  ;;  %v268_v16 = vadd.s32 192, %v9369_v60  ;;  %v10580_v54 = vld [vmem:[#allocation2 + $0xd0] sm:$0xff] }
 0x432   : > { %2410 = vrot.lane.b32.xlu0 %v1734_v8, %s8845_s27  ;;  %7906 = vmatmul.mubr.msk.f32.gmra.mrb[44].mxu1 %vm13824_vm15, %v3182_v51 }
 0x433   : > { %2412 = vrot.lane.b32.xlu1 %v1735_v23, %s8845_s27 }
 0x434   : > { %v2647_v0 = vpop.permute.xlu0 %2646 }
 0x435   : > { %v3117_v32 = vsel %vm13826_vm0, %v3084_v48, %v2647_v0  ;;  %v10557_v63 = vpop.permute.xlu1 %2044  ;;  %v448_v48 = vand.u32 15, %v268_v16  ;;  %vm13829_vm0 = vcmask 31744   ;;  %v10601_v16 = vld [vmem:[%s13379_s1 + $0x7a] ss:$0 sm:$0xff] }
 0x436   : > { %v3150_v22 = vsel %vm13821_vm14, %v3117_v32, %v2745_v13  ;;  %2538 = vrot.lane.b32.xlu0 %v10538_v9, %s8847_s29  ;;  %v1934_v32 = vsel %vm10491_vm4, %v10580_v54, %v10538_v9  ;;  %vm13833_vm14 = vcmask 97280  }
 0x437   : > { %2062 = vrot.lane.b32.xlu1 %v1735_v23, %s8843_s24  ;;  %v3183_v43 = vsel %vm13827_vm5, %v3150_v22, %v2873_v33  ;;  %v1965_v33 = vsel %vm10401_vm6, %v1765_v29, %v10460_v15  ;;  %v2955_v22 = vsel %vm13829_vm0, %v9917_v1, %v10306_v35  ;;  %vm10605_vm15 = vcmp.ge.s32.totalorder %v448_v48, 1 }
 0x438   : > { %7908 = vmatprep.mubr.msk.f32.mxu1 %vm13828_vm9, %v3183_v43  ;;  %v2297_v28 = vpop.permute.xlu0 %2296  ;;  %v2987_v43 = vsel %vm13830_vm13, %v2955_v22, %v10465_v47  ;;  %v13832_v11 = vsel %vm10605_vm15, 4294967295, %v13831_v11  ;;  %v1866_v47 = vsel %vm10605_vm15, %v10580_v54, %v10538_v9  ;;  %v1897_v48 = vsel %vm10508_vm12, %v1765_v29, %v10460_v15 }
 0x439   : > { %v2521_v24 = vpop.permute.xlu1 %2520  ;;  %vm13839_vm9 = vcmask 130048   ;;  %vm13840_vm13 = vcmask 162816   ;;  %vm13845_vm6 = vcmask 97280  }
 0x43a   : > { %2188 = vrot.lane.b32.xlu0 %v10538_v9, %s8849_s3 }
 0x43b   : > { %2664 = vrot.lane.b32.xlu1 %v10567_v14, %s8850_s4 }
 0x43c   : > { %v10571_v13 = vpop.permute.xlu0 %2748 }
 0x43d   : > { %v10574_v23 = vpop.permute.xlu1 %2170 }
 0x43e   : > { %2886 = vrot.lane.b32.xlu0 %v1965_v33, %s8851_s5  ;;  %v455_v33 = vand.u32 15, %v269_v56 }
 0x43f   : > { %2314 = vrot.lane.b32.xlu1 %v10567_v14, %s8846_s28 }
 0x440   : > { %v2877_v51 = vpop.permute.xlu0 %2876  ;;  %vm10628_vm5 = vcmp.le.s32.totalorder %v455_v33, 14 }
 0x441   : > { %v10585_v0 = vpop.permute.xlu1 %2750  ;;  %v13837_v26 = vsel %vm10628_vm5, 4294967295, %v13836_v26 }
 0x442   : > { %2662 = vrot.lane.b32.xlu0 %v1934_v32, %s8850_s4  ;;  %13838 = vst [vmem:[#allocation59_spill] sm:$0xff] %v13837_v26 }
 0x443   : > { %2060 = vrot.lane.b32.xlu1 %v1734_v8, %s8843_s24  ;;  %v3019_v8 = vsel %vm13833_vm14, %v2987_v43, %v10442_v19  ;;  %v1788_v43 = vsel %vm10165_vm8, %v10037_v4, %v9997_v45  ;;  %v1829_v45 = vsel %vm10628_vm5, %v1765_v29, %v10460_v15  ;;  %vm13841_vm14 = vmmov %vm13829_vm0  ;;  %v10666_v29 = vld [vmem:[#allocation2 + $0xe2] sm:$0xff]  ;;  %vm13851_vm8 = vcmask 195584  }
 0x444   : > { %v10603_v39 = vpop.permute.xlu0 %2398  ;;  %v2956_v33 = vsel %vm13829_vm0, %v1788_v43, %v10450_v30  ;;  %v1737_v43 = vld [vmem:[#allocation2 + $0xe9] sm:$0xff] }
 0x445   : > { %v10609_v1 = vpop.permute.xlu1 %2400  ;;  %v7889_v35 = vpop.f32.mrb[32].mxu1 }
 0x446   : > { %v10618_v32 = vadd.f32 %v7889_v35, %v10601_v16  ;;  %v3371_v56 = vpop.f32.mrb[33].mxu1  ;;  %2312 = vrot.lane.b32.xlu0 %v1866_v47, %s8846_s28  ;;  %v3052_v35 = vsel %vm13839_vm9, %v3019_v8, %v10388_v27  ;;  %vm13842_vm9 = vmmov %vm13829_vm0  ;;  %vm13843_vm0 = vcmask 64512  }
 0x447   : > { %v10625_v22 = vadd.f32 %v10601_v16, %v3371_v56  ;;  %2536 = vrot.lane.b32.xlu1 %v1897_v48, %s8847_s29  ;;  %v3085_v48 = vsel %vm13840_vm13, %v3052_v35, %v2521_v24  ;;  %v2988_v4 = vsel %vm13843_vm0, %v2956_v33, %v10423_v41  ;;  %vm13844_vm13 = vcmask 195584  }
 0x448   : > { %13834 = vst [vmem:[#allocation57_spill] sm:$0xff] %v10618_v32  ;;  %v10632_v19 = vpop.permute.xlu0 %2526  ;;  %v13496_v37 = vmax.f32 %v10618_v32, 0.0  ;;  %v3118_v30 = vsel %vm13844_vm13, %v3085_v48, %v10536_v10  ;;  %v3020_v8 = vsel %vm13845_vm6, %v2988_v4, %v2297_v28  ;;  %vm13848_vm0 = vcmask 261120  }
 0x449   : > { %13835 = vst [vmem:[#allocation58_spill] sm:$0xff] %v10625_v22  ;;  %v13495_v47 = vmax.f32 %v10625_v22, 0.0  ;;  %v10641_v56 = vpop.permute.xlu1 %2050  ;;  %vm13849_vm6 = vcmask 293888   ;;  %vm13850_vm13 = vcmask 162816   ;;  %v13856_v22 = vmov 0 }
 0x44a   : > { %2764 = vrot.lane.b32.xlu0 %v1736_v20, %s8848_s30 }
 0x44b   : > { %2186 = vrot.lane.b32.xlu1 %v1829_v45, %s8849_s3  ;;  %7937 = vmatprep.mubr.msk.f32.mxu0 %vm13841_vm14, %v13495_v47  ;;  %vm13846_vm14 = vcmask 228352  }
 0x44c   : > { %7938 = vmatmul.mubr.msk.f32.vlgmr.msra.gmra.mrb[32].mxu0 %vm13842_vm9, %v13496_v37  ;;  %v10658_v27 = vpop.permute.xlu0 %2176  ;;  %v3151_v35 = vsel %vm13846_vm14, %v3118_v30, %v10476_v52  ;;  %vm13847_vm9 = vcmask 130048  }
 0x44d   : > { %v10664_v24 = vpop.permute.xlu1 %2652  ;;  %v3053_v41 = vsel %vm13847_vm9, %v3020_v8, %v10489_v34  ;;  %vm13852_vm9 = vmmov %vm13848_vm0 }
 0x44e   : > { %2892 = vrot.lane.b32.xlu0 %v10666_v29, %s8851_s5  ;;  %v3086_v28 = vsel %vm13850_vm13, %v3053_v41, %v10512_v6  ;;  %v10696_v6 = vld [vmem:[#allocation2 + $0xe8] sm:$0xff]  ;;  %v270_v41 = vadd.s32 208, %v9369_v60 }
 0x44f   : > { %2766 = vrot.lane.b32.xlu1 %v1737_v43, %s8848_s30 }
 0x450   : > { %v2875_v45 = vpop.permute.xlu0 %2874 }
 0x451   : > { %v3184_v10 = vsel %vm13848_vm0, %v3151_v35, %v2875_v45  ;;  %v10677_v33 = vpop.permute.xlu1 %2302  ;;  %vm13853_vm0 = vmmov %vm13849_vm6  ;;  %v1767_v45 = vld [vmem:[#allocation2 + $0xda] sm:$0xff] }
 0x452   : > { %2414 = vrot.lane.b32.xlu0 %v1736_v20, %s8845_s27  ;;  %7909 = vmatmul.mubr.msk.f32.gmra.mrb[46].mxu1 %vm13849_vm6, %v3184_v10  ;;  %v10709_v10 = vld [vmem:[#allocation2 + $0xe0] sm:$0xff]  ;;  %vm13855_vm6 = vcmask 64512  }
 0x453   : > { %2416 = vrot.lane.b32.xlu1 %v1737_v43, %s8845_s27 }
 0x454   : > { %v2651_v48 = vpop.permute.xlu0 %2650 }
 0x455   : > { %v3119_v52 = vsel %vm13851_vm8, %v3086_v28, %v2651_v48  ;;  %v10685_v4 = vpop.permute.xlu1 %2048  ;;  %v271_v28 = vadd.s32 216, %v9369_v60  ;;  %vm13854_vm8 = vcmask 31744  }
 0x456   : > { %v3152_v34 = vsel %vm13846_vm14, %v3119_v52, %v10571_v13  ;;  %2542 = vrot.lane.b32.xlu0 %v10666_v29, %s8847_s29  ;;  %v462_v52 = vand.u32 15, %v270_v41  ;;  %vm13858_vm14 = vcmask 97280  }
 0x457   : > { %2066 = vrot.lane.b32.xlu1 %v1737_v43, %s8843_s24  ;;  %v3185_v30 = vsel %vm13852_vm9, %v3152_v34, %v2877_v51  ;;  %v1967_v51 = vsel %vm10508_vm12, %v1767_v45, %v10567_v14  ;;  %v469_v37 = vand.u32 15, %v271_v28  ;;  %v1899_v28 = vsel %vm10628_vm5, %v1767_v45, %v10567_v14 }
 0x458   : > { %7911 = vmatprep.mubr.msk.f32.mxu1 %vm13853_vm0, %v3185_v30  ;;  %v2301_v8 = vpop.permute.xlu0 %2300  ;;  %v1936_v30 = vsel %vm10605_vm15, %v10709_v10, %v10666_v29  ;;  %vm10731_vm13 = vcmp.ge.s32.totalorder %v462_v52, 1  ;;  %vm13864_vm0 = vcmask 130048   ;;  %vm13875_vm12 = vcmask 162816  }
 0x459   : > { %v2525_v35 = vpop.permute.xlu1 %2524  ;;  %v13857_v22 = vsel %vm10731_vm13, 4294967295, %v13856_v22  ;;  %vm10754_vm9 = vcmp.le.s32.totalorder %v469_v37, 14 }
 0x45a   : > { %2192 = vrot.lane.b32.xlu0 %v10666_v29, %s8849_s3 }
 0x45b   : > { %2668 = vrot.lane.b32.xlu1 %v10696_v6, %s8850_s4 }
 0x45c   : > { %v10700_v13 = vpop.permute.xlu0 %2752 }
 0x45d   : > { %v10703_v43 = vpop.permute.xlu1 %2174 }
 0x45e   : > { %2890 = vrot.lane.b32.xlu0 %v1967_v51, %s8851_s5  ;;  %v2957_v51 = vsel %vm13854_vm8, %v10026_v61, %v10413_v59  ;;  %v1868_v61 = vsel %vm10731_vm13, %v10709_v10, %v10666_v29 }
 0x45f   : > { %2318 = vrot.lane.b32.xlu1 %v10696_v6, %s8846_s28  ;;  %v2989_v47 = vsel %vm13855_vm6, %v2957_v51, %v10574_v23  ;;  %vm13865_vm6 = vcmask 162816  }
 0x460   : > { %v10714_v48 = vpop.permute.xlu0 %2880  ;;  %v3021_v59 = vsel %vm13858_vm14, %v2989_v47, %v10549_v12  ;;  %vm13866_vm14 = vmmov %vm13854_vm8 }
 0x461   : > { %v10716_v34 = vpop.permute.xlu1 %2754  ;;  %v3054_v47 = vsel %vm13864_vm0, %v3021_v59, %v10495_v58  ;;  %v153_v58 = vld [vmem:[%s13379_s1 + $0x3c] sm:$0xff]  ;;  %vm13867_vm0 = vmmov %vm13854_vm8 }
 0x462   : > { %2666 = vrot.lane.b32.xlu0 %v1936_v30, %s8850_s4  ;;  %v13861_v30 = vmov 0 }
 0x463   : > { %2064 = vrot.lane.b32.xlu1 %v1736_v20, %s8843_s24  ;;  %v13862_v30 = vsel %vm10754_vm9, 4294967295, %v13861_v30 }
 0x464   : > { %v10729_v41 = vpop.permute.xlu0 %2402  ;;  %13863 = vst [vmem:[#allocation62_spill] sm:$0xff] %v13862_v30 }
 0x465   : > { %v10735_v32 = vpop.permute.xlu1 %2404  ;;  %v7892_v31 = vpop.f32.mrb[34].mxu1 }
 0x466   : > { %v10744_v20 = vadd.f32 %v7892_v31, %v10601_v16  ;;  %v3381_v23 = vpop.f32.mrb[35].mxu1  ;;  %2316 = vrot.lane.b32.xlu0 %v1868_v61, %s8846_s28  ;;  %v1790_v31 = vsel %vm10277_vm3, %v10145_v7, %v10105_v50  ;;  %v1831_v50 = vsel %vm10754_vm9, %v1767_v45, %v10567_v14  ;;  %v154_v7 = vld [vmem:[%s13379_s1 + $0x44] sm:$0xf]  ;;  %vm13876_vm3 = vcmask 195584  }
 0x467   : > { %v10751_v52 = vadd.f32 %v10601_v16, %v3381_v23  ;;  %2540 = vrot.lane.b32.xlu1 %v1899_v28, %s8847_s29  ;;  %v1738_v23 = vld [vmem:[#allocation2 + $0xf1] sm:$0xff]  ;;  %v2958_v37 = vsel %vm13854_vm8, %v1790_v31, %v10557_v63  ;;  %v3087_v28 = vsel %vm13865_vm6, %v3054_v47, %v2525_v35  ;;  %v8227_v63 = vpack.c.bf16 %v154_v7, %v153_v58  ;;  %v1739_v58 = vld [vmem:[#allocation2 + $0xf9] sm:$0xff] }
 0x468   : > { %13859 = vst [vmem:[#allocation60_spill] sm:$0xff] %v10744_v20  ;;  %v10758_v12 = vpop.permute.xlu0 %2530  ;;  %v13508_v46 = vmax.f32 %v10744_v20, 0.0  ;;  %vm13868_vm8 = vcmask 64512   ;;  %vm13869_vm6 = vcmask 195584   ;;  %v10798_v47 = vld [vmem:[#allocation2 + $0xf2] sm:$0xff] }
 0x469   : > { %13860 = vst [vmem:[#allocation61_spill] sm:$0xff] %v10751_v52  ;;  %v13507_v51 = vmax.f32 %v10751_v52, 0.0  ;;  %v10767_v61 = vpop.permute.xlu1 %2054  ;;  %v2990_v45 = vsel %vm13868_vm8, %v2958_v37, %v10530_v5  ;;  %v3120_v59 = vsel %vm13869_vm6, %v3087_v28, %v10664_v24  ;;  %8229 = vmatprep.subr.msk.bf16.mxu1 %vm8890_vm2, %v8227_v63  ;;  %vm13872_vm8 = vcmask 130048  }
 0x46a   : > { %2768 = vrot.lane.b32.xlu0 %v1738_v23, %s8848_s30  ;;  %8232 = vmatpush3.bf16.msk.msra.mxu1 %vm8890_vm2, %v8227_v63  ;;  %vm13873_vm6 = vcmask 261120  }
 0x46b   : > { %2190 = vrot.lane.b32.xlu1 %v1831_v50, %s8849_s3  ;;  %7940 = vmatprep.mubr.msk.f32.mxu0 %vm13866_vm14, %v13507_v51  ;;  %vm13870_vm14 = vcmask 97280  }
 0x46c   : > { %7941 = vmatmul.mubr.msk.f32.gmra.mrb[34].mxu0 %vm13867_vm0, %v13508_v46  ;;  %v10790_v35 = vpop.permute.xlu0 %2180  ;;  %v3022_v50 = vsel %vm13870_vm14, %v2990_v45, %v2301_v8  ;;  %vm13871_vm0 = vcmask 228352   ;;  %vm13874_vm14 = vcmask 293888   ;;  %v13881_v46 = vmov 0 }
 0x46d   : > { %v10796_v31 = vpop.permute.xlu1 %2656  ;;  %v3153_v5 = vsel %vm13871_vm0, %v3120_v59, %v10585_v0  ;;  %v3055_v37 = vsel %vm13872_vm8, %v3022_v50, %v10603_v39  ;;  %vm13877_vm8 = vmmov %vm13873_vm6 }
 0x46e   : > { %2896 = vrot.lane.b32.xlu0 %v10798_v47, %s8851_s5  ;;  %v3088_v8 = vsel %vm13875_vm12, %v3055_v37, %v10632_v19  ;;  %vm13880_vm12 = vcmask 64512  }
 0x46f   : > { %2770 = vrot.lane.b32.xlu1 %v1739_v58, %s8848_s30 }
 0x470   : > { %v2879_v24 = vpop.permute.xlu0 %2878 }
 0x471   : > { %v3186_v28 = vsel %vm13873_vm6, %v3153_v5, %v2879_v24  ;;  %v10813_v7 = vpop.permute.xlu1 %2306  ;;  %vm13878_vm6 = vmmov %vm13874_vm14  ;;  %v10833_v5 = vld [vmem:[#allocation2 + $0xf8] sm:$0xff]  ;;  %v1769_v24 = vld [vmem:[#allocation2 + $0xea] sm:$0xff] }
 0x472   : > { %2418 = vrot.lane.b32.xlu0 %v1738_v23, %s8845_s27  ;;  %7912 = vmatmul.mubr.msk.f32.gmra.mrb[48].mxu1 %vm13874_vm14, %v3186_v28  ;;  %v10846_v28 = vld [vmem:[#allocation2 + $0xf0] sm:$0xff] }
 0x473   : > { %2420 = vrot.lane.b32.xlu1 %v1739_v58, %s8845_s27 }
 0x474   : > { %v2655_v63 = vpop.permute.xlu0 %2654 }
 0x475   : > { %v3121_v0 = vsel %vm13876_vm3, %v3088_v8, %v2655_v63  ;;  %v10821_v45 = vpop.permute.xlu1 %2052  ;;  %vm13879_vm3 = vcmask 31744  }
 0x476   : > { %v3154_v39 = vsel %vm13871_vm0, %v3121_v0, %v10700_v13  ;;  %2546 = vrot.lane.b32.xlu0 %v10798_v47, %s8847_s29  ;;  %vm13883_vm0 = vcmask 97280  }
 0x477   : > { %2070 = vrot.lane.b32.xlu1 %v1739_v58, %s8843_s24  ;;  %v3187_v59 = vsel %vm13877_vm8, %v3154_v39, %v10714_v48  ;;  %v272_v58 = vadd.s32 224, %v9369_v60  ;;  %v1969_v48 = vsel %vm10628_vm5, %v1769_v24, %v10696_v6  ;;  %v1938_v39 = vsel %vm10731_vm13, %v10846_v28, %v10798_v47 }
 0x478   : > { %7914 = vmatprep.mubr.msk.f32.mxu1 %vm13878_vm6, %v3187_v59  ;;  %v2305_v50 = vpop.permute.xlu0 %2304  ;;  %v2959_v59 = vsel %vm13879_vm3, %v10134_v53, %v10520_v57  ;;  %vm13886_vm8 = vcmask 130048   ;;  %vm13887_vm6 = vmmov %vm13879_vm3  ;;  %vm13888_vm3 = vcmask 162816   ;;  %vm13901_vm5 = vcmask 162816  }
 0x479   : > { %v2529_v19 = vpop.permute.xlu1 %2528  ;;  %v476_v63 = vand.u32 15, %v272_v58  ;;  %v273_v58 = vadd.s32 232, %v9369_v60 }
 0x47a   : > { %2196 = vrot.lane.b32.xlu0 %v10798_v47, %s8849_s3 }
 0x47b   : > { %2672 = vrot.lane.b32.xlu1 %v10833_v5, %s8850_s4  ;;  %vm10868_vm14 = vcmp.ge.s32.totalorder %v476_v63, 1  ;;  %v10884_v63 = vld [vmem:[#allocation2 + $0x118] sm:$0xff] }
 0x47c   : > { %v10837_v13 = vpop.permute.xlu0 %2756  ;;  %v13882_v46 = vsel %vm10868_vm14, 4294967295, %v13881_v46  ;;  %v1870_v53 = vsel %vm10868_vm14, %v10846_v28, %v10798_v47 }
 0x47d   : > { %v10840_v37 = vpop.permute.xlu1 %2178 }
 0x47e   : > { %2894 = vrot.lane.b32.xlu0 %v1969_v48, %s8851_s5  ;;  %v2991_v48 = vsel %vm13880_vm12, %v2959_v59, %v10703_v43  ;;  %v483_v59 = vand.u32 15, %v273_v58  ;;  %vm13889_vm12 = vmmov %vm13887_vm6 }
 0x47f   : > { %2322 = vrot.lane.b32.xlu1 %v10833_v5, %s8846_s28  ;;  %v3023_v57 = vsel %vm13883_vm0, %v2991_v48, %v10677_v33  ;;  %v1792_v33 = vsel %vm10384_vm1, %v10257_v44, %v10217_v25  ;;  %v1901_v25 = vsel %vm10754_vm9, %v1769_v24, %v10696_v6  ;;  %v13890_v44 = vmov 0 }
 0x480   : > { %v10850_v8 = vpop.permute.xlu0 %2884  ;;  %v2960_v49 = vsel %vm13887_vm6, %v1792_v33, %v10685_v4  ;;  %vm10914_vm0 = vcmp.le.s32.totalorder %v483_v59, 14  ;;  %v10929_v33 = vld [vmem:[#allocation2 + $0x102] sm:$0xff] }
 0x481   : > { %v10852_v0 = vpop.permute.xlu1 %2758  ;;  %v13891_v44 = vsel %vm10914_vm0, 4294967295, %v13890_v44 }
 0x482   : > { %2670 = vrot.lane.b32.xlu0 %v1938_v39, %s8850_s4  ;;  %13892 = vst [vmem:[#allocation65_spill] sm:$0xff] %v13891_v44 }
 0x483   : > { %2068 = vrot.lane.b32.xlu1 %v1738_v23, %s8843_s24 }
 0x484   : > { %v10866_v51 = vpop.permute.xlu0 %2406 }
 0x485   : > { %v10872_v52 = vpop.permute.xlu1 %2408  ;;  %v7895_v20 = vpop.f32.mrb[36].mxu1 }
 0x486   : > { %v10881_v43 = vadd.f32 %v7895_v20, %v10601_v16  ;;  %v3391_v23 = vpop.f32.mrb[37].mxu1  ;;  %2320 = vrot.lane.b32.xlu0 %v1870_v53, %s8846_s28  ;;  %v3056_v20 = vsel %vm13886_vm8, %v3023_v57, %v10609_v1  ;;  %vm13893_vm8 = vmmov %vm13887_vm6  ;;  %vm13894_vm6 = vcmask 64512  }
 0x487   : > { %v10887_v39 = vadd.f32 %v10601_v16, %v3391_v23  ;;  %2680 = vrot.lane.b32.xlu1 %v10884_v63, %s8850_s4  ;;  %v1838_v23 = vld [vmem:[#allocation2 + $0x101] sm:$0xff]  ;;  %v3089_v58 = vsel %vm13888_vm3, %v3056_v20, %v2529_v19  ;;  %v2992_v4 = vsel %vm13894_vm6, %v2960_v49, %v10658_v27  ;;  %vm13895_vm3 = vcmask 195584  }
 0x488   : > { %13884 = vst [vmem:[#allocation63_spill] sm:$0xff] %v10881_v43  ;;  %v10891_v26 = vpop.permute.xlu0 %2534  ;;  %v13520_v3 = vmax.f32 %v10881_v43, 0.0  ;;  %v3122_v19 = vsel %vm13895_vm3, %v3089_v58, %v10796_v31  ;;  %v1833_v20 = vsel %vm10914_vm0, %v1769_v24, %v10696_v6  ;;  %v274_v31 = vadd.s32 240, %v9369_v60  ;;  %v1839_v24 = vld [vmem:[#allocation2 + $0x109] sm:$0xff] }
 0x489   : > { %13885 = vst [vmem:[#allocation64_spill] sm:$0xff] %v10887_v39  ;;  %v13519_v48 = vmax.f32 %v10887_v39, 0.0  ;;  %v10900_v53 = vpop.permute.xlu1 %2058  ;;  %vm13898_vm6 = vcmask 130048   ;;  %vm13899_vm3 = vcmask 261120  }
 0x48a   : > { %2772 = vrot.lane.b32.xlu0 %v1838_v23, %s8848_s30 }
 0x48b   : > { %2544 = vrot.lane.b32.xlu1 %v1901_v25, %s8847_s29  ;;  %7943 = vmatprep.mubr.msk.f32.mxu0 %vm13889_vm12, %v13519_v48  ;;  %vm13896_vm12 = vcmask 97280  }
 0x48c   : > { %7944 = vmatmul.mubr.msk.f32.gmra.mrb[36].mxu0 %vm13893_vm8, %v13520_v3  ;;  %v10921_v1 = vpop.permute.xlu0 %2184  ;;  %v3024_v59 = vsel %vm13896_vm12, %v2992_v4, %v2305_v50  ;;  %vm13897_vm8 = vcmask 228352   ;;  %vm13900_vm12 = vcmask 293888   ;;  %v13909_v3 = vmov 0 }
 0x48d   : > { %v10927_v57 = vpop.permute.xlu1 %2660  ;;  %v3155_v49 = vsel %vm13897_vm8, %v3122_v19, %v10716_v34  ;;  %v3057_v58 = vsel %vm13898_vm6, %v3024_v59, %v10729_v41  ;;  %v490_v19 = vand.u32 15, %v274_v31  ;;  %vm13902_vm8 = vcmask 195584   ;;  %v10958_v59 = vld [vmem:[#allocation2 + $0x112] sm:$0xff] }
 0x48e   : > { %2900 = vrot.lane.b32.xlu0 %v10929_v33, %s8851_s5  ;;  %v3090_v34 = vsel %vm13901_vm5, %v3057_v58, %v10758_v12  ;;  %vm13903_vm6 = vcmask 228352   ;;  %vm13904_vm5 = vmmov %vm13900_vm12  ;;  %v1837_v58 = vld [vmem:[#allocation2 + $0x108] sm:$0xff] }
 0x48f   : > { %2194 = vrot.lane.b32.xlu1 %v1833_v20, %s8849_s3 }
 0x490   : > { %v2883_v27 = vpop.permute.xlu0 %2882 }
 0x491   : > { %v3188_v50 = vsel %vm13899_vm3, %v3155_v49, %v2883_v27  ;;  %v10944_v25 = vpop.permute.xlu1 %2310  ;;  %v13905_v27 = vmov 0 }
 0x492   : > { %2422 = vrot.lane.b32.xlu0 %v1838_v23, %s8845_s27  ;;  %7915 = vmatmul.mubr.msk.f32.gmra.mrb[50].mxu1 %vm13900_vm12, %v3188_v50  ;;  %v1906_v23 = vld [vmem:[#allocation2 + $0x110] sm:$0xff]  ;;  %vm10964_vm12 = vcmp.ge.s32.totalorder %v490_v19, 1  ;;  %v1771_v50 = vld [vmem:[#allocation2 + $0xfa] sm:$0xff] }
 0x493   : > { %2774 = vrot.lane.b32.xlu1 %v1839_v24, %s8848_s30  ;;  %v13906_v27 = vsel %vm10964_vm12, 4294967295, %v13905_v27  ;;  %v1836_v19 = vld [vmem:[#allocation2 + $0x100] sm:$0xff] }
 0x494   : > { %v2659_v4 = vpop.permute.xlu0 %2658 }
 0x495   : > { %v3123_v20 = vsel %vm13902_vm8, %v3090_v34, %v2659_v4  ;;  %v10952_v48 = vpop.permute.xlu1 %2056  ;;  %v1971_v4 = vsel %vm10754_vm9, %v1771_v50, %v10833_v5  ;;  %vm13907_vm8 = vcmask 31744   ;;  %vm13919_vm9 = vcmask 97280  }
 0x496   : > { %v3156_v41 = vsel %vm13903_vm6, %v3123_v20, %v10837_v13  ;;  %2550 = vrot.lane.b32.xlu0 %v10929_v33, %s8847_s29  ;;  %v1942_v13 = vsel %vm10964_vm12, %v1906_v23, %v10958_v59  ;;  %vm13908_vm6 = vcmask 64512  }
 0x497   : > { %2424 = vrot.lane.b32.xlu1 %v1839_v24, %s8845_s27  ;;  %v3189_v12 = vsel %vm13899_vm3, %v3156_v41, %v10850_v8  ;;  %v275_v8 = vadd.s32 248, %v9369_v60  ;;  %v1940_v60 = vsel %vm10868_vm14, %v1836_v19, %v10929_v33 }
 0x498   : > { %7917 = vmatprep.mubr.msk.f32.mxu1 %vm13904_vm5, %v3189_v12  ;;  %v2309_v49 = vpop.permute.xlu0 %2308  ;;  %v2961_v12 = vsel %vm13907_vm8, %v10246_v18, %v10641_v56  ;;  %vm13911_vm5 = vcmask 97280   ;;  %vm13912_vm8 = vcmask 130048  }
 0x499   : > { %v2533_v31 = vpop.permute.xlu1 %2532  ;;  %v497_v20 = vand.u32 15, %v275_v8  ;;  %v2993_v8 = vsel %vm13908_vm6, %v2961_v12, %v10840_v37  ;;  %vm13913_vm6 = vcmask 31744  }
 0x49a   : > { %2678 = vrot.lane.b32.xlu0 %v1942_v13, %s8850_s4  ;;  %v1903_v13 = vsel %vm10914_vm0, %v1771_v50, %v10833_v5 }
 0x49b   : > { %2676 = vrot.lane.b32.xlu1 %v1837_v58, %s8850_s4  ;;  %vm10998_vm3 = vcmp.le.s32.totalorder %v497_v20, 14 }
 0x49c   : > { %v10974_v24 = vpop.permute.xlu0 %2760  ;;  %v13910_v3 = vsel %vm10998_vm3, 4294967295, %v13909_v3  ;;  %v1835_v20 = vsel %vm10998_vm3, %v1771_v50, %v10833_v5  ;;  %v1872_v50 = vsel %vm10964_vm12, %v1836_v19, %v10929_v33 }
 0x49d   : > { %v10976_v34 = vpop.permute.xlu1 %2182 }
 0x49e   : > { %2898 = vrot.lane.b32.xlu0 %v1971_v4, %s8851_s5  ;;  %v1841_v4 = vld [vmem:[#allocation2 + $0x10a] sm:$0xff] }
 0x49f   : > { %2326 = vrot.lane.b32.xlu1 %v1837_v58, %s8846_s28  ;;  %v1973_v56 = vsel %vm10914_vm0, %v1841_v4, %v1837_v58  ;;  %vm13916_vm0 = vmmov %vm13913_vm6 }
 0x4a0   : > { %v2889_v41 = vpop.permute.xlu0 %2888 }
 0x4a1   : > { %v10983_v23 = vpop.permute.xlu1 %2762 }
 0x4a2   : > { %2674 = vrot.lane.b32.xlu0 %v1940_v60, %s8850_s4  ;;  %v3025_v60 = vsel %vm13911_vm5, %v2993_v8, %v10813_v7  ;;  %v1794_v7 = vsel %vm10491_vm4, %v10364_v2, %v10324_v40  ;;  %vm13914_vm5 = vcmask 162816   ;;  %v1909_v40 = vld [vmem:[#allocation2 + $0x119] sm:$0xff] }
 0x4a3   : > { %2548 = vrot.lane.b32.xlu1 %v1903_v13, %s8847_s29  ;;  %v3058_v8 = vsel %vm13912_vm8, %v3025_v60, %v10735_v32  ;;  %vm13915_vm8 = vmmov %vm13913_vm6  ;;  %v1905_v60 = vsel %vm10998_vm3, %v1841_v4, %v1837_v58 }
 0x4a4   : > { %v11002_v39 = vpop.permute.xlu0 %2410 }
 0x4a5   : > { %v11004_v43 = vpop.permute.xlu1 %2412  ;;  %v7898_v18 = vpop.f32.mrb[38].mxu1 }
 0x4a6   : > { %v11011_v30 = vadd.f32 %v7898_v18, %v10601_v16  ;;  %v3401_v37 = vpop.f32.mrb[39].mxu1  ;;  %2902 = vrot.lane.b32.xlu0 %v1973_v56, %s8851_s5 }
 0x4a7   : > { %v11018_v12 = vadd.f32 %v10601_v16, %v3401_v37  ;;  %2198 = vrot.lane.b32.xlu1 %v1835_v20, %s8849_s3  ;;  %v2962_v37 = vsel %vm13913_vm6, %v1794_v7, %v10821_v45  ;;  %v3091_v20 = vsel %vm13914_vm5, %v3058_v8, %v2533_v31  ;;  %vm13917_vm6 = vcmask 64512   ;;  %v1908_v31 = vld [vmem:[#allocation2 + $0x111] sm:$0xff]  ;;  %v1911_v7 = vld [vmem:[#allocation2 + $0x11a] sm:$0xff]  ;;  %s8857_s3 = smov 88  }
 0x4a8   : > { %v11021_v13 = vpop.permute.xlu0 %2538  ;;  %v13564_v44 = vmax.f32 %v11011_v30, 0.0  ;;  %v2994_v32 = vsel %vm13917_vm6, %v2962_v37, %v10790_v35  ;;  %vm13918_vm5 = vcmask 195584   ;;  %vm13922_vm6 = vcmask 261120  }
 0x4a9   : > { %v13561_v18 = vmax.f32 %v11018_v12, 0.0  ;;  %v11030_v56 = vpop.permute.xlu1 %2062  ;;  %v3124_v45 = vsel %vm13918_vm5, %v3091_v20, %v10927_v57  ;;  %v3026_v19 = vsel %vm13919_vm9, %v2994_v32, %v2309_v49  ;;  %vm13923_vm9 = vcmask 293888  }
 0x4aa   : > { %2324 = vrot.lane.b32.xlu0 %v1872_v50, %s8846_s28  ;;  %v1975_v49 = vsel %vm10998_vm3, %v1911_v7, %v10884_v63  ;;  %vm13924_vm5 = vcmask 162816   ;;  %vm13937_vm3 = vcmask 195584  }
 0x4ab   : > { %2778 = vrot.lane.b32.xlu1 %v1909_v40, %s8848_s30  ;;  %7946 = vmatprep.mubr.msk.f32.mxu0 %vm13915_vm8, %v13561_v18  ;;  %vm13921_vm8 = vcmask 130048  }
 0x4ac   : > { %7947 = vmatmul.mubr.msk.f32.gmra.mrb[38].mxu0 %vm13916_vm0, %v13564_v44  ;;  %v11047_v2 = vpop.permute.xlu0 %2188  ;;  %vm13920_vm0 = vcmask 228352   ;;  %v3059_v35 = vsel %vm13921_vm8, %v3026_v19, %v10866_v51  ;;  %vm13926_vm8 = vcmask 228352  }
 0x4ad   : > { %v2665_v33 = vpop.permute.xlu1 %2664  ;;  %v3157_v8 = vsel %vm13920_vm0, %v3124_v45, %v10852_v0  ;;  %v3092_v0 = vsel %vm13924_vm5, %v3059_v35, %v10891_v26  ;;  %vm13925_vm0 = vcmask 195584   ;;  %vm13927_vm5 = vcmask 31744  }
 0x4ae   : > { %2776 = vrot.lane.b32.xlu0 %v1908_v31, %s8848_s30  ;;  %v2963_v26 = vsel %vm13927_vm5, %v10353_v21, %v10767_v61  ;;  %v1796_v21 = vsel %vm10605_vm15, %v10471_v42, %v10431_v55  ;;  %vm13941_vm15 = vcmask 261120  }
 0x4af   : > { %2552 = vrot.lane.b32.xlu1 %v1905_v60, %s8847_s29 }
 0x4b0   : > { %v2887_v50 = vpop.permute.xlu0 %2886 }
 0x4b1   : > { %v3190_v57 = vsel %vm13922_vm6, %v3157_v8, %v2887_v50  ;;  %v11063_v37 = vpop.permute.xlu1 %2314 }
 0x4b2   : > { %2904 = vrot.lane.b32.xlu0 %v10958_v59, %s8851_s5  ;;  %7918 = vmatmul.mubr.msk.f32.gmra.mrb[52].mxu1 %vm13923_vm9, %v3190_v57 }
 0x4b3   : > { %2906 = vrot.lane.b32.xlu1 %v1975_v49, %s8851_s5 }
 0x4b4   : > { %v2663_v58 = vpop.permute.xlu0 %2662 }
 0x4b5   : > { %v3125_v51 = vsel %vm13925_vm0, %v3092_v0, %v2663_v58  ;;  %v11075_v4 = vpop.permute.xlu1 %2060  ;;  %vm13928_vm0 = vcmask 64512  }
 0x4b6   : > { %v3158_v20 = vsel %vm13926_vm8, %v3125_v51, %v10974_v24  ;;  %v2995_v60 = vsel %vm13928_vm0, %v2963_v26, %v10976_v34  ;;  %vm13929_vm8 = vcmask 97280  }
 0x4b7   : > { %v3191_v59 = vsel %vm13922_vm6, %v3158_v20, %v2889_v41  ;;  %v3027_v8 = vsel %vm13929_vm8, %v2995_v60, %v10944_v25  ;;  %vm13931_vm6 = vcmask 130048  }
 0x4b8   : > { %7920 = vmatprep.mubr.msk.f32.mxu1 %vm13923_vm9, %v3191_v59  ;;  %v2313_v40 = vpop.permute.xlu0 %2312  ;;  %v3060_v61 = vsel %vm13931_vm6, %v3027_v8, %v10872_v52  ;;  %vm13932_vm9 = vmmov %vm13927_vm5  ;;  %vm13933_vm5 = vcmask 162816   ;;  %vm13936_vm6 = vcmask 64512  }
 0x4b9   : > { %v2537_v32 = vpop.permute.xlu1 %2536  ;;  %v2964_v0 = vsel %vm13932_vm9, %v1796_v21, %v10952_v48  ;;  %vm13934_vm0 = vmmov %vm13932_vm9  ;;  %vm13938_vm9 = vcmask 97280  }
 0x4ba   : > { %v3093_v58 = vsel %vm13933_vm5, %v3060_v61, %v2537_v32  ;;  %vm13935_vm8 = vmmov %vm13934_vm0  ;;  %v2996_v42 = vsel %vm13936_vm6, %v2964_v0, %v10921_v1  ;;  %vm13939_vm5 = vcmask 228352   ;;  %vm13943_vm6 = vcmask 162816  }
 0x4bb   : > { %v3126_v52 = vsel %vm13937_vm3, %v3093_v58, %v2665_v33  ;;  %v3028_v20 = vsel %vm13938_vm9, %v2996_v42, %v2313_v40  ;;  %vm13944_vm9 = vmmov %vm13939_vm5 }
 0x4bc   : > { %v2765_v63 = vpop.permute.xlu0 %2764  ;;  %v3159_v59 = vsel %vm13939_vm5, %v3126_v52, %v10983_v23  ;;  %vm13945_vm5 = vmmov %vm13941_vm15 }
 0x4bd   : > { %v2187_v45 = vpop.permute.xlu1 %2186 }
 0x4c0   : > { %v2893_v31 = vpop.permute.xlu0 %2892 }
 0x4c1   : > { %v11081_v19 = vpop.permute.xlu1 %2766 }
 0x4c4   : > { %v11088_v7 = vpop.permute.xlu0 %2414 }
 0x4c5   : > { %v11090_v24 = vpop.permute.xlu1 %2416  ;;  %v7901_v41 = vpop.f32.mrb[40].mxu1 }
 0x4c6   : > { %v11095_v50 = vadd.f32 %v7901_v41, %v10601_v16  ;;  %v3411_v35 = vpop.f32.mrb[41].mxu1 }
 0x4c7   : > { %v11098_v57 = vadd.f32 %v10601_v16, %v3411_v35 }
 0x4c8   : > { %v11100_v49 = vpop.permute.xlu0 %2542  ;;  %v13560_v51 = vmax.f32 %v11095_v50, 0.0 }
 0x4c9   : > { %13930 = vst [vmem:[#allocation66_spill] sm:$0xff] %v11098_v57  ;;  %v13559_v34 = vmax.f32 %v11098_v57, 0.0  ;;  %v11109_v25 = vpop.permute.xlu1 %2066 }
 0x4cb   : > { %7949 = vmatprep.mubr.msk.f32.mxu0 %vm13934_vm0, %v13559_v34  ;;  %vm13940_vm0 = vcmask 130048  }
 0x4cc   : > { %7950 = vmatmul.mubr.msk.f32.gmra.mrb[40].mxu0 %vm13935_vm8, %v13560_v51  ;;  %v11121_v55 = vpop.permute.xlu0 %2192  ;;  %v3061_v26 = vsel %vm13940_vm0, %v3028_v20, %v11002_v39  ;;  %vm13942_vm8 = vcmask 293888   ;;  %vm13948_vm0 = vcmask 64512  }
 0x4cd   : > { %v2669_v48 = vpop.permute.xlu1 %2668  ;;  %v3094_v1 = vsel %vm13943_vm6, %v3061_v26, %v11021_v13  ;;  %vm13946_vm4 = vmmov %vm13942_vm8 }
 0x4d0   : > { %v2891_v32 = vpop.permute.xlu0 %2890 }
 0x4d1   : > { %v3192_v60 = vsel %vm13941_vm15, %v3159_v59, %v2891_v32  ;;  %v11132_v41 = vpop.permute.xlu1 %2318  ;;  %vm13947_vm15 = vcmask 31744  }
 0x4d2   : > { %7921 = vmatmul.mubr.msk.f32.gmra.mrb[54].mxu1 %vm13942_vm8, %v3192_v60  ;;  %v2965_v13 = vsel %vm13947_vm15, %v10460_v15, %v10900_v53  ;;  %v1798_v15 = vsel %vm10731_vm13, %v10580_v54, %v10538_v9  ;;  %vm13952_vm8 = vcmask 130048   ;;  %vm13953_vm6 = vmmov %vm13947_vm15  ;;  %vm14194_vm13 = vcmask 130048  }
 0x4d3   : > { %v2997_v52 = vsel %vm13948_vm0, %v2965_v13, %v2187_v45  ;;  %vm13957_vm15 = vmmov %vm13948_vm0  ;;  %vm13958_vm0 = vcmask 195584  }
 0x4d4   : > { %v2667_v33 = vpop.permute.xlu0 %2666 }
 0x4d5   : > { %v3127_v8 = vsel %vm13937_vm3, %v3094_v1, %v2667_v33  ;;  %v11138_v40 = vpop.permute.xlu1 %2064  ;;  %v2966_v33 = vsel %vm13953_vm6, %v1798_v15, %v11075_v4  ;;  %vm13954_vm3 = vcmask 162816  }
 0x4d6   : > { %v3160_v23 = vsel %vm13944_vm9, %v3127_v8, %v2765_v63  ;;  %vm13955_vm9 = vmmov %vm13953_vm6  ;;  %v2998_v54 = vsel %vm13957_vm15, %v2966_v33, %v11047_v2 }
 0x4d7   : > { %v3193_v35 = vsel %vm13945_vm5, %v3160_v23, %v2893_v31  ;;  %vm13956_vm5 = vmmov %vm13953_vm6  ;;  %vm13960_vm6 = vcmask 130048  }
 0x4d8   : > { %7923 = vmatprep.mubr.msk.f32.mxu1 %vm13946_vm4, %v3193_v35  ;;  %v2317_v39 = vpop.permute.xlu0 %2316  ;;  %vm13949_vm4 = vcmask 97280   ;;  %vm13964_vm15 = vmmov %vm13958_vm0 }
 0x4d9   : > { %v2541_v21 = vpop.permute.xlu1 %2540  ;;  %v3029_v59 = vsel %vm13949_vm4, %v2997_v52, %v11063_v37  ;;  %v3030_v35 = vsel %vm13949_vm4, %v2998_v54, %v2317_v39 }
 0x4da   : > { %v3062_v53 = vsel %vm13952_vm8, %v3029_v59, %v11004_v43  ;;  %vm13959_vm8 = vcmask 228352   ;;  %v3063_v52 = vsel %vm13960_vm6, %v3030_v35, %v11088_v7  ;;  %vm13968_vm6 = vcmask 31744  }
 0x4db   : > { %v3095_v8 = vsel %vm13954_vm3, %v3062_v53, %v2541_v21  ;;  %vm13961_vm3 = vcmask 261120  }
 0x4dc   : > { %v2769_v61 = vpop.permute.xlu0 %2768  ;;  %v3128_v43 = vsel %vm13958_vm0, %v3095_v8, %v2669_v48  ;;  %vm13965_vm0 = vmmov %vm13959_vm8 }
 0x4dd   : > { %v2191_v0 = vpop.permute.xlu1 %2190  ;;  %v3161_v21 = vsel %vm13959_vm8, %v3128_v43, %v11081_v19  ;;  %vm13966_vm4 = vmmov %vm13961_vm3 }
 0x4e0   : > { %v2897_v58 = vpop.permute.xlu0 %2896 }
 0x4e1   : > { %v11143_v42 = vpop.permute.xlu1 %2770 }
 0x4e4   : > { %v11149_v20 = vpop.permute.xlu0 %2418 }
 0x4e5   : > { %v11151_v63 = vpop.permute.xlu1 %2420  ;;  %v7904_v31 = vpop.f32.mrb[42].mxu1 }
 0x4e6   : > { %v11156_v32 = vadd.f32 %v7904_v31, %v10601_v16  ;;  %v3421_v26 = vpop.f32.mrb[43].mxu1 }
 0x4e7   : > { %v11159_v60 = vadd.f32 %v10601_v16, %v3421_v26 }
 0x4e8   : > { %13950 = vst [vmem:[#allocation67_spill] sm:$0xff] %v11156_v32  ;;  %v11161_v1 = vpop.permute.xlu0 %2546  ;;  %v13558_v23 = vmax.f32 %v11156_v32, 0.0 }
 0x4e9   : > { %13951 = vst [vmem:[#allocation68_spill] sm:$0xff] %v11159_v60  ;;  %v13557_v45 = vmax.f32 %v11159_v60, 0.0  ;;  %v11170_v37 = vpop.permute.xlu1 %2070 }
 0x4eb   : > { %7952 = vmatprep.mubr.msk.f32.mxu0 %vm13955_vm9, %v13557_v45  ;;  %vm13962_vm9 = vcmask 293888  }
 0x4ec   : > { %7953 = vmatmul.mubr.msk.f32.gmra.mrb[42].mxu0 %vm13956_vm5, %v13558_v23  ;;  %v11182_v9 = vpop.permute.xlu0 %2196  ;;  %vm13963_vm5 = vcmask 162816   ;;  %vm13967_vm8 = vmmov %vm13962_vm9 }
 0x4ed   : > { %v2673_v4 = vpop.permute.xlu1 %2672  ;;  %v3096_v2 = vsel %vm13963_vm5, %v3063_v52, %v11100_v49  ;;  %v2967_v49 = vsel %vm13968_vm6, %v10567_v14, %v11030_v56  ;;  %v1800_v14 = vsel %vm10868_vm14, %v10709_v10, %v10666_v29  ;;  %vm13973_vm5 = vcmask 130048  }
 0x4ee   : > { %vm13993_vm14 = vcmask 261120  }
 0x4f0   : > { %v2895_v13 = vpop.permute.xlu0 %2894 }
 0x4f1   : > { %v3194_v31 = vsel %vm13961_vm3, %v3161_v21, %v2895_v13  ;;  %v2323_v59 = vpop.permute.xlu1 %2322  ;;  %vm13969_vm3 = vcmask 64512  }
 0x4f2   : > { %7924 = vmatmul.mubr.msk.f32.gmra.mrb[56].mxu1 %vm13962_vm9, %v3194_v31  ;;  %v2999_v35 = vsel %vm13969_vm3, %v2967_v49, %v2191_v0  ;;  %vm13970_vm9 = vcmask 97280  }
 0x4f4   : > { %v2671_v26 = vpop.permute.xlu0 %2670 }
 0x4f5   : > { %v3129_v48 = vsel %vm13964_vm15, %v3096_v2, %v2671_v26  ;;  %v2069_v15 = vpop.permute.xlu1 %2068  ;;  %vm13974_vm15 = vmmov %vm13968_vm6 }
 0x4f6   : > { %v3162_v39 = vsel %vm13965_vm0, %v3129_v48, %v2769_v61  ;;  %vm13975_vm0 = vcmask 162816  }
 0x4f7   : > { %v3195_v19 = vsel %vm13966_vm4, %v3162_v39, %v2897_v58  ;;  %v3031_v58 = vsel %vm13970_vm9, %v2999_v35, %v11132_v41  ;;  %v2968_v41 = vsel %vm13974_vm15, %v1800_v14, %v11138_v40  ;;  %vm13976_vm4 = vmmov %vm13968_vm6 }
 0x4f8   : > { %7926 = vmatprep.mubr.msk.f32.mxu1 %vm13967_vm8, %v3195_v19  ;;  %v2321_v53 = vpop.permute.xlu0 %2320  ;;  %v3064_v56 = vsel %vm13973_vm5, %v3031_v58, %v11090_v24  ;;  %vm13977_vm8 = vmmov %vm13976_vm4  ;;  %vm13981_vm5 = vcmask 97280  }
 0x4f9   : > { %v11200_v7 = vpop.permute.xlu1 %2680  ;;  %vm13978_vm6 = vmmov %vm13969_vm3  ;;  %vm13979_vm3 = vcmask 195584  }
 0x4fa   : > { %v3000_v10 = vsel %vm13978_vm6, %v2968_v41, %v11121_v55  ;;  %vm13980_vm9 = vmmov %vm13976_vm4 }
 0x4fb   : > { %v2969_v40 = vsel %vm13980_vm9, %v10696_v6, %v11109_v25  ;;  %vm13982_vm15 = vmmov %vm13978_vm6  ;;  %vm13988_vm9 = vcmask 162816  }
 0x4fc   : > { %v2773_v33 = vpop.permute.xlu0 %2772  ;;  %vm13986_vm6 = vmmov %vm13981_vm5 }
 0x4fd   : > { %v2545_v8 = vpop.permute.xlu1 %2544 }
 0x4fe   : > { %v3097_v39 = vsel %vm13975_vm0, %v3064_v56, %v2545_v8  ;;  %v3032_v8 = vsel %vm13981_vm5, %v3000_v10, %v2321_v53  ;;  %vm13983_vm0 = vcmask 228352   ;;  %vm13989_vm5 = vcmask 195584  }
 0x4ff   : > { %v3130_v24 = vsel %vm13979_vm3, %v3097_v39, %v2673_v4  ;;  %vm13987_vm3 = vcmask 293888  }
 0x500   : > { %v2901_v54 = vpop.permute.xlu0 %2900 }
 0x501   : > { %v2195_v43 = vpop.permute.xlu1 %2194 }
 0x502   : > { %v3001_v35 = vsel %vm13982_vm15, %v2969_v40, %v2195_v43 }
 0x503   : > { %v3033_v4 = vsel %vm13986_vm6, %v3001_v35, %v2323_v59  ;;  %vm13994_vm6 = vmmov %vm13987_vm3 }
 0x504   : > { %v2423_v21 = vpop.permute.xlu0 %2422 }
 0x505   : > { %v2775_v13 = vpop.permute.xlu1 %2774  ;;  %v7907_v61 = vpop.f32.mrb[44].mxu1 }
 0x506   : > { %v11209_v52 = vadd.f32 %v7907_v61, %v10601_v16  ;;  %v3431_v31 = vpop.f32.mrb[45].mxu1  ;;  %v3163_v61 = vsel %vm13983_vm0, %v3130_v24, %v11143_v42 }
 0x507   : > { %v11212_v2 = vadd.f32 %v10601_v16, %v3431_v31 }
 0x508   : > { %13971 = vst [vmem:[#allocation69_spill] sm:$0xff] %v11209_v52  ;;  %v2551_v26 = vpop.permute.xlu0 %2550  ;;  %v13556_v19 = vmax.f32 %v11209_v52, 0.0 }
 0x509   : > { %13972 = vst [vmem:[#allocation70_spill] sm:$0xff] %v11212_v2  ;;  %v13555_v0 = vmax.f32 %v11212_v2, 0.0  ;;  %v2425_v48 = vpop.permute.xlu1 %2424 }
 0x50b   : > { %7955 = vmatprep.mubr.msk.f32.mxu0 %vm13976_vm4, %v13555_v0  ;;  %vm13984_vm4 = vcmask 130048  }
 0x50c   : > { %7956 = vmatmul.mubr.msk.f32.gmra.mrb[44].mxu0 %vm13977_vm8, %v13556_v19  ;;  %v2679_v29 = vpop.permute.xlu0 %2678  ;;  %v3065_v31 = vsel %vm13984_vm4, %v3032_v8, %v11149_v20  ;;  %vm13985_vm8 = vcmask 261120   ;;  %vm13990_vm15 = vmmov %vm13984_vm4 }
 0x50d   : > { %v2677_v49 = vpop.permute.xlu1 %2676  ;;  %v3098_v6 = vsel %vm13988_vm9, %v3065_v31, %v11161_v1  ;;  %v3066_v42 = vsel %vm13990_vm15, %v3033_v4, %v11151_v63  ;;  %vm13991_vm4 = vmmov %vm13988_vm9  ;;  %v1802_v1 = vsel %vm10964_vm12, %v10846_v28, %v10798_v47  ;;  %vm13996_vm9 = vcmask 31744  }
 0x50e   : > { %v2970_v63 = vsel %vm13996_vm9, %v1802_v1, %v2069_v15  ;;  %vm13998_vm15 = vmmov %vm13996_vm9  ;;  %vm14005_vm9 = vcmask 162816   ;;  %v14030_v1 = vld [vmem:[#allocation9_spill] sm:$0xff]  ;;  %vm13591_vm12 = vcmask 1014784  }
 0x510   : > { %v2899_v58 = vpop.permute.xlu0 %2898 }
 0x511   : > { %v3196_v55 = vsel %vm13985_vm8, %v3163_v61, %v2899_v58  ;;  %v2327_v14 = vpop.permute.xlu1 %2326  ;;  %vm13992_vm8 = vmmov %vm13989_vm5 }
 0x512   : > { %7927 = vmatmul.mubr.msk.f32.gmra.mrb[58].mxu1 %vm13987_vm3, %v3196_v55  ;;  %vm13995_vm3 = vmmov %vm13983_vm0 }
 0x514   : > { %v2675_v25 = vpop.permute.xlu0 %2674 }
 0x515   : > { %v3131_v53 = vsel %vm13989_vm5, %v3098_v6, %v2675_v25  ;;  %v2549_v43 = vpop.permute.xlu1 %2548  ;;  %vm13997_vm5 = vmmov %vm13993_vm14 }
 0x516   : > { %v3164_v56 = vsel %vm13983_vm0, %v3131_v53, %v2773_v33  ;;  %v3099_v20 = vsel %vm13991_vm4, %v3066_v42, %v2549_v43  ;;  %vm14000_vm0 = vcmask 64512  }
 0x517   : > { %v3132_v41 = vsel %vm13992_vm8, %v3099_v20, %v2677_v49  ;;  %v3197_v59 = vsel %vm13993_vm14, %v3164_v56, %v2901_v54  ;;  %v2971_v49 = vsel %vm13998_vm15, %v10833_v5, %v11170_v37  ;;  %vm13999_vm14 = vmmov %vm13994_vm6  ;;  %vm14002_vm8 = vcmask 97280   ;;  %v14022_v20 = vld [vmem:[#allocation5_spill] sm:$0xff] }
 0x518   : > { %7929 = vmatprep.mubr.msk.f32.mxu1 %vm13994_vm6, %v3197_v59  ;;  %v3165_v39 = vsel %vm13995_vm3, %v3132_v41, %v2775_v13  ;;  %v2903_v10 = vpop.permute.xlu0 %2902  ;;  %vm14001_vm4 = vmmov %vm14000_vm0  ;;  %vm14004_vm3 = vcmask 130048   ;;  %v14024_v41 = vld [vmem:[#allocation6_spill] sm:$0xff]  ;;  %v14028_v59 = vld [vmem:[#allocation8_spill] sm:$0xff] }
 0x519   : > { %v3198_v33 = vsel %vm13997_vm5, %v3165_v39, %v2903_v10  ;;  %v2199_v24 = vpop.permute.xlu1 %2198  ;;  %v3002_v47 = vsel %vm14001_vm4, %v2970_v63, %v11182_v9  ;;  %vm14003_vm6 = vmmov %vm14002_vm8  ;;  %vm14006_vm5 = vcmask 195584   ;;  %vm14010_vm4 = vcmask 228352   ;;  %v14034_v39 = vld [vmem:[#allocation11_spill] sm:$0xff]  ;;  %v14036_v10 = vld [vmem:[#allocation12_spill] sm:$0xff] }
 0x51a   : > { %7930 = vmatmul.mubr.msk.f32.gmra.mrb[60].mxu1 %vm13999_vm14, %v3198_v33  ;;  %v3003_v54 = vsel %vm14000_vm0, %v2971_v49, %v2199_v24  ;;  %vm14007_vm15 = vmmov %vm14004_vm3  ;;  %v14037_v63 = vld [vmem:[#allocation13_spill] sm:$0xff]  ;;  %v14039_v24 = vld [vmem:[#allocation14_spill] sm:$0xff] }
 0x51b   : > { %v3035_v15 = vsel %vm14003_vm6, %v3003_v54, %v2327_v14  ;;  %vm14008_vm14 = vmmov %vm14005_vm9  ;;  %vm14012_vm6 = vcmask 261120   ;;  %v14041_v54 = vld [vmem:[#allocation15_spill] sm:$0xff] }
 0x51c   : > { %v2325_v28 = vpop.permute.xlu0 %2324  ;;  %v3068_v31 = vsel %vm14007_vm15, %v3035_v15, %v2425_v48  ;;  %vm14009_vm0 = vmmov %vm14006_vm5  ;;  %vm14018_vm15 = vcmask 97280   ;;  %v14045_v15 = vld [vmem:[#allocation17_spill] sm:$0xff] }
 0x51d   : > { %v3034_v13 = vsel %vm14002_vm8, %v3002_v47, %v2325_v28  ;;  %v2779_v40 = vpop.permute.xlu1 %2778  ;;  %vm14011_vm8 = vmmov %vm14010_vm4  ;;  %v155_v47 = vld [vmem:[%s13379_s1 + $0x48] sm:$0xff]  ;;  %v156_v28 = vld [vmem:[%s13379_s1 + $0x50] sm:$0xf] }
 0x51e   : > { %v3067_v8 = vsel %vm14004_vm3, %v3034_v13, %v2423_v21  ;;  %vm14013_vm3 = vmmov %vm14012_vm6  ;;  %v8233_v13 = vpack.c.bf16 %v156_v28, %v155_v47 }
 0x51f   : > { %v11273_v35 = vpop.f32.mrb[32].mxu0  ;;  %v3100_v61 = vsel %vm14005_vm9, %v3067_v8, %v2551_v26  ;;  %vm14015_vm9 = vcmask 293888  }
 0x520   : > { %v11276_v5 = vpop.f32.mrb[33].mxu0  ;;  %v2777_v37 = vpop.permute.xlu0 %2776  ;;  %v3133_v58 = vsel %vm14006_vm5, %v3100_v61, %v2679_v29  ;;  %vm14017_vm5 = vmmov %vm14015_vm9  ;;  %8235 = vmatprep.subr.msk.bf16.mxu0 %vm8890_vm2, %v8233_v13 }
 0x521   : > { %v2553_v9 = vpop.permute.xlu1 %2552  ;;  %v3166_v14 = vsel %vm14010_vm4, %v3133_v58, %v2777_v37  ;;  %8238 = vmatpush3.bf16.msk.msra.mxu0 %vm8890_vm2, %v8233_v13  ;;  %vm14054_vm2 = vcmask 31744   ;;  %v14085_v13 = vld [vmem:[#allocation34_spill] sm:$0xff] }
 0x522   : > { %v3101_v55 = vsel %vm14008_vm14, %v3068_v31, %v2553_v9  ;;  %vm14019_vm14 = vcmask 31744   ;;  %v14050_v9 = vld [vmem:[#allocation18_spill] sm:$0xff] }
 0x523   : > { %v3134_v4 = vsel %vm14009_vm0, %v3101_v55, %v11200_v7  ;;  %vm14020_vm0 = vmmov %vm14018_vm15  ;;  %v14052_v55 = vld [vmem:[#allocation19_spill] sm:$0xff] }
 0x524   : > { %v2905_v21 = vpop.permute.xlu0 %2904  ;;  %v3167_v6 = vsel %vm14011_vm8, %v3134_v4, %v2779_v40  ;;  %vm14021_vm4 = vmmov %vm14019_vm14  ;;  %v14043_v40 = vld [vmem:[#allocation16_spill] sm:$0xff] }
 0x525   : > { %v3199_v26 = vsel %vm14012_vm6, %v3166_v14, %v2905_v21  ;;  %v2907_v25 = vpop.permute.xlu1 %2906  ;;  %v7910_v53 = vpop.f32.mrb[46].mxu1  ;;  %vm14023_vm8 = vmmov %vm14020_vm0  ;;  %v14055_v21 = vld [vmem:[#allocation20_spill] sm:$0xff] }
 0x526   : > { %v3200_v42 = vsel %vm14013_vm3, %v3167_v6, %v2907_v25  ;;  %v11288_v29 = vadd.f32 %v7910_v53, %v10601_v16  ;;  %v3441_v48 = vpop.f32.mrb[47].mxu1  ;;  %7932 = vmatprep.mubr.msk.f32.mxu1 %vm14015_vm9, %v3199_v26  ;;  %vm14025_vm6 = vmmov %vm14020_vm0  ;;  %v14060_v6 = vld [vmem:[#allocation22_spill] sm:$0xff]  ;;  %v14062_v26 = vld [vmem:[#allocation23_spill] sm:$0xff] }
 0x527   : > { %v11292_v43 = vadd.f32 %v10601_v16, %v3441_v48  ;;  %7933 = vmatmul.mubr.msk.f32.gmra.mrb[62].mxu1 %vm14017_vm5, %v3200_v42  ;;  %vm14027_vm3 = vmmov %vm14020_vm0  ;;  %v14064_v25 = vld [vmem:[#allocation24_spill] sm:$0xff]  ;;  %v14065_v53 = vld [vmem:[#allocation25_spill] sm:$0xff] }
 0x528   : > { %14014 = vst [vmem:[#allocation71_spill] sm:$0xff] %v11288_v29  ;;  %7989 = vmatprep.mubr.msk.f32.mxu1 %vm14018_vm15, %v9066_v36  ;;  %v13554_v56 = vmax.f32 %v11288_v29, 0.0  ;;  %v14026_v36 = vld [vmem:[#allocation7_spill] sm:$0xff]  ;;  %vm14029_vm9 = vmmov %vm14020_vm0  ;;  %v14067_v42 = vld [vmem:[#allocation26_spill] sm:$0xff] }
 0x529   : > { %14016 = vst [vmem:[#allocation72_spill] sm:$0xff] %v11292_v43  ;;  %v13552_v7 = vmax.f32 %v11292_v43, 0.0  ;;  %vm14031_vm5 = vmmov %vm14020_vm0  ;;  %v14069_v48 = vld [vmem:[#allocation27_spill] sm:$0xff]  ;;  %v4522_v29 = vld [vmem:[#allocation3 + $0x8] sm:$0xff] }
 0x52a   : > { %vm14033_vm15 = vmmov %vm14020_vm0 }
 0x52b   : > { %7958 = vmatprep.mubr.msk.f32.mxu0 %vm14019_vm14, %v13552_v7  ;;  %7990 = vmatmul.mubr.msk.f32.vlgmr.msra.gmra.mrb[64].mxu1 %vm14020_vm0, %v9072_v38  ;;  %v14032_v38 = vld [vmem:[#allocation10_spill] sm:$0xff]  ;;  %vm14035_vm14 = vmmov %vm14020_vm0 }
 0x52c   : > { %7959 = vmatmul.mubr.msk.f32.gmra.mrb[46].mxu0 %vm14021_vm4, %v13554_v56  ;;  %7992 = vmatprep.mubr.msk.f32.mxu1 %vm14023_vm8, %v14022_v20  ;;  %vm14038_vm4 = vmmov %vm14020_vm0  ;;  %v14071_v20 = vld [vmem:[#allocation28_spill] sm:$0xff] }
 0x52d   : > { %vm14040_vm8 = vmmov %vm14020_vm0 }
 0x52f   : > { %7993 = vmatmul.mubr.msk.f32.gmra.mrb[66].mxu1 %vm14025_vm6, %v14024_v41  ;;  %vm14042_vm6 = vmmov %vm14020_vm0  ;;  %v14073_v41 = vld [vmem:[#allocation29_spill] sm:$0xff] }
 0x530   : > { %7995 = vmatprep.mubr.msk.f32.mxu1 %vm14027_vm3, %v14026_v36  ;;  %vm14044_vm3 = vmmov %vm14020_vm0 }
 0x533   : > { %7996 = vmatmul.mubr.msk.f32.gmra.mrb[68].mxu1 %vm14029_vm9, %v14028_v59  ;;  %vm14046_vm9 = vmmov %vm14020_vm0  ;;  %v14075_v59 = vld [vmem:[#allocation30_spill] sm:$0xff] }
 0x534   : > { %7998 = vmatprep.mubr.msk.f32.mxu1 %vm14031_vm5, %v14030_v1  ;;  %vm14051_vm5 = vmmov %vm14020_vm0 }
 0x537   : > { %7999 = vmatmul.mubr.msk.f32.gmra.mrb[70].mxu1 %vm14033_vm15, %v14032_v38  ;;  %vm14053_vm15 = vmmov %vm14020_vm0  ;;  %v14077_v38 = vld [vmem:[#allocation31_spill] sm:$0xff] }
 0x538   : > { %8001 = vmatprep.mubr.msk.f32.mxu1 %vm14035_vm14, %v14034_v39  ;;  %vm14056_vm14 = vmmov %vm14020_vm0  ;;  %v14079_v39 = vld [vmem:[#allocation32_spill] sm:$0xff] }
 0x53b   : > { %8002 = vmatmul.mubr.msk.f32.gmra.mrb[72].mxu1 %vm14020_vm0, %v14036_v10  ;;  %vm14057_vm0 = vmmov %vm14054_vm2  ;;  %v14081_v10 = vld [vmem:[#allocation33_spill] sm:$0xff] }
 0x53c   : > { %8004 = vmatprep.mubr.msk.f32.mxu1 %vm14038_vm4, %v14037_v63  ;;  %vm14059_vm4 = vmmov %vm14044_vm3 }
 0x53f   : > { %v11325_v33 = vpop.f32.mrb[34].mxu0  ;;  %8005 = vmatmul.mubr.msk.f32.gmra.mrb[74].mxu1 %vm14040_vm8, %v14039_v24  ;;  %vm14061_vm8 = vmmov %vm14044_vm3  ;;  %v8816_v24 = vld [vmem:[%s13379_s1 + $0x7a] ss:$0 sm:$0xff] }
 0x540   : > { %v11329_v49 = vpop.f32.mrb[35].mxu0  ;;  %8007 = vmatprep.mubr.msk.f32.mxu1 %vm14042_vm6, %v14041_v54  ;;  %vm14063_vm6 = vmmov %vm14044_vm3 }
 0x543   : > { %8008 = vmatmul.mubr.msk.f32.gmra.mrb[76].mxu1 %vm14044_vm3, %v14043_v40 }
 0x544   : > { %8010 = vmatprep.mubr.msk.f32.mxu1 %vm14046_vm9, %v14045_v15  ;;  %vm14066_vm9 = vmmov %vm14044_vm3 }
 0x545   : > { %v7913_v61 = vpop.f32.mrb[48].mxu1 }
 0x546   : > { %v11348_v37 = vadd.f32 %v7913_v61, %v10601_v16  ;;  %v3451_v58 = vpop.f32.mrb[49].mxu1 }
 0x547   : > { %v11351_v31 = vadd.f32 %v10601_v16, %v3451_v58  ;;  %8011 = vmatmul.mubr.msk.f32.gmra.mrb[78].mxu1 %vm14051_vm5, %v14050_v9  ;;  %v14058_v16 = vld [vmem:[#allocation21_spill] sm:$0xff]  ;;  %vm14068_vm5 = vmmov %vm14044_vm3 }
 0x548   : > { %14048 = vst [vmem:[#allocation5_spill] sm:$0xff] %v11348_v37  ;;  %8013 = vmatprep.mubr.msk.f32.mxu1 %vm14053_vm15, %v14052_v55  ;;  %v13550_v14 = vmax.f32 %v11348_v37, 0.0  ;;  %vm14070_vm15 = vmmov %vm14044_vm3 }
 0x549   : > { %14049 = vst [vmem:[#allocation6_spill] sm:$0xff] %v11351_v31  ;;  %v13549_v4 = vmax.f32 %v11351_v31, 0.0 }
 0x54b   : > { %7961 = vmatprep.mubr.msk.f32.mxu0 %vm14054_vm2, %v13549_v4  ;;  %8014 = vmatmul.mubr.msk.f32.gmra.mrb[80].mxu1 %vm14056_vm14, %v14055_v21  ;;  %vm14072_vm2 = vmmov %vm14044_vm3 }
 0x54c   : > { %7962 = vmatmul.mubr.msk.f32.gmra.mrb[48].mxu0 %vm14057_vm0, %v13550_v14  ;;  %8016 = vmatprep.mubr.msk.f32.mxu1 %vm14059_vm4, %v14058_v16  ;;  %vm14074_vm14 = vmmov %vm14072_vm2  ;;  %v11502_v14 = vld [vmem:[%s13379_s1 + $0x7c] ss:$0 sm:$0xff] }
 0x54d   : > { %vm14076_vm0 = vmmov %vm14072_vm2 }
 0x54e   : > { %vm14078_vm4 = vmmov %vm14076_vm0 }
 0x54f   : > { %8017 = vmatmul.mubr.msk.f32.gmra.mrb[82].mxu1 %vm14061_vm8, %v14060_v6  ;;  %vm14080_vm8 = vmmov %vm14076_vm0 }
 0x550   : > { %8019 = vmatprep.mubr.msk.f32.mxu1 %vm14063_vm6, %v14062_v26  ;;  %vm14082_vm6 = vmmov %vm14076_vm0 }
 0x553   : > { %8020 = vmatmul.mubr.msk.f32.gmra.mrb[84].mxu1 %vm14044_vm3, %v14064_v25  ;;  %vm14086_vm3 = vmmov %vm14076_vm0 }
 0x554   : > { %8022 = vmatprep.mubr.msk.f32.mxu1 %vm14066_vm9, %v14065_v53  ;;  %vm14087_vm9 = vcmask 31744  }
 0x557   : > { %8023 = vmatmul.mubr.msk.f32.gmra.mrb[86].mxu1 %vm14068_vm5, %v14067_v42  ;;  %vm14088_vm5 = vmmov %vm14087_vm9 }
 0x558   : > { %8025 = vmatprep.mubr.msk.f32.mxu1 %vm14070_vm15, %v14069_v48  ;;  %vm14091_vm15 = vmmov %vm14088_vm5 }
 0x55b   : > { %8026 = vmatmul.mubr.msk.f32.gmra.mrb[88].mxu1 %vm14072_vm2, %v14071_v20  ;;  %vm14092_vm2 = vmmov %vm14088_vm5 }
 0x55c   : > { %8028 = vmatprep.mubr.msk.f32.mxu1 %vm14074_vm14, %v14073_v41  ;;  %vm14095_vm14 = vmmov %vm14092_vm2 }
 0x55f   : > { %v11385_v36 = vpop.f32.mrb[36].mxu0  ;;  %8029 = vmatmul.mubr.msk.f32.gmra.mrb[90].mxu1 %vm14076_vm0, %v14075_v59  ;;  %vm14096_vm0 = vmmov %vm14092_vm2 }
 0x560   : > { %v11389_v1 = vpop.f32.mrb[37].mxu0  ;;  %8031 = vmatprep.mubr.msk.f32.mxu1 %vm14078_vm4, %v14077_v38  ;;  %vm14099_vm4 = vmmov %vm14096_vm0 }
 0x563   : > { %8032 = vmatmul.mubr.msk.f32.gmra.mrb[92].mxu1 %vm14080_vm8, %v14079_v39  ;;  %vm14100_vm8 = vmmov %vm14096_vm0 }
 0x564   : > { %8034 = vmatprep.mubr.msk.f32.mxu1 %vm14082_vm6, %v14081_v10  ;;  %vm14103_vm6 = vmmov %vm14096_vm0 }
 0x565   : > { %v7916_v63 = vpop.f32.mrb[50].mxu1 }
 0x566   : > { %v11400_v54 = vadd.f32 %v8816_v24, %v7916_v63  ;;  %v3461_v47 = vpop.f32.mrb[51].mxu1 }
 0x567   : > { %v11402_v28 = vadd.f32 %v8816_v24, %v3461_v47  ;;  %8035 = vmatmul.mubr.msk.f32.gmra.mrb[94].mxu1 %vm14086_vm3, %v14085_v13  ;;  %vm14104_vm3 = vmmov %vm14096_vm0 }
 0x568   : > { %14083 = vst [vmem:[#allocation7_spill] sm:$0xff] %v11400_v54  ;;  %v13546_v15 = vmax.f32 %v11400_v54, 0.0 }
 0x569   : > { %14084 = vst [vmem:[#allocation8_spill] sm:$0xff] %v11402_v28  ;;  %v13545_v40 = vmax.f32 %v11402_v28, 0.0 }
 0x56b   : > { %7964 = vmatprep.mubr.msk.f32.mxu0 %vm14087_vm9, %v13545_v40  ;;  %vm14107_vm9 = vmmov %vm14096_vm0 }
 0x56c   : > { %7965 = vmatmul.mubr.msk.f32.gmra.mrb[50].mxu0 %vm14088_vm5, %v13546_v15  ;;  %vm14108_vm5 = vmmov %vm14096_vm0 }
 0x57f   : > { %v11414_v8 = vpop.f32.mrb[38].mxu0 }
 0x580   : > { %v11416_v61 = vpop.f32.mrb[39].mxu0 }
 0x585   : > { %v7919_v58 = vpop.f32.mrb[52].mxu1 }
 0x586   : > { %v11418_v9 = vadd.f32 %v8816_v24, %v7919_v58  ;;  %v3471_v55 = vpop.f32.mrb[53].mxu1 }
 0x587   : > { %v11420_v21 = vadd.f32 %v8816_v24, %v3471_v55 }
 0x588   : > { %14089 = vst [vmem:[#allocation9_spill] sm:$0xff] %v11418_v9  ;;  %v13542_v6 = vmax.f32 %v11418_v9, 0.0 }
 0x589   : > { %14090 = vst [vmem:[#allocation10_spill] sm:$0xff] %v11420_v21  ;;  %v13541_v16 = vmax.f32 %v11420_v21, 0.0 }
 0x58b   : > { %7967 = vmatprep.mubr.msk.f32.mxu0 %vm14091_vm15, %v13541_v16  ;;  %vm14111_vm15 = vmmov %vm14096_vm0 }
 0x58c   : > { %7968 = vmatmul.mubr.msk.f32.gmra.mrb[52].mxu0 %vm14092_vm2, %v13542_v6  ;;  %vm14112_vm2 = vmmov %vm14096_vm0 }
 0x59f   : > { %v11430_v26 = vpop.f32.mrb[40].mxu0 }
 0x5a0   : > { %v11432_v25 = vpop.f32.mrb[41].mxu0 }
 0x5a5   : > { %v7922_v53 = vpop.f32.mrb[54].mxu1 }
 0x5a6   : > { %v11434_v42 = vadd.f32 %v8816_v24, %v7922_v53  ;;  %v3481_v48 = vpop.f32.mrb[55].mxu1 }
 0x5a7   : > { %v11436_v20 = vadd.f32 %v8816_v24, %v3481_v48 }
 0x5a8   : > { %14093 = vst [vmem:[#allocation11_spill] sm:$0xff] %v11434_v42  ;;  %v13540_v59 = vmax.f32 %v11434_v42, 0.0 }
 0x5a9   : > { %14094 = vst [vmem:[#allocation12_spill] sm:$0xff] %v11436_v20  ;;  %v13539_v41 = vmax.f32 %v11436_v20, 0.0 }
 0x5ab   : > { %7970 = vmatprep.mubr.msk.f32.mxu0 %vm14095_vm14, %v13539_v41  ;;  %vm14113_vm14 = vcmask 97280  }
 0x5ac   : > { %7971 = vmatmul.mubr.msk.f32.gmra.mrb[54].mxu0 %vm14096_vm0, %v13540_v59  ;;  %vm14114_vm0 = vmmov %vm14113_vm14 }
 0x5bf   : > { %v11446_v38 = vpop.f32.mrb[42].mxu0 }
 0x5c0   : > { %v11448_v39 = vpop.f32.mrb[43].mxu0 }
 0x5c5   : > { %v7925_v10 = vpop.f32.mrb[56].mxu1 }
 0x5c6   : > { %v11450_v63 = vadd.f32 %v8816_v24, %v7925_v10  ;;  %v3491_v47 = vpop.f32.mrb[57].mxu1 }
 0x5c7   : > { %v11452_v13 = vadd.f32 %v8816_v24, %v3491_v47 }
 0x5c8   : > { %14097 = vst [vmem:[#allocation13_spill] sm:$0xff] %v11450_v63  ;;  %v13544_v55 = vmax.f32 %v11450_v63, 0.0 }
 0x5c9   : > { %14098 = vst [vmem:[#allocation14_spill] sm:$0xff] %v11452_v13  ;;  %v13543_v58 = vmax.f32 %v11452_v13, 0.0 }
 0x5cb   : > { %7973 = vmatprep.mubr.msk.f32.mxu0 %vm14099_vm4, %v13543_v58  ;;  %vm14115_vm4 = vmmov %vm14114_vm0 }
 0x5cc   : > { %7974 = vmatmul.mubr.msk.f32.gmra.mrb[56].mxu0 %vm14100_vm8, %v13544_v55  ;;  %vm14116_vm8 = vmmov %vm14114_vm0 }
 0x5df   : > { %v11462_v53 = vpop.f32.mrb[44].mxu0 }
 0x5e0   : > { %v11464_v48 = vpop.f32.mrb[45].mxu0 }
 0x5e5   : > { %v7928_v10 = vpop.f32.mrb[58].mxu1 }
 0x5e6   : > { %v11466_v41 = vadd.f32 %v8816_v24, %v7928_v10  ;;  %v3501_v47 = vpop.f32.mrb[59].mxu1 }
 0x5e7   : > { %v11468_v59 = vadd.f32 %v8816_v24, %v3501_v47 }
 0x5e8   : > { %14101 = vst [vmem:[#allocation15_spill] sm:$0xff] %v11466_v41  ;;  %v13548_v6 = vmax.f32 %v11466_v41, 0.0 }
 0x5e9   : > { %14102 = vst [vmem:[#allocation16_spill] sm:$0xff] %v11468_v59  ;;  %v13547_v16 = vmax.f32 %v11468_v59, 0.0 }
 0x5eb   : > { %7976 = vmatprep.mubr.msk.f32.mxu0 %vm14103_vm6, %v13547_v16  ;;  %vm14117_vm6 = vmmov %vm14114_vm0 }
 0x5ec   : > { %7977 = vmatmul.mubr.msk.f32.gmra.mrb[58].mxu0 %vm14104_vm3, %v13548_v6  ;;  %vm14118_vm3 = vmmov %vm14114_vm0 }
 0x5ed   : > { %v7931_v58 = vpop.f32.mrb[60].mxu1 }
 0x5ee   : > { %v11478_v55 = vadd.f32 %v8816_v24, %v7931_v58  ;;  %v3511_v10 = vpop.f32.mrb[61].mxu1 }
 0x5ef   : > { %v11480_v40 = vadd.f32 %v8816_v24, %v3511_v10  ;;  %v11495_v10 = vld [vmem:[%s13379_s1 + $0x7b] ss:$0 sm:$0xff] }
 0x5f0   : > { %14105 = vst [vmem:[#allocation17_spill] sm:$0xff] %v11478_v55  ;;  %v13553_v15 = vmax.f32 %v11478_v55, 0.0  ;;  %v3747_v34 = vadd.f32 %v11325_v33, %v11495_v10 }
 0x5f1   : > { %14106 = vst [vmem:[#allocation4_spill] sm:$0xff] %v11480_v40  ;;  %v13551_v47 = vmax.f32 %v11480_v40, 0.0  ;;  %v14188_v40 = vld [vmem:[#allocation47_spill] sm:$0xff] }
 0x5f3   : > { %7979 = vmatprep.mubr.msk.f32.mxu0 %vm14107_vm9, %v13551_v47  ;;  %vm14119_vm9 = vmmov %vm14114_vm0 }
 0x5f4   : > { %7980 = vmatmul.mubr.msk.f32.gmra.mrb[60].mxu0 %vm14108_vm5, %v13553_v15  ;;  %vm14120_vm5 = vmmov %vm14114_vm0 }
 0x5fa   : > { %v7934_v16 = vpop.f32.mrb[62].mxu1 }
 0x5fb   : > { %v11490_v6 = vadd.f32 %v8816_v24, %v7934_v16  ;;  %v3521_v58 = vpop.f32.mrb[63].mxu1  ;;  %v3737_v16 = vadd.f32 %v11273_v35, %v11495_v10 }
 0x5fc   : > { %v11497_v4 = vadd.f32 %v8816_v24, %v3521_v58  ;;  %v3732_v24 = vadd.f32 %v11495_v10, %v11276_v5 }
 0x5fd   : > { %14109 = vst [vmem:[#allocation18_spill] sm:$0xff] %v11490_v6  ;;  %v13563_v15 = vmax.f32 %v11490_v6, 0.0 }
 0x5fe   : > { %14110 = vst [vmem:[#allocation19_spill] sm:$0xff] %v11497_v4  ;;  %v13562_v47 = vmax.f32 %v11497_v4, 0.0  ;;  %v7991_v7 = vpop.f32.mrb[64].mxu1 }
 0x5ff   : > { %v3969_v56 = vadd.f32 %v7991_v7, %v11502_v14  ;;  %v11509_v0 = vpop.f32.mrb[46].mxu0  ;;  %v3963_v19 = vpop.f32.mrb[65].mxu1 }
 0x600   : > { %v3964_v58 = vadd.f32 %v11502_v14, %v3963_v19  ;;  %v11514_v45 = vpop.f32.mrb[47].mxu0  ;;  %7982 = vmatprep.mubr.msk.f32.mxu0 %vm14111_vm15, %v13562_v47  ;;  %v3742_v19 = vadd.f32 %v11495_v10, %v11329_v49  ;;  %vm14121_vm15 = vmmov %vm14114_vm0 }
 0x601   : > { %v4123_v23 = vmul.f32 %v3969_v56, %v3737_v16  ;;  %7983 = vmatmul.mubr.msk.f32.gmra.mrb[62].mxu0 %vm14112_vm2, %v13563_v15  ;;  %vm14122_vm2 = vmmov %vm14114_vm0  ;;  %v14178_v15 = vld [vmem:[#allocation43_spill] sm:$0xff] }
 0x602   : > { %v4122_v35 = vmul.f32 %v3964_v58, %v3732_v24  ;;  %v7994_v7 = vpop.f32.mrb[66].mxu1  ;;  %v3757_v24 = vadd.f32 %v11385_v36, %v11495_v10 }
 0x603   : > { %v3979_v5 = vadd.f32 %v7994_v7, %v11502_v14  ;;  %v3973_v51 = vpop.f32.mrb[67].mxu1  ;;  %v3752_v7 = vadd.f32 %v11495_v10, %v11389_v1 }
 0x604   : > { %v3974_v18 = vadd.f32 %v11502_v14, %v3973_v51  ;;  %8041 = vmatprep.mubr.msk.f32.mxu0 %vm14113_vm14, %v4122_v35  ;;  %vm14123_vm14 = vmmov %vm14114_vm0 }
 0x605   : > { %v4125_v56 = vmul.f32 %v3979_v5, %v3747_v34  ;;  %8042 = vmatmul.mubr.msk.f32.vlgmr.msra.gmra.mrb[64].mxu0 %vm14114_vm0, %v4123_v23 }
 0x606   : > { %v4124_v16 = vmul.f32 %v3974_v18, %v3742_v19  ;;  %v7997_v47 = vpop.f32.mrb[68].mxu1  ;;  %v3767_v18 = vadd.f32 %v11414_v8, %v11495_v10 }
 0x607   : > { %v3989_v33 = vadd.f32 %v7997_v47, %v11502_v14  ;;  %v3983_v58 = vpop.f32.mrb[69].mxu1  ;;  %v3762_v47 = vadd.f32 %v11495_v10, %v11416_v61 }
 0x608   : > { %v3984_v49 = vadd.f32 %v11502_v14, %v3983_v58  ;;  %8044 = vmatprep.mubr.msk.f32.mxu0 %vm14115_vm4, %v4124_v16  ;;  %v3777_v16 = vadd.f32 %v11430_v26, %v11495_v10  ;;  %vm14124_vm4 = vmmov %vm14114_vm0 }
 0x609   : > { %v4127_v51 = vmul.f32 %v3989_v33, %v3757_v24  ;;  %8045 = vmatmul.mubr.msk.f32.gmra.mrb[66].mxu0 %vm14116_vm8, %v4125_v56  ;;  %v3772_v33 = vadd.f32 %v11495_v10, %v11432_v25  ;;  %vm14125_vm8 = vmmov %vm14114_vm0 }
 0x60a   : > { %v4126_v34 = vmul.f32 %v3984_v49, %v3752_v7  ;;  %v8000_v23 = vpop.f32.mrb[70].mxu1 }
 0x60b   : > { %v3999_v36 = vadd.f32 %v8000_v23, %v11502_v14  ;;  %v3993_v35 = vpop.f32.mrb[71].mxu1  ;;  %v3782_v23 = vadd.f32 %v11495_v10, %v11448_v39 }
 0x60c   : > { %v3994_v1 = vadd.f32 %v11502_v14, %v3993_v35  ;;  %8047 = vmatprep.mubr.msk.f32.mxu0 %vm14117_vm6, %v4126_v34  ;;  %vm14126_vm6 = vmmov %vm14114_vm0 }
 0x60d   : > { %v4129_v5 = vmul.f32 %v3999_v36, %v3767_v18  ;;  %8048 = vmatmul.mubr.msk.f32.gmra.mrb[68].mxu0 %vm14118_vm3, %v4127_v51  ;;  %v3787_v51 = vadd.f32 %v11446_v38, %v11495_v10  ;;  %vm14127_vm3 = vmmov %vm14114_vm0 }
 0x60e   : > { %v4128_v19 = vmul.f32 %v3994_v1, %v3762_v47  ;;  %v8003_v56 = vpop.f32.mrb[72].mxu1  ;;  %v3797_v47 = vadd.f32 %v11462_v53, %v11495_v10 }
 0x60f   : > { %v4009_v8 = vadd.f32 %v8003_v56, %v11502_v14  ;;  %v4003_v24 = vpop.f32.mrb[73].mxu1 }
 0x610   : > { %v4004_v61 = vadd.f32 %v11502_v14, %v4003_v24  ;;  %8050 = vmatprep.mubr.msk.f32.mxu0 %vm14119_vm9, %v4128_v19  ;;  %vm14128_vm9 = vmmov %vm14114_vm0 }
 0x611   : > { %v4131_v58 = vmul.f32 %v4009_v8, %v3777_v16  ;;  %8051 = vmatmul.mubr.msk.f32.gmra.mrb[70].mxu0 %vm14120_vm5, %v4129_v5  ;;  %v3792_v5 = vadd.f32 %v11495_v10, %v11464_v48  ;;  %v3807_v8 = vadd.f32 %v11509_v0, %v11495_v10  ;;  %vm14129_vm5 = vmmov %vm14114_vm0 }
 0x612   : > { %v4130_v7 = vmul.f32 %v4004_v61, %v3772_v33  ;;  %v8006_v49 = vpop.f32.mrb[74].mxu1  ;;  %v3802_v33 = vadd.f32 %v11495_v10, %v11514_v45 }
 0x613   : > { %v4019_v26 = vadd.f32 %v8006_v49, %v11502_v14  ;;  %v4013_v34 = vpop.f32.mrb[75].mxu1 }
 0x614   : > { %v4014_v25 = vadd.f32 %v11502_v14, %v4013_v34  ;;  %8053 = vmatprep.mubr.msk.f32.mxu0 %vm14121_vm15, %v4130_v7  ;;  %vm14130_vm15 = vmmov %vm14114_vm0 }
 0x615   : > { %v4133_v18 = vmul.f32 %v4019_v26, %v3787_v51  ;;  %8054 = vmatmul.mubr.msk.f32.gmra.mrb[72].mxu0 %vm14122_vm2, %v4131_v58  ;;  %vm14131_vm2 = vmmov %vm14114_vm0 }
 0x616   : > { %v4132_v36 = vmul.f32 %v4014_v25, %v3782_v23  ;;  %v8009_v35 = vpop.f32.mrb[76].mxu1 }
 0x617   : > { %v4029_v38 = vadd.f32 %v8009_v35, %v11502_v14  ;;  %v4023_v1 = vpop.f32.mrb[77].mxu1 }
 0x618   : > { %v4024_v39 = vadd.f32 %v11502_v14, %v4023_v1  ;;  %8056 = vmatprep.mubr.msk.f32.mxu0 %vm14123_vm14, %v4132_v36  ;;  %vm4484_vm14 = vcmask 286720  }
 0x619   : > { %v4135_v19 = vmul.f32 %v4029_v38, %v3797_v47  ;;  %8057 = vmatmul.mubr.msk.f32.gmra.mrb[74].mxu0 %vm14114_vm0, %v4133_v18 }
 0x61a   : > { %v4134_v56 = vmul.f32 %v4024_v39, %v3792_v5  ;;  %v8012_v16 = vpop.f32.mrb[78].mxu1 }
 0x61b   : > { %v4039_v53 = vadd.f32 %v8012_v16, %v11502_v14  ;;  %v4033_v24 = vpop.f32.mrb[79].mxu1 }
 0x61c   : > { %v4034_v48 = vadd.f32 %v11502_v14, %v4033_v24  ;;  %8059 = vmatprep.mubr.msk.f32.mxu0 %vm14124_vm4, %v4134_v56  ;;  %vm14133_vm4 = vmmov %vm14114_vm0 }
 0x61d   : > { %v4137_v61 = vmul.f32 %v4039_v53, %v3807_v8  ;;  %8060 = vmatmul.mubr.msk.f32.gmra.mrb[76].mxu0 %vm14125_vm8, %v4135_v19  ;;  %vm14134_vm8 = vmmov %vm14114_vm0 }
 0x61e   : > { %v4136_v58 = vmul.f32 %v4034_v48, %v3802_v33  ;;  %v8015_v7 = vpop.f32.mrb[80].mxu1 }
 0x61f   : > { %v4049_v49 = vadd.f32 %v8015_v7, %v11502_v14  ;;  %v7963_v51 = vpop.f32.mrb[48].mxu0  ;;  %v4043_v26 = vpop.f32.mrb[81].mxu1 }
 0x620   : > { %v3817_v0 = vadd.f32 %v7963_v51, %v11495_v10  ;;  %v4044_v34 = vadd.f32 %v11502_v14, %v4043_v26  ;;  %v3811_v23 = vpop.f32.mrb[49].mxu0  ;;  %8062 = vmatprep.mubr.msk.f32.mxu0 %vm14126_vm6, %v4136_v58  ;;  %vm14135_vm6 = vmmov %vm14114_vm0 }
 0x621   : > { %v3812_v45 = vadd.f32 %v11495_v10, %v3811_v23  ;;  %8063 = vmatmul.mubr.msk.f32.gmra.mrb[78].mxu0 %vm14127_vm3, %v4137_v61  ;;  %vm14136_vm3 = vmmov %vm14114_vm0 }
 0x622   : > { %v4139_v25 = vmul.f32 %v4049_v49, %v3817_v0  ;;  %v8018_v18 = vpop.f32.mrb[82].mxu1 }
 0x623   : > { %v4138_v36 = vmul.f32 %v4044_v34, %v3812_v45  ;;  %v4059_v35 = vadd.f32 %v8018_v18, %v11502_v14  ;;  %v4053_v47 = vpop.f32.mrb[83].mxu1 }
 0x624   : > { %v4054_v38 = vadd.f32 %v11502_v14, %v4053_v47 }
 0x625   : > { %8065 = vmatprep.mubr.msk.f32.mxu0 %vm14128_vm9, %v4138_v36  ;;  %vm14137_vm9 = vmmov %vm14114_vm0 }
 0x626   : > { %v8021_v1 = vpop.f32.mrb[84].mxu1  ;;  %8066 = vmatmul.mubr.msk.f32.gmra.mrb[80].mxu0 %vm14129_vm5, %v4139_v25  ;;  %vm14138_vm5 = vmmov %vm14114_vm0 }
 0x627   : > { %v4069_v5 = vadd.f32 %v8021_v1, %v11502_v14  ;;  %v4063_v39 = vpop.f32.mrb[85].mxu1 }
 0x628   : > { %v4064_v19 = vadd.f32 %v11502_v14, %v4063_v39 }
 0x62a   : > { %v8024_v56 = vpop.f32.mrb[86].mxu1 }
 0x62b   : > { %v4079_v16 = vadd.f32 %v8024_v56, %v11502_v14  ;;  %v4073_v8 = vpop.f32.mrb[87].mxu1 }
 0x62c   : > { %v4074_v53 = vadd.f32 %v11502_v14, %v4073_v8 }
 0x62e   : > { %v8027_v24 = vpop.f32.mrb[88].mxu1 }
 0x62f   : > { %v4089_v33 = vadd.f32 %v8027_v24, %v11502_v14  ;;  %v4083_v48 = vpop.f32.mrb[89].mxu1 }
 0x630   : > { %v4084_v61 = vadd.f32 %v11502_v14, %v4083_v48  ;;  %v14132_v48 = vmov 0.0  }
 0x631   : > { %4485 = vst.msk [vmem:[#allocation3 + $0x10] sm:$0x1] %vm4484_vm14, %v14132_v48  ;;  %4488 = vst.msk [vmem:[#allocation3 + $0x121] sm:$0x1] %vm4484_vm14, %v14132_v48 }
 0x632   : > { %v8030_v58 = vpop.f32.mrb[90].mxu1  ;;  %vm14141_vm14 = vmmov %vm14114_vm0 }
 0x633   : > { %v11595_v7 = vadd.f32 %v8030_v58, %v11502_v14  ;;  %v4093_v49 = vpop.f32.mrb[91].mxu1 }
 0x634   : > { %v11598_v51 = vadd.f32 %v11502_v14, %v4093_v49 }
 0x636   : > { %v8033_v26 = vpop.f32.mrb[92].mxu1 }
 0x637   : > { %v11601_v0 = vadd.f32 %v8033_v26, %v11502_v14  ;;  %v4103_v34 = vpop.f32.mrb[93].mxu1 }
 0x638   : > { %v11604_v23 = vadd.f32 %v11502_v14, %v4103_v34 }
 0x63a   : > { %v8036_v45 = vpop.f32.mrb[94].mxu1 }
 0x63b   : > { %v11607_v25 = vadd.f32 %v8036_v45, %v11502_v14  ;;  %v4113_v18 = vpop.f32.mrb[95].mxu1  ;;  %v4553_v45 = vld [vmem:[#allocation3 + $0x1] sm:$0xff] }
 0x63c   : > { %v11610_v36 = vadd.f32 %v11502_v14, %v4113_v18  ;;  %v4554_v18 = vld [vmem:[#allocation3 + $0x9] sm:$0xff] }
 0x63f   : > { %v7966_v47 = vpop.f32.mrb[50].mxu0 }
 0x640   : > { %v3827_v1 = vadd.f32 %v7966_v47, %v11495_v10  ;;  %v3821_v39 = vpop.f32.mrb[51].mxu0 }
 0x641   : > { %v3822_v56 = vadd.f32 %v11495_v10, %v3821_v39 }
 0x642   : > { %v4141_v8 = vmul.f32 %v4059_v35, %v3827_v1 }
 0x643   : > { %v4140_v24 = vmul.f32 %v4054_v38, %v3822_v56  ;;  %v8336_v38 = vpack.i.bf16 %v4554_v18, %v4553_v45  ;;  %v166_v18 = vld [vmem:[%s13379_s1 + $0xa0] sm:$0xff] }
 0x645   : > { %8068 = vmatprep.mubr.msk.f32.mxu0 %vm14130_vm15, %v4140_v24  ;;  %8337 = vrot.lane.b32.xlu1 %v8336_v38, %s8852_s16  ;;  %vm14139_vm15 = vmmov %vm14114_vm0 }
 0x646   : > { %8069 = vmatmul.mubr.msk.f32.gmra.mrb[82].mxu0 %vm14131_vm2, %v4141_v8  ;;  %vm14140_vm2 = vmmov %vm14114_vm0 }
 0x65f   : > { %v7969_v58 = vpop.f32.mrb[52].mxu0 }
 0x660   : > { %v3837_v14 = vadd.f32 %v7969_v58, %v11495_v10  ;;  %v3831_v49 = vpop.f32.mrb[53].mxu0 }
 0x661   : > { %v3832_v26 = vadd.f32 %v11495_v10, %v3831_v49 }
 0x662   : > { %v4143_v34 = vmul.f32 %v4069_v5, %v3837_v14 }
 0x663   : > { %v4142_v35 = vmul.f32 %v4064_v19, %v3832_v26  ;;  %v8853_v26 = vmov 0.0|0.0  }
 0x664   : > { %8239 = vmatprep.subr.bf16.mxu1 %v8853_v26 }
 0x665   : > { %8071 = vmatprep.mubr.msk.f32.mxu0 %vm14114_vm0, %v4142_v35  ;;  %v167_v35 = vld [vmem:[%s13379_s1 + $0xa8] sm:$0xff] }
 0x666   : > { %8072 = vmatmul.mubr.msk.f32.gmra.mrb[84].mxu0 %vm14133_vm4, %v4143_v34  ;;  %v8246_v38 = vpack.c.bf16 %v167_v35, %v166_v18  ;;  %vm14142_vm4 = vcmask 293888  }
 0x67f   : > { %v7972_v47 = vpop.f32.mrb[54].mxu0 }
 0x680   : > { %v3847_v1 = vadd.f32 %v7972_v47, %v11495_v10  ;;  %v3841_v39 = vpop.f32.mrb[55].mxu0  ;;  %v168_v47 = vld [vmem:[%s13379_s1 + $0xb0] sm:$0xff] }
 0x681   : > { %v3842_v56 = vadd.f32 %v11495_v10, %v3841_v39 }
 0x682   : > { %v4145_v8 = vmul.f32 %v4079_v16, %v3847_v1  ;;  %v162_v16 = vld [vmem:[%s13379_s1 + $0x80] sm:$0xff]  ;;  %v169_v1 = vld [vmem:[%s13379_s1 + $0xb8] sm:$0xff] }
 0x683   : > { %v4144_v24 = vmul.f32 %v4074_v53, %v3842_v56  ;;  %v163_v53 = vld [vmem:[%s13379_s1 + $0x88] sm:$0xff]  ;;  %v8249_v39 = vpack.c.bf16 %v169_v1, %v168_v47  ;;  %v170_v56 = vld [vmem:[%s13379_s1 + $0xc0] sm:$0xff] }
 0x684   : > { %v8240_v34 = vpack.c.bf16 %v163_v53, %v162_v16 }
 0x685   : > { %8074 = vmatprep.mubr.msk.f32.mxu0 %vm14134_vm8, %v4144_v24  ;;  %vm14143_vm8 = vmmov %vm14114_vm0 }
 0x686   : > { %8075 = vmatmul.mubr.msk.f32.gmra.mrb[86].mxu0 %vm14135_vm6, %v4145_v8  ;;  %8241 = vmatpush1.bf16.msra.mxu1 %v8240_v34  ;;  %v171_v8 = vld [vmem:[%s13379_s1 + $0xc8] sm:$0xff]  ;;  %vm14144_vm6 = vmmov %vm14142_vm4 }
 0x687   : > { %8242 = vmatprep.subr.bf16.mxu1 %v8853_v26  ;;  %v8252_v24 = vpack.c.bf16 %v171_v8, %v170_v56  ;;  %v178_v8 = vld [vmem:[%s13379_s1 + $0x100] sm:$0xff] }
 0x69f   : > { %v7975_v5 = vpop.f32.mrb[56].mxu0 }
 0x6a0   : > { %v3857_v19 = vadd.f32 %v7975_v5, %v11495_v10  ;;  %v3851_v48 = vpop.f32.mrb[57].mxu0 }
 0x6a1   : > { %v3852_v58 = vadd.f32 %v11495_v10, %v3851_v48  ;;  %v173_v48 = vld [vmem:[%s13379_s1 + $0xd8] sm:$0xff] }
 0x6a2   : > { %v4147_v14 = vmul.f32 %v4089_v33, %v3857_v19  ;;  %v164_v33 = vld [vmem:[%s13379_s1 + $0x90] sm:$0xff] }
 0x6a3   : > { %v4146_v49 = vmul.f32 %v4084_v61, %v3852_v58  ;;  %v165_v61 = vld [vmem:[%s13379_s1 + $0x98] sm:$0xff]  ;;  %v172_v19 = vld [vmem:[%s13379_s1 + $0xd0] sm:$0xff] }
 0x6a4   : > { %v8243_v45 = vpack.c.bf16 %v165_v61, %v164_v33  ;;  %v174_v33 = vld [vmem:[%s13379_s1 + $0xe0] sm:$0xff]  ;;  %v175_v61 = vld [vmem:[%s13379_s1 + $0xe8] sm:$0xff] }
 0x6a5   : > { %8077 = vmatprep.mubr.msk.f32.mxu0 %vm14136_vm3, %v4146_v49  ;;  %v8255_v49 = vpack.c.bf16 %v173_v48, %v172_v19  ;;  %v182_v48 = vld [vmem:[%s13379_s1 + $0x120] sm:$0xff]  ;;  %vm14145_vm3 = vmmov %vm14142_vm4 }
 0x6a6   : > { %8078 = vmatmul.mubr.msk.f32.gmra.mrb[88].mxu0 %vm14137_vm9, %v4147_v14  ;;  %8244 = vmatpush1.bf16.msra.mxu1 %v8243_v45  ;;  %v8258_v45 = vpack.c.bf16 %v175_v61, %v174_v33  ;;  %v11725_v33 = vld [vmem:[%s13379_s1 + $0x7d] ss:$0 sm:$0xff]  ;;  %vm14146_vm9 = vmmov %vm14145_vm3 }
 0x6a7   : > { %8245 = vmatprep.subr.bf16.mxu1 %v8853_v26 }
 0x6aa   : > { %8247 = vmatpush1.bf16.msra.mxu1 %v8246_v38 }
 0x6ab   : > { %8248 = vmatprep.subr.bf16.mxu1 %v8853_v26 }
 0x6ae   : > { %8250 = vmatpush1.bf16.msra.mxu1 %v8249_v39 }
 0x6af   : > { %8251 = vmatprep.subr.bf16.mxu1 %v8853_v26 }
 0x6b2   : > { %8253 = vmatpush1.bf16.msra.mxu1 %v8252_v24  ;;  %v179_v24 = vld [vmem:[%s13379_s1 + $0x108] sm:$0xff] }
 0x6b3   : > { %8254 = vmatprep.subr.bf16.mxu1 %v8853_v26 }
 0x6b6   : > { %8256 = vmatpush1.bf16.msra.mxu1 %v8255_v49 }
 0x6b7   : > { %8257 = vmatprep.subr.bf16.mxu1 %v8853_v26 }
 0x6ba   : > { %8259 = vmatpush1.bf16.msra.mxu1 %v8258_v45  ;;  %v184_v45 = vld [vmem:[%s13379_s1 + $0x130] sm:$0xff] }
 0x6bb   : > { %8260 = vmatprep.subr.bf16.mxu1 %v8853_v26 }
 0x6bf   : > { %v7978_v5 = vpop.f32.mrb[58].mxu0 }
 0x6c0   : > { %v3867_v58 = vadd.f32 %v7978_v5, %v11495_v10  ;;  %v3861_v14 = vpop.f32.mrb[59].mxu0  ;;  %v8264_v5 = vpack.c.bf16 %v179_v24, %v178_v8 }
 0x6c1   : > { %v3862_v16 = vadd.f32 %v11495_v10, %v3861_v14 }
 0x6c2   : > { %v4149_v53 = vmul.f32 %v11595_v7, %v3867_v58  ;;  %v176_v7 = vld [vmem:[%s13379_s1 + $0xf0] sm:$0xff]  ;;  %v183_v58 = vld [vmem:[%s13379_s1 + $0x128] sm:$0xff] }
 0x6c3   : > { %v4148_v34 = vmul.f32 %v11598_v51, %v3862_v16  ;;  %v177_v51 = vld [vmem:[%s13379_s1 + $0xf8] sm:$0xff]  ;;  %v8270_v49 = vpack.c.bf16 %v183_v58, %v182_v48 }
 0x6c4   : > { %v8261_v47 = vpack.c.bf16 %v177_v51, %v176_v7 }
 0x6c5   : > { %8080 = vmatprep.mubr.msk.f32.mxu0 %vm14138_vm5, %v4148_v34  ;;  %vm14147_vm5 = vmmov %vm14145_vm3 }
 0x6c6   : > { %8081 = vmatmul.mubr.msk.f32.gmra.mrb[90].mxu0 %vm14139_vm15, %v4149_v53  ;;  %8262 = vmatpush1.bf16.msra.mxu1 %v8261_v47  ;;  %vm14148_vm15 = vmmov %vm14145_vm3 }
 0x6c7   : > { %v7981_v18 = vpop.f32.mrb[60].mxu0  ;;  %8263 = vmatprep.subr.bf16.mxu1 %v8853_v26 }
 0x6c8   : > { %v3877_v35 = vadd.f32 %v7981_v18, %v11495_v10  ;;  %v3871_v38 = vpop.f32.mrb[61].mxu0  ;;  %v185_v18 = vld [vmem:[%s13379_s1 + $0x138] sm:$0xff] }
 0x6c9   : > { %v3872_v1 = vadd.f32 %v11495_v10, %v3871_v38 }
 0x6ca   : > { %v4151_v39 = vmul.f32 %v11601_v0, %v3877_v35  ;;  %8265 = vmatpush1.bf16.msra.mxu1 %v8264_v5  ;;  %v180_v0 = vld [vmem:[%s13379_s1 + $0x110] sm:$0xff] }
 0x6cb   : > { %v4150_v56 = vmul.f32 %v11604_v23, %v3872_v1  ;;  %v181_v23 = vld [vmem:[%s13379_s1 + $0x118] sm:$0xff]  ;;  %8266 = vmatprep.subr.bf16.mxu1 %v8853_v26  ;;  %v187_v1 = vld [vmem:[%s13379_s1 + $0x148] sm:$0xff]  ;;  %v188_v5 = vld [vmem:[%s13379_s1 + $0x150] sm:$0xff] }
 0x6cc   : > { %v8267_v19 = vpack.c.bf16 %v181_v23, %v180_v0  ;;  %v189_v0 = vld [vmem:[%s13379_s1 + $0x158] sm:$0xff] }
 0x6cd   : > { %8083 = vmatprep.mubr.msk.f32.mxu0 %vm14140_vm2, %v4150_v56  ;;  %vm14150_vm2 = vmmov %vm14145_vm3 }
 0x6ce   : > { %8084 = vmatmul.mubr.msk.f32.gmra.mrb[92].mxu0 %vm14141_vm14, %v4151_v39  ;;  %8268 = vmatpush1.bf16.msra.mxu1 %v8267_v19  ;;  %v8279_v19 = vpack.c.bf16 %v189_v0, %v188_v5  ;;  %vm14151_vm14 = vmmov %vm14150_vm2  ;;  %v4585_v0 = vld [vmem:[#allocation3 + $0x2] sm:$0xff] }
 0x6cf   : > { %8269 = vmatprep.subr.bf16.mxu1 %v8853_v26 }
 0x6d2   : > { %8271 = vmatpush1.bf16.msra.mxu1 %v8270_v49 }
 0x6d3   : > { %8272 = vmatprep.subr.bf16.mxu1 %v8853_v26 }
 0x6d4   : > { %v7984_v14 = vpop.f32.mrb[62].mxu0 }
 0x6d5   : > { %v3887_v16 = vadd.f32 %v7984_v14, %v11495_v10  ;;  %v3881_v53 = vpop.f32.mrb[63].mxu0 }
 0x6d6   : > { %v3882_v34 = vadd.f32 %v11495_v10, %v3881_v53  ;;  %v8273_v10 = vpack.c.bf16 %v185_v18, %v184_v45 }
 0x6d7   : > { %v4153_v61 = vmul.f32 %v11607_v25, %v3887_v16 }
 0x6d8   : > { %v4152_v7 = vmul.f32 %v11610_v36, %v3882_v34  ;;  %v8043_v51 = vpop.f32.mrb[64].mxu0  ;;  %8274 = vmatpush1.bf16.msra.mxu1 %v8273_v10  ;;  %v186_v36 = vld [vmem:[%s13379_s1 + $0x140] sm:$0xff] }
 0x6d9   : > { %v4329_v35 = vadd.f32 %v8043_v51, %v11725_v33  ;;  %v4323_v38 = vpop.f32.mrb[65].mxu0  ;;  %8275 = vmatprep.subr.bf16.mxu1 %v8853_v26  ;;  %v8276_v8 = vpack.c.bf16 %v187_v1, %v186_v36  ;;  %v190_v51 = vld [vmem:[%s13379_s1 + $0x160] sm:$0xff] }
 0x6da   : > { %v4324_v25 = vadd.f32 %v11725_v33, %v4323_v38  ;;  %8086 = vmatprep.mubr.msk.f32.mxu0 %vm14114_vm0, %v4152_v7  ;;  %vm14153_vm0 = vmmov %vm14150_vm2 }
 0x6db   : > { %4490 = vst.msk [vmem:[#allocation3 + $0x19] sm:$0xff] %vm14142_vm4, %v4329_v35  ;;  %8087 = vmatmul.mubr.msk.f32.gmra.mrb[94].mxu0 %vm14143_vm8, %v4153_v61  ;;  %vm14154_vm4 = vmmov %vm14153_vm0 }
 0x6dc   : > { %4489 = vst.msk [vmem:[#allocation3 + $0x11] sm:$0xff] %vm14144_vm6, %v4324_v25  ;;  %v8046_v47 = vpop.f32.mrb[66].mxu0  ;;  %8277 = vmatpush1.bf16.msra.mxu1 %v8276_v8  ;;  %v191_v25 = vld [vmem:[%s13379_s1 + $0x168] sm:$0xff]  ;;  %v192_v8 = vld [vmem:[%s13379_s1 + $0x170] sm:$0xff]  ;;  %vm14155_vm8 = vmmov %vm14153_vm0 }
 0x6dd   : > { %v4339_v39 = vadd.f32 %v8046_v47, %v11725_v33  ;;  %v4333_v56 = vpop.f32.mrb[67].mxu0  ;;  %8278 = vmatprep.subr.bf16.mxu1 %v8853_v26  ;;  %v8282_v1 = vpack.c.bf16 %v191_v25, %v190_v51  ;;  %vm14156_vm6 = vmmov %vm14153_vm0 }
 0x6de   : > { %v4334_v24 = vadd.f32 %v11725_v33, %v4333_v56 }
 0x6df   : > { %4492 = vst.msk [vmem:[#allocation3 + $0x29] sm:$0xff] %vm14145_vm3, %v4339_v39  ;;  %vm14158_vm3 = vmmov %vm14153_vm0 }
 0x6e0   : > { %4491 = vst.msk [vmem:[#allocation3 + $0x21] sm:$0xff] %vm14146_vm9, %v4334_v24  ;;  %v8049_v23 = vpop.f32.mrb[68].mxu0  ;;  %8280 = vmatpush1.bf16.msra.mxu1 %v8279_v19  ;;  %vm14159_vm9 = vmmov %vm14153_vm0 }
 0x6e1   : > { %v4349_v48 = vadd.f32 %v8049_v23, %v11725_v33  ;;  %v4343_v58 = vpop.f32.mrb[69].mxu0  ;;  %8281 = vmatprep.subr.bf16.mxu1 %v8853_v26 }
 0x6e2   : > { %v4344_v14 = vadd.f32 %v11725_v33, %v4343_v58  ;;  %v4556_v49 = vld [vmem:[#allocation3 + $0x19] sm:$0xff] }
 0x6e3   : > { %4494 = vst.msk [vmem:[#allocation3 + $0x39] sm:$0xff] %vm14147_vm5, %v4349_v48  ;;  %v4555_v16 = vld [vmem:[#allocation3 + $0x11] sm:$0xff]  ;;  %vm14160_vm5 = vmmov %vm14153_vm0 }
 0x6e4   : > { %v11763_v53 = vld [vmem:[#allocation3 + $0x10] sm:$0xff]  ;;  %v11765_v34 = vld [vmem:[#allocation3 + $0x18] sm:$0xff]  ;;  %4493 = vst.msk [vmem:[#allocation3 + $0x31] sm:$0xff] %vm14148_vm15, %v4344_v14  ;;  %v8052_v61 = vpop.f32.mrb[70].mxu0  ;;  %v8341_v45 = vpack.i.bf16 %v4556_v49, %v4555_v16  ;;  %8283 = vmatpush1.bf16.msra.mxu1 %v8282_v1  ;;  %vm14161_vm15 = vmmov %vm14153_vm0 }
 0x6e5   : > { %v4687_v7 = vsel %vm9462_vm10, %v11763_v53, 0.0  ;;  %v4359_v10 = vadd.f32 %v8052_v61, %v11725_v33  ;;  %v4353_v35 = vpop.f32.mrb[71].mxu0  ;;  %v4586_v36 = vld [vmem:[#allocation3 + $0xa] sm:$0xff]  ;;  %8284 = vmatprep.subr.bf16.mxu1 %v8853_v26  ;;  %v11807_v51 = vld [vmem:[#allocation3 + $0x12] sm:$0xff] }
 0x6e6   : > { %v8351_v38 = vpack.i.bf16 %v11765_v34, %v4687_v7  ;;  %v4354_v47 = vadd.f32 %v11725_v33, %v4353_v35  ;;  %8342 = vrot.lane.b32.xlu1 %v8341_v45, %s8845_s27  ;;  %v4650_v19 = vsel %vm9489_vm11, %v4586_v36, 0.0  ;;  %v193_v48 = vld [vmem:[%s13379_s1 + $0x178] sm:$0xff] }
 0x6e7   : > { %4496 = vst.msk [vmem:[#allocation3 + $0x49] sm:$0xff] %vm14150_vm2, %v4359_v10  ;;  %v11784_v39 = vld [vmem:[#allocation3 + $0x1a] sm:$0xff]  ;;  %v8285_v16 = vpack.c.bf16 %v193_v48, %v192_v8  ;;  %v8356_v7 = vpack.i.bf16 %v4650_v19, %v4585_v0  ;;  %v11813_v25 = vld [vmem:[#allocation3 + $0x28] sm:$0xff]  ;;  %vm14162_vm2 = vmmov %vm14153_vm0 }
 0x6e8   : > { %8352 = vrot.lane.b32.xlu0 %v8351_v38, %s8854_s20  ;;  %4495 = vst.msk [vmem:[#allocation3 + $0x41] sm:$0xff] %vm14151_vm14, %v4354_v47  ;;  %v8055_v56 = vpop.f32.mrb[72].mxu0  ;;  %v4557_v14 = vld [vmem:[#allocation3 + $0x21] sm:$0xff]  ;;  %v4720_v49 = vsel %vm9489_vm11, %v11784_v39, 0.0  ;;  %v4558_v8 = vld [vmem:[#allocation3 + $0x29] sm:$0xff]  ;;  %vm14163_vm14 = vmmov %vm14153_vm0 }
 0x6e9   : > { %v4369_v24 = vadd.f32 %v8055_v56, %v11725_v33  ;;  %v4363_v5 = vpop.f32.mrb[73].mxu0  ;;  %v11804_v61 = vld [vmem:[#allocation3 + $0x20] sm:$0xff]  ;;  %8286 = vmatpush1.bf16.msra.mxu1 %v8285_v16  ;;  %v8371_v35 = vpack.i.bf16 %v4720_v49, %v11807_v51  ;;  %v8361_v16 = vpack.i.bf16 %v4558_v8, %v4557_v14 }
 0x6ea   : > { %v4364_v58 = vadd.f32 %v11725_v33, %v4363_v5  ;;  %8347 = vrot.lane.b32.xlu1 %v8341_v45, %s8852_s16  ;;  %v4757_v47 = vsel %vm9462_vm10, %v11804_v61, 0.0  ;;  %v194_v5 = vld [vmem:[%s13379_s1 + $0x180] sm:$0xff]  ;;  %v195_v0 = vld [vmem:[%s13379_s1 + $0x188] sm:$0xff] }
 0x6eb   : > { %4498 = vst.msk [vmem:[#allocation3 + $0x59] sm:$0xff] %vm14153_vm0, %v4369_v24  ;;  %v8376_v24 = vpack.i.bf16 %v11813_v25, %v4757_v47  ;;  %v8287_v49 = vpack.c.bf16 %v195_v0, %v194_v5  ;;  %v4559_v5 = vld [vmem:[#allocation3 + $0x31] sm:$0xff] }
 0x6ec   : > { %5561 = vrot.lane.b32.xlu0 %v4557_v14, %s8842_s19  ;;  %4497 = vst.msk [vmem:[#allocation3 + $0x51] sm:$0xff] %vm14154_vm4, %v4364_v58  ;;  %v8058_v26 = vpop.f32.mrb[74].mxu0  ;;  %v4689_v58 = vsel %vm9393_vm7, %v11804_v61, 0.0  ;;  %vm14166_vm4 = vcmask 1043456  }
 0x6ed   : > { %v4379_v45 = vadd.f32 %v8058_v26, %v11725_v33  ;;  %v4373_v10 = vpop.f32.mrb[75].mxu0  ;;  %8288 = vmatprep.subr.bf16.mxu0 %v8287_v49 }
 0x6ee   : > { %v4374_v38 = vadd.f32 %v11725_v33, %v4373_v10  ;;  %8357 = vrot.lane.b32.xlu1 %v8356_v7, %s8855_s26  ;;  %v8381_v10 = vpack.i.bf16 %v11813_v25, %v4689_v58  ;;  %8290 = vmatpush3.bf16.msra.mxu0 %v8287_v49  ;;  %v4589_v49 = vld [vmem:[#allocation3 + $0x22] sm:$0xff] }
 0x6ef   : > { %4500 = vst.msk [vmem:[#allocation3 + $0x69] sm:$0xff] %vm14155_vm8, %v4379_v45  ;;  %v11912_v23 = vld [vmem:[#allocation3 + $0x48] sm:$0xff] }
 0x6f0   : > { %8372 = vrot.lane.b32.xlu0 %v8371_v35, %s8856_s6  ;;  %4499 = vst.msk [vmem:[#allocation3 + $0x61] sm:$0xff] %vm14156_vm6, %v4374_v38  ;;  %v8061_v36 = vpop.f32.mrb[76].mxu0  ;;  %v196_v35 = vld [vmem:[%s13379_s1 + $0x190] sm:$0xff]  ;;  %v197_v38 = vld [vmem:[%s13379_s1 + $0x198] sm:$0xff]  ;;  %vm14169_vm6 = vmmov %vm14166_vm4 }
 0x6f1   : > { %v4389_v1 = vadd.f32 %v8061_v36, %v11725_v33  ;;  %v4383_v56 = vpop.f32.mrb[77].mxu0  ;;  %v8291_v14 = vpack.c.bf16 %v197_v38, %v196_v35  ;;  %v4591_v35 = vld [vmem:[#allocation3 + $0x32] sm:$0xff] }
 0x6f2   : > { %v4384_v19 = vadd.f32 %v11725_v33, %v4383_v56  ;;  %5563 = vrot.lane.b32.xlu1 %v4558_v8, %s8842_s19  ;;  %v199_v56 = vld [vmem:[%s13379_s1 + $0x1a8] sm:$0xff] }
 0x6f3   : > { %4502 = vst.msk [vmem:[#allocation3 + $0x79] sm:$0xff] %vm14158_vm3, %v4389_v1  ;;  %8292 = vmatprep.subr.bf16.mxu0 %v8291_v14  ;;  %v198_v1 = vld [vmem:[%s13379_s1 + $0x1a0] sm:$0xff] }
 0x6f4   : > { %8377 = vrot.lane.b32.xlu0 %v8376_v24, %s8857_s3  ;;  %4501 = vst.msk [vmem:[#allocation3 + $0x71] sm:$0xff] %vm14159_vm9, %v4384_v19  ;;  %v8064_v26 = vpop.f32.mrb[78].mxu0  ;;  %8294 = vmatpush3.bf16.msra.mxu0 %v8291_v14  ;;  %v4590_v19 = vld [vmem:[#allocation3 + $0x2a] sm:$0xff]  ;;  %v8295_v58 = vpack.c.bf16 %v199_v56, %v198_v1  ;;  %v11882_v1 = vld [vmem:[#allocation3 + $0x38] sm:$0xff]  ;;  %vm14174_vm9 = vmmov %vm14162_vm2 }
 0x6f5   : > { %v4399_v7 = vadd.f32 %v8064_v26, %v11725_v33  ;;  %v4393_v45 = vpop.f32.mrb[79].mxu0  ;;  %v14164_v26 = vld [vmem:[#allocation40_spill] sm:$0xff] }
 0x6f6   : > { %v4394_v47 = vadd.f32 %v11725_v33, %v4393_v45  ;;  %8362 = vrot.lane.b32.xlu1 %v8361_v16, %s8845_s27  ;;  %vm14165_vm0 = vnez %v14164_v26  ;;  %8296 = vmatprep.subr.bf16.mxu0 %v8295_v58  ;;  %v201_v45 = vld [vmem:[%s13379_s1 + $0x1b8] sm:$0xff] }
 0x6f7   : > { %4504 = vst.msk [vmem:[#allocation3 + $0x89] sm:$0xff] %vm14160_vm5, %v4399_v7  ;;  %v4652_v7 = vsel %vm14165_vm0, %v11784_v39, 0.0  ;;  %v11875_v39 = vld [vmem:[#allocation3 + $0x30] sm:$0xff]  ;;  %vm14175_vm5 = vmmov %vm14162_vm2 }
 0x6f8   : > { %8382 = vrot.lane.b32.xlu0 %v8381_v10, %s8854_s20  ;;  %4503 = vst.msk [vmem:[#allocation3 + $0x81] sm:$0xff] %vm14161_vm15, %v4394_v47  ;;  %v4722_v10 = vsel %vm14165_vm0, %v4590_v19, 0.0  ;;  %8298 = vmatpush3.bf16.msra.mxu0 %v8295_v58  ;;  %v8386_v47 = vpack.i.bf16 %v4652_v7, %v11807_v51  ;;  %v4759_v56 = vsel %vm9393_vm7, %v11875_v39, 0.0  ;;  %v4560_v51 = vld [vmem:[#allocation3 + $0x39] sm:$0xff] }
 0x6f9   : > { %v8067_v36 = vpop.f32.mrb[80].mxu0  ;;  %v8401_v14 = vpack.i.bf16 %v4722_v10, %v4589_v49  ;;  %v8391_v58 = vpack.i.bf16 %v4560_v51, %v4559_v5  ;;  %v4790_v10 = vsel %vm9489_vm11, %v4590_v19, 0.0 }
 0x6fa   : > { %v4409_v8 = vadd.f32 %v8067_v36, %v11725_v33  ;;  %v4403_v24 = vpop.f32.mrb[81].mxu0  ;;  %8367 = vrot.lane.b32.xlu1 %v8361_v16, %s8852_s16  ;;  %v200_v16 = vld [vmem:[%s13379_s1 + $0x1b0] sm:$0xff]  ;;  %v202_v36 = vld [vmem:[%s13379_s1 + $0x1c0] sm:$0xf] }
 0x6fb   : > { %v4404_v0 = vadd.f32 %v11725_v33, %v4403_v24  ;;  %v8299_v38 = vpack.c.bf16 %v201_v45, %v200_v16  ;;  %v14167_v24 = vld [vmem:[#allocation36_spill] sm:$0xff]  ;;  %v14170_v16 = vld [vmem:[#allocation41_spill] sm:$0xff] }
 0x6fc   : > { %5565 = vrot.lane.b32.xlu0 %v4559_v5, %s8842_s19  ;;  %4506 = vst.msk [vmem:[#allocation3 + $0x99] sm:$0xff] %vm14162_vm2, %v4409_v8  ;;  %v8406_v8 = vpack.i.bf16 %v11882_v1, %v4759_v56  ;;  %vm14168_vm8 = vnez %v14167_v24  ;;  %vm14171_vm3 = vnez %v14170_v16  ;;  %vm14179_vm2 = vnez %v14178_v15  ;;  %v4533_v16 = vld [vmem:[#allocation3 + $0x60] sm:$0xff] }
 0x6fd   : > { %4505 = vst.msk [vmem:[#allocation3 + $0x91] sm:$0xff] %vm14163_vm14, %v4404_v0  ;;  %8300 = vmatprep.subr.bf16.mxu0 %v8299_v38  ;;  %v4691_v0 = vsel %vm14168_vm8, %v11875_v39, 0.0  ;;  %v4654_v45 = vsel %vm14171_vm3, %v4590_v19, 0.0 }
 0x6fe   : > { %5689 = vrot.lane.b32.xlu1 %v4589_v49, %s8851_s5  ;;  %8302 = vmatpush3.bf16.msra.mxu0 %v8299_v38  ;;  %v8411_v7 = vpack.i.bf16 %v11882_v1, %v4691_v0  ;;  %v4592_v38 = vld [vmem:[#allocation3 + $0x3a] sm:$0xff] }
 0x6ff   : > { %8105 = vmatprep.subr.msk.mxu0 %vm14166_vm4, %v202_v36  ;;  %v4724_v5 = vsel %vm14171_vm3, %v4592_v38, 0.0 }
 0x700   : > { %5693 = vrot.lane.b32.xlu0 %v4591_v35, %s8851_s5  ;;  %v8431_v56 = vpack.i.bf16 %v4724_v5, %v4591_v35 }
 0x702   : > { %8387 = vrot.lane.b32.xlu1 %v8386_v47, %s8855_s26  ;;  %8106 = vmatpush3.msk.msra.mxu0 %vm14169_vm6, %v202_v36  ;;  %v8416_v47 = vpack.i.bf16 %v4654_v45, %v4589_v49  ;;  %v11909_v36 = vld [vmem:[#allocation3 + $0x40] sm:$0xff]  ;;  %v14172_v45 = vld [vmem:[#allocation37_spill] sm:$0xff] }
 0x703   : > { %v4761_v19 = vsel %vm14168_vm8, %v11909_v36, 0.0  ;;  %vm14173_vm11 = vnez %v14172_v45 }
 0x704   : > { %8402 = vrot.lane.b32.xlu0 %v8401_v14, %s8856_s6  ;;  %v4561_v14 = vld [vmem:[#allocation3 + $0x41] sm:$0xff]  ;;  %v8436_v0 = vpack.i.bf16 %v11912_v23, %v4761_v19  ;;  %v4563_v19 = vld [vmem:[#allocation3 + $0x51] sm:$0xff] }
 0x705   : > { %v4540_v48 = vld [vmem:[#allocation3 + $0x98] sm:$0xff] }
 0x706   : > { %5567 = vrot.lane.b32.xlu1 %v4560_v51, %s8842_s19  ;;  %v4562_v51 = vld [vmem:[#allocation3 + $0x49] sm:$0xff] }
 0x707   : > { %v8421_v49 = vpack.i.bf16 %v4562_v51, %v4561_v14 }
 0x708   : > { %8407 = vrot.lane.b32.xlu0 %v8406_v8, %s8857_s3 }
 0x70a   : > { %8392 = vrot.lane.b32.xlu1 %v8391_v58, %s8845_s27 }
 0x70c   : > { %8412 = vrot.lane.b32.xlu0 %v8411_v7, %s8854_s20 }
 0x70e   : > { %8397 = vrot.lane.b32.xlu1 %v8391_v58, %s8852_s16 }
 0x710   : > { %5691 = vrot.lane.b32.xlu0 %v4790_v10, %s8851_s5  ;;  %v4693_v10 = vsel %vm14173_vm11, %v11909_v36, 0.0 }
 0x711   : > { %v8441_v5 = vpack.i.bf16 %v11912_v23, %v4693_v10 }
 0x712   : > { %8417 = vrot.lane.b32.xlu1 %v8416_v47, %s8855_s26 }
 0x714   : > { %5569 = vrot.lane.b32.xlu0 %v4561_v14, %s8842_s19  ;;  %v14176_v14 = vld [vmem:[#allocation42_spill] sm:$0xff] }
 0x715   : > { %vm14177_vm15 = vnez %v14176_v14 }
 0x716   : > { %5571 = vrot.lane.b32.xlu1 %v4562_v51, %s8842_s19  ;;  %v4593_v51 = vld [vmem:[#allocation3 + $0x42] sm:$0xff] }
 0x718   : > { %8432 = vrot.lane.b32.xlu0 %v8431_v56, %s8856_s6  ;;  %v4656_v56 = vsel %vm14177_vm15, %v4592_v38, 0.0 }
 0x719   : > { %v8070_v8 = vpop.f32.mrb[82].mxu0 }
 0x71a   : > { %v4419_v58 = vadd.f32 %v8070_v8, %v11725_v33  ;;  %v4413_v7 = vpop.f32.mrb[83].mxu0  ;;  %8422 = vrot.lane.b32.xlu1 %v8421_v49, %s8845_s27  ;;  %v4594_v8 = vld [vmem:[#allocation3 + $0x4a] sm:$0xff] }
 0x71b   : > { %v4414_v47 = vadd.f32 %v11725_v33, %v4413_v7  ;;  %v4595_v7 = vld [vmem:[#allocation3 + $0x52] sm:$0xff] }
 0x71c   : > { %8437 = vrot.lane.b32.xlu0 %v8436_v0, %s8857_s3  ;;  %4508 = vst.msk [vmem:[#allocation3 + $0xa9] sm:$0xff] %vm14174_vm9, %v4419_v58  ;;  %v8446_v0 = vpack.i.bf16 %v4656_v56, %v4591_v35  ;;  %v4726_v58 = vsel %vm14177_vm15, %v4594_v8, 0.0  ;;  %v4564_v56 = vld [vmem:[#allocation3 + $0x59] sm:$0xff]  ;;  %vm14189_vm9 = vnez %v14188_v40 }
 0x71d   : > { %4507 = vst.msk [vmem:[#allocation3 + $0xa1] sm:$0xff] %vm14175_vm5, %v4414_v47  ;;  %v8461_v10 = vpack.i.bf16 %v4726_v58, %v4593_v51  ;;  %v4792_v47 = vsel %vm14165_vm0, %v4592_v38, 0.0  ;;  %v8451_v26 = vpack.i.bf16 %v4564_v56, %v4563_v19  ;;  %vm14182_vm0 = vmmov %vm14175_vm5 }
 0x71e   : > { %8427 = vrot.lane.b32.xlu1 %v8421_v49, %s8852_s16  ;;  %v11939_v49 = vld [vmem:[#allocation3 + $0x50] sm:$0xff]  ;;  %vm14183_vm4 = vmmov %vm14182_vm0 }
 0x71f   : > { %v4763_v35 = vsel %vm14173_vm11, %v11939_v49, 0.0  ;;  %v4695_v58 = vsel %vm14179_vm2, %v11939_v49, 0.0  ;;  %vm14190_vm5 = vmmov %vm14182_vm0 }
 0x720   : > { %8442 = vrot.lane.b32.xlu0 %v8441_v5, %s8854_s20  ;;  %v4532_v5 = vld [vmem:[#allocation3 + $0x58] sm:$0xff] }
 0x721   : > { %v8471_v38 = vpack.i.bf16 %v4532_v5, %v4695_v58 }
 0x722   : > { %5697 = vrot.lane.b32.xlu1 %v4593_v51, %s8851_s5 }
 0x724   : > { %5573 = vrot.lane.b32.xlu0 %v4563_v19, %s8842_s19 }
 0x726   : > { %8447 = vrot.lane.b32.xlu1 %v8446_v0, %s8855_s26  ;;  %v8466_v0 = vpack.i.bf16 %v4532_v5, %v4763_v35  ;;  %v4596_v35 = vld [vmem:[#allocation3 + $0x5a] sm:$0xff] }
 0x728   : > { %5701 = vrot.lane.b32.xlu0 %v4595_v7, %s8851_s5 }
 0x72a   : > { %5695 = vrot.lane.b32.xlu1 %v4792_v47, %s8851_s5  ;;  %v14180_v47 = vld [vmem:[#allocation44_spill] sm:$0xff] }
 0x72b   : > { %vm14181_vm14 = vnez %v14180_v47 }
 0x72c   : > { %8462 = vrot.lane.b32.xlu0 %v8461_v10, %s8856_s6  ;;  %v4658_v44 = vsel %vm14181_vm14, %v4594_v8, 0.0  ;;  %v4794_v10 = vsel %vm14171_vm3, %v4594_v8, 0.0  ;;  %v4728_v19 = vsel %vm14181_vm14, %v4596_v35, 0.0 }
 0x72d   : > { %v8476_v4 = vpack.i.bf16 %v4658_v44, %v4593_v51  ;;  %v8491_v8 = vpack.i.bf16 %v4728_v19, %v4595_v7  ;;  %v4566_v44 = vld [vmem:[#allocation3 + $0x69] sm:$0xff] }
 0x72e   : > { %5575 = vrot.lane.b32.xlu1 %v4564_v56, %s8842_s19  ;;  %v4534_v51 = vld [vmem:[#allocation3 + $0x68] sm:$0xff] }
 0x730   : > { %8467 = vrot.lane.b32.xlu0 %v8466_v0, %s8857_s3  ;;  %v4565_v0 = vld [vmem:[#allocation3 + $0x61] sm:$0xff] }
 0x732   : > { %8452 = vrot.lane.b32.xlu1 %v8451_v26, %s8845_s27 }
 0x734   : > { %8472 = vrot.lane.b32.xlu0 %v8471_v38, %s8854_s20  ;;  %v14184_v38 = vld [vmem:[#allocation45_spill] sm:$0xff] }
 0x735   : > { %vm14185_vm6 = vnez %v14184_v38 }
 0x736   : > { %8457 = vrot.lane.b32.xlu1 %v8451_v26, %s8852_s16 }
 0x738   : > { %5699 = vrot.lane.b32.xlu0 %v4794_v10, %s8851_s5  ;;  %v4697_v10 = vsel %vm14185_vm6, %v4533_v16, 0.0 }
 0x739   : > { %v8073_v6 = vpop.f32.mrb[84].mxu0  ;;  %v8501_v19 = vpack.i.bf16 %v4534_v51, %v4697_v10  ;;  %v11993_v10 = vpop.permute.xlu1 %8337 }
 0x73a   : > { %v4429_v5 = vadd.f32 %v8073_v6, %v11725_v33  ;;  %v4423_v56 = vpop.f32.mrb[85].mxu0  ;;  %8477 = vrot.lane.b32.xlu1 %v8476_v4, %s8855_s26  ;;  %v4765_v6 = vsel %vm14179_vm2, %v4533_v16, 0.0  ;;  %v8481_v4 = vpack.i.bf16 %v4566_v44, %v4565_v0 }
 0x73b   : > { %v4424_v58 = vadd.f32 %v11725_v33, %v4423_v56  ;;  %v8496_v26 = vpack.i.bf16 %v4534_v51, %v4765_v6  ;;  %v11986_v51 = vld [vmem:[#allocation3 + $0x72] sm:$0xff] }
 0x73c   : > { %5577 = vrot.lane.b32.xlu0 %v4565_v0, %s8842_s19  ;;  %4510 = vst.msk [vmem:[#allocation3 + $0xb9] sm:$0xff] %vm14182_vm0, %v4429_v5  ;;  %v14186_v5 = vld [vmem:[#allocation46_spill] sm:$0xff]  ;;  %v4535_v6 = vld [vmem:[#allocation3 + $0x70] sm:$0xff] }
 0x73d   : > { %4509 = vst.msk [vmem:[#allocation3 + $0xb1] sm:$0xff] %vm14183_vm4, %v4424_v58  ;;  %vm14187_vm3 = vnez %v14186_v5  ;;  %v4597_v58 = vld [vmem:[#allocation3 + $0x62] sm:$0xff]  ;;  %v4567_v0 = vld [vmem:[#allocation3 + $0x71] sm:$0xff]  ;;  %vm13597_vm4 = vcmask 588800  }
 0x73e   : > { %5579 = vrot.lane.b32.xlu1 %v4566_v44, %s8842_s19  ;;  %v4660_v56 = vsel %vm14187_vm3, %v4596_v35, 0.0 }
 0x73f   : > { %v8506_v44 = vpack.i.bf16 %v4660_v56, %v4595_v7  ;;  %v4536_v7 = vld [vmem:[#allocation3 + $0x78] sm:$0xff] }
 0x740   : > { %8492 = vrot.lane.b32.xlu0 %v8491_v8, %s8856_s6  ;;  %v4598_v8 = vld [vmem:[#allocation3 + $0x6a] sm:$0xff]  ;;  %v4568_v56 = vld [vmem:[#allocation3 + $0x79] sm:$0xff] }
 0x741   : > { %v4730_v16 = vsel %vm14187_vm3, %v4598_v8, 0.0  ;;  %v8511_v14 = vpack.i.bf16 %v4568_v56, %v4567_v0 }
 0x742   : > { %8482 = vrot.lane.b32.xlu1 %v8481_v4, %s8845_s27 }
 0x744   : > { %8497 = vrot.lane.b32.xlu0 %v8496_v26, %s8857_s3  ;;  %v4796_v26 = vsel %vm14177_vm15, %v4596_v35, 0.0 }
 0x746   : > { %8487 = vrot.lane.b32.xlu1 %v8481_v4, %s8852_s16  ;;  %v8521_v4 = vpack.i.bf16 %v4730_v16, %v4597_v58  ;;  %v4699_v16 = vsel %vm14189_vm9, %v4535_v6, 0.0 }
 0x747   : > { %v8531_v59 = vpack.i.bf16 %v4536_v7, %v4699_v16 }
 0x748   : > { %8502 = vrot.lane.b32.xlu0 %v8501_v19, %s8854_s20  ;;  %v4767_v19 = vsel %vm14185_vm6, %v4535_v6, 0.0  ;;  %vm14195_vm6 = vmmov %vm14194_vm13 }
 0x74a   : > { %5705 = vrot.lane.b32.xlu1 %v4597_v58, %s8851_s5 }
 0x74c   : > { %5581 = vrot.lane.b32.xlu0 %v4567_v0, %s8842_s19 }
 0x74e   : > { %8507 = vrot.lane.b32.xlu1 %v8506_v44, %s8855_s26  ;;  %v8526_v44 = vpack.i.bf16 %v4536_v7, %v4767_v19  ;;  %v14191_v19 = vld [vmem:[#allocation48_spill] sm:$0xff]  ;;  %v12016_v7 = vld [vmem:[#allocation3 + $0x7a] sm:$0xff] }
 0x74f   : > { %vm14192_vm15 = vnez %v14191_v19  ;;  %v4573_v19 = vld [vmem:[#allocation3 + $0xa1] sm:$0xff] }
 0x750   : > { %5709 = vrot.lane.b32.xlu0 %v11986_v51, %s8851_s5  ;;  %v4662_v0 = vsel %vm14192_vm15, %v4598_v8, 0.0 }
 0x752   : > { %5703 = vrot.lane.b32.xlu1 %v4796_v26, %s8851_s5 }
 0x754   : > { %8522 = vrot.lane.b32.xlu0 %v8521_v4, %s8856_s6 }
 0x756   : > { %5583 = vrot.lane.b32.xlu1 %v4568_v56, %s8842_s19 }
 0x758   : > { %8527 = vrot.lane.b32.xlu0 %v8526_v44, %s8857_s3  ;;  %v8343_v35 = vpop.permute.xlu1 %8342  ;;  %v4521_v44 = vld [vmem:[#allocation3] sm:$0xff] }
 0x759   : > { %v8076_v26 = vpop.f32.mrb[86].mxu0  ;;  %v8345_v20 = vunpack.i.h.bf16 %v8343_v35  ;;  %v8344_v42 = vunpack.i.l.bf16 %v8343_v35 }
 0x75a   : > { %v12002_v55 = vpop.permute.xlu0 %8352  ;;  %v4439_v41 = vadd.f32 %v8076_v26, %v11725_v33  ;;  %v4433_v13 = vpop.f32.mrb[87].mxu0  ;;  %8512 = vrot.lane.b32.xlu1 %v8511_v14, %s8845_s27  ;;  %v4732_v26 = vsel %vm14192_vm15, %v12016_v7, 0.0 }
 0x75b   : > { %v4434_v4 = vadd.f32 %v11725_v33, %v4433_v13  ;;  %v4798_v13 = vsel %vm14181_vm14, %v4598_v8, 0.0  ;;  %v8354_v47 = vunpack.i.l.bf16 %v12002_v55  ;;  %v4537_v8 = vld [vmem:[#allocation3 + $0x80] sm:$0xff]  ;;  %vm14193_vm14 = vmmov %vm14182_vm0 }
 0x75c   : > { %8532 = vrot.lane.b32.xlu0 %v8531_v59, %s8854_s20  ;;  %4512 = vst.msk [vmem:[#allocation3 + $0xc9] sm:$0xff] %vm14190_vm5, %v4439_v41  ;;  %v12009_v6 = vpop.permute.xlu1 %8347  ;;  %v8536_v41 = vpack.i.bf16 %v4662_v0, %v4597_v58  ;;  %v8339_v59 = vunpack.i.l.bf16 %v11993_v10  ;;  %v4569_v58 = vld [vmem:[#allocation3 + $0x81] sm:$0xff]  ;;  %v8340_v0 = vunpack.i.h.bf16 %v11993_v10  ;;  %vm13593_vm5 = vcmask 883712  }
 0x75d   : > { %4511 = vst.msk [vmem:[#allocation3 + $0xc1] sm:$0xff] %vm14182_vm0, %v4434_v4  ;;  %v4617_v4 = vsel %vm9462_vm10, %v4521_v44, 0.0  ;;  %vm5915_vm10 = vcmask 424960   ;;  %vm13596_vm0 = vcmask 719872   ;;  %v4769_v10 = vsel %vm14189_vm9, %v4537_v8, 0.0 }
 0x75e   : > { %v12014_v56 = vpop.permute.xlu0 %5561  ;;  %8517 = vrot.lane.b32.xlu1 %v8511_v14, %s8852_s16  ;;  %v8355_v14 = vunpack.i.h.bf16 %v12002_v55  ;;  %v5785_v18 = vsel %vm14193_vm14, %v4617_v4, %v8339_v59  ;;  %v8551_v55 = vpack.i.bf16 %v4732_v26, %v11986_v51  ;;  %v5883_v28 = vsel %vm14195_vm6, %v8354_v47, %v8344_v42  ;;  %v4538_v4 = vld [vmem:[#allocation3 + $0x88] sm:$0xff]  ;;  %vm14198_vm6 = vmmov %vm14193_vm14 }
 0x75f   : > { %v8556_v60 = vpack.i.bf16 %v4538_v4, %v4769_v10  ;;  %vm13592_vm14 = vcmask 556032   ;;  %v8349_v10 = vunpack.i.l.bf16 %v12009_v6 }
 0x760   : > { %5707 = vrot.lane.b32.xlu0 %v4798_v13, %s8851_s5  ;;  %v8358_v16 = vpop.permute.xlu1 %8357 }
 0x761   : > { %v8359_v13 = vunpack.i.l.bf16 %v8358_v16  ;;  %v8360_v31 = vunpack.i.h.bf16 %v8358_v16 }
 0x762   : > { %v8373_v63 = vpop.permute.xlu0 %8372  ;;  %8537 = vrot.lane.b32.xlu1 %v8536_v41, %s8855_s26  ;;  %v4570_v41 = vld [vmem:[#allocation3 + $0x89] sm:$0xff] }
 0x763   : > { %v8375_v21 = vunpack.i.h.bf16 %v8373_v63  ;;  %v8374_v9 = vunpack.i.l.bf16 %v8373_v63  ;;  %v5884_v63 = vsel %vm14194_vm13, %v8355_v14, %v8345_v20  ;;  %v5818_v37 = vsel %vm13597_vm4, %v5785_v18, %v8359_v13 }
 0x764   : > { %5585 = vrot.lane.b32.xlu0 %v4569_v58, %s8842_s19  ;;  %v12034_v44 = vpop.permute.xlu1 %5563  ;;  %v8541_v2 = vpack.i.bf16 %v4570_v41, %v4569_v58  ;;  %v5786_v58 = vsel %vm14198_vm6, %v4522_v29, %v8340_v0  ;;  %v14199_v29 = vld [vmem:[#allocation50_spill] sm:$0xff]  ;;  %v12075_v0 = vld [vmem:[#allocation3 + $0x82] sm:$0xff] }
 0x765   : > { %v5916_v26 = vsel %vm5915_vm10, %v5883_v28, %v8374_v9  ;;  %v5917_v43 = vsel %vm5915_vm10, %v5884_v63, %v8375_v21  ;;  %v5851_v28 = vsel %vm13593_vm5, %v5818_v37, %v8354_v47  ;;  %v14196_v9 = vld [vmem:[#allocation49_spill] sm:$0xff]  ;;  %vm14200_vm6 = vnez %v14199_v29 }
 0x766   : > { %v8378_v35 = vpop.permute.xlu0 %8377  ;;  %5587 = vrot.lane.b32.xlu1 %v4570_v41, %s8842_s19  ;;  %vm14197_vm13 = vnez %v14196_v9  ;;  %v4664_v47 = vsel %vm14200_vm6, %v12016_v7, 0.0  ;;  %v12077_v41 = vld [vmem:[#allocation3 + $0x8a] sm:$0xff] }
 0x767   : > { %v8380_v54 = vunpack.i.h.bf16 %v8378_v35  ;;  %v8379_v59 = vunpack.i.l.bf16 %v8378_v35  ;;  %v4701_v21 = vsel %vm14197_vm13, %v4537_v8, 0.0 }
 0x768   : > { %8552 = vrot.lane.b32.xlu0 %v8551_v55, %s8856_s6  ;;  %v8363_v52 = vpop.permute.xlu1 %8362  ;;  %v8561_v55 = vpack.i.bf16 %v4538_v4, %v4701_v21 }
 0x769   : > { %v5949_v20 = vsel %vm13596_vm0, %v5916_v26, %v8379_v59  ;;  %v5950_v42 = vsel %vm13596_vm0, %v5917_v43, %v8380_v54  ;;  %v5819_v54 = vsel %vm13597_vm4, %v5786_v58, %v8360_v31  ;;  %v8365_v59 = vunpack.i.h.bf16 %v8363_v52 }
 0x76a   : > { %v12048_v35 = vpop.permute.xlu0 %8382  ;;  %v5982_v16 = vsel %vm13591_vm12, %v5949_v20, %v12014_v56  ;;  %8542 = vrot.lane.b32.xlu1 %v8541_v2, %s8845_s27  ;;  %v5983_v43 = vsel %vm13591_vm12, %v5950_v42, %v12034_v44  ;;  %v5852_v37 = vsel %vm13593_vm5, %v5819_v54, %v8355_v14  ;;  %vm14201_vm12 = vcmask 261120  }
 0x76b   : > { %6214 = vmatprep.mubr.f32.mxu1 %v5982_v16  ;;  %v8566_v14 = vpack.i.bf16 %v4664_v47, %v11986_v51  ;;  %v8364_v4 = vunpack.i.l.bf16 %v8363_v52  ;;  %v8385_v26 = vunpack.i.h.bf16 %v12048_v35  ;;  %v8384_v20 = vunpack.i.l.bf16 %v12048_v35  ;;  %v4539_v16 = vld [vmem:[#allocation3 + $0x90] sm:$0xff] }
 0x76c   : > { %8557 = vrot.lane.b32.xlu0 %v8556_v60, %s8857_s3  ;;  %6215 = vmatmul.mubr.f32.vlgmr.msra.gmra.mrb[96].mxu1 %v5851_v28  ;;  %v12061_v13 = vpop.permute.xlu1 %8367  ;;  %v12091_v28 = vld [vmem:[#allocation3 + $0x92] sm:$0xff]  ;;  %v4800_v52 = vsel %vm14187_vm3, %v12016_v7, 0.0  ;;  %v4771_v35 = vsel %vm14197_vm13, %v4539_v16, 0.0  ;;  %vm14204_vm5 = vcmask 293888  }
 0x76d   : > { %6219 = vmatprep.mubr.f32.mxu1 %v5983_v43  ;;  %vm14206_vm3 = vmmov %vm14204_vm5 }
 0x76e   : > { %v12063_v18 = vpop.permute.xlu0 %5565  ;;  %8547 = vrot.lane.b32.xlu1 %v8541_v2, %s8852_s16  ;;  %v4571_v2 = vld [vmem:[#allocation3 + $0x91] sm:$0xff] }
 0x770   : > { %8562 = vrot.lane.b32.xlu0 %v8561_v55, %s8854_s20  ;;  %6220 = vmatmul.mubr.f32.gmra.mrb[98].mxu1 %v5852_v37  ;;  %v5690_v60 = vpop.permute.xlu1 %5689  ;;  %v4619_v55 = vsel %vm9393_vm7, %v11763_v53, 0.0  ;;  %v8350_v37 = vunpack.i.h.bf16 %v12009_v6  ;;  %vm14205_vm7 = vmmov %vm14204_vm5 }
 0x771   : > { %v6014_v31 = vsel %vm14201_vm12, %v12014_v56, %v5690_v60  ;;  %v4734_v56 = vsel %vm14200_vm6, %v12077_v41, 0.0  ;;  %vm14202_vm12 = vcmask 130048  }
 0x772   : > { %v12073_v8 = vpop.permute.xlu0 %5693  ;;  %5713 = vrot.lane.b32.xlu1 %v12075_v0, %s8851_s5  ;;  %8107 = vmatprep.mubr.msk.f32.mxu0 %vm13592_vm14, %v6014_v31  ;;  %v8581_v43 = vpack.i.bf16 %v4734_v56, %v12075_v0  ;;  %v5886_v60 = vsel %vm14202_vm12, %v8385_v26, %v8365_v59  ;;  %vm14203_vm14 = vmmov %vm14202_vm12  ;;  %v5787_v56 = vsel %vm14204_vm5, %v4619_v55, %v8349_v10  ;;  %vm14207_vm5 = vcmask 1014784  }
 0x773   : > { %v5885_v47 = vsel %vm14203_vm14, %v8384_v20, %v8364_v4  ;;  %vm14208_vm14 = vcmask 883712  }
 0x774   : > { %5589 = vrot.lane.b32.xlu0 %v4571_v2, %s8842_s19  ;;  %v8388_v63 = vpop.permute.xlu1 %8387 }
 0x775   : > { %v8389_v51 = vunpack.i.l.bf16 %v8388_v63 }
 0x776   : > { %v8403_v42 = vpop.permute.xlu0 %8402  ;;  %8567 = vrot.lane.b32.xlu1 %v8566_v14, %s8855_s26 }
 0x777   : > { %v8405_v21 = vunpack.i.h.bf16 %v8403_v42  ;;  %v8404_v58 = vunpack.i.l.bf16 %v8403_v42  ;;  %v8390_v42 = vunpack.i.h.bf16 %v8388_v63  ;;  %v5820_v59 = vsel %vm13597_vm4, %v5787_v56, %v8389_v51  ;;  %v14216_v56 = vld [vmem:[#allocation52_spill] sm:$0xff] }
 0x778   : > { %5717 = vrot.lane.b32.xlu0 %v12091_v28, %s8851_s5  ;;  %v12096_v54 = vpop.permute.xlu1 %5567  ;;  %v5853_v51 = vsel %vm14208_vm14, %v5820_v59, %v8384_v20 }
 0x779   : > { %v8079_v31 = vpop.f32.mrb[88].mxu0  ;;  %v5918_v6 = vsel %vm5915_vm10, %v5885_v47, %v8404_v58  ;;  %v5919_v4 = vsel %vm5915_vm10, %v5886_v60, %v8405_v21  ;;  %v8586_v58 = vpack.i.bf16 %v4540_v48, %v4771_v35  ;;  %v14209_v21 = vld [vmem:[#allocation51_spill] sm:$0xff] }
 0x77a   : > { %v8408_v14 = vpop.permute.xlu0 %8407  ;;  %v4449_v5 = vadd.f32 %v8079_v31, %v11725_v33  ;;  %v4443_v57 = vpop.f32.mrb[89].mxu0  ;;  %5711 = vrot.lane.b32.xlu1 %v4800_v52, %s8851_s5  ;;  %vm14210_vm12 = vnez %v14209_v21 }
 0x77b   : > { %v8410_v7 = vunpack.i.h.bf16 %v8408_v14  ;;  %v8409_v32 = vunpack.i.l.bf16 %v8408_v14  ;;  %v4444_v53 = vadd.f32 %v11725_v33, %v4443_v57  ;;  %v4572_v57 = vld [vmem:[#allocation3 + $0x99] sm:$0xff] }
 0x77c   : > { %8582 = vrot.lane.b32.xlu0 %v8581_v43, %s8856_s6  ;;  %4514 = vst.msk [vmem:[#allocation3 + $0xd9] sm:$0xff] %vm14205_vm7, %v4449_v5  ;;  %v8393_v10 = vpop.permute.xlu1 %8392  ;;  %v4703_v43 = vsel %vm14210_vm12, %v4539_v16, 0.0  ;;  %vm14211_vm7 = vmmov %vm14206_vm3  ;;  %v8571_v35 = vpack.i.bf16 %v4572_v57, %v4571_v2  ;;  %v8369_v5 = vunpack.i.l.bf16 %v12061_v13 }
 0x77d   : > { %v5951_v63 = vsel %vm13596_vm0, %v5918_v6, %v8409_v32  ;;  %v5952_v55 = vsel %vm13596_vm0, %v5919_v4, %v8410_v7  ;;  %4513 = vst.msk [vmem:[#allocation3 + $0xd1] sm:$0xff] %vm14206_vm3, %v4444_v53  ;;  %v5788_v32 = vsel %vm14211_vm7, %v11765_v34, %v8350_v37  ;;  %vm14212_vm3 = vmmov %vm14207_vm5  ;;  %v8591_v20 = vpack.i.bf16 %v4540_v48, %v4703_v43  ;;  %v12161_v48 = vld [vmem:[#allocation3 + $0x9a] sm:$0xff] }
 0x77e   : > { %v12121_v52 = vpop.permute.xlu0 %8412  ;;  %v5984_v33 = vsel %vm14207_vm5, %v5951_v63, %v12063_v18  ;;  %5591 = vrot.lane.b32.xlu1 %v4572_v57, %s8842_s19  ;;  %v5985_v60 = vsel %vm14212_vm3, %v5952_v55, %v12096_v54  ;;  %v5821_v47 = vsel %vm13597_vm4, %v5788_v32, %v8390_v42  ;;  %vm14213_vm5 = vcmask 261120  }
 0x77f   : > { %6224 = vmatprep.mubr.f32.mxu1 %v5984_v33  ;;  %v5854_v34 = vsel %vm14208_vm14, %v5821_v47, %v8385_v26  ;;  %vm14214_vm7 = vmmov %vm14213_vm5  ;;  %vm14215_vm3 = vcmask 556032   ;;  %vm14217_vm0 = vnez %v14216_v56  ;;  %v4802_v26 = vsel %vm14192_vm15, %v12077_v41, 0.0 }
 0x780   : > { %8587 = vrot.lane.b32.xlu0 %v8586_v58, %s8857_s3  ;;  %6225 = vmatmul.mubr.f32.gmra.mrb[100].mxu1 %v5853_v51  ;;  %v12135_v31 = vpop.permute.xlu1 %8397  ;;  %v6016_v37 = vsel %vm14214_vm7, %v12063_v18, %v12073_v8  ;;  %v4666_v42 = vsel %vm14217_vm0, %v12077_v41, 0.0  ;;  %vm14218_vm4 = vmmov %vm14215_vm3  ;;  %v8395_v53 = vunpack.i.h.bf16 %v8393_v10  ;;  %v8394_v6 = vunpack.i.l.bf16 %v8393_v10  ;;  %v4574_v41 = vld [vmem:[#allocation3 + $0xa9] sm:$0xff] }
 0x781   : > { %6229 = vmatprep.mubr.f32.mxu1 %v5985_v60  ;;  %v8596_v18 = vpack.i.bf16 %v4666_v42, %v12075_v0  ;;  %v8415_v59 = vunpack.i.h.bf16 %v12121_v52  ;;  %v8414_v4 = vunpack.i.l.bf16 %v12121_v52  ;;  %v4621_v33 = vsel %vm14168_vm8, %v11804_v61, 0.0 }
 0x782   : > { %v5692_v14 = vpop.permute.xlu0 %5691  ;;  %8572 = vrot.lane.b32.xlu1 %v8571_v35, %s8845_s27  ;;  %v8370_v10 = vunpack.i.h.bf16 %v12061_v13  ;;  %v4736_v52 = vsel %vm14217_vm0, %v12161_v48, 0.0  ;;  %v8601_v51 = vpack.i.bf16 %v4574_v41, %v4573_v19  ;;  %vm14219_vm15 = vcmask 293888  }
 0x783   : > { %v6015_v16 = vsel %vm14213_vm5, %v12034_v44, %v5692_v14  ;;  %v5789_v43 = vsel %vm14219_vm15, %v4621_v33, %v8369_v5  ;;  %vm14222_vm8 = vcmask 588800   ;;  %vm14223_vm14 = vcmask 719872   ;;  %v4542_v5 = vld [vmem:[#allocation3 + $0xa8] sm:$0xff] }
 0x784   : > { %8592 = vrot.lane.b32.xlu0 %v8591_v20, %s8854_s20  ;;  %6230 = vmatmul.mubr.f32.gmra.mrb[102].mxu1 %v5854_v34  ;;  %v8418_v2 = vpop.permute.xlu1 %8417  ;;  %v4541_v20 = vld [vmem:[#allocation3 + $0xa0] sm:$0xff]  ;;  %vm14224_vm7 = vmmov %vm14223_vm14  ;;  %v8611_v42 = vpack.i.bf16 %v4736_v52, %v12091_v28  ;;  %vm14226_vm15 = vcmask 883712  }
 0x785   : > { %8108 = vmatmul.mubr.msk.f32.vlgmr.msra.gmra.mrb[96].mxu0 %vm14215_vm3, %v6015_v16  ;;  %v8419_v63 = vunpack.i.l.bf16 %v8418_v2  ;;  %v8420_v24 = vunpack.i.h.bf16 %v8418_v2  ;;  %vm14225_vm3 = vcmask 1014784  }
 0x786   : > { %8110 = vmatprep.mubr.msk.f32.mxu0 %vm14218_vm4, %v6016_v37  ;;  %v12150_v44 = vpop.permute.xlu0 %5569  ;;  %8577 = vrot.lane.b32.xlu1 %v8571_v35, %s8852_s16  ;;  %vm14220_vm4 = vcmask 130048  }
 0x787   : > { %v5888_v32 = vsel %vm14220_vm4, %v8415_v59, %v8395_v53  ;;  %vm14221_vm5 = vmmov %vm14220_vm4  ;;  %v5822_v13 = vsel %vm14222_vm8, %v5789_v43, %v8419_v63  ;;  %vm14227_vm4 = vcmask 293888  }
 0x788   : > { %5715 = vrot.lane.b32.xlu0 %v4802_v26, %s8851_s5  ;;  %v12158_v8 = vpop.permute.xlu1 %5571  ;;  %v5887_v60 = vsel %vm14221_vm5, %v8414_v4, %v8394_v6  ;;  %v5790_v53 = vsel %vm14227_vm4, %v11813_v25, %v8370_v10  ;;  %vm14228_vm5 = vmmov %vm14225_vm3 }
 0x78a   : > { %v8433_v7 = vpop.permute.xlu0 %8432  ;;  %8597 = vrot.lane.b32.xlu1 %v8596_v18, %s8855_s26  ;;  %v5855_v18 = vsel %vm14226_vm15, %v5822_v13, %v8414_v4  ;;  %v12205_v4 = vld [vmem:[#allocation3 + $0xa2] sm:$0xff] }
 0x78b   : > { %v8435_v55 = vunpack.i.h.bf16 %v8433_v7  ;;  %v8434_v0 = vunpack.i.l.bf16 %v8433_v7  ;;  %v4773_v7 = vsel %vm14210_vm12, %v4541_v20, 0.0 }
 0x78c   : > { %5593 = vrot.lane.b32.xlu0 %v4573_v19, %s8842_s19  ;;  %v12167_v57 = vpop.permute.xlu1 %8422  ;;  %v5823_v19 = vsel %vm14222_vm8, %v5790_v53, %v8420_v24 }
 0x78d   : > { %v5920_v61 = vsel %vm5915_vm10, %v5887_v60, %v8434_v0  ;;  %v5921_v14 = vsel %vm5915_vm10, %v5888_v32, %v8435_v55  ;;  %v8616_v55 = vpack.i.bf16 %v4542_v5, %v4773_v7  ;;  %v14229_v0 = vld [vmem:[#allocation53_spill] sm:$0xff]  ;;  %v8424_v53 = vunpack.i.l.bf16 %v12167_v57 }
 0x78e   : > { %v8438_v58 = vpop.permute.xlu0 %8437  ;;  %5595 = vrot.lane.b32.xlu1 %v4574_v41, %s8842_s19  ;;  %v4575_v60 = vld [vmem:[#allocation3 + $0xb1] sm:$0xff] }
 0x78f   : > { %v8440_v47 = vunpack.i.h.bf16 %v8438_v58  ;;  %v8439_v35 = vunpack.i.l.bf16 %v8438_v58  ;;  %v14232_v58 = vld [vmem:[#allocation54_spill] sm:$0xff] }
 0x790   : > { %8602 = vrot.lane.b32.xlu0 %v8601_v51, %s8845_s27  ;;  %v12184_v16 = vpop.permute.xlu1 %8427 }
 0x791   : > { %v5953_v34 = vsel %vm14223_vm14, %v5920_v61, %v8439_v35  ;;  %v5954_v37 = vsel %vm14224_vm7, %v5921_v14, %v8440_v47  ;;  %vm14230_vm14 = vnez %v14229_v0  ;;  %vm14231_vm7 = vmmov %vm14226_vm15  ;;  %v4576_v47 = vld [vmem:[#allocation3 + $0xb9] sm:$0xff]  ;;  %v12223_v35 = vld [vmem:[%s13379_s1 + $0x7d] ss:$0 sm:$0xff] }
 0x792   : > { %v12189_v26 = vpop.permute.xlu0 %8442  ;;  %v5986_v2 = vsel %vm14225_vm3, %v5953_v34, %v12150_v44  ;;  %8607 = vrot.lane.b32.xlu1 %v8601_v51, %s8852_s16  ;;  %v5987_v6 = vsel %vm14228_vm5, %v5954_v37, %v12158_v8  ;;  %v4705_v33 = vsel %vm14230_vm14, %v4541_v20, 0.0  ;;  %v5856_v25 = vsel %vm14231_vm7, %v5823_v19, %v8415_v59  ;;  %vm14234_vm15 = vmmov %vm14227_vm4 }
 0x793   : > { %6234 = vmatprep.mubr.f32.mxu1 %v5986_v2  ;;  %v8621_v52 = vpack.i.bf16 %v4542_v5, %v4705_v33  ;;  %vm14233_vm3 = vnez %v14232_v58  ;;  %v12231_v14 = vpack.i.bf16 %v4576_v47, %v4575_v60  ;;  %v8399_v34 = vunpack.i.l.bf16 %v12135_v31  ;;  %v12236_v2 = vld [vmem:[#allocation3 + $0xaa] sm:$0xff] }
 0x794   : > { %8612 = vrot.lane.b32.xlu0 %v8611_v42, %s8856_s6  ;;  %6235 = vmatmul.mubr.f32.gmra.mrb[104].mxu1 %v5855_v18  ;;  %v5698_v41 = vpop.permute.xlu1 %5697  ;;  %v4668_v51 = vsel %vm14233_vm3, %v12161_v48, 0.0  ;;  %v8445_v37 = vunpack.i.h.bf16 %v12189_v26  ;;  %v8444_v42 = vunpack.i.l.bf16 %v12189_v26  ;;  %vm14235_vm5 = vcmask 261120  }
 0x795   : > { %6239 = vmatprep.mubr.f32.mxu1 %v5987_v6  ;;  %v8626_v13 = vpack.i.bf16 %v4668_v51, %v12091_v28  ;;  %v8425_v28 = vunpack.i.h.bf16 %v12167_v57  ;;  %vm14236_vm8 = vmmov %vm14235_vm5  ;;  %vm14237_vm7 = vcmask 556032   ;;  %v4623_v57 = vsel %vm14173_vm11, %v11875_v39, 0.0  ;;  %v12271_v39 = vld [vmem:[#allocation3 + $0xb2] sm:$0xff] }
 0x796   : > { %v12203_v63 = vpop.permute.xlu0 %5573  ;;  %5721 = vrot.lane.b32.xlu1 %v12205_v4, %s8851_s5  ;;  %v6018_v7 = vsel %vm14236_vm8, %v12150_v44, %v5698_v41  ;;  %v4804_v41 = vsel %vm14200_vm6, %v12161_v48, 0.0  ;;  %v8400_v33 = vunpack.i.h.bf16 %v12135_v31  ;;  %vm14241_vm8 = vcmask 293888  }
 0x797   : > { %vm14242_vm11 = vcmask 588800   ;;  %vm14243_vm6 = vmmov %vm14241_vm8 }
 0x798   : > { %8617 = vrot.lane.b32.xlu0 %v8616_v55, %s8857_s3  ;;  %6240 = vmatmul.mubr.f32.gmra.mrb[106].mxu1 %v5856_v25  ;;  %v12213_v10 = vpop.permute.xlu1 %8447 }
 0x799   : > { %v8082_v43 = vpop.f32.mrb[90].mxu0  ;;  %v8449_v6 = vunpack.i.l.bf16 %v12213_v10 }
 0x79a   : > { %v12218_v32 = vpop.permute.xlu0 %5701  ;;  %v4459_v59 = vadd.f32 %v12223_v35, %v8082_v43  ;;  %v4453_v24 = vpop.f32.mrb[91].mxu0  ;;  %8622 = vrot.lane.b32.xlu1 %v8621_v52, %s8854_s20 }
 0x79b   : > { %v4454_v61 = vadd.f32 %v12223_v35, %v4453_v24 }
 0x79c   : > { %5597 = vrot.lane.b32.xlu0 %v4575_v60, %s8842_s19  ;;  %4516 = vst.msk [vmem:[#allocation3 + $0xe9] sm:$0xff] %vm14234_vm15, %v4459_v59  ;;  %v5696_v20 = vpop.permute.xlu1 %5695  ;;  %vm14238_vm15 = vmmov %vm14237_vm7  ;;  %v5791_v60 = vsel %vm14241_vm8, %v4623_v57, %v8399_v34  ;;  %v8450_v59 = vunpack.i.h.bf16 %v12213_v10  ;;  %vm14248_vm8 = vcmask 883712  }
 0x79d   : > { %4515 = vst.msk [vmem:[#allocation3 + $0xe1] sm:$0xff] %vm14227_vm4, %v4454_v61  ;;  %v6017_v18 = vsel %vm14235_vm5, %v12096_v54, %v5696_v20  ;;  %v4738_v54 = vsel %vm14233_vm3, %v12236_v2, 0.0  ;;  %vm14239_vm4 = vcmask 130048   ;;  %v4543_v20 = vld [vmem:[#allocation3 + $0xb0] sm:$0xff] }
 0x79e   : > { %v8463_v5 = vpop.permute.xlu0 %8462  ;;  %8627 = vrot.lane.b32.xlu1 %v8626_v13, %s8855_s26  ;;  %8111 = vmatmul.mubr.msk.f32.gmra.mrb[98].mxu0 %vm14237_vm7, %v6017_v18  ;;  %v5890_v25 = vsel %vm14239_vm4, %v8445_v37, %v8425_v28  ;;  %vm14240_vm5 = vmmov %vm14239_vm4  ;;  %v5824_v13 = vsel %vm14242_vm11, %v5791_v60, %v8449_v6  ;;  %vm14244_vm7 = vcmask 719872   ;;  %v8641_v28 = vpack.i.bf16 %v4738_v54, %v12205_v4 }
 0x79f   : > { %v8465_v19 = vunpack.i.h.bf16 %v8463_v5  ;;  %v8464_v55 = vunpack.i.l.bf16 %v8463_v5  ;;  %8113 = vmatprep.mubr.msk.f32.mxu0 %vm14238_vm15, %v6018_v7  ;;  %v5889_v52 = vsel %vm14240_vm5, %v8444_v42, %v8424_v53  ;;  %vm14245_vm15 = vmmov %vm14244_vm7  ;;  %vm14247_vm5 = vcmask 1014784  }
 0x7a0   : > { %8632 = vrot.lane.b32.xlu0 %v12231_v14, %s8845_s27  ;;  %v12254_v44 = vpop.permute.xlu1 %5575  ;;  %vm14246_vm4 = vmmov %vm14243_vm6  ;;  %v5857_v6 = vsel %vm14248_vm8, %v5824_v13, %v8444_v42 }
 0x7a1   : > { %v8085_v51 = vpop.f32.mrb[92].mxu0  ;;  %v5922_v61 = vsel %vm5915_vm10, %v5889_v52, %v8464_v55  ;;  %v5923_v10 = vsel %vm5915_vm10, %v5890_v25, %v8465_v19  ;;  %v4544_v19 = vld [vmem:[#allocation3 + $0xb8] sm:$0xff]  ;;  %v4775_v55 = vsel %vm14230_vm14, %v4543_v20, 0.0  ;;  %vm14249_vm11 = vmmov %vm14246_vm4  ;;  %v4707_v52 = vsel %vm10384_vm1, %v4543_v20, 0.0 }
 0x7a2   : > { %v8468_v43 = vpop.permute.xlu0 %8467  ;;  %v4469_v29 = vadd.f32 %v12223_v35, %v8085_v51  ;;  %v4463_v45 = vpop.f32.mrb[93].mxu0  ;;  %5719 = vrot.lane.b32.xlu1 %v4804_v41, %s8851_s5  ;;  %v5792_v41 = vsel %vm14249_vm11, %v11882_v1, %v8400_v33  ;;  %v8646_v42 = vpack.i.bf16 %v4544_v19, %v4775_v55  ;;  %v8651_v60 = vpack.i.bf16 %v4544_v19, %v4707_v52  ;;  %v4545_v52 = vld [vmem:[#allocation3 + $0xc0] sm:$0xff] }
 0x7a3   : > { %v8470_v48 = vunpack.i.h.bf16 %v8468_v43  ;;  %v8469_v24 = vunpack.i.l.bf16 %v8468_v43  ;;  %v4464_v31 = vadd.f32 %v12223_v35, %v4463_v45  ;;  %v8429_v45 = vunpack.i.l.bf16 %v12184_v16 }
 0x7a4   : > { %5725 = vrot.lane.b32.xlu0 %v12271_v39, %s8851_s5  ;;  %4518 = vst.msk [vmem:[#allocation3 + $0xf9] sm:$0xff] %vm14243_vm6, %v4469_v29  ;;  %v12280_v34 = vpop.permute.xlu1 %8452  ;;  %vm14250_vm6 = vmmov %vm14247_vm5 }
 0x7a5   : > { %v5955_v18 = vsel %vm14244_vm7, %v5922_v61, %v8469_v24  ;;  %v5956_v5 = vsel %vm14245_vm15, %v5923_v10, %v8470_v48  ;;  %4517 = vst.msk [vmem:[#allocation3 + $0xf1] sm:$0xff] %vm14246_vm4, %v4464_v31  ;;  %vm14251_vm7 = vcmask 588800   ;;  %vm14252_vm15 = vcmask 261120   ;;  %vm14253_vm4 = vmmov %vm14248_vm8  ;;  %v12336_v61 = vld [vmem:[#allocation3 + $0xba] sm:$0xff] }
 0x7a6   : > { %v12286_v7 = vpop.permute.xlu0 %8472  ;;  %v5988_v53 = vsel %vm14247_vm5, %v5955_v18, %v12203_v63  ;;  %5599 = vrot.lane.b32.xlu1 %v4576_v47, %s8842_s19  ;;  %v5989_v54 = vsel %vm14250_vm6, %v5956_v5, %v12254_v44  ;;  %v5825_v57 = vsel %vm14251_vm7, %v5792_v41, %v8450_v59  ;;  %vm14254_vm5 = vmmov %vm14252_vm15  ;;  %vm14255_vm8 = vcmask 556032  }
 0x7a7   : > { %6244 = vmatprep.mubr.f32.mxu1 %v5988_v53  ;;  %v5858_v1 = vsel %vm14253_vm4, %v5825_v57, %v8445_v37  ;;  %v6020_v33 = vsel %vm14254_vm5, %v12203_v63, %v12218_v32  ;;  %vm14258_vm6 = vmmov %vm14255_vm8  ;;  %v4806_v63 = vsel %vm14217_vm0, %v12236_v2, 0.0  ;;  %vm14259_vm7 = vcmask 293888  }
 0x7a8   : > { %8642 = vrot.lane.b32.xlu0 %v8641_v28, %s8856_s6  ;;  %6245 = vmatmul.mubr.f32.gmra.mrb[108].mxu1 %v5857_v6  ;;  %v12300_v25 = vpop.permute.xlu1 %8457  ;;  %v8455_v56 = vunpack.i.h.bf16 %v12280_v34  ;;  %v8475_v13 = vunpack.i.h.bf16 %v12286_v7  ;;  %v8474_v10 = vunpack.i.l.bf16 %v12286_v7  ;;  %vm14260_vm0 = vmmov %vm14259_vm7  ;;  %v8430_v7 = vunpack.i.h.bf16 %v12184_v16 }
 0x7a9   : > { %6249 = vmatprep.mubr.f32.mxu1 %v5989_v54  ;;  %vm14262_vm4 = vcmask 130048  }
 0x7aa   : > { %v5700_v47 = vpop.permute.xlu0 %5699  ;;  %8637 = vrot.lane.b32.xlu1 %v12231_v14, %s8852_s16  ;;  %v5892_v41 = vsel %vm14262_vm4, %v8475_v13, %v8455_v56  ;;  %vm14263_vm5 = vmmov %vm14262_vm4  ;;  %v12385_v56 = vld [vmem:[#allocation3 + $0xc2] sm:$0xff] }
 0x7ab   : > { %v6019_v51 = vsel %vm14252_vm15, %v12158_v8, %v5700_v47  ;;  %v14256_v8 = vld [vmem:[#allocation55_spill] sm:$0xff]  ;;  %vm14261_vm15 = vmmov %vm14260_vm0 }
 0x7ac   : > { %8647 = vrot.lane.b32.xlu0 %v8646_v42, %s8857_s3  ;;  %6250 = vmatmul.mubr.f32.gmra.mrb[110].mxu1 %v5858_v1  ;;  %v12316_v43 = vpop.permute.xlu1 %8477  ;;  %vm14257_vm11 = vnez %v14256_v8 }
 0x7ad   : > { %8114 = vmatmul.mubr.msk.f32.gmra.mrb[100].mxu0 %vm14255_vm8, %v6019_v51  ;;  %v4670_v14 = vsel %vm14257_vm11, %v12236_v2, 0.0  ;;  %v8454_v2 = vunpack.i.l.bf16 %v12280_v34  ;;  %v8479_v20 = vunpack.i.l.bf16 %v12316_v43  ;;  %v4625_v34 = vsel %vm14179_vm2, %v11909_v36, 0.0 }
 0x7ae   : > { %8116 = vmatprep.mubr.msk.f32.mxu0 %vm14258_vm6, %v6020_v33  ;;  %v12322_v26 = vpop.permute.xlu0 %5577  ;;  %8652 = vrot.lane.b32.xlu1 %v8651_v60, %s8854_s20  ;;  %v8088_v37 = vpop.f32.mrb[94].mxu0  ;;  %v8656_v29 = vpack.i.bf16 %v4670_v14, %v12205_v4  ;;  %v4577_v4 = vld [vmem:[#allocation3 + $0xc1] sm:$0xff]  ;;  %v4740_v53 = vsel %vm14257_vm11, %v12336_v61, 0.0  ;;  %v5793_v55 = vsel %vm14261_vm15, %v4625_v34, %v8429_v45  ;;  %v8480_v15 = vunpack.i.h.bf16 %v12316_v43  ;;  %v4579_v34 = vld [vmem:[#allocation3 + $0xd1] sm:$0xff] }
 0x7af   : > { %v4479_v32 = vadd.f32 %v12223_v35, %v8088_v37  ;;  %v4473_v59 = vpop.f32.mrb[95].mxu0  ;;  %v5891_v54 = vsel %vm14263_vm5, %v8474_v10, %v8454_v2  ;;  %vm14264_vm2 = vcmask 588800   ;;  %vm14265_vm8 = vcmask 719872  }
 0x7b0   : > { %5723 = vrot.lane.b32.xlu0 %v4806_v63, %s8851_s5  ;;  %v4474_v48 = vadd.f32 %v12223_v35, %v4473_v59  ;;  %v12332_v24 = vpop.permute.xlu1 %5579  ;;  %v4578_v35 = vld [vmem:[#allocation3 + $0xc9] sm:$0xff]  ;;  %v5826_v16 = vsel %vm14264_vm2, %v5793_v55, %v8479_v20  ;;  %vm14266_vm6 = vmmov %vm14265_vm8  ;;  %v8671_v60 = vpack.i.bf16 %v4740_v53, %v12271_v39  ;;  %v5794_v59 = vsel %vm14261_vm15, %v11912_v23, %v8430_v7  ;;  %v4580_v7 = vld [vmem:[#allocation3 + $0xd9] sm:$0xff] }
 0x7b1   : > { %4520 = vst.msk [vmem:[#allocation3 + $0x109] sm:$0xff] %vm14259_vm7, %v4479_v32  ;;  %v8661_v19 = vpack.i.bf16 %v4578_v35, %v4577_v4  ;;  %vm14267_vm7 = vcmask 1014784   ;;  %v4546_v63 = vld [vmem:[#allocation3 + $0xc8] sm:$0xff]  ;;  %v4777_v32 = vsel %vm10384_vm1, %v4545_v52, 0.0  ;;  %vm14270_vm5 = vmmov %vm14264_vm2  ;;  %vm14271_vm2 = vnez %v13811_v17 }
 0x7b2   : > { %v8493_v31 = vpop.permute.xlu0 %8492  ;;  %4519 = vst.msk [vmem:[#allocation3 + $0x101] sm:$0xff] %vm14260_vm0, %v4474_v48  ;;  %8657 = vrot.lane.b32.xlu1 %v8656_v29, %s8855_s26  ;;  %vm14268_vm0 = vcmask 883712   ;;  %vm14269_vm4 = vmmov %vm14267_vm7  ;;  %v5827_v48 = vsel %vm14270_vm5, %v5794_v59, %v8480_v15  ;;  %v8676_v2 = vpack.i.bf16 %v4546_v63, %v4777_v32  ;;  %v14273_v20 = vld [vmem:[#allocation56_spill] sm:$0xff]  ;;  %vm14277_vm15 = vcmask 556032   ;;  %v12443_v59 = vld [vmem:[#allocation3 + $0xd0] sm:$0xff] }
 0x7b3   : > { %v8495_v18 = vunpack.i.h.bf16 %v8493_v31  ;;  %v8494_v5 = vunpack.i.l.bf16 %v8493_v31  ;;  %v5859_v37 = vsel %vm14268_vm0, %v5826_v16, %v8474_v10  ;;  %v4709_v10 = vsel %vm14271_vm2, %v4545_v52, 0.0  ;;  %v12410_v15 = vld [vmem:[#allocation3 + $0xca] sm:$0xff] }
 0x7b4   : > { %5601 = vrot.lane.b32.xlu0 %v4577_v4, %s8842_s19  ;;  %v12346_v28 = vpop.permute.xlu1 %8482  ;;  %vm14279_vm5 = vnez %v14184_v38 }
 0x7b5   : > { %v5924_v36 = vsel %vm5915_vm10, %v5891_v54, %v8494_v5  ;;  %v5925_v42 = vsel %vm5915_vm10, %v5892_v41, %v8495_v18 }
 0x7b6   : > { %v8498_v6 = vpop.permute.xlu0 %8497  ;;  %5603 = vrot.lane.b32.xlu1 %v4578_v35, %s8842_s19  ;;  %v8681_v35 = vpack.i.bf16 %v4546_v63, %v4709_v10 }
 0x7b7   : > { %v8500_v57 = vunpack.i.h.bf16 %v8498_v6  ;;  %v8499_v47 = vunpack.i.l.bf16 %v8498_v6  ;;  %v8459_v6 = vunpack.i.l.bf16 %v12300_v25 }
 0x7b8   : > { %8662 = vrot.lane.b32.xlu0 %v8661_v19, %s8845_s27  ;;  %v12364_v51 = vpop.permute.xlu1 %8487 }
 0x7b9   : > { %v5957_v1 = vsel %vm14265_vm8, %v5924_v36, %v8499_v47  ;;  %v5958_v33 = vsel %vm14266_vm6, %v5925_v42, %v8500_v57  ;;  %vm14272_vm8 = vmmov %vm14268_vm0  ;;  %vm14274_vm6 = vnez %v14273_v20  ;;  %v8484_v42 = vunpack.i.l.bf16 %v12346_v28 }
 0x7ba   : > { %v12369_v14 = vpop.permute.xlu0 %8502  ;;  %v5990_v43 = vsel %vm14267_vm7, %v5957_v1, %v12322_v26  ;;  %8667 = vrot.lane.b32.xlu1 %v8661_v19, %s8852_s16  ;;  %v5991_v29 = vsel %vm14269_vm4, %v5958_v33, %v12332_v24  ;;  %v5860_v23 = vsel %vm14272_vm8, %v5827_v48, %v8475_v13  ;;  %v4672_v18 = vsel %vm14274_vm6, %v12336_v61, 0.0  ;;  %vm14278_vm4 = vmmov %vm14277_vm15 }
 0x7bb   : > { %6254 = vmatprep.mubr.f32.mxu1 %v5990_v43  ;;  %v8686_v13 = vpack.i.bf16 %v4672_v18, %v12271_v39  ;;  %v8691_v19 = vpack.i.bf16 %v4580_v7, %v4579_v34  ;;  %vm14275_vm7 = vcmask 261120   ;;  %v8505_v54 = vunpack.i.h.bf16 %v12369_v14 }
 0x7bc   : > { %8672 = vrot.lane.b32.xlu0 %v8671_v60, %s8856_s6  ;;  %6255 = vmatmul.mubr.f32.gmra.mrb[112].mxu1 %v5859_v37  ;;  %v5706_v45 = vpop.permute.xlu1 %5705  ;;  %v8504_v57 = vunpack.i.l.bf16 %v12369_v14  ;;  %vm14276_vm0 = vmmov %vm14275_vm7  ;;  %v8460_v1 = vunpack.i.h.bf16 %v12300_v25  ;;  %v4742_v33 = vsel %vm14274_vm6, %v12410_v15, 0.0  ;;  %v4808_v14 = vsel %vm14233_vm3, %v12336_v61, 0.0 }
 0x7bd   : > { %6259 = vmatprep.mubr.f32.mxu1 %v5991_v29  ;;  %v6022_v47 = vsel %vm14276_vm0, %v12322_v26, %v5706_v45  ;;  %v4627_v26 = vsel %vm14279_vm5, %v11939_v49, 0.0  ;;  %vm14280_vm8 = vcmask 293888   ;;  %v12435_v49 = vld [vmem:[#allocation3 + $0xd2] sm:$0xff]  ;;  %vm14283_vm3 = vcmask 588800  }
 0x7be   : > { %v12383_v31 = vpop.permute.xlu0 %5581  ;;  %5729 = vrot.lane.b32.xlu1 %v12385_v56, %s8851_s5  ;;  %v5795_v43 = vsel %vm14280_vm8, %v4627_v26, %v8459_v6  ;;  %vm14286_vm5 = vcmask 1014784   ;;  %vm14287_vm8 = vcmask 883712   ;;  %v4779_v18 = vsel %vm14271_vm2, %v12443_v59, 0.0 }
 0x7bf   : > { %v8489_v26 = vunpack.i.l.bf16 %v12364_v51 }
 0x7c0   : > { %8677 = vrot.lane.b32.xlu0 %v8676_v2, %s8857_s3  ;;  %6260 = vmatmul.mubr.f32.gmra.mrb[114].mxu1 %v5860_v23  ;;  %v12393_v4 = vpop.permute.xlu1 %8507  ;;  %v8701_v2 = vpack.i.bf16 %v4742_v33, %v12385_v56  ;;  %v12497_v33 = vld [vmem:[#allocation3 + $0xda] sm:$0xff] }
 0x7c1   : > { %v8509_v39 = vunpack.i.l.bf16 %v12393_v4  ;;  %v8510_v25 = vunpack.i.h.bf16 %v12393_v4 }
 0x7c2   : > { %v12398_v5 = vpop.permute.xlu0 %5709  ;;  %8682 = vrot.lane.b32.xlu1 %v8681_v35, %s8854_s20  ;;  %v12456_v35 = vld [vmem:[#allocation3 + $0xd8] sm:$0xff] }
 0x7c3   : > { %v5828_v61 = vsel %vm14283_vm3, %v5795_v43, %v8509_v39 }
 0x7c4   : > { %5605 = vrot.lane.b32.xlu0 %v4579_v34, %s8842_s19  ;;  %v5704_v53 = vpop.permute.xlu1 %5703  ;;  %v5861_v4 = vsel %vm14287_vm8, %v5828_v61, %v8504_v57  ;;  %v8818_v34 = vld [vmem:[#allocation3 + $0x58] sm:$0xff]  ;;  %v8490_v61 = vunpack.i.h.bf16 %v12364_v51 }
 0x7c5   : > { %v6021_v55 = vsel %vm14275_vm7, %v12254_v44, %v5704_v53  ;;  %v8485_v44 = vunpack.i.h.bf16 %v12346_v28  ;;  %vm14281_vm7 = vcmask 130048  }
 0x7c6   : > { %v8523_v41 = vpop.permute.xlu0 %8522  ;;  %8687 = vrot.lane.b32.xlu1 %v8686_v13, %s8855_s26  ;;  %8117 = vmatmul.mubr.msk.f32.gmra.mrb[102].mxu0 %vm14277_vm15, %v6021_v55  ;;  %vm14282_vm0 = vmmov %vm14281_vm7  ;;  %vm14284_vm15 = vcmask 719872  }
 0x7c7   : > { %v8525_v36 = vunpack.i.h.bf16 %v8523_v41  ;;  %v8524_v16 = vunpack.i.l.bf16 %v8523_v41  ;;  %8119 = vmatprep.mubr.msk.f32.mxu0 %vm14278_vm4, %v6022_v47  ;;  %v5894_v28 = vsel %vm14281_vm7, %v8505_v54, %v8485_v44  ;;  %v5893_v37 = vsel %vm14282_vm0, %v8504_v57, %v8484_v42  ;;  %vm14285_vm4 = vmmov %vm14284_vm15  ;;  %v14295_v42 = vld [vmem:[#allocation59_spill] sm:$0xff] }
 0x7c8   : > { %8692 = vrot.lane.b32.xlu0 %v8691_v19, %s8845_s27  ;;  %v12419_v52 = vpop.permute.xlu1 %5583  ;;  %vm14288_vm7 = vcmask 293888   ;;  %vm14289_vm0 = vmmov %vm14286_vm5  ;;  %v8706_v41 = vpack.i.bf16 %v12456_v35, %v4779_v18 }
 0x7c9   : > { %v5926_v58 = vsel %vm5915_vm10, %v5893_v37, %v8524_v16  ;;  %v5927_v32 = vsel %vm5915_vm10, %v5894_v28, %v8525_v36  ;;  %v5796_v13 = vsel %vm14288_vm7, %v8818_v34, %v8460_v1  ;;  %vm14294_vm7 = vcmask 556032   ;;  %v4582_v28 = vld [vmem:[#allocation3 + $0xe9] sm:$0xff] }
 0x7ca   : > { %v8528_v60 = vpop.permute.xlu0 %8527  ;;  %5727 = vrot.lane.b32.xlu1 %v4808_v14, %s8851_s5 }
 0x7cb   : > { %v8530_v63 = vunpack.i.h.bf16 %v8528_v60  ;;  %v8529_v38 = vunpack.i.l.bf16 %v8528_v60 }
 0x7cc   : > { %5733 = vrot.lane.b32.xlu0 %v12435_v49, %s8851_s5  ;;  %v12445_v29 = vpop.permute.xlu1 %8512 }
 0x7cd   : > { %v5959_v48 = vsel %vm14284_vm15, %v5926_v58, %v8529_v38  ;;  %v5960_v45 = vsel %vm14285_vm4, %v5927_v32, %v8530_v63  ;;  %vm14290_vm15 = vnez %v13832_v11  ;;  %vm14291_vm4 = vcmask 261120  }
 0x7ce   : > { %v12450_v10 = vpop.permute.xlu0 %8532  ;;  %v5992_v23 = vsel %vm14286_vm5, %v5959_v48, %v12383_v31  ;;  %5607 = vrot.lane.b32.xlu1 %v4580_v7, %s8842_s19  ;;  %v5993_v53 = vsel %vm14289_vm0, %v5960_v45, %v12419_v52  ;;  %v5829_v7 = vsel %vm14283_vm3, %v5796_v13, %v8510_v25  ;;  %v4711_v57 = vsel %vm14290_vm15, %v12443_v59, 0.0  ;;  %vm14292_vm5 = vmmov %vm14287_vm8  ;;  %v8819_v25 = vld [vmem:[#allocation3 + $0x60] sm:$0xff] }
 0x7cf   : > { %6264 = vmatprep.mubr.f32.mxu1 %v5992_v23  ;;  %v5862_v39 = vsel %vm14292_vm5, %v5829_v7, %v8505_v54  ;;  %vm14293_vm8 = vmmov %vm14291_vm4  ;;  %v8711_v44 = vpack.i.bf16 %v12456_v35, %v4711_v57  ;;  %vm14296_vm0 = vnez %v14295_v42  ;;  %v4810_v54 = vsel %vm14257_vm11, %v12410_v15, 0.0  ;;  %v12521_v13 = vld [vmem:[#allocation3 + $0xe0] sm:$0xff] }
 0x7d0   : > { %8702 = vrot.lane.b32.xlu0 %v8701_v2, %s8856_s6  ;;  %6265 = vmatmul.mubr.f32.gmra.mrb[116].mxu1 %v5861_v4  ;;  %v12466_v6 = vpop.permute.xlu1 %8517  ;;  %v6024_v36 = vsel %vm14293_vm8, %v12383_v31, %v12398_v5  ;;  %vm14297_vm3 = vmmov %vm14294_vm7  ;;  %v8515_v60 = vunpack.i.h.bf16 %v12445_v29  ;;  %v8514_v14 = vunpack.i.l.bf16 %v12445_v29  ;;  %v8535_v43 = vunpack.i.h.bf16 %v12450_v10 }
 0x7d1   : > { %6269 = vmatprep.mubr.f32.mxu1 %v5993_v53  ;;  %v8534_v8 = vunpack.i.l.bf16 %v12450_v10  ;;  %v4629_v58 = vsel %vm14189_vm9, %v8819_v25, 0.0  ;;  %v4744_v32 = vsel %vm14296_vm0, %v12497_v33, 0.0  ;;  %vm14298_vm11 = vcmask 293888  }
 0x7d2   : > { %v5708_v55 = vpop.permute.xlu0 %5707  ;;  %8697 = vrot.lane.b32.xlu1 %v8691_v19, %s8852_s16  ;;  %v5797_v45 = vsel %vm14298_vm11, %v4629_v58, %v8489_v26  ;;  %vm14301_vm9 = vcmask 588800   ;;  %vm14302_vm8 = vcmask 719872   ;;  %vm14305_vm11 = vcmask 883712   ;;  %v4583_v58 = vld [vmem:[#allocation3 + $0xf1] sm:$0xff] }
 0x7d3   : > { %v6023_v47 = vsel %vm14291_vm4, %v12332_v24, %v5708_v55  ;;  %v4674_v24 = vsel %vm14296_vm0, %v12410_v15, 0.0  ;;  %v4581_v15 = vld [vmem:[#allocation3 + $0xe1] sm:$0xff]  ;;  %vm14299_vm4 = vcmask 130048  }
 0x7d4   : > { %8707 = vrot.lane.b32.xlu0 %v8706_v41, %s8857_s3  ;;  %6270 = vmatmul.mubr.f32.gmra.mrb[118].mxu1 %v5862_v39  ;;  %v8538_v16 = vpop.permute.xlu1 %8537  ;;  %v8716_v31 = vpack.i.bf16 %v4674_v24, %v12385_v56  ;;  %v8721_v48 = vpack.i.bf16 %v4582_v28, %v4581_v15  ;;  %v5896_v2 = vsel %vm14299_vm4, %v8535_v43, %v8515_v60  ;;  %vm14300_vm5 = vmmov %vm14299_vm4  ;;  %vm14306_vm4 = vcmask 293888   ;;  %v12546_v60 = vld [vmem:[#allocation3 + $0xe2] sm:$0xff] }
 0x7d5   : > { %8120 = vmatmul.mubr.msk.f32.gmra.mrb[104].mxu0 %vm14294_vm7, %v6023_v47  ;;  %v8539_v56 = vunpack.i.l.bf16 %v8538_v16  ;;  %v5895_v10 = vsel %vm14300_vm5, %v8534_v8, %v8514_v14  ;;  %v8540_v40 = vunpack.i.h.bf16 %v8538_v16  ;;  %vm14303_vm7 = vmmov %vm14302_vm8  ;;  %v8731_v41 = vpack.i.bf16 %v4744_v32, %v12435_v49 }
 0x7d6   : > { %8122 = vmatprep.mubr.msk.f32.mxu0 %vm14297_vm3, %v6024_v36  ;;  %v12486_v19 = vpop.permute.xlu0 %5585  ;;  %8712 = vrot.lane.b32.xlu1 %v8711_v44, %s8854_s20  ;;  %vm14304_vm3 = vcmask 1014784   ;;  %v12534_v36 = vld [vmem:[#allocation3 + $0xe8] sm:$0xff]  ;;  %v4781_v16 = vsel %vm14290_vm15, %v12521_v13, 0.0 }
 0x7d7   : > { %v5830_v18 = vsel %vm14301_vm9, %v5797_v45, %v8539_v56  ;;  %v8820_v44 = vld [vmem:[#allocation3 + $0x68] sm:$0xff]  ;;  %vm14307_vm5 = vmmov %vm14304_vm3  ;;  %v8736_v14 = vpack.i.bf16 %v12534_v36, %v4781_v16 }
 0x7d8   : > { %5731 = vrot.lane.b32.xlu0 %v4810_v54, %s8851_s5  ;;  %v12494_v5 = vpop.permute.xlu1 %5587  ;;  %v5863_v39 = vsel %vm14305_vm11, %v5830_v18, %v8534_v8  ;;  %v5798_v24 = vsel %vm14306_vm4, %v8820_v44, %v8490_v61  ;;  %v4584_v61 = vld [vmem:[#allocation3 + $0xf9] sm:$0xff] }
 0x7da   : > { %v8553_v1 = vpop.permute.xlu0 %8552  ;;  %8717 = vrot.lane.b32.xlu1 %v8716_v31, %s8855_s26  ;;  %v5831_v31 = vsel %vm14301_vm9, %v5798_v24, %v8540_v40  ;;  %v12574_v40 = vld [vmem:[#allocation3 + $0xea] sm:$0xff] }
 0x7db   : > { %v8555_v37 = vunpack.i.h.bf16 %v8553_v1  ;;  %v8554_v63 = vunpack.i.l.bf16 %v8553_v1 }
 0x7dc   : > { %5609 = vrot.lane.b32.xlu0 %v4581_v15, %s8842_s19  ;;  %v12505_v38 = vpop.permute.xlu1 %8542 }
 0x7dd   : > { %v5928_v51 = vsel %vm5915_vm10, %v5895_v10, %v8554_v63  ;;  %v5929_v34 = vsel %vm5915_vm10, %v5896_v2, %v8555_v37  ;;  %v14310_v37 = vld [vmem:[#allocation62_spill] sm:$0xff] }
 0x7de   : > { %v8558_v29 = vpop.permute.xlu0 %8557  ;;  %5611 = vrot.lane.b32.xlu1 %v4582_v28, %s8842_s19 }
 0x7df   : > { %v8560_v23 = vunpack.i.h.bf16 %v8558_v29  ;;  %v8559_v4 = vunpack.i.l.bf16 %v8558_v29  ;;  %v8519_v29 = vunpack.i.l.bf16 %v12466_v6 }
 0x7e0   : > { %8722 = vrot.lane.b32.xlu0 %v8721_v48, %s8845_s27  ;;  %v12523_v53 = vpop.permute.xlu1 %8547 }
 0x7e1   : > { %v5961_v7 = vsel %vm14302_vm8, %v5928_v51, %v8559_v4  ;;  %v5962_v55 = vsel %vm14303_vm7, %v5929_v34, %v8560_v23  ;;  %vm14308_vm8 = vnez %v13857_v22  ;;  %vm14309_vm7 = vmmov %vm14305_vm11  ;;  %vm14312_vm11 = vcmask 261120  }
 0x7e2   : > { %v12528_v57 = vpop.permute.xlu0 %8562  ;;  %v5994_v47 = vsel %vm14304_vm3, %v5961_v7, %v12486_v19  ;;  %8727 = vrot.lane.b32.xlu1 %v8721_v48, %s8852_s16  ;;  %v5995_v54 = vsel %vm14307_vm5, %v5962_v55, %v12494_v5  ;;  %v4713_v8 = vsel %vm14308_vm8, %v12521_v13, 0.0  ;;  %v5864_v15 = vsel %vm14309_vm7, %v5831_v31, %v8535_v43  ;;  %vm14313_vm4 = vmmov %vm14312_vm11 }
 0x7e3   : > { %6274 = vmatprep.mubr.f32.mxu1 %v5994_v47  ;;  %v8741_v56 = vpack.i.bf16 %v12534_v36, %v4713_v8  ;;  %vm14311_vm3 = vnez %v14310_v37  ;;  %v8751_v48 = vpack.i.bf16 %v4584_v61, %v4583_v58  ;;  %v8565_v10 = vunpack.i.h.bf16 %v12528_v57  ;;  %v158_v37 = vld [vmem:[%s13379_s1 + $0x5c] sm:$0xff] }
 0x7e4   : > { %8732 = vrot.lane.b32.xlu0 %v8731_v41, %s8856_s6  ;;  %6275 = vmatmul.mubr.f32.gmra.mrb[120].mxu1 %v5863_v39  ;;  %v5714_v26 = vpop.permute.xlu1 %5713  ;;  %v4676_v63 = vsel %vm14311_vm3, %v12497_v33, 0.0  ;;  %v8564_v23 = vunpack.i.l.bf16 %v12528_v57  ;;  %vm14314_vm5 = vcmask 556032   ;;  %v8544_v34 = vunpack.i.l.bf16 %v12505_v38 }
 0x7e5   : > { %6279 = vmatprep.mubr.f32.mxu1 %v5995_v54  ;;  %v8746_v43 = vpack.i.bf16 %v4676_v63, %v12435_v49  ;;  %v6026_v4 = vsel %vm14313_vm4, %v12486_v19, %v5714_v26  ;;  %vm14315_vm9 = vmmov %vm14314_vm5  ;;  %v8821_v19 = vld [vmem:[#allocation3 + $0x70] sm:$0xff]  ;;  %v8520_v41 = vunpack.i.h.bf16 %v12466_v6  ;;  %v4746_v57 = vsel %vm14311_vm3, %v12574_v40, 0.0 }
 0x7e6   : > { %v12544_v1 = vpop.permute.xlu0 %5589  ;;  %5737 = vrot.lane.b32.xlu1 %v12546_v60, %s8851_s5  ;;  %v4631_v55 = vsel %vm14197_vm13, %v8821_v19, 0.0  ;;  %v4812_v39 = vsel %vm14274_vm6, %v12497_v33, 0.0  ;;  %vm14316_vm7 = vcmask 293888   ;;  %v12598_v6 = vld [vmem:[#allocation3 + $0xf2] sm:$0xff]  ;;  %vm14319_vm13 = vcmask 588800  }
 0x7e7   : > { %v5799_v16 = vsel %vm14316_vm7, %v4631_v55, %v8519_v29  ;;  %v12606_v26 = vld [vmem:[#allocation3 + $0xf0] sm:$0xff]  ;;  %vm14320_vm6 = vcmask 719872   ;;  %vm14323_vm7 = vcmask 883712   ;;  %v8822_v29 = vld [vmem:[#allocation3 + $0x78] sm:$0xff]  ;;  %v8549_v42 = vunpack.i.l.bf16 %v12523_v53 }
 0x7e8   : > { %8737 = vrot.lane.b32.xlu0 %v8736_v14, %s8857_s3  ;;  %6280 = vmatmul.mubr.f32.gmra.mrb[122].mxu1 %v5864_v15  ;;  %v12556_v28 = vpop.permute.xlu1 %8567 }
 0x7e9   : > { %v8569_v49 = vunpack.i.l.bf16 %v12556_v28  ;;  %v8570_v54 = vunpack.i.h.bf16 %v12556_v28 }
 0x7ea   : > { %v12562_v25 = vpop.permute.xlu0 %5717  ;;  %8742 = vrot.lane.b32.xlu1 %v8741_v56, %s8854_s20  ;;  %v8761_v56 = vpack.i.bf16 %v4746_v57, %v12546_v60 }
 0x7eb   : > { %v5832_v33 = vsel %vm14319_vm13, %v5799_v16, %v8569_v49  ;;  %v12664_v16 = vld [vmem:[#allocation3 + $0x10a] sm:$0xff] }
 0x7ec   : > { %5613 = vrot.lane.b32.xlu0 %v4583_v58, %s8842_s19  ;;  %v5712_v32 = vpop.permute.xlu1 %5711  ;;  %v5865_v58 = vsel %vm14323_vm7, %v5832_v33, %v8564_v23 }
 0x7ed   : > { %v6025_v45 = vsel %vm14312_vm11, %v12419_v52, %v5712_v32  ;;  %v8545_v52 = vunpack.i.h.bf16 %v12505_v38  ;;  %vm14317_vm11 = vcmask 130048   ;;  %v4783_v32 = vsel %vm14308_vm8, %v12606_v26, 0.0 }
 0x7ee   : > { %v8583_v2 = vpop.permute.xlu0 %8582  ;;  %8747 = vrot.lane.b32.xlu1 %v8746_v43, %s8855_s26  ;;  %8123 = vmatmul.mubr.msk.f32.gmra.mrb[106].mxu0 %vm14314_vm5, %v6025_v45  ;;  %vm14318_vm4 = vmmov %vm14317_vm11  ;;  %v12619_v43 = vld [vmem:[#allocation3 + $0xf8] sm:$0xff] }
 0x7ef   : > { %v8585_v51 = vunpack.i.h.bf16 %v8583_v2  ;;  %v8584_v18 = vunpack.i.l.bf16 %v8583_v2  ;;  %8125 = vmatprep.mubr.msk.f32.mxu0 %vm14315_vm9, %v6026_v4  ;;  %v5898_v38 = vsel %vm14317_vm11, %v8565_v10, %v8545_v52  ;;  %v5897_v44 = vsel %vm14318_vm4, %v8564_v23, %v8544_v34  ;;  %vm14321_vm5 = vmmov %vm14320_vm6 }
 0x7f0   : > { %8752 = vrot.lane.b32.xlu0 %v8751_v48, %s8845_s27  ;;  %v12583_v7 = vpop.permute.xlu1 %5591  ;;  %vm14322_vm9 = vcmask 1014784   ;;  %vm14324_vm11 = vcmask 293888   ;;  %v8766_v49 = vpack.i.bf16 %v12619_v43, %v4783_v32 }
 0x7f1   : > { %v5930_v20 = vsel %vm5915_vm10, %v5897_v44, %v8584_v18  ;;  %v5931_v31 = vsel %vm5915_vm10, %v5898_v38, %v8585_v51  ;;  %v5800_v45 = vsel %vm14324_vm11, %v8822_v29, %v8520_v41  ;;  %vm14325_vm4 = vmmov %vm14322_vm9  ;;  %vm14330_vm11 = vcmask 556032   ;;  %v14331_v41 = vld [vmem:[#allocation65_spill] sm:$0xff] }
 0x7f2   : > { %v8588_v47 = vpop.permute.xlu0 %8587  ;;  %5735 = vrot.lane.b32.xlu1 %v4812_v39, %s8851_s5  ;;  %v4684_v39 = vld [vmem:[#allocation3 + $0x109] sm:$0xff] }
 0x7f3   : > { %v8590_v24 = vunpack.i.h.bf16 %v8588_v47  ;;  %v8589_v9 = vunpack.i.l.bf16 %v8588_v47  ;;  %v4683_v47 = vld [vmem:[#allocation3 + $0x101] sm:$0xff] }
 0x7f4   : > { %5741 = vrot.lane.b32.xlu0 %v12598_v6, %s8851_s5  ;;  %v12608_v14 = vpop.permute.xlu1 %8572 }
 0x7f5   : > { %v5963_v8 = vsel %vm14320_vm6, %v5930_v20, %v8589_v9  ;;  %v5964_v15 = vsel %vm14321_vm5, %v5931_v31, %v8590_v24  ;;  %vm14326_vm6 = vnez %v13882_v46  ;;  %vm14327_vm5 = vcmask 261120   ;;  %v4685_v31 = vld [vmem:[#allocation3 + $0x102] sm:$0xff] }
 0x7f6   : > { %v12613_v28 = vpop.permute.xlu0 %8592  ;;  %v5996_v63 = vsel %vm14322_vm9, %v5963_v8, %v12544_v1  ;;  %5615 = vrot.lane.b32.xlu1 %v4584_v61, %s8842_s19  ;;  %v5997_v2 = vsel %vm14325_vm4, %v5964_v15, %v12583_v7  ;;  %v5833_v61 = vsel %vm14319_vm13, %v5800_v45, %v8570_v54  ;;  %v4715_v51 = vsel %vm14326_vm6, %v12606_v26, 0.0  ;;  %vm14328_vm9 = vmmov %vm14323_vm7  ;;  %v4681_v8 = vld [vmem:[#allocation3 + $0x100] sm:$0xff] }
 0x7f7   : > { %6284 = vmatprep.mubr.f32.mxu1 %v5996_v63  ;;  %v5866_v52 = vsel %vm14328_vm9, %v5833_v61, %v8565_v10  ;;  %vm14329_vm7 = vmmov %vm14327_vm5  ;;  %v8771_v55 = vpack.i.bf16 %v12619_v43, %v4715_v51  ;;  %vm14332_vm4 = vnez %v14331_v41  ;;  %v8575_v9 = vunpack.i.h.bf16 %v12608_v14  ;;  %v4682_v61 = vld [vmem:[#allocation3 + $0x108] sm:$0xff] }
 0x7f8   : > { %8762 = vrot.lane.b32.xlu0 %v8761_v56, %s8856_s6  ;;  %6285 = vmatmul.mubr.f32.gmra.mrb[124].mxu1 %v5865_v58  ;;  %v12629_v4 = vpop.permute.xlu1 %8577  ;;  %v6028_v34 = vsel %vm14329_vm7, %v12544_v1, %v12562_v25  ;;  %vm14333_vm13 = vmmov %vm14330_vm11  ;;  %v4814_v1 = vsel %vm14296_vm0, %v12574_v40, 0.0  ;;  %vm14334_vm0 = vnez %v13910_v3  ;;  %v8574_v54 = vunpack.i.l.bf16 %v12608_v14  ;;  %v8823_v14 = vld [vmem:[#allocation3 + $0x80] sm:$0xff] }
 0x7f9   : > { %6289 = vmatprep.mubr.f32.mxu1 %v5997_v2  ;;  %v4750_v24 = vsel %vm14334_vm0, %v12664_v16, 0.0  ;;  %v8595_v20 = vunpack.i.h.bf16 %v12613_v28  ;;  %v8594_v33 = vunpack.i.l.bf16 %v12613_v28  ;;  %v4633_v29 = vsel %vm14210_vm12, %v8823_v14, 0.0 }
 0x7fa   : > { %v5716_v23 = vpop.permute.xlu0 %5715  ;;  %8757 = vrot.lane.b32.xlu1 %v8751_v48, %s8852_s16  ;;  %v8550_v28 = vunpack.i.h.bf16 %v12523_v53  ;;  %v8786_v2 = vpack.i.bf16 %v4750_v24, %v4685_v31  ;;  %vm14336_vm9 = vcmask 293888   ;;  %vm14337_vm7 = vcmask 130048   ;;  %v8824_v24 = vld [vmem:[#allocation3 + $0x88] sm:$0xff] }
 0x7fb   : > { %v6027_v18 = vsel %vm14327_vm5, %v12494_v5, %v5716_v23  ;;  %v4678_v5 = vsel %vm14332_vm4, %v12574_v40, 0.0  ;;  %v12670_v40 = vld [vmem:[#allocation3 + $0xfa] sm:$0xff]  ;;  %vm14335_vm5 = vnez %v13906_v27  ;;  %v5900_v51 = vsel %vm14337_vm7, %v8595_v20, %v8575_v9 }
 0x7fc   : > { %8767 = vrot.lane.b32.xlu0 %v8766_v49, %s8857_s3  ;;  %6290 = vmatmul.mubr.f32.gmra.mrb[126].mxu1 %v5866_v52  ;;  %v12644_v19 = vpop.permute.xlu1 %8597  ;;  %v8776_v25 = vpack.i.bf16 %v4678_v5, %v12546_v60  ;;  %v8781_v60 = vpack.i.bf16 %v4684_v39, %v4683_v47  ;;  %v4748_v58 = vsel %vm14332_vm4, %v12670_v40, 0.0  ;;  %v4717_v23 = vsel %vm14335_vm5, %v4681_v8, 0.0 }
 0x7fd   : > { %8126 = vmatmul.mubr.msk.f32.gmra.mrb[108].mxu0 %vm14330_vm11, %v6027_v18  ;;  %v8599_v15 = vunpack.i.l.bf16 %v12644_v19  ;;  %v5801_v49 = vsel %vm14336_vm9, %v4633_v29, %v8549_v42  ;;  %vm14338_vm11 = vmmov %vm14337_vm7  ;;  %v8600_v21 = vunpack.i.h.bf16 %v12644_v19  ;;  %vm14339_vm12 = vcmask 588800  }
 0x7fe   : > { %8128 = vmatprep.mubr.msk.f32.mxu0 %vm14333_vm13, %v6028_v34  ;;  %v12651_v48 = vpop.permute.xlu0 %5593  ;;  %8772 = vrot.lane.b32.xlu1 %v8771_v55, %s8854_s20  ;;  %v5899_v18 = vsel %vm14338_vm11, %v8594_v33, %v8574_v54  ;;  %vm14340_vm13 = vcmask 719872   ;;  %v8791_v42 = vpack.i.bf16 %v4748_v58, %v12598_v6  ;;  %vm14342_vm7 = vcmask 1014784  }
 0x7ff   : > { %v5834_v55 = vsel %vm14339_vm12, %v5801_v49, %v8599_v15  ;;  %vm14341_vm9 = vmmov %vm14340_vm13  ;;  %vm14343_vm11 = vcmask 883712   ;;  %vm14344_vm12 = vcmask 293888   ;;  %v4785_v54 = vsel %vm14326_vm6, %v4681_v8, 0.0 }
 0x800   : > { %5739 = vrot.lane.b32.xlu0 %v4814_v1, %s8851_s5  ;;  %v12659_v10 = vpop.permute.xlu1 %5595  ;;  %v5802_v9 = vsel %vm14344_vm12, %v8824_v24, %v8550_v28  ;;  %v4816_v8 = vsel %vm14311_vm3, %v12670_v40, 0.0  ;;  %v8796_v14 = vpack.i.bf16 %v4682_v61, %v4785_v54  ;;  %v4752_v28 = vld [vmem:[#allocation3 + $0x118] sm:$0xff]  ;;  %vm14348_vm3 = vcmask 261120   ;;  %v8825_v54 = vld [vmem:[#allocation3 + $0x90] sm:$0xff] }
 0x801   : > { %vm14350_vm12 = vcmask 556032   ;;  %v4818_v3 = vsel %vm14332_vm4, %v12664_v16, 0.0  ;;  %vm14357_vm4 = vcmask 719872  }
 0x802   : > { %v12661_v57 = vpop.permute.xlu0 %8602  ;;  %8777 = vrot.lane.b32.xlu1 %v8776_v25, %s8855_s26 }
 0x803   : > { %v8605_v24 = vunpack.i.h.bf16 %v12661_v57 }
 0x804   : > { %5617 = vrot.lane.b32.xlu0 %v4683_v47, %s8842_s19  ;;  %v12667_v38 = vpop.permute.xlu1 %8607  ;;  %v8806_v47 = vpack.i.bf16 %v4682_v61, %v4717_v23 }
 0x806   : > { %v8613_v44 = vpop.permute.xlu0 %8612  ;;  %5619 = vrot.lane.b32.xlu1 %v4684_v39, %s8842_s19 }
 0x807   : > { %v8615_v56 = vunpack.i.h.bf16 %v8613_v44  ;;  %v8614_v63 = vunpack.i.l.bf16 %v8613_v44 }
 0x808   : > { %8782 = vrot.lane.b32.xlu0 %v8781_v60, %s8845_s27  ;;  %v5722_v32 = vpop.permute.xlu1 %5721  ;;  %v5867_v60 = vsel %vm14343_vm11, %v5834_v55, %v8594_v33  ;;  %v4680_v33 = vsel %vm14334_vm0, %v12670_v40, 0.0 }
 0x809   : > { %v5932_v53 = vsel %vm5915_vm10, %v5899_v18, %v8614_v63  ;;  %v5933_v5 = vsel %vm5915_vm10, %v5900_v51, %v8615_v56  ;;  %v4751_v56 = vld [vmem:[#allocation3 + $0x110] sm:$0xff]  ;;  %v8811_v40 = vpack.i.bf16 %v4680_v33, %v12598_v6  ;;  %v4754_v6 = vld [vmem:[#allocation3 + $0x119] sm:$0xff] }
 0x80a   : > { %v8618_v45 = vpop.permute.xlu0 %8617  ;;  %5745 = vrot.lane.b32.xlu1 %v4685_v31, %s8851_s5 }
 0x80b   : > { %v8620_v52 = vunpack.i.h.bf16 %v8618_v45  ;;  %v8619_v34 = vunpack.i.l.bf16 %v8618_v45  ;;  %v4787_v45 = vsel %vm14335_vm5, %v4751_v56, 0.0 }
 0x80c   : > { %8787 = vrot.lane.b32.xlu0 %v8786_v2, %s8856_s6  ;;  %v12699_v1 = vpop.permute.xlu1 %8622  ;;  %v157_v2 = vld [vmem:[%s13379_s1 + $0x54] sm:$0xff]  ;;  %v8801_v51 = vpack.i.bf16 %v4752_v28, %v4787_v45 }
 0x80d   : > { %v5965_v25 = vsel %vm14340_vm13, %v5932_v53, %v8619_v34  ;;  %v5966_v39 = vsel %vm14341_vm9, %v5933_v5, %v8620_v52  ;;  %vm14345_vm13 = vmmov %vm14342_vm7  ;;  %vm14346_vm9 = vcmask 588800   ;;  %v8303_v23 = vpack.c.bf16 %v158_v37, %v157_v2  ;;  %v159_v52 = vld [vmem:[%s13379_s1 + $0x64] sm:$0xff] }
 0x80e   : > { %v12704_v44 = vpop.permute.xlu0 %5597  ;;  %v5998_v19 = vsel %vm14342_vm7, %v5965_v25, %v12651_v48  ;;  %8807 = vrot.lane.b32.xlu1 %v8806_v47, %s8854_s20  ;;  %v5999_v31 = vsel %vm14345_vm13, %v5966_v39, %v12659_v10  ;;  %v5835_v15 = vsel %vm14346_vm9, %v5802_v9, %v8600_v21  ;;  %vm14347_vm7 = vmmov %vm14343_vm11  ;;  %v8579_v53 = vunpack.i.l.bf16 %v12629_v4 }
 0x80f   : > { %6294 = vmatprep.mubr.f32.mxu1 %v5998_v19  ;;  %v5868_v29 = vsel %vm14347_vm7, %v5835_v15, %v8595_v20  ;;  %vm14349_vm11 = vmmov %vm14348_vm3  ;;  %8304 = vmatprep.subr.bf16.mxu0 %v8303_v23  ;;  %v8625_v5 = vunpack.i.h.bf16 %v12699_v1  ;;  %v8624_v25 = vunpack.i.l.bf16 %v12699_v1  ;;  %v8604_v1 = vunpack.i.l.bf16 %v12661_v57 }
 0x810   : > { %6295 = vmatmul.mubr.f32.gmra.mrb[128].mxu1 %v5867_v60  ;;  %8792 = vrot.lane.b32.xlu0 %v8791_v42, %s8856_s6  ;;  %v12717_v63 = vpop.permute.xlu1 %8627  ;;  %v6030_v18 = vsel %vm14349_vm11, %v12651_v48, %v5722_v32  ;;  %vm14351_vm13 = vmmov %vm14350_vm12  ;;  %v4753_v48 = vld [vmem:[#allocation3 + $0x111] sm:$0xff]  ;;  %v4756_v32 = vld [vmem:[#allocation3 + $0x11a] sm:$0xff]  ;;  %v8580_v15 = vunpack.i.h.bf16 %v12629_v4  ;;  %vm14353_vm9 = vcmask 130048  }
 0x811   : > { %6299 = vmatprep.mubr.f32.mxu1 %v5999_v31  ;;  %8306 = vmatpush3.bf16.msra.mxu0 %v8303_v23  ;;  %v8629_v47 = vunpack.i.l.bf16 %v12717_v63  ;;  %v4820_v19 = vsel %vm14334_vm0, %v4756_v32, 0.0  ;;  %v161_v60 = vld [vmem:[%s13379_s1 + $0x74] sm:$0xf]  ;;  %v4635_v31 = vsel %vm14230_vm14, %v8825_v54, 0.0  ;;  %vm14352_vm0 = vcmask 293888   ;;  %vm14354_vm7 = vmmov %vm14353_vm9 }
 0x812   : > { %v12722_v58 = vpop.permute.xlu0 %8632  ;;  %5743 = vrot.lane.b32.xlu1 %v4816_v8, %s8851_s5  ;;  %v5803_v33 = vsel %vm14352_vm0, %v4635_v31, %v8579_v53  ;;  %v5901_v8 = vsel %vm14353_vm9, %v8624_v25, %v8604_v1  ;;  %v5902_v57 = vsel %vm14354_vm7, %v8625_v5, %v8605_v24  ;;  %v8630_v0 = vunpack.i.h.bf16 %v12717_v63  ;;  %vm14358_vm11 = vmmov %vm14357_vm4  ;;  %v8827_v24 = vld [vmem:[#allocation3 + $0xa0] sm:$0xff] }
 0x813   : > { %vm14356_vm14 = vcmask 588800   ;;  %vm14361_vm0 = vcmask 261120   ;;  %vm14362_vm9 = vcmask 883712   ;;  %vm14363_vm7 = vcmask 293888  }
 0x814   : > { %6300 = vmatmul.mubr.f32.gmra.mrb[130].mxu1 %v5868_v29  ;;  %8797 = vrot.lane.b32.xlu0 %v8796_v14, %s8857_s3  ;;  %v5720_v61 = vpop.permute.xlu1 %5719  ;;  %v5836_v41 = vsel %vm14356_vm14, %v5803_v33, %v8629_v47  ;;  %v4637_v1 = vsel %vm10384_vm1, %v8827_v24, 0.0  ;;  %v8610_v54 = vunpack.i.h.bf16 %v12667_v38  ;;  %vm14374_vm1 = vcmask 719872  }
 0x815   : > { %v6029_v20 = vsel %vm14348_vm3, %v12583_v7, %v5720_v61  ;;  %v160_v7 = vld [vmem:[%s13379_s1 + $0x6c] sm:$0xff]  ;;  %vm14355_vm3 = vcmask 1043456   ;;  %v4755_v61 = vld [vmem:[#allocation3 + $0x112] sm:$0xff]  ;;  %v5869_v23 = vsel %vm14362_vm9, %v5836_v41, %v8624_v25 }
 0x816   : > { %v12741_v49 = vpop.permute.xlu0 %5725  ;;  %8129 = vmatmul.mubr.msk.f32.gmra.mrb[110].mxu0 %vm14350_vm12, %v6029_v20  ;;  %8812 = vrot.lane.b32.xlu1 %v8811_v40, %s8855_s26  ;;  %v8307_v21 = vpack.c.bf16 %v160_v7, %v159_v52  ;;  %vm14359_vm12 = vcmask 1014784   ;;  %v8826_v20 = vld [vmem:[#allocation3 + $0x98] sm:$0xff] }
 0x817   : > { %8131 = vmatprep.mubr.msk.f32.mxu0 %vm14351_vm13, %v6030_v18  ;;  %vm14360_vm13 = vmmov %vm14355_vm3 }
 0x818   : > { %8802 = vrot.lane.b32.xlu0 %v8801_v51, %s8857_s3  ;;  %v12755_v34 = vpop.permute.xlu1 %5599  ;;  %8308 = vmatprep.subr.bf16.mxu0 %v8307_v21  ;;  %v5804_v51 = vsel %vm14363_vm7, %v8826_v20, %v8580_v15  ;;  %vm14365_vm14 = vmmov %vm14359_vm12 }
 0x819   : > { %8310 = vmatpush3.bf16.msra.mxu0 %v8307_v21 }
 0x81a   : > { %v8643_v55 = vpop.permute.xlu0 %8642  ;;  %5623 = vrot.lane.b32.xlu1 %v4754_v6, %s8842_s19  ;;  %8163 = vmatprep.subr.msk.mxu0 %vm14355_vm3, %v161_v60  ;;  %vm14364_vm3 = vcmask 556032  }
 0x81b   : > { %v8645_v39 = vunpack.i.h.bf16 %v8643_v55  ;;  %v8644_v42 = vunpack.i.l.bf16 %v8643_v55  ;;  %v8609_v55 = vunpack.i.l.bf16 %v12667_v38 }
 0x81c   : > { %5621 = vrot.lane.b32.xlu0 %v4753_v48, %s8842_s19  ;;  %v12770_v9 = vpop.permute.xlu1 %8637 }
 0x81d   : > { %v5934_v4 = vsel %vm5915_vm10, %v5901_v8, %v8644_v42  ;;  %v5935_v16 = vsel %vm5915_vm10, %v5902_v57, %v8645_v39  ;;  %8164 = vmatpush3.msk.msra.mxu0 %vm14360_vm13, %v161_v60  ;;  %vm14369_vm13 = vmmov %vm14362_vm9  ;;  %vm14371_vm9 = vcmask 130048  }
 0x81e   : > { %v8648_v56 = vpop.permute.xlu0 %8647  ;;  %5751 = vrot.lane.b32.xlu1 %v4820_v19, %s8851_s5  ;;  %v8635_v19 = vunpack.i.h.bf16 %v12722_v58 }
 0x81f   : > { %v8650_v14 = vunpack.i.h.bf16 %v8648_v56  ;;  %v8649_v29 = vunpack.i.l.bf16 %v8648_v56 }
 0x820   : > { %5747 = vrot.lane.b32.xlu0 %v4818_v3, %s8851_s5  ;;  %v12788_v28 = vpop.permute.xlu1 %8652 }
 0x821   : > { %v5967_v45 = vsel %vm14357_vm4, %v5934_v4, %v8649_v29  ;;  %v5968_v2 = vsel %vm14358_vm11, %v5935_v16, %v8650_v14  ;;  %vm14366_vm4 = vcmask 588800   ;;  %vm14367_vm11 = vmmov %vm14361_vm0 }
 0x822   : > { %v5724_v37 = vpop.permute.xlu0 %5723  ;;  %v6000_v40 = vsel %vm14359_vm12, %v5967_v45, %v12704_v44  ;;  %v6001_v18 = vsel %vm14365_vm14, %v5968_v2, %v12755_v34  ;;  %v5837_v6 = vsel %vm14366_vm4, %v5804_v51, %v8630_v0  ;;  %v6032_v52 = vsel %vm14367_vm11, %v12704_v44, %v12741_v49  ;;  %vm14368_vm12 = vmmov %vm14364_vm3 }
 0x823   : > { %v6031_v63 = vsel %vm14361_vm0, %v12659_v10, %v5724_v37  ;;  %6304 = vmatprep.mubr.f32.mxu1 %v6000_v40  ;;  %v5870_v48 = vsel %vm14369_vm13, %v5837_v6, %v8625_v5  ;;  %v8655_v44 = vunpack.i.h.bf16 %v12788_v28  ;;  %v8654_v49 = vunpack.i.l.bf16 %v12788_v28  ;;  %vm14370_vm0 = vmmov %vm14363_vm7  ;;  %v8828_v28 = vld [vmem:[#allocation3 + $0xa8] sm:$0xff] }
 0x824   : > { %6305 = vmatmul.mubr.f32.gmra.mrb[132].mxu1 %v5869_v23  ;;  %8132 = vmatmul.mubr.msk.f32.gmra.mrb[112].mxu0 %vm14364_vm3, %v6031_v63  ;;  %v8658_v10 = vpop.permute.xlu1 %8657  ;;  %v8634_v5 = vunpack.i.l.bf16 %v12722_v58  ;;  %v5805_v15 = vsel %vm14370_vm0, %v4637_v1, %v8609_v55  ;;  %vm14372_vm7 = vmmov %vm14371_vm9  ;;  %v8640_v1 = vunpack.i.h.bf16 %v12770_v9 }
 0x825   : > { %5749 = vrot.lane.b32.xlu0 %v4755_v61, %s8851_s5  ;;  %6309 = vmatprep.mubr.f32.mxu1 %v6001_v18  ;;  %v8659_v47 = vunpack.i.l.bf16 %v8658_v10  ;;  %v5904_v3 = vsel %vm14372_vm7, %v8655_v44, %v8635_v19  ;;  %v8660_v57 = vunpack.i.h.bf16 %v8658_v10  ;;  %vm14373_vm3 = vmmov %vm14366_vm4  ;;  %vm14376_vm4 = vcmask 1014784  }
 0x826   : > { %8134 = vmatprep.mubr.msk.f32.mxu0 %vm14368_vm12, %v6032_v52  ;;  %v5602_v7 = vpop.permute.xlu0 %5601  ;;  %v5903_v56 = vsel %vm14371_vm9, %v8654_v49, %v8634_v5  ;;  %vm14375_vm14 = vmmov %vm14374_vm1  ;;  %vm14382_vm7 = vcmask 261120  }
 0x827   : > { %v5838_v58 = vsel %vm14373_vm3, %v5805_v15, %v8659_v47  ;;  %vm14377_vm11 = vmmov %vm14369_vm13 }
 0x828   : > { %6310 = vmatmul.mubr.f32.gmra.mrb[134].mxu1 %v5870_v48  ;;  %v12809_v32 = vpop.permute.xlu1 %5603  ;;  %v5871_v16 = vsel %vm14377_vm11, %v5838_v58, %v8654_v49  ;;  %vm14378_vm12 = vmmov %vm14370_vm0  ;;  %v8639_v48 = vunpack.i.l.bf16 %v12770_v9 }
 0x829   : > { %v5806_v45 = vsel %vm14378_vm12, %v8828_v28, %v8610_v54  ;;  %vm14379_vm13 = vmmov %vm14376_vm4 }
 0x82a   : > { %v12811_v21 = vpop.permute.xlu0 %8662  ;;  %vm14380_vm0 = vmmov %vm14373_vm3 }
 0x82b   : > { %v5839_v37 = vsel %vm14380_vm0, %v5806_v45, %v8660_v57  ;;  %vm14381_vm9 = vmmov %vm14377_vm11  ;;  %v8664_v19 = vunpack.i.l.bf16 %v12811_v21  ;;  %vm14387_vm11 = vcmask 130048  }
 0x82c   : > { %v12813_v53 = vpop.permute.xlu1 %8667  ;;  %v5872_v63 = vsel %vm14381_vm9, %v5839_v37, %v8655_v44  ;;  %vm14383_vm3 = vmmov %vm14382_vm7  ;;  %vm14392_vm9 = vcmask 1014784  }
 0x82e   : > { %v8673_v25 = vpop.permute.xlu0 %8672 }
 0x82f   : > { %v8675_v39 = vunpack.i.h.bf16 %v8673_v25  ;;  %v8674_v42 = vunpack.i.l.bf16 %v8673_v25 }
 0x830   : > { %v5730_v60 = vpop.permute.xlu1 %5729 }
 0x831   : > { %v5936_v14 = vsel %vm5915_vm10, %v5903_v56, %v8674_v42  ;;  %v5937_v29 = vsel %vm5915_vm10, %v5904_v3, %v8675_v39  ;;  %v6034_v18 = vsel %vm14383_vm3, %v5602_v7, %v5730_v60  ;;  %v8665_v42 = vunpack.i.h.bf16 %v12811_v21  ;;  %v8829_v60 = vld [vmem:[#allocation3 + $0xb0] sm:$0xff] }
 0x832   : > { %v8678_v31 = vpop.permute.xlu0 %8677  ;;  %v4639_v24 = vsel %vm14271_vm2, %v8829_v60, 0.0  ;;  %vm14390_vm2 = vcmask 719872  }
 0x833   : > { %v8680_v33 = vunpack.i.h.bf16 %v8678_v31  ;;  %v8679_v8 = vunpack.i.l.bf16 %v8678_v31 }
 0x834   : > { %v12829_v62 = vpop.permute.xlu1 %8682 }
 0x835   : > { %v5969_v38 = vsel %vm14374_vm1, %v5936_v14, %v8679_v8  ;;  %v5970_v0 = vsel %vm14375_vm14, %v5937_v29, %v8680_v33  ;;  %vm14384_vm1 = vcmask 556032   ;;  %v8685_v25 = vunpack.i.h.bf16 %v12829_v62 }
 0x836   : > { %v5606_v4 = vpop.permute.xlu0 %5605  ;;  %v6002_v41 = vsel %vm14376_vm4, %v5969_v38, %v5602_v7  ;;  %v6003_v2 = vsel %vm14379_vm13, %v5970_v0, %v12809_v32  ;;  %vm14385_vm14 = vmmov %vm14384_vm1  ;;  %v8684_v44 = vunpack.i.l.bf16 %v12829_v62 }
 0x837   : > { %6314 = vmatprep.mubr.f32.mxu1 %v6002_v41  ;;  %vm14386_vm4 = vmmov %vm14378_vm12  ;;  %v8830_v41 = vld [vmem:[#allocation3 + $0xb8] sm:$0xff] }
 0x838   : > { %6315 = vmatmul.mubr.f32.gmra.mrb[136].mxu1 %v5871_v16  ;;  %v8688_v40 = vpop.permute.xlu1 %8687  ;;  %v5807_v31 = vsel %vm14386_vm4, %v4639_v24, %v8639_v48  ;;  %v5905_v15 = vsel %vm14387_vm11, %v8684_v44, %v8664_v19  ;;  %vm14388_vm12 = vmmov %vm14387_vm11 }
 0x839   : > { %6319 = vmatprep.mubr.f32.mxu1 %v6003_v2  ;;  %v8689_v49 = vunpack.i.l.bf16 %v8688_v40  ;;  %v5906_v56 = vsel %vm14388_vm12, %v8685_v25, %v8665_v42  ;;  %v8690_v8 = vunpack.i.h.bf16 %v8688_v40  ;;  %vm14389_vm13 = vmmov %vm14380_vm0 }
 0x83a   : > { %v12839_v61 = vpop.permute.xlu0 %8692  ;;  %vm14391_vm0 = vmmov %vm14390_vm2 }
 0x83b   : > { %v5840_v57 = vsel %vm14389_vm13, %v5807_v31, %v8689_v49  ;;  %vm14398_vm11 = vmmov %vm14392_vm9  ;;  %v8695_v24 = vunpack.i.h.bf16 %v12839_v61 }
 0x83c   : > { %6320 = vmatmul.mubr.f32.gmra.mrb[138].mxu1 %v5872_v63  ;;  %v5728_v23 = vpop.permute.xlu1 %5727  ;;  %vm14399_vm12 = vmmov %vm14389_vm13 }
 0x83d   : > { %v6033_v20 = vsel %vm14382_vm7, %v12755_v34, %v5728_v23  ;;  %vm14393_vm7 = vmmov %vm14383_vm3  ;;  %vm14394_vm3 = vcmask 883712  }
 0x83e   : > { %v5734_v51 = vpop.permute.xlu0 %5733  ;;  %8135 = vmatmul.mubr.msk.f32.gmra.mrb[114].mxu0 %vm14384_vm1, %v6033_v20  ;;  %v5873_v0 = vsel %vm14394_vm3, %v5840_v57, %v8684_v44  ;;  %vm14395_vm1 = vmmov %vm14386_vm4  ;;  %vm14397_vm4 = vcmask 556032  }
 0x83f   : > { %v12845_v6 = vpop.f32.mrb[96].mxu1  ;;  %8137 = vmatprep.mubr.msk.f32.mxu0 %vm14385_vm14, %v6034_v18  ;;  %v5808_v16 = vsel %vm14395_vm1, %v8830_v41, %v8640_v1  ;;  %vm14396_vm14 = vmmov %vm14393_vm7  ;;  %v8694_v1 = vunpack.i.l.bf16 %v12839_v61 }
 0x840   : > { %v6218_v52 = vpop.f32.mrb[97].mxu1  ;;  %v12849_v10 = vpop.permute.xlu1 %5607  ;;  %v6036_v28 = vsel %vm14396_vm14, %v5606_v4, %v5734_v51  ;;  %v5841_v2 = vsel %vm14399_vm12, %v5808_v16, %v8690_v8  ;;  %vm14400_vm13 = vmmov %vm14397_vm4  ;;  %v12892_v51 = vld [vmem:[%s13379_s1 + $0x7e] ss:$0 sm:$0xff]  ;;  %v8832_v16 = vld [vmem:[#allocation3 + $0xc8] sm:$0xff] }
 0x841   : > { %v8669_v52 = vunpack.i.l.bf16 %v12813_v53  ;;  %vm14408_vm14 = vmmov %vm14398_vm11 }
 0x842   : > { %v8703_v55 = vpop.permute.xlu0 %8702 }
 0x843   : > { %v6221_v34 = vpop.f32.mrb[98].mxu1  ;;  %v8705_v47 = vunpack.i.h.bf16 %v8703_v55  ;;  %v8704_v7 = vunpack.i.l.bf16 %v8703_v55 }
 0x844   : > { %v6223_v39 = vpop.f32.mrb[99].mxu1  ;;  %v12856_v5 = vpop.permute.xlu1 %8697  ;;  %v6222_v55 = vadd.f32 %v12892_v51, %v6221_v34 }
 0x845   : > { %v5938_v21 = vsel %vm5915_vm10, %v5905_v15, %v8704_v7  ;;  %v5939_v14 = vsel %vm5915_vm10, %v5906_v56, %v8705_v47  ;;  %v6217_v47 = vadd.f32 %v12892_v51, %v12845_v6  ;;  %v8831_v15 = vld [vmem:[#allocation3 + $0xc0] sm:$0xff] }
 0x846   : > { %v8708_v54 = vpop.permute.xlu0 %8707  ;;  %v4641_v56 = vsel %vm14290_vm15, %v8831_v15, 0.0  ;;  %vm14406_vm15 = vcmask 719872  }
 0x847   : > { %v8710_v3 = vunpack.i.h.bf16 %v8708_v54  ;;  %v8709_v33 = vunpack.i.l.bf16 %v8708_v54 }
 0x848   : > { %v12867_v17 = vpop.permute.xlu1 %8712 }
 0x849   : > { %v5971_v9 = vsel %vm14390_vm2, %v5938_v21, %v8709_v33  ;;  %v5972_v58 = vsel %vm14391_vm0, %v5939_v14, %v8710_v3  ;;  %vm14401_vm2 = vmmov %vm14394_vm3  ;;  %v8714_v44 = vunpack.i.l.bf16 %v12867_v17  ;;  %v8670_v3 = vunpack.i.h.bf16 %v12813_v53 }
 0x84a   : > { %v5732_v29 = vpop.permute.xlu0 %5731  ;;  %v6004_v62 = vsel %vm14392_vm9, %v5971_v9, %v5606_v4  ;;  %v6005_v45 = vsel %vm14398_vm11, %v5972_v58, %v12849_v10  ;;  %v5874_v40 = vsel %vm14401_vm2, %v5841_v2, %v8685_v25  ;;  %v8715_v25 = vunpack.i.h.bf16 %v12867_v17  ;;  %vm14402_vm0 = vmmov %vm14395_vm1 }
 0x84b   : > { %v6035_v38 = vsel %vm14393_vm7, %v12809_v32, %v5732_v29  ;;  %6324 = vmatprep.mubr.f32.mxu1 %v6004_v62  ;;  %v5809_v8 = vsel %vm14402_vm0, %v4641_v56, %v8669_v52  ;;  %vm14403_vm9 = vcmask 130048   ;;  %vm14405_vm3 = vmmov %vm14399_vm12 }
 0x84c   : > { %6325 = vmatmul.mubr.f32.gmra.mrb[140].mxu1 %v5873_v0  ;;  %8138 = vmatmul.mubr.msk.f32.gmra.mrb[116].mxu0 %vm14397_vm4, %v6035_v38  ;;  %v8718_v37 = vpop.permute.xlu1 %8717  ;;  %v5907_v21 = vsel %vm14403_vm9, %v8714_v44, %v8694_v1  ;;  %vm14404_vm7 = vmmov %vm14403_vm9 }
 0x84d   : > { %6329 = vmatprep.mubr.f32.mxu1 %v6005_v45  ;;  %8140 = vmatprep.mubr.msk.f32.mxu0 %vm14400_vm13, %v6036_v28  ;;  %v8719_v7 = vunpack.i.l.bf16 %v8718_v37  ;;  %v5908_v57 = vsel %vm14404_vm7, %v8715_v25, %v8695_v24  ;;  %v8720_v17 = vunpack.i.h.bf16 %v8718_v37  ;;  %vm14407_vm1 = vmmov %vm14406_vm15  ;;  %vm14415_vm7 = vcmask 556032  }
 0x84e   : > { %v5610_v32 = vpop.permute.xlu0 %5609  ;;  %vm14409_vm4 = vmmov %vm14401_vm2 }
 0x84f   : > { %v5842_v58 = vsel %vm14405_vm3, %v5809_v8, %v8719_v7  ;;  %vm14410_vm11 = vmmov %vm14402_vm0  ;;  %vm14413_vm0 = vcmask 261120  }
 0x850   : > { %6330 = vmatmul.mubr.f32.gmra.mrb[142].mxu1 %v5874_v40  ;;  %v12883_v63 = vpop.permute.xlu1 %5611  ;;  %v5875_v41 = vsel %vm14409_vm4, %v5842_v58, %v8714_v44  ;;  %v5810_v28 = vsel %vm14410_vm11, %v8832_v16, %v8670_v3  ;;  %vm14411_vm12 = vmmov %vm14408_vm14  ;;  %v4643_v3 = vsel %vm14308_vm8, %v12443_v59, 0.0  ;;  %vm14421_vm8 = vcmask 719872  }
 0x851   : > { %vm14412_vm13 = vmmov %vm14405_vm3 }
 0x852   : > { %v12885_v23 = vpop.permute.xlu0 %8722  ;;  %v5843_v2 = vsel %vm14412_vm13, %v5810_v28, %v8720_v17  ;;  %vm14414_vm9 = vmmov %vm14413_vm0 }
 0x853   : > { %v12887_v4 = vpop.f32.mrb[100].mxu1  ;;  %vm14416_vm3 = vmmov %vm14415_vm7  ;;  %v8724_v24 = vunpack.i.l.bf16 %v12885_v23  ;;  %v8725_v15 = vunpack.i.h.bf16 %v12885_v23 }
 0x854   : > { %v6228_v20 = vpop.f32.mrb[101].mxu1  ;;  %v12894_v18 = vpop.permute.xlu1 %8727  ;;  %vm14420_vm4 = vmmov %vm14412_vm13 }
 0x855   : > { %v5876_v20 = vsel %vm14401_vm2, %v5843_v2, %v8715_v25  ;;  %vm14424_vm2 = vmmov %vm14413_vm0 }
 0x856   : > { %v8733_v48 = vpop.permute.xlu0 %8732 }
 0x857   : > { %v12900_v49 = vpop.f32.mrb[102].mxu1  ;;  %v8735_v39 = vunpack.i.h.bf16 %v8733_v48  ;;  %v8734_v42 = vunpack.i.l.bf16 %v8733_v48 }
 0x858   : > { %v8109_v19 = vpop.f32.mrb[96].mxu0  ;;  %v6233_v60 = vpop.f32.mrb[103].mxu1  ;;  %v6232_v22 = vadd.f32 %v12892_v51, %v12900_v49 }
 0x859   : > { %v12906_v54 = vadd.f32 %v8109_v19, %v6222_v55  ;;  %v6441_v34 = vpop.f32.mrb[97].mxu0  ;;  %v5738_v31 = vpop.permute.xlu1 %5737  ;;  %v5940_v9 = vsel %vm5915_vm10, %v5907_v21, %v8734_v42  ;;  %v5941_v11 = vsel %vm5915_vm10, %v5908_v57, %v8735_v39  ;;  %v8699_v42 = vunpack.i.l.bf16 %v12856_v5 }
 0x85a   : > { %v12911_v6 = vadd.f32 %v6441_v34, %v6217_v47  ;;  %v8738_v33 = vpop.permute.xlu0 %8737  ;;  %v6038_v44 = vsel %vm14414_vm9, %v5610_v32, %v5738_v31  ;;  %vm14426_vm9 = vmmov %vm14420_vm4 }
 0x85b   : > { %v8740_v61 = vunpack.i.h.bf16 %v8738_v33  ;;  %v8739_v14 = vunpack.i.l.bf16 %v8738_v33  ;;  %v8700_v33 = vunpack.i.h.bf16 %v12856_v5 }
 0x85d   : > { %v12919_v29 = vpop.permute.xlu1 %8742  ;;  %v5973_v53 = vsel %vm14406_vm15, %v5940_v9, %v8739_v14  ;;  %v5974_v62 = vsel %vm14407_vm1, %v5941_v11, %v8740_v61  ;;  %vm14417_vm15 = vcmask 130048   ;;  %vm14418_vm1 = vmmov %vm14410_vm11 }
 0x85e   : > { %v12923_v38 = vpop.permute.xlu0 %5613  ;;  %v6006_v0 = vsel %vm14408_vm14, %v5973_v53, %v5610_v32  ;;  %v6007_v45 = vsel %vm14411_vm12, %v5974_v62, %v12883_v63  ;;  %v8744_v25 = vunpack.i.l.bf16 %v12919_v29  ;;  %v8745_v60 = vunpack.i.h.bf16 %v12919_v29  ;;  %vm14419_vm14 = vmmov %vm14417_vm15 }
 0x85f   : > { %6334 = vmatprep.mubr.f32.mxu1 %v6006_v0  ;;  %v5811_v57 = vsel %vm14418_vm1, %v4643_v3, %v8699_v42  ;;  %vm14422_vm11 = vmmov %vm14421_vm8  ;;  %v6227_v53 = vadd.f32 %v12892_v51, %v12887_v4  ;;  %v8729_v3 = vunpack.i.l.bf16 %v12894_v18 }
 0x860   : > { %6335 = vmatmul.mubr.f32.gmra.mrb[144].mxu1 %v5875_v41  ;;  %v5909_v8 = vsel %vm14417_vm15, %v8744_v25, %v8724_v24  ;;  %v5910_v61 = vsel %vm14419_vm14, %v8745_v60, %v8725_v15  ;;  %vm14423_vm13 = vmmov %vm14418_vm1 }
 0x861   : > { %v8748_v37 = vpop.permute.xlu1 %8747  ;;  %6339 = vmatprep.mubr.f32.mxu1 %v6007_v45  ;;  %v5812_v16 = vsel %vm14423_vm13, %v12456_v35, %v8700_v33  ;;  %vm14428_vm15 = vmmov %vm14411_vm12 }
 0x862   : > { %v12931_v40 = vpop.permute.xlu0 %8752  ;;  %v8749_v32 = vunpack.i.l.bf16 %v8748_v37  ;;  %v8750_v14 = vunpack.i.h.bf16 %v8748_v37  ;;  %vm14429_vm1 = vmmov %vm14416_vm3 }
 0x864   : > { %6340 = vmatmul.mubr.f32.gmra.mrb[146].mxu1 %v5876_v20  ;;  %v5844_v58 = vsel %vm14420_vm4, %v5811_v57, %v8749_v32  ;;  %v5845_v37 = vsel %vm14426_vm9, %v5812_v16, %v8750_v14  ;;  %v8755_v57 = vunpack.i.h.bf16 %v12931_v40  ;;  %vm14431_vm4 = vcmask 130048  }
 0x865   : > { %v5736_v52 = vpop.permute.xlu1 %5735 }
 0x866   : > { %v6037_v48 = vsel %vm14413_vm0, %v12849_v10, %v5736_v52  ;;  %v5742_v55 = vpop.permute.xlu0 %5741  ;;  %vm14425_vm0 = vcmask 883712  }
 0x867   : > { %v12937_v47 = vpop.f32.mrb[104].mxu1  ;;  %8141 = vmatmul.mubr.msk.f32.gmra.mrb[118].mxu0 %vm14415_vm7, %v6037_v48  ;;  %v5877_v2 = vsel %vm14425_vm0, %v5844_v58, %v8744_v25  ;;  %vm14427_vm7 = vmmov %vm14424_vm2 }
 0x868   : > { %v6238_v7 = vpop.f32.mrb[105].mxu1  ;;  %8143 = vmatprep.mubr.msk.f32.mxu0 %vm14416_vm3, %v6038_v44  ;;  %v6040_v4 = vsel %vm14427_vm7, %v12923_v38, %v5742_v55  ;;  %vm14430_vm14 = vmmov %vm14425_vm0  ;;  %v6237_v32 = vadd.f32 %v12892_v51, %v12937_v47  ;;  %v8754_v47 = vunpack.i.l.bf16 %v12931_v40  ;;  %vm14440_vm7 = vcmask 719872  }
 0x869   : > { %v12941_v39 = vpop.permute.xlu1 %5615  ;;  %v5878_v48 = vsel %vm14430_vm14, %v5845_v37, %v8745_v60  ;;  %vm14438_vm0 = vmmov %vm14426_vm9 }
 0x86a   : > { %v8763_v19 = vpop.permute.xlu0 %8762  ;;  %vm14439_vm9 = vmmov %vm14431_vm4 }
 0x86b   : > { %v6241_v10 = vpop.f32.mrb[106].mxu1  ;;  %v8765_v1 = vunpack.i.h.bf16 %v8763_v19  ;;  %v8764_v34 = vunpack.i.l.bf16 %v8763_v19 }
 0x86c   : > { %v6243_v31 = vpop.f32.mrb[107].mxu1  ;;  %v6242_v19 = vadd.f32 %v12892_v51, %v6241_v10 }
 0x86d   : > { %v12948_v56 = vpop.permute.xlu1 %8757  ;;  %v5942_v23 = vsel %vm5915_vm10, %v5909_v8, %v8764_v34  ;;  %v5943_v11 = vsel %vm5915_vm10, %v5910_v61, %v8765_v1 }
 0x86e   : > { %v8768_v21 = vpop.permute.xlu0 %8767 }
 0x86f   : > { %v8770_v17 = vunpack.i.h.bf16 %v8768_v21  ;;  %v8769_v9 = vunpack.i.l.bf16 %v8768_v21 }
 0x871   : > { %v12962_v59 = vpop.permute.xlu1 %8772  ;;  %v5975_v5 = vsel %vm14421_vm8, %v5942_v23, %v8769_v9  ;;  %v5976_v29 = vsel %vm14422_vm11, %v5943_v11, %v8770_v17  ;;  %v8112_v0 = vpop.f32.mrb[98].mxu0  ;;  %v8730_v9 = vunpack.i.h.bf16 %v12894_v18  ;;  %v4645_v11 = vsel %vm14326_vm6, %v12521_v13, 0.0  ;;  %vm14432_vm8 = vmmov %vm14431_vm4 }
 0x872   : > { %v5740_v62 = vpop.permute.xlu0 %5739  ;;  %v6008_v41 = vsel %vm14411_vm12, %v5975_v5, %v12923_v38  ;;  %v12974_v28 = vadd.f32 %v8112_v0, %v6232_v22  ;;  %v6451_v45 = vpop.f32.mrb[99].mxu0  ;;  %v6009_v35 = vsel %vm14428_vm15, %v5976_v29, %v12941_v39  ;;  %v8775_v33 = vunpack.i.h.bf16 %v12962_v59  ;;  %vm14433_vm11 = vmmov %vm14424_vm2 }
 0x873   : > { %v6039_v49 = vsel %vm14424_vm2, %v12883_v63, %v5740_v62  ;;  %6344 = vmatprep.mubr.f32.mxu1 %v6008_v41  ;;  %v12980_v20 = vadd.f32 %v6451_v45, %v6227_v53  ;;  %v8774_v8 = vunpack.i.l.bf16 %v12962_v59  ;;  %vm14434_vm12 = vmmov %vm14423_vm13 }
 0x874   : > { %6345 = vmatmul.mubr.f32.gmra.mrb[148].mxu1 %v5877_v2  ;;  %8144 = vmatmul.mubr.msk.f32.gmra.mrb[120].mxu0 %vm14416_vm3, %v6039_v49  ;;  %v5912_v59 = vsel %vm14432_vm8, %v8775_v33, %v8755_v57  ;;  %v5813_v29 = vsel %vm14434_vm12, %v4645_v11, %v8729_v3  ;;  %vm14435_vm13 = vmmov %vm14424_vm2  ;;  %v8760_v57 = vunpack.i.h.bf16 %v12948_v56 }
 0x875   : > { %v12985_v63 = vpop.permute.xlu1 %8777  ;;  %6349 = vmatprep.mubr.f32.mxu1 %v6009_v35  ;;  %8146 = vmatprep.mubr.msk.f32.mxu0 %vm14429_vm1, %v6040_v4  ;;  %v5911_v22 = vsel %vm14431_vm4, %v8774_v8, %v8754_v47  ;;  %vm14436_vm2 = vmmov %vm14429_vm1 }
 0x876   : > { %v5618_v52 = vpop.permute.xlu0 %5617  ;;  %v8779_v61 = vunpack.i.l.bf16 %v12985_v63  ;;  %v8780_v46 = vunpack.i.h.bf16 %v12985_v63  ;;  %vm14437_vm6 = vmmov %vm14429_vm1 }
 0x877   : > { %vm14441_vm3 = vmmov %vm14440_vm7 }
 0x878   : > { %6350 = vmatmul.mubr.f32.gmra.mrb[150].mxu1 %v5878_v48  ;;  %v5846_v41 = vsel %vm14438_vm0, %v5813_v29, %v8779_v61  ;;  %vm14442_vm1 = vmmov %vm14434_vm12 }
 0x879   : > { %v12989_v44 = vpop.permute.xlu1 %5619  ;;  %v5814_v48 = vsel %vm14442_vm1, %v12534_v36, %v8730_v9  ;;  %vm14443_vm4 = vmmov %vm14428_vm15 }
 0x87a   : > { %v12991_v38 = vpop.permute.xlu0 %8782  ;;  %vm14444_vm8 = vmmov %vm14438_vm0 }
 0x87b   : > { %v12993_v55 = vpop.f32.mrb[108].mxu1  ;;  %v8784_v53 = vunpack.i.l.bf16 %v12991_v38  ;;  %vm14446_vm12 = vmmov %vm14441_vm3 }
 0x87c   : > { %v6248_v7 = vpop.f32.mrb[109].mxu1 }
 0x87d   : > { %v5746_v42 = vpop.permute.xlu1 %5745  ;;  %v8759_v7 = vunpack.i.l.bf16 %v12948_v56 }
 0x87e   : > { %v12995_v25 = vpop.permute.xlu0 %8787  ;;  %v6042_v18 = vsel %vm14435_vm13, %v5618_v52, %v5746_v42  ;;  %v8785_v42 = vunpack.i.h.bf16 %v12991_v38  ;;  %vm14447_vm13 = vmmov %vm14430_vm14 }
 0x87f   : > { %v12998_v24 = vpop.f32.mrb[110].mxu1  ;;  %v8789_v4 = vunpack.i.l.bf16 %v12995_v25  ;;  %v8790_v38 = vunpack.i.h.bf16 %v12995_v25 }
 0x880   : > { %v8115_v1 = vpop.f32.mrb[100].mxu0  ;;  %v6253_v60 = vpop.f32.mrb[111].mxu1 }
 0x881   : > { %v13002_v34 = vadd.f32 %v8115_v1, %v6242_v19  ;;  %v6461_v31 = vpop.f32.mrb[101].mxu0  ;;  %v13004_v15 = vpop.permute.xlu1 %8807 }
 0x882   : > { %v13009_v21 = vadd.f32 %v6461_v31, %v6237_v32  ;;  %v8793_v10 = vpop.permute.xlu0 %8792  ;;  %v8809_v23 = vunpack.i.l.bf16 %v13004_v15  ;;  %v8810_v16 = vunpack.i.h.bf16 %v13004_v15  ;;  %v5879_v32 = vsel %vm14430_vm14, %v5846_v41, %v8774_v8 }
 0x883   : > { %v8795_v14 = vunpack.i.h.bf16 %v8793_v10  ;;  %v8794_v17 = vunpack.i.l.bf16 %v8793_v10  ;;  %v5847_v31 = vsel %vm14444_vm8, %v5814_v48, %v8780_v46  ;;  %v4647_v8 = vsel %vm14335_vm5, %v12606_v26, 0.0 }
 0x884   : > { %v5913_v49 = vsel %vm14439_vm9, %v8809_v23, %v8784_v53  ;;  %v5880_v61 = vsel %vm14447_vm13, %v5847_v31, %v8775_v33  ;;  %vm14451_vm5 = vcmask 261120   ;;  %v6247_v46 = vadd.f32 %v12892_v51, %v12993_v55 }
 0x885   : > { %v5744_v58 = vpop.permute.xlu1 %5743  ;;  %v5944_v13 = vsel %vm5915_vm10, %v5911_v22, %v8794_v17 }
 0x886   : > { %v6041_v40 = vsel %vm14433_vm11, %v12941_v39, %v5744_v58  ;;  %v8798_v5 = vpop.permute.xlu0 %8797  ;;  %v5945_v39 = vsel %vm5915_vm10, %v5912_v59, %v8795_v14  ;;  %vm14445_vm11 = vmmov %vm14439_vm9 }
 0x887   : > { %v8800_v62 = vunpack.i.h.bf16 %v8798_v5  ;;  %v8799_v0 = vunpack.i.l.bf16 %v8798_v5  ;;  %8147 = vmatmul.mubr.msk.f32.gmra.mrb[122].mxu0 %vm14436_vm2, %v6041_v40  ;;  %v5914_v15 = vsel %vm14445_vm11, %v8810_v16, %v8785_v42  ;;  %vm14448_vm2 = vmmov %vm14443_vm4 }
 0x888   : > { %8149 = vmatprep.mubr.msk.f32.mxu0 %vm14437_vm6, %v6042_v18  ;;  %vm14449_vm6 = vmmov %vm14442_vm1  ;;  %v5947_v25 = vsel %vm5915_vm10, %v5914_v15, %v8790_v38 }
 0x889   : > { %v8813_v45 = vpop.permute.xlu1 %8812  ;;  %v5977_v2 = vsel %vm14440_vm7, %v5944_v13, %v8799_v0  ;;  %v5978_v37 = vsel %vm14441_vm3, %v5945_v39, %v8800_v62  ;;  %v5815_v17 = vsel %vm14449_vm6, %v4647_v8, %v8759_v7  ;;  %vm14450_vm9 = vmmov %vm14441_vm3 }
 0x88a   : > { %v8803_v35 = vpop.permute.xlu0 %8802  ;;  %v6010_v63 = vsel %vm14428_vm15, %v5977_v2, %v5618_v52  ;;  %v8814_v1 = vunpack.i.l.bf16 %v8813_v45  ;;  %v6011_v60 = vsel %vm14443_vm4, %v5978_v37, %v12989_v44  ;;  %v5946_v52 = vsel %vm5915_vm10, %v5913_v49, %v8789_v4  ;;  %vm14452_vm7 = vmmov %vm14447_vm13 }
 0x88b   : > { %v8804_v19 = vunpack.i.l.bf16 %v8803_v35  ;;  %6354 = vmatprep.mubr.f32.mxu1 %v6010_v63  ;;  %v8805_v36 = vunpack.i.h.bf16 %v8803_v35  ;;  %v8815_v9 = vunpack.i.h.bf16 %v8813_v45  ;;  %vm14453_vm3 = vmmov %vm14442_vm1  ;;  %vm14454_vm15 = vcmask 556032  }
 0x88c   : > { %6355 = vmatmul.mubr.f32.gmra.mrb[152].mxu1 %v5879_v32  ;;  %v5848_v11 = vsel %vm14438_vm0, %v5815_v17, %v8814_v1  ;;  %v5816_v40 = vsel %vm14453_vm3, %v12619_v43, %v8760_v57  ;;  %vm14455_vm1 = vmmov %vm14448_vm2 }
 0x88d   : > { %6359 = vmatprep.mubr.f32.mxu1 %v6011_v60  ;;  %v5979_v3 = vsel %vm14446_vm12, %v5946_v52, %v8804_v19  ;;  %v5624_v22 = vpop.permute.xlu1 %5623  ;;  %v5980_v27 = vsel %vm14450_vm9, %v5947_v25, %v8805_v36  ;;  %v5881_v59 = vsel %vm14452_vm7, %v5848_v11, %v8809_v23  ;;  %vm14456_vm10 = vmmov %vm14438_vm0  ;;  %v6252_v23 = vadd.f32 %v12892_v51, %v12998_v24 }
 0x88e   : > { %v5622_v10 = vpop.permute.xlu0 %5621  ;;  %v6013_v29 = vsel %vm14455_vm1, %v5980_v27, %v5624_v22  ;;  %v5849_v53 = vsel %vm14456_vm10, %v5816_v40, %v8815_v9  ;;  %vm14457_vm14 = vmmov %vm14452_vm7 }
 0x88f   : > { %v6256_v47 = vpop.f32.mrb[112].mxu1  ;;  %v6012_v14 = vsel %vm14448_vm2, %v5979_v3, %v5622_v10  ;;  %v5882_v0 = vsel %vm14457_vm14, %v5849_v53, %v8810_v16  ;;  %vm14458_vm4 = vmmov %vm14451_vm5 }
 0x890   : > { %v6258_v58 = vpop.f32.mrb[113].mxu1  ;;  %6360 = vmatmul.mubr.f32.gmra.mrb[154].mxu1 %v5880_v61  ;;  %vm14459_vm8 = vmmov %vm14458_vm4 }
 0x891   : > { %6364 = vmatprep.mubr.f32.mxu1 %v6012_v14  ;;  %v5752_v18 = vpop.permute.xlu1 %5751  ;;  %vm14460_vm11 = vmmov %vm14454_vm15 }
 0x892   : > { %v5748_v26 = vpop.permute.xlu0 %5747  ;;  %v6045_v43 = vsel %vm14459_vm8, %v5624_v22, %v5752_v18  ;;  %vm14461_vm12 = vmmov %vm14460_vm11 }
 0x893   : > { %v6043_v56 = vsel %vm14451_vm5, %v12989_v44, %v5748_v26  ;;  %v6261_v33 = vpop.f32.mrb[114].mxu1  ;;  %vm14462_vm13 = vmmov %vm14453_vm3 }
 0x894   : > { %v6263_v5 = vpop.f32.mrb[115].mxu1  ;;  %6365 = vmatmul.mubr.f32.gmra.mrb[156].mxu1 %v5881_v59  ;;  %8150 = vmatmul.mubr.msk.f32.gmra.mrb[124].mxu0 %vm14454_vm15, %v6043_v56  ;;  %vm14463_vm2 = vmmov %vm14453_vm3 }
 0x895   : > { %6369 = vmatprep.mubr.f32.mxu1 %v6013_v29  ;;  %vm14464_vm6 = vmmov %vm14463_vm2 }
 0x896   : > { %vm14465_vm0 = vmmov %vm14463_vm2 }
 0x897   : > { %v5750_v62 = vpop.permute.xlu0 %5749  ;;  %vm14466_vm9 = vmmov %vm14465_vm0 }
 0x898   : > { %v6044_v44 = vsel %vm14458_vm4, %v5622_v10, %v5750_v62  ;;  %6370 = vmatmul.mubr.f32.gmra.mrb[158].mxu1 %v5882_v0  ;;  %vm14467_vm5 = vmmov %vm14465_vm0 }
 0x899   : > { %8152 = vmatprep.mubr.msk.f32.mxu0 %vm14460_vm11, %v6044_v44  ;;  %v8118_v13 = vpop.f32.mrb[102].mxu0  ;;  %vm14468_vm7 = vmmov %vm14465_vm0 }
 0x89a   : > { %8153 = vmatmul.mubr.msk.f32.gmra.mrb[126].mxu0 %vm14461_vm12, %v6045_v43  ;;  %v6477_v41 = vadd.f32 %v8118_v13, %v6252_v23  ;;  %v6471_v39 = vpop.f32.mrb[103].mxu0  ;;  %vm14469_vm3 = vmmov %vm14465_vm0 }
 0x89b   : > { %8165 = vmatprep.mubr.msk.f32.mxu0 %vm14462_vm13, %v12911_v6  ;;  %v6472_v16 = vadd.f32 %v6471_v39, %v6247_v46  ;;  %v6262_v6 = vadd.f32 %v12892_v51, %v6261_v33  ;;  %vm14470_vm15 = vmmov %vm14465_vm0 }
 0x89c   : > { %vm14471_vm1 = vmmov %vm14465_vm0 }
 0x89d   : > { %vm14472_vm10 = vmmov %vm14465_vm0 }
 0x89e   : > { %8166 = vmatmul.mubr.msk.f32.vlgmr.msra.gmra.mrb[128].mxu0 %vm14463_vm2, %v12906_v54  ;;  %v6257_v54 = vadd.f32 %v12892_v51, %v6256_v47  ;;  %vm14473_vm14 = vmmov %vm14465_vm0 }
 0x89f   : > { %8168 = vmatprep.mubr.msk.f32.mxu0 %vm14464_vm6, %v12980_v20  ;;  %vm14474_vm4 = vmmov %vm14465_vm0 }
 0x8a0   : > { %vm14475_vm8 = vmmov %vm14465_vm0 }
 0x8a1   : > { %vm14476_vm11 = vmmov %vm14465_vm0 }
 0x8a2   : > { %8169 = vmatmul.mubr.msk.f32.gmra.mrb[130].mxu0 %vm14465_vm0, %v12974_v28  ;;  %vm14477_vm12 = vmmov %vm14465_vm0 }
 0x8a3   : > { %8171 = vmatprep.mubr.msk.f32.mxu0 %vm14466_vm9, %v13009_v21  ;;  %v6266_v55 = vpop.f32.mrb[116].mxu1  ;;  %vm14478_vm13 = vmmov %vm14465_vm0 }
 0x8a4   : > { %v6268_v24 = vpop.f32.mrb[117].mxu1  ;;  %v6267_v48 = vadd.f32 %v12892_v51, %v6266_v55  ;;  %vm14479_vm2 = vmmov %vm14465_vm0 }
 0x8a5   : > { %vm14480_vm6 = vmmov %vm14465_vm0 }
 0x8a6   : > { %8172 = vmatmul.mubr.msk.f32.gmra.mrb[132].mxu0 %vm14467_vm5, %v13002_v34  ;;  %vm14481_vm9 = vmmov %vm14465_vm0 }
 0x8a7   : > { %8174 = vmatprep.mubr.msk.f32.mxu0 %vm14468_vm7, %v6472_v16  ;;  %v6271_v49 = vpop.f32.mrb[118].mxu1  ;;  %vm14482_vm5 = vmmov %vm14465_vm0 }
 0x8a8   : > { %v8121_v45 = vpop.f32.mrb[104].mxu0  ;;  %v6273_v20 = vpop.f32.mrb[119].mxu1  ;;  %v6272_v63 = vadd.f32 %v12892_v51, %v6271_v49  ;;  %vm14483_vm7 = vmmov %vm14465_vm0 }
 0x8a9   : > { %v6487_v2 = vadd.f32 %v8121_v45, %v6262_v6  ;;  %v6481_v37 = vpop.f32.mrb[105].mxu0 }
 0x8aa   : > { %v6482_v28 = vadd.f32 %v6481_v37, %v6257_v54  ;;  %8175 = vmatmul.mubr.msk.f32.gmra.mrb[134].mxu0 %vm14469_vm3, %v6477_v41  ;;  %vm14484_vm3 = vmmov %vm14465_vm0 }
 0x8ac   : > { %8177 = vmatprep.mubr.msk.f32.mxu0 %vm14470_vm15, %v6482_v28  ;;  %vm14485_vm15 = vmmov %vm14465_vm0 }
 0x8ae   : > { %8178 = vmatmul.mubr.msk.f32.gmra.mrb[136].mxu0 %vm14471_vm1, %v6487_v2  ;;  %vm14486_vm1 = vmmov %vm14465_vm0 }
 0x8b7   : > { %v6276_v21 = vpop.f32.mrb[120].mxu1 }
 0x8b8   : > { %v6278_v34 = vpop.f32.mrb[121].mxu1  ;;  %v6277_v15 = vadd.f32 %v12892_v51, %v6276_v21 }
 0x8bb   : > { %v6281_v4 = vpop.f32.mrb[122].mxu1 }
 0x8bc   : > { %v6283_v35 = vpop.f32.mrb[123].mxu1  ;;  %v6282_v31 = vadd.f32 %v12892_v51, %v6281_v4 }
 0x8c1   : > { %v8124_v7 = vpop.f32.mrb[106].mxu0 }
 0x8c2   : > { %v6497_v42 = vadd.f32 %v8124_v7, %v6272_v63  ;;  %v6491_v19 = vpop.f32.mrb[107].mxu0 }
 0x8c3   : > { %v6492_v32 = vadd.f32 %v6491_v19, %v6267_v48 }
 0x8c5   : > { %8180 = vmatprep.mubr.msk.f32.mxu0 %vm14472_vm10, %v6492_v32  ;;  %vm14487_vm10 = vmmov %vm14465_vm0 }
 0x8c6   : > { %8181 = vmatmul.mubr.msk.f32.gmra.mrb[138].mxu0 %vm14473_vm14, %v6497_v42  ;;  %vm14488_vm14 = vmmov %vm14465_vm0 }
 0x8cb   : > { %v6286_v1 = vpop.f32.mrb[124].mxu1 }
 0x8cc   : > { %v6288_v60 = vpop.f32.mrb[125].mxu1  ;;  %v6287_v9 = vadd.f32 %v12892_v51, %v6286_v1 }
 0x8cf   : > { %v6291_v52 = vpop.f32.mrb[126].mxu1 }
 0x8d0   : > { %v8127_v36 = vpop.f32.mrb[108].mxu0  ;;  %v6293_v3 = vpop.f32.mrb[127].mxu1  ;;  %v6292_v17 = vadd.f32 %v12892_v51, %v6291_v52 }
 0x8d1   : > { %v6507_v38 = vadd.f32 %v8127_v36, %v6282_v31  ;;  %v6501_v10 = vpop.f32.mrb[109].mxu0 }
 0x8d2   : > { %v6502_v8 = vadd.f32 %v6501_v10, %v6277_v15 }
 0x8d4   : > { %8183 = vmatprep.mubr.msk.f32.mxu0 %vm14474_vm4, %v6502_v8  ;;  %vm14489_vm4 = vmmov %vm14465_vm0 }
 0x8d5   : > { %8184 = vmatmul.mubr.msk.f32.gmra.mrb[140].mxu0 %vm14475_vm8, %v6507_v38  ;;  %vm14490_vm8 = vmmov %vm14465_vm0 }
 0x8e3   : > { %v6296_v57 = vpop.f32.mrb[128].mxu1 }
 0x8e4   : > { %v6298_v47 = vpop.f32.mrb[129].mxu1  ;;  %v6297_v26 = vadd.f32 %v12892_v51, %v6296_v57 }
 0x8e7   : > { %v6301_v61 = vpop.f32.mrb[130].mxu1 }
 0x8e8   : > { %v6303_v14 = vpop.f32.mrb[131].mxu1  ;;  %v6302_v27 = vadd.f32 %v12892_v51, %v6301_v61 }
 0x8e9   : > { %v8130_v58 = vpop.f32.mrb[110].mxu0 }
 0x8ea   : > { %v6517_v11 = vadd.f32 %v8130_v58, %v6292_v17  ;;  %v6511_v25 = vpop.f32.mrb[111].mxu0 }
 0x8eb   : > { %v6512_v22 = vadd.f32 %v6511_v25, %v6287_v9 }
 0x8ed   : > { %8186 = vmatprep.mubr.msk.f32.mxu0 %vm14476_vm11, %v6512_v22  ;;  %vm14491_vm11 = vmmov %vm14465_vm0 }
 0x8ee   : > { %8187 = vmatmul.mubr.msk.f32.gmra.mrb[142].mxu0 %vm14477_vm12, %v6517_v11  ;;  %vm14492_vm12 = vmmov %vm14465_vm0 }
 0x8f7   : > { %v6306_v56 = vpop.f32.mrb[132].mxu1  ;;  %v8133_v33 = vpop.f32.mrb[112].mxu0 }
 0x8f8   : > { %v6527_v59 = vadd.f32 %v8133_v33, %v6302_v27  ;;  %v6308_v40 = vpop.f32.mrb[133].mxu1  ;;  %v6521_v5 = vpop.f32.mrb[113].mxu0  ;;  %v6307_v46 = vadd.f32 %v12892_v51, %v6306_v56 }
 0x8f9   : > { %v6522_v29 = vadd.f32 %v6521_v5, %v6297_v26 }
 0x8fb   : > { %v6311_v53 = vpop.f32.mrb[134].mxu1  ;;  %8189 = vmatprep.mubr.msk.f32.mxu0 %vm14478_vm13, %v6522_v29  ;;  %vm7088_vm13 = vcmask 326656  }
 0x8fc   : > { %v6313_v18 = vpop.f32.mrb[135].mxu1  ;;  %8190 = vmatmul.mubr.msk.f32.gmra.mrb[144].mxu0 %vm14479_vm2, %v6527_v59  ;;  %v6312_v43 = vadd.f32 %v12892_v51, %v6311_v53  ;;  %vm14495_vm2 = vcmask 31744  }
 0x90b   : > { %v6316_v62 = vpop.f32.mrb[136].mxu1 }
 0x90c   : > { %v6318_v0 = vpop.f32.mrb[137].mxu1  ;;  %v6317_v24 = vadd.f32 %v12892_v51, %v6316_v62 }
 0x90f   : > { %v6321_v44 = vpop.f32.mrb[138].mxu1 }
 0x910   : > { %v6323_v23 = vpop.f32.mrb[139].mxu1  ;;  %v6322_v55 = vadd.f32 %v12892_v51, %v6321_v44 }
 0x911   : > { %v8136_v13 = vpop.f32.mrb[114].mxu0 }
 0x912   : > { %v6537_v41 = vadd.f32 %v8136_v13, %v6312_v43  ;;  %v6531_v39 = vpop.f32.mrb[115].mxu0  ;;  %v13140_v13 = vld [vmem:[%s13379_s1 + $0x7f] ss:$0 sm:$0xff] }
 0x913   : > { %v6532_v16 = vadd.f32 %v6531_v39, %v6307_v46 }
 0x915   : > { %8192 = vmatprep.mubr.msk.f32.mxu0 %vm14480_vm6, %v6532_v16  ;;  %vm14498_vm6 = vmmov %vm14495_vm2 }
 0x916   : > { %8193 = vmatmul.mubr.msk.f32.gmra.mrb[146].mxu0 %vm14465_vm0, %v6537_v41  ;;  %vm14501_vm0 = vmmov %vm14495_vm2 }
 0x91f   : > { %v6326_v6 = vpop.f32.mrb[140].mxu1  ;;  %v8139_v49 = vpop.f32.mrb[116].mxu0 }
 0x920   : > { %v6547_v54 = vadd.f32 %v8139_v49, %v6322_v55  ;;  %v6328_v45 = vpop.f32.mrb[141].mxu1  ;;  %v6541_v20 = vpop.f32.mrb[117].mxu0  ;;  %v6327_v48 = vadd.f32 %v12892_v51, %v6326_v6 }
 0x921   : > { %v6542_v2 = vadd.f32 %v6541_v20, %v6317_v24 }
 0x923   : > { %v6331_v37 = vpop.f32.mrb[142].mxu1  ;;  %8195 = vmatprep.mubr.msk.f32.mxu0 %vm14481_vm9, %v6542_v2  ;;  %vm14504_vm9 = vmmov %vm14501_vm0 }
 0x924   : > { %v6333_v28 = vpop.f32.mrb[143].mxu1  ;;  %8196 = vmatmul.mubr.msk.f32.gmra.mrb[148].mxu0 %vm14482_vm5, %v6547_v54  ;;  %v6332_v63 = vadd.f32 %v12892_v51, %v6331_v37  ;;  %vm14507_vm5 = vmmov %vm14501_vm0 }
 0x933   : > { %v6336_v21 = vpop.f32.mrb[144].mxu1 }
 0x934   : > { %v6338_v34 = vpop.f32.mrb[145].mxu1  ;;  %v6337_v60 = vadd.f32 %v12892_v51, %v6336_v21 }
 0x937   : > { %v6341_v4 = vpop.f32.mrb[146].mxu1 }
 0x938   : > { %v6343_v35 = vpop.f32.mrb[147].mxu1  ;;  %v6342_v1 = vadd.f32 %v12892_v51, %v6341_v4 }
 0x93a   : > { %v8142_v7 = vpop.f32.mrb[118].mxu0 }
 0x93b   : > { %v6557_v42 = vadd.f32 %v8142_v7, %v6332_v63  ;;  %v6551_v19 = vpop.f32.mrb[119].mxu0 }
 0x93c   : > { %v6552_v32 = vadd.f32 %v6551_v19, %v6327_v48 }
 0x93e   : > { %8198 = vmatprep.mubr.msk.f32.mxu0 %vm14483_vm7, %v6552_v32  ;;  %vm14510_vm7 = vmmov %vm14501_vm0 }
 0x93f   : > { %8199 = vmatmul.mubr.msk.f32.gmra.mrb[150].mxu0 %vm14484_vm3, %v6557_v42  ;;  %vm14512_vm3 = vmmov %vm14501_vm0 }
 0x947   : > { %v6346_v31 = vpop.f32.mrb[148].mxu1  ;;  %v8145_v52 = vpop.f32.mrb[120].mxu0 }
 0x948   : > { %v6567_v15 = vadd.f32 %v8145_v52, %v6342_v1  ;;  %v6348_v36 = vpop.f32.mrb[149].mxu1  ;;  %v6561_v3 = vpop.f32.mrb[121].mxu0  ;;  %v6347_v47 = vadd.f32 %v12892_v51, %v6346_v31 }
 0x949   : > { %v6562_v38 = vadd.f32 %v6561_v3, %v6337_v60 }
 0x94b   : > { %v6351_v10 = vpop.f32.mrb[150].mxu1  ;;  %8201 = vmatprep.mubr.msk.f32.mxu0 %vm14485_vm15, %v6562_v38  ;;  %vm14514_vm15 = vmmov %vm14501_vm0 }
 0x94c   : > { %v6353_v8 = vpop.f32.mrb[151].mxu1  ;;  %8202 = vmatmul.mubr.msk.f32.gmra.mrb[152].mxu0 %vm14486_vm1, %v6567_v15  ;;  %v6352_v57 = vadd.f32 %v12892_v51, %v6351_v10  ;;  %vm14516_vm1 = vmmov %vm14501_vm0 }
 0x95a   : > { %v8148_v61 = vpop.f32.mrb[122].mxu0 }
 0x95b   : > { %v6577_v14 = vadd.f32 %v8148_v61, %v6352_v57  ;;  %v6571_v17 = vpop.f32.mrb[123].mxu0 }
 0x95c   : > { %v6572_v9 = vadd.f32 %v6571_v17, %v6347_v47 }
 0x95e   : > { %8204 = vmatprep.mubr.msk.f32.mxu0 %vm14487_vm10, %v6572_v9  ;;  %vm14519_vm10 = vmmov %vm14501_vm0 }
 0x95f   : > { %v6356_v58 = vpop.f32.mrb[152].mxu1  ;;  %8205 = vmatmul.mubr.msk.f32.gmra.mrb[154].mxu0 %vm14488_vm14, %v6577_v14  ;;  %v14493_v14 = vld [vmem:[#allocation57_spill] sm:$0xff]  ;;  %vm14522_vm14 = vmmov %vm14501_vm0 }
 0x960   : > { %v6358_v11 = vpop.f32.mrb[153].mxu1  ;;  %v6357_v26 = vadd.f32 %v12892_v51, %v6356_v58  ;;  %v14494_v17 = vmax.f32 %v14493_v14, 0.0 }
 0x963   : > { %v6361_v25 = vpop.f32.mrb[154].mxu1 }
 0x964   : > { %v6363_v22 = vpop.f32.mrb[155].mxu1  ;;  %v6362_v27 = vadd.f32 %v12892_v51, %v6361_v25  ;;  %v14496_v25 = vld [vmem:[#allocation58_spill] sm:$0xff] }
 0x965   : > { %v14497_v22 = vmax.f32 %v14496_v25, 0.0 }
 0x967   : > { %v6366_v56 = vpop.f32.mrb[156].mxu1  ;;  %v8151_v33 = vpop.f32.mrb[124].mxu0 }
 0x968   : > { %v6587_v59 = vadd.f32 %v8151_v33, %v6362_v27  ;;  %v6368_v40 = vpop.f32.mrb[157].mxu1  ;;  %v6581_v5 = vpop.f32.mrb[125].mxu0  ;;  %v6367_v0 = vadd.f32 %v12892_v51, %v6366_v56 }
 0x969   : > { %v6582_v29 = vadd.f32 %v6581_v5, %v6357_v26 }
 0x96b   : > { %v6371_v53 = vpop.f32.mrb[158].mxu1  ;;  %8207 = vmatprep.mubr.msk.f32.mxu0 %vm14489_vm4, %v6582_v29  ;;  %vm14525_vm4 = vmmov %vm14501_vm0 }
 0x96c   : > { %v6372_v18 = vadd.f32 %v12892_v51, %v6371_v53  ;;  %v6373_v62 = vpop.f32.mrb[159].mxu1  ;;  %8208 = vmatmul.mubr.msk.f32.gmra.mrb[156].mxu0 %vm14490_vm8, %v6587_v59  ;;  %v14499_v59 = vld [vmem:[#allocation60_spill] sm:$0xff]  ;;  %vm14528_vm8 = vmmov %vm14501_vm0 }
 0x96d   : > { %v8154_v44 = vpop.f32.mrb[126].mxu0  ;;  %v14500_v40 = vmax.f32 %v14499_v59, 0.0  ;;  %v14529_v59 = vld [vmem:[#allocation70_spill] sm:$0xff] }
 0x96e   : > { %v6597_v23 = vadd.f32 %v8154_v44, %v6372_v18  ;;  %v6591_v43 = vpop.f32.mrb[127].mxu0 }
 0x96f   : > { %v6592_v46 = vadd.f32 %v6591_v43, %v6367_v0  ;;  %v14502_v0 = vld [vmem:[#allocation61_spill] sm:$0xff] }
 0x970   : > { %v14503_v44 = vmax.f32 %v14502_v0, 0.0 }
 0x971   : > { %v8167_v41 = vpop.f32.mrb[128].mxu0  ;;  %8210 = vmatprep.mubr.msk.f32.mxu0 %vm14491_vm11, %v6592_v46  ;;  %vm14531_vm11 = vmmov %vm14501_vm0 }
 0x972   : > { %v6775_v39 = vadd.f32 %v8167_v41, %v13140_v13  ;;  %v6769_v16 = vpop.f32.mrb[129].mxu0  ;;  %8211 = vmatmul.mubr.msk.f32.gmra.mrb[158].mxu0 %vm14492_vm12, %v6597_v23  ;;  %vm14534_vm12 = vmmov %vm14501_vm0 }
 0x973   : > { %v6770_v55 = vadd.f32 %v13140_v13, %v6769_v16 }
 0x974   : > { %6962 = vrot.lane.b32.xlu1 %v6775_v39, %s8843_s24  ;;  %v14505_v39 = vld [vmem:[#allocation63_spill] sm:$0xff] }
 0x975   : > { %v8170_v51 = vpop.f32.mrb[130].mxu0  ;;  %6960 = vrot.lane.b32.xlu0 %v6770_v55, %s8843_s24  ;;  %v14506_v16 = vmax.f32 %v14505_v39, 0.0  ;;  %v14532_v39 = vld [vmem:[#allocation71_spill] sm:$0xff] }
 0x976   : > { %v6785_v24 = vadd.f32 %v8170_v51, %v13140_v13  ;;  %v6779_v6 = vpop.f32.mrb[131].mxu0 }
 0x977   : > { %v6780_v49 = vadd.f32 %v13140_v13, %v6779_v6  ;;  %v14508_v6 = vld [vmem:[#allocation64_spill] sm:$0xff] }
 0x978   : > { %6966 = vrot.lane.b32.xlu1 %v6785_v24, %s8843_s24 }
 0x979   : > { %v8173_v54 = vpop.f32.mrb[132].mxu0  ;;  %6964 = vrot.lane.b32.xlu0 %v6780_v49, %s8843_s24  ;;  %v14509_v49 = vmax.f32 %v14508_v6, 0.0  ;;  %v14535_v6 = vld [vmem:[#allocation72_spill] sm:$0xff] }
 0x97a   : > { %v6795_v45 = vadd.f32 %v8173_v54, %v13140_v13  ;;  %v6789_v20 = vpop.f32.mrb[133].mxu0 }
 0x97b   : > { %v6790_v2 = vadd.f32 %v13140_v13, %v6789_v20 }
 0x97c   : > { %6970 = vrot.lane.b32.xlu1 %v6795_v45, %s8843_s24 }
 0x97d   : > { %v8176_v37 = vpop.f32.mrb[134].mxu0  ;;  %6968 = vrot.lane.b32.xlu0 %v6790_v2, %s8843_s24  ;;  %v14511_v2 = vmax.f32 %v11011_v30, 0.0 }
 0x97e   : > { %v6805_v28 = vadd.f32 %v8176_v37, %v13140_v13  ;;  %v6799_v21 = vpop.f32.mrb[135].mxu0 }
 0x97f   : > { %v6800_v34 = vadd.f32 %v13140_v13, %v6799_v21 }
 0x980   : > { %6974 = vrot.lane.b32.xlu1 %v6805_v28, %s8843_s24 }
 0x981   : > { %v8179_v4 = vpop.f32.mrb[136].mxu0  ;;  %6972 = vrot.lane.b32.xlu0 %v6800_v34, %s8843_s24  ;;  %v14513_v34 = vmax.f32 %v11018_v12, 0.0 }
 0x982   : > { %v6815_v35 = vadd.f32 %v8179_v4, %v13140_v13  ;;  %v6809_v63 = vpop.f32.mrb[137].mxu0 }
 0x983   : > { %v6810_v48 = vadd.f32 %v13140_v13, %v6809_v63 }
 0x984   : > { %6978 = vrot.lane.b32.xlu1 %v6815_v35, %s8843_s24 }
 0x985   : > { %6976 = vrot.lane.b32.xlu0 %v6810_v48, %s8843_s24  ;;  %v14515_v48 = vmax.f32 %v11095_v50, 0.0 }
 0x999   : > { %v8182_v7 = vpop.f32.mrb[138].mxu0 }
 0x99a   : > { %v6825_v42 = vadd.f32 %v8182_v7, %v13140_v13  ;;  %v6819_v19 = vpop.f32.mrb[139].mxu0 }
 0x99b   : > { %v6820_v32 = vadd.f32 %v13140_v13, %v6819_v19 }
 0x99c   : > { %6982 = vrot.lane.b32.xlu1 %v6825_v42, %s8843_s24 }
 0x99d   : > { %6980 = vrot.lane.b32.xlu0 %v6820_v32, %s8843_s24  ;;  %v14517_v32 = vld [vmem:[#allocation66_spill] sm:$0xff] }
 0x9a8   : > { %v8185_v1 = vpop.f32.mrb[140].mxu0 }
 0x9a9   : > { %v6835_v60 = vadd.f32 %v8185_v1, %v13140_v13  ;;  %v6829_v31 = vpop.f32.mrb[141].mxu0  ;;  %v14518_v1 = vmax.f32 %v14517_v32, 0.0 }
 0x9aa   : > { %v6830_v52 = vadd.f32 %v13140_v13, %v6829_v31 }
 0x9ab   : > { %6986 = vrot.lane.b32.xlu1 %v6835_v60, %s8843_s24 }
 0x9ac   : > { %6984 = vrot.lane.b32.xlu0 %v6830_v52, %s8843_s24 }
 0x9c1   : > { %v8188_v15 = vpop.f32.mrb[142].mxu0 }
 0x9c2   : > { %v6845_v36 = vadd.f32 %v8188_v15, %v13140_v13  ;;  %v6839_v3 = vpop.f32.mrb[143].mxu0 }
 0x9c3   : > { %v6840_v38 = vadd.f32 %v13140_v13, %v6839_v3 }
 0x9c4   : > { %6990 = vrot.lane.b32.xlu1 %v6845_v36, %s8843_s24  ;;  %v14520_v36 = vld [vmem:[#allocation67_spill] sm:$0xff] }
 0x9c5   : > { %6988 = vrot.lane.b32.xlu0 %v6840_v38, %s8843_s24  ;;  %v14521_v3 = vmax.f32 %v14520_v36, 0.0 }
 0x9cf   : > { %v8191_v10 = vpop.f32.mrb[144].mxu0 }
 0x9d0   : > { %v6855_v8 = vadd.f32 %v8191_v10, %v13140_v13  ;;  %v6849_v57 = vpop.f32.mrb[145].mxu0 }
 0x9d1   : > { %v6850_v47 = vadd.f32 %v13140_v13, %v6849_v57  ;;  %v14523_v57 = vld [vmem:[#allocation68_spill] sm:$0xff] }
 0x9d2   : > { %6994 = vrot.lane.b32.xlu1 %v6855_v8, %s8843_s24 }
 0x9d3   : > { %6992 = vrot.lane.b32.xlu0 %v6850_v47, %s8843_s24  ;;  %v14524_v47 = vmax.f32 %v14523_v57, 0.0 }
 0x9e6   : > { %v6963_v61 = vpop.permute.xlu1 %6962 }
 0x9e7   : > { %v7057_v9 = vsel %vm14495_vm2, %v14494_v17, %v6963_v61  ;;  %v6961_v58 = vpop.permute.xlu0 %6960  ;;  %vm14537_vm2 = vmmov %vm14501_vm0 }
 0x9e8   : > { %v7090_v11 = vsel %vm7088_vm13, %v7057_v9, 0.0  ;;  %v7056_v27 = vsel %vm14498_vm6, %v14497_v22, %v6961_v58  ;;  %v14526_v22 = vld [vmem:[#allocation69_spill] sm:$0xff]  ;;  %vm14540_vm6 = vmmov %vm14501_vm0 }
 0x9e9   : > { %7122 = vst [vmem:[%s13185_s21 + $0x8] sm:$0xff] %v7090_v11  ;;  %v7089_v26 = vsel %vm7088_vm13, %v7056_v27, 0.0  ;;  %v8194_v33 = vpop.f32.mrb[146].mxu0  ;;  %v14527_v27 = vmax.f32 %v14526_v22, 0.0 }
 0x9ea   : > { %7121 = vst [vmem:[%s13185_s21] sm:$0xff] %v7089_v26  ;;  %v6967_v56 = vpop.permute.xlu1 %6966  ;;  %v6865_v29 = vadd.f32 %v8194_v33, %v13140_v13  ;;  %v6859_v18 = vpop.f32.mrb[147].mxu0 }
 0x9eb   : > { %v7059_v5 = vsel %vm14501_vm0, %v14500_v40, %v6967_v56  ;;  %v6965_v53 = vpop.permute.xlu0 %6964  ;;  %v6860_v43 = vadd.f32 %v13140_v13, %v6859_v18  ;;  %v14530_v40 = vmax.f32 %v14529_v59, 0.0 }
 0x9ec   : > { %v7092_v62 = vsel %vm7088_vm13, %v7059_v5, 0.0  ;;  %v7058_v23 = vsel %vm14504_vm9, %v14503_v44, %v6965_v53  ;;  %6998 = vrot.lane.b32.xlu1 %v6865_v29, %s8843_s24  ;;  %vm14545_vm9 = vmmov %vm14501_vm0 }
 0x9ed   : > { %7124 = vst [vmem:[%s13185_s21 + $0x18] sm:$0xff] %v7092_v62  ;;  %v7091_v46 = vsel %vm7088_vm13, %v7058_v23, 0.0  ;;  %6996 = vrot.lane.b32.xlu0 %v6860_v43, %s8843_s24 }
 0x9ee   : > { %7123 = vst [vmem:[%s13185_s21 + $0x10] sm:$0xff] %v7091_v46  ;;  %v6971_v41 = vpop.permute.xlu1 %6970 }
 0x9ef   : > { %v7061_v55 = vsel %vm14507_vm5, %v14506_v16, %v6971_v41  ;;  %v6969_v51 = vpop.permute.xlu0 %6968  ;;  %v14533_v16 = vmax.f32 %v14532_v39, 0.0  ;;  %vm14548_vm5 = vmmov %vm14501_vm0 }
 0x9f0   : > { %v7094_v24 = vsel %vm7088_vm13, %v7061_v55, 0.0  ;;  %v7060_v54 = vsel %vm14510_vm7, %v14509_v49, %v6969_v51  ;;  %v14536_v49 = vmax.f32 %v14535_v6, 0.0  ;;  %vm14551_vm7 = vmmov %vm14501_vm0 }
 0x9f1   : > { %7126 = vst [vmem:[%s13185_s21 + $0x28] sm:$0xff] %v7094_v24  ;;  %v7093_v45 = vsel %vm7088_vm13, %v7060_v54, 0.0 }
 0x9f2   : > { %7125 = vst [vmem:[%s13185_s21 + $0x20] sm:$0xff] %v7093_v45  ;;  %v6975_v20 = vpop.permute.xlu1 %6974 }
 0x9f3   : > { %v7063_v37 = vsel %vm14512_vm3, %v14511_v2, %v6975_v20  ;;  %v6973_v28 = vpop.permute.xlu0 %6972  ;;  %vm14554_vm3 = vmmov %vm14501_vm0 }
 0x9f4   : > { %v7096_v21 = vsel %vm7088_vm13, %v7063_v37, 0.0  ;;  %v7062_v4 = vsel %vm14514_vm15, %v14513_v34, %v6973_v28  ;;  %v14538_v34 = vld [vmem:[#allocation5_spill] sm:$0xff]  ;;  %vm14557_vm15 = vmmov %vm14501_vm0 }
 0x9f5   : > { %7128 = vst [vmem:[%s13185_s21 + $0x38] sm:$0xff] %v7096_v21  ;;  %v7095_v35 = vsel %vm7088_vm13, %v7062_v4, 0.0  ;;  %v14539_v4 = vmax.f32 %v14538_v34, 0.0  ;;  %v14573_v34 = vld [vmem:[#allocation17_spill] sm:$0xff] }
 0x9f6   : > { %7127 = vst [vmem:[%s13185_s21 + $0x30] sm:$0xff] %v7095_v35  ;;  %v6979_v63 = vpop.permute.xlu1 %6978 }
 0x9f7   : > { %v7065_v30 = vsel %vm14516_vm1, %v14515_v48, %v6979_v63  ;;  %v6977_v7 = vpop.permute.xlu0 %6976  ;;  %v8197_v42 = vpop.f32.mrb[148].mxu0  ;;  %vm14560_vm1 = vmmov %vm14501_vm0 }
 0x9f8   : > { %v7098_v19 = vsel %vm7088_vm13, %v7065_v30, 0.0  ;;  %v7064_v12 = vsel %vm14519_vm10, %v14518_v1, %v6977_v7  ;;  %v6875_v60 = vadd.f32 %v8197_v42, %v13140_v13  ;;  %v6869_v31 = vpop.f32.mrb[149].mxu0  ;;  %v14541_v42 = vld [vmem:[#allocation6_spill] sm:$0xff]  ;;  %vm14563_vm10 = vmmov %vm14501_vm0 }
 0x9f9   : > { %7130 = vst [vmem:[%s13185_s21 + $0x48] sm:$0xff] %v7098_v19  ;;  %v7097_v52 = vsel %vm7088_vm13, %v7064_v12, 0.0  ;;  %v6870_v50 = vadd.f32 %v13140_v13, %v6869_v31  ;;  %v14542_v19 = vmax.f32 %v14541_v42, 0.0 }
 0x9fa   : > { %7129 = vst [vmem:[%s13185_s21 + $0x40] sm:$0xff] %v7097_v52  ;;  %7002 = vrot.lane.b32.xlu1 %v6875_v60, %s8843_s24  ;;  %v14543_v52 = vld [vmem:[#allocation7_spill] sm:$0xff] }
 0x9fb   : > { %7000 = vrot.lane.b32.xlu0 %v6870_v50, %s8843_s24  ;;  %v14544_v50 = vmax.f32 %v14543_v52, 0.0 }
 0xa0e   : > { %v6983_v15 = vpop.permute.xlu1 %6982 }
 0xa0f   : > { %v7067_v38 = vsel %vm14522_vm14, %v14521_v3, %v6983_v15  ;;  %v6981_v10 = vpop.permute.xlu0 %6980  ;;  %vm14566_vm14 = vmmov %vm14501_vm0 }
 0xa10   : > { %v7100_v8 = vsel %vm7088_vm13, %v7067_v38, 0.0  ;;  %v7066_v61 = vsel %vm14525_vm4, %v14524_v47, %v6981_v10  ;;  %v14546_v38 = vld [vmem:[#allocation8_spill] sm:$0xff]  ;;  %v14549_v47 = vld [vmem:[#allocation9_spill] sm:$0xff]  ;;  %vm14569_vm4 = vmmov %vm14501_vm0 }
 0xa11   : > { %7132 = vst [vmem:[%s13185_s21 + $0x58] sm:$0xff] %v7100_v8  ;;  %v7099_v14 = vsel %vm7088_vm13, %v7066_v61, 0.0  ;;  %v14547_v10 = vmax.f32 %v14546_v38, 0.0  ;;  %v14550_v61 = vmax.f32 %v14549_v47, 0.0 }
 0xa12   : > { %v8200_v17 = vpop.f32.mrb[150].mxu0  ;;  %7131 = vst [vmem:[%s13185_s21 + $0x50] sm:$0xff] %v7099_v14 }
 0xa13   : > { %v6885_v9 = vadd.f32 %v8200_v17, %v13140_v13  ;;  %v6879_v58 = vpop.f32.mrb[151].mxu0 }
 0xa14   : > { %v6880_v11 = vadd.f32 %v13140_v13, %v6879_v58  ;;  %v14552_v58 = vld [vmem:[#allocation10_spill] sm:$0xff] }
 0xa15   : > { %7006 = vrot.lane.b32.xlu1 %v6885_v9, %s8843_s24 }
 0xa16   : > { %7004 = vrot.lane.b32.xlu0 %v6880_v11, %s8843_s24  ;;  %v14553_v11 = vmax.f32 %v14552_v58, 0.0 }
 0xa1d   : > { %v6987_v25 = vpop.permute.xlu1 %6986 }
 0xa1e   : > { %v7069_v26 = vsel %vm14528_vm8, %v14527_v27, %v6987_v25  ;;  %v6985_v56 = vpop.permute.xlu0 %6984  ;;  %vm14572_vm8 = vmmov %vm14501_vm0 }
 0xa1f   : > { %v7102_v33 = vsel %vm7088_vm13, %v7069_v26, 0.0  ;;  %v7068_v5 = vsel %vm14531_vm11, %v14530_v40, %v6985_v56  ;;  %v8203_v29 = vpop.f32.mrb[152].mxu0  ;;  %v14555_v26 = vld [vmem:[#allocation11_spill] sm:$0xff]  ;;  %vm14575_vm11 = vmmov %vm14501_vm0 }
 0xa20   : > { %7134 = vst [vmem:[%s13185_s21 + $0x68] sm:$0xff] %v7102_v33  ;;  %v7101_v53 = vsel %vm7088_vm13, %v7068_v5, 0.0  ;;  %v6895_v18 = vadd.f32 %v8203_v29, %v13140_v13  ;;  %v6889_v62 = vpop.f32.mrb[153].mxu0  ;;  %v14556_v56 = vmax.f32 %v14555_v26, 0.0  ;;  %v14558_v5 = vld [vmem:[#allocation12_spill] sm:$0xff] }
 0xa21   : > { %7133 = vst [vmem:[%s13185_s21 + $0x60] sm:$0xff] %v7101_v53  ;;  %v6890_v0 = vadd.f32 %v13140_v13, %v6889_v62  ;;  %v14559_v29 = vmax.f32 %v14558_v5, 0.0 }
 0xa22   : > { %7010 = vrot.lane.b32.xlu1 %v6895_v18, %s8843_s24 }
 0xa23   : > { %7008 = vrot.lane.b32.xlu0 %v6890_v0, %s8843_s24  ;;  %v14561_v0 = vld [vmem:[#allocation13_spill] sm:$0xff] }
 0xa32   : > { %v8206_v44 = vpop.f32.mrb[154].mxu0 }
 0xa33   : > { %v6905_v23 = vadd.f32 %v8206_v44, %v13140_v13  ;;  %v6899_v43 = vpop.f32.mrb[155].mxu0  ;;  %v14562_v44 = vmax.f32 %v14561_v0, 0.0 }
 0xa34   : > { %v6900_v46 = vadd.f32 %v13140_v13, %v6899_v43 }
 0xa35   : > { %7014 = vrot.lane.b32.xlu1 %v6905_v23, %s8843_s24 }
 0xa36   : > { %7012 = vrot.lane.b32.xlu0 %v6900_v46, %s8843_s24  ;;  %v6991_v41 = vpop.permute.xlu1 %6990 }
 0xa37   : > { %v7071_v55 = vsel %vm14534_vm12, %v14533_v16, %v6991_v41  ;;  %v6989_v51 = vpop.permute.xlu0 %6988  ;;  %v14564_v41 = vld [vmem:[#allocation14_spill] sm:$0xff]  ;;  %vm14578_vm12 = vmmov %vm14501_vm0 }
 0xa38   : > { %v7104_v24 = vsel %vm7088_vm13, %v7071_v55, 0.0  ;;  %v7070_v54 = vsel %vm14537_vm2, %v14536_v49, %v6989_v51  ;;  %v14565_v39 = vmax.f32 %v14564_v41, 0.0  ;;  %vm14581_vm2 = vmmov %vm14501_vm0 }
 0xa39   : > { %7136 = vst [vmem:[%s13185_s21 + $0x78] sm:$0xff] %v7104_v24  ;;  %v7103_v45 = vsel %vm7088_vm13, %v7070_v54, 0.0  ;;  %v14567_v24 = vld [vmem:[#allocation15_spill] sm:$0xff] }
 0xa3a   : > { %7135 = vst [vmem:[%s13185_s21 + $0x70] sm:$0xff] %v7103_v45  ;;  %v14568_v6 = vmax.f32 %v14567_v24, 0.0 }
 0xa3f   : > { %v8209_v20 = vpop.f32.mrb[156].mxu0 }
 0xa40   : > { %v6915_v2 = vadd.f32 %v8209_v20, %v13140_v13  ;;  %v6909_v37 = vpop.f32.mrb[157].mxu0  ;;  %v14570_v20 = vld [vmem:[#allocation16_spill] sm:$0xff] }
 0xa41   : > { %v6910_v28 = vadd.f32 %v13140_v13, %v6909_v37 }
 0xa42   : > { %7018 = vrot.lane.b32.xlu1 %v6915_v2, %s8843_s24  ;;  %v14571_v2 = vmax.f32 %v14570_v20, 0.0 }
 0xa43   : > { %7016 = vrot.lane.b32.xlu0 %v6910_v28, %s8843_s24 }
 0xa44   : > { %v6995_v21 = vpop.permute.xlu1 %6994 }
 0xa45   : > { %v7073_v35 = vsel %vm14540_vm6, %v14539_v4, %v6995_v21  ;;  %v8212_v63 = vpop.f32.mrb[158].mxu0  ;;  %v6993_v48 = vpop.permute.xlu0 %6992  ;;  %v14574_v4 = vmax.f32 %v14573_v34, 0.0  ;;  %vm14584_vm6 = vmmov %vm14501_vm0 }
 0xa46   : > { %v7106_v30 = vsel %vm7088_vm13, %v7073_v35, 0.0  ;;  %v6925_v7 = vadd.f32 %v8212_v63, %v13140_v13  ;;  %v7072_v32 = vsel %vm14501_vm0, %v14542_v19, %v6993_v48  ;;  %v6919_v1 = vpop.f32.mrb[159].mxu0 }
 0xa47   : > { %7138 = vst [vmem:[%s13185_s21 + $0x88] sm:$0xff] %v7106_v30  ;;  %v7105_v12 = vsel %vm7088_vm13, %v7072_v32, 0.0  ;;  %v6920_v60 = vadd.f32 %v13140_v13, %v6919_v1  ;;  %v14576_v30 = vld [vmem:[#allocation4_spill] sm:$0xff]  ;;  %v14579_v1 = vld [vmem:[#allocation18_spill] sm:$0xff] }
 0xa48   : > { %7137 = vst [vmem:[%s13185_s21 + $0x80] sm:$0xff] %v7105_v12  ;;  %7022 = vrot.lane.b32.xlu1 %v6925_v7, %s8843_s24  ;;  %v14577_v7 = vmax.f32 %v14576_v30, 0.0  ;;  %v14580_v12 = vmax.f32 %v14579_v1, 0.0 }
 0xa49   : > { %7020 = vrot.lane.b32.xlu0 %v6920_v60, %s8843_s24 }
 0xa5e   : > { %v6999_v31 = vpop.permute.xlu1 %6998 }
 0xa5f   : > { %v7075_v15 = vsel %vm14545_vm9, %v14544_v50, %v6999_v31  ;;  %v6997_v36 = vpop.permute.xlu0 %6996  ;;  %v14582_v50 = vld [vmem:[#allocation19_spill] sm:$0xff] }
 0xa60   : > { %v7108_v3 = vsel %vm7088_vm13, %v7075_v15, 0.0  ;;  %v7074_v8 = vsel %vm14548_vm5, %v14547_v10, %v6997_v36  ;;  %v14583_v15 = vmax.f32 %v14582_v50, 0.0 }
 0xa61   : > { %7140 = vst [vmem:[%s13185_s21 + $0x98] sm:$0xff] %v7108_v3  ;;  %v7107_v13 = vsel %vm7088_vm13, %v7074_v8, 0.0 }
 0xa62   : > { %7139 = vst [vmem:[%s13185_s21 + $0x90] sm:$0xff] %v7107_v13 }
 0xa6c   : > { %v7003_v57 = vpop.permute.xlu1 %7002 }
 0xa6d   : > { %v7077_v14 = vsel %vm14551_vm7, %v14550_v61, %v7003_v57  ;;  %v7001_v17 = vpop.permute.xlu0 %7000 }
 0xa6e   : > { %v7110_v9 = vsel %vm7088_vm13, %v7077_v14, 0.0  ;;  %v7076_v25 = vsel %vm14554_vm3, %v14553_v11, %v7001_v17 }
 0xa6f   : > { %7142 = vst [vmem:[%s13185_s21 + $0xa8] sm:$0xff] %v7110_v9  ;;  %v7109_v22 = vsel %vm7088_vm13, %v7076_v25, 0.0 }
 0xa70   : > { %7141 = vst [vmem:[%s13185_s21 + $0xa0] sm:$0xff] %v7109_v22 }
 0xa87   : > { %v7007_v27 = vpop.permute.xlu1 %7006 }
 0xa88   : > { %v7079_v33 = vsel %vm14557_vm15, %v14556_v56, %v7007_v27  ;;  %v7005_v59 = vpop.permute.xlu0 %7004 }
 0xa89   : > { %v7112_v40 = vsel %vm7088_vm13, %v7079_v33, 0.0  ;;  %v7078_v53 = vsel %vm14560_vm1, %v14559_v29, %v7005_v59 }
 0xa8a   : > { %7144 = vst [vmem:[%s13185_s21 + $0xb8] sm:$0xff] %v7112_v40  ;;  %v7111_v18 = vsel %vm7088_vm13, %v7078_v53, 0.0 }
 0xa8b   : > { %7143 = vst [vmem:[%s13185_s21 + $0xb0] sm:$0xff] %v7111_v18 }
 0xa94   : > { %v7011_v62 = vpop.permute.xlu1 %7010 }
 0xa95   : > { %v7081_v23 = vsel %vm14563_vm10, %v14562_v44, %v7011_v62  ;;  %v7009_v43 = vpop.permute.xlu0 %7008 }
 0xa96   : > { %v7114_v46 = vsel %vm7088_vm13, %v7081_v23, 0.0  ;;  %v7080_v16 = vsel %vm14566_vm14, %v14565_v39, %v7009_v43 }
 0xa97   : > { %7146 = vst [vmem:[%s13185_s21 + $0xc8] sm:$0xff] %v7114_v46  ;;  %v7113_v55 = vsel %vm7088_vm13, %v7080_v16, 0.0 }
 0xa98   : > { %7145 = vst [vmem:[%s13185_s21 + $0xc0] sm:$0xff] %v7113_v55 }
 0xaa7   : > { %v7015_v51 = vpop.permute.xlu1 %7014 }
 0xaa8   : > { %v7083_v49 = vsel %vm14569_vm4, %v14568_v6, %v7015_v51  ;;  %v7013_v54 = vpop.permute.xlu0 %7012 }
 0xaa9   : > { %v7116_v45 = vsel %vm7088_vm13, %v7083_v49, 0.0  ;;  %v7082_v37 = vsel %vm14572_vm8, %v14571_v2, %v7013_v54 }
 0xaaa   : > { %7148 = vst [vmem:[%s13185_s21 + $0xd8] sm:$0xff] %v7116_v45  ;;  %v7115_v28 = vsel %vm7088_vm13, %v7082_v37, 0.0 }
 0xaab   : > { %7147 = vst [vmem:[%s13185_s21 + $0xd0] sm:$0xff] %v7115_v28 }
 0xab4   : > { %v7019_v21 = vpop.permute.xlu1 %7018 }
 0xab5   : > { %v7085_v35 = vsel %vm14575_vm11, %v14574_v4, %v7019_v21  ;;  %v7017_v63 = vpop.permute.xlu0 %7016 }
 0xab6   : > { %v7118_v48 = vsel %vm7088_vm13, %v7085_v35, 0.0  ;;  %v7084_v42 = vsel %vm14578_vm12, %v14577_v7, %v7017_v63 }
 0xab7   : > { %7150 = vst [vmem:[%s13185_s21 + $0xe8] sm:$0xff] %v7118_v48  ;;  %v7117_v19 = vsel %vm7088_vm13, %v7084_v42, 0.0 }
 0xab8   : > { %7149 = vst [vmem:[%s13185_s21 + $0xe0] sm:$0xff] %v7117_v19 }
 0xaba   : > { %v7023_v32 = vpop.permute.xlu1 %7022 }
 0xabb   : > { %v7087_v60 = vsel %vm14581_vm2, %v14580_v12, %v7023_v32  ;;  %v7021_v31 = vpop.permute.xlu0 %7020 }
 0xabc   : > { %v7120_v52 = vsel %vm7088_vm13, %v7087_v60, 0.0  ;;  %v7086_v36 = vsel %vm14584_vm6, %v14583_v15, %v7021_v31 }
 0xabd   : > { %7152 = vst [vmem:[%s13185_s21 + $0xf8] sm:$0xff] %v7120_v52  ;;  %v7119_v3 = vsel %vm7088_vm13, %v7086_v36, 0.0 }
 0xabe   : > { %7151 = vst [vmem:[%s13185_s21 + $0xf0] sm:$0xff] %v7119_v3 }
 0xabf PF: > { %s12_s9 = sadd.s32 1, %s8839_s9  }
 0xac0   : > { %p9_p4 = scmp.ge.s32.totalorder %s12_s9, 4  }
 0xac2   :  { %11 = sbr.rel (!%p9_p4) target bundleno = 1 (0x1), region = 58 }

</bundles_post_ra>
